<compile_context>
chip_gen: v6e
topology: v6e:2x2x1
jax: 0.10.0
libtpu: 0.0.40
codegen_flags: <defaults>
</compile_context>

<pallas_src>
import math

import jax
import jax.numpy as jnp
from jax.experimental import pallas as pl
from jax.experimental.pallas import tpu as pltpu

NUM_CLASSES = 10
_NEG_INF = -1e30
_M_TILE = 512            # row-tile target for the mem-bound conv stages


def _round_up(x, m):
    return ((x + m - 1) // m) * m


def _pick_m_tile(m, target=_M_TILE):
    """Adaptive row tile: multiple of 16 (bf16 sublanes), minimal padding."""
    n_blocks = max(1, -(-m // target))
    tm = _round_up(-(-m // n_blocks), 16)
    return tm, tm * n_blocks


# ----------------------------- Pallas kernels ------------------------------

def _conv1_kernel(cols_ref, w_ref, b_ref, o_ref):
    # cols_ref: (tm, 36)  bf16 -- the 4 pool-corner 3x3 patches folded into K
    # w_ref:    (36, 512) bf16 block-diagonal (corner t -> cols [128t, 128t+128))
    # b_ref:    (1, 128)  f32
    # o_ref:    (tm, 128) bf16  fused conv+bias+ReLU+2x2maxpool output
    cout = o_ref.shape[1]
    z = jnp.dot(cols_ref[...], w_ref[...], preferred_element_type=jnp.float32)
    zm = jnp.maximum(
        jnp.maximum(z[:, 0 * cout:1 * cout], z[:, 1 * cout:2 * cout]),
        jnp.maximum(z[:, 2 * cout:3 * cout], z[:, 3 * cout:4 * cout]))
    o_ref[...] = jnp.maximum(zm + b_ref[...], 0.0).astype(o_ref.dtype)


def _conv_pool_kernel(cols_ref, w_ref, b_ref, o_ref):
    # cols_ref: (4*tm, K) bf16 -- rows [t*tm, (t+1)*tm) are pool corner t
    # w_ref:    (K, Cout) bf16 (resident across the grid)
    # b_ref:    (1, Cout) f32
    # o_ref:    (tm, Cout) bf16
    tm = o_ref.shape[0]
    z = jnp.dot(cols_ref[...], w_ref[...], preferred_element_type=jnp.float32)
    zm = jnp.maximum(jnp.maximum(z[0 * tm:1 * tm], z[1 * tm:2 * tm]),
                     jnp.maximum(z[2 * tm:3 * tm], z[3 * tm:4 * tm]))
    o_ref[...] = jnp.maximum(zm + b_ref[...], 0.0).astype(o_ref.dtype)


def _tail_kernel(cols_ref, w3_ref, b3_ref, w1_ref, b1_ref, w2_ref, b2_ref,
                 wl_ref, bl_ref, o_ref):
    # Merged conv31/conv32 (+pool) -> combined -> fc1 -> fc2 -> fc3(+ReLU)
    # -> masked log_softmax, all in one kernel.  Padded logit lanes are masked
    # out of the softmax reduction.
    tm = o_ref.shape[0]
    z = jnp.dot(cols_ref[...], w3_ref[...], preferred_element_type=jnp.float32)
    zm = jnp.maximum(jnp.maximum(z[0 * tm:1 * tm], z[1 * tm:2 * tm]),
                     jnp.maximum(z[2 * tm:3 * tm], z[3 * tm:4 * tm]))
    combined = jnp.maximum(zm + b3_ref[...], 0.0)                # (tm, 1024) f32
    h1 = jnp.maximum(
        jnp.dot(combined.astype(jnp.bfloat16), w1_ref[...],
                preferred_element_type=jnp.float32) + b1_ref[...], 0.0)
    h2 = jnp.maximum(
        jnp.dot(h1.astype(jnp.bfloat16), w2_ref[...],
                preferred_element_type=jnp.float32) + b2_ref[...], 0.0)
    logits = jnp.maximum(
        jnp.dot(h2.astype(jnp.bfloat16), wl_ref[...],
                preferred_element_type=jnp.float32) + bl_ref[...], 0.0)
    lane = jax.lax.broadcasted_iota(jnp.int32, logits.shape, 1)
    valid = lane < NUM_CLASSES
    zmask = jnp.where(valid, logits, _NEG_INF)
    mx = jnp.max(zmask, axis=-1, keepdims=True)
    e = jnp.where(valid, jnp.exp(zmask - mx), 0.0)
    s = jnp.sum(e, axis=-1, keepdims=True)
    o_ref[...] = zmask - mx - jnp.log(s)


# --------------------------------- glue ------------------------------------

def _im2col_pooled_corners(x, k=3):
    """im2col for a valid kxk conv grouped by 2x2 max-pool corner.

    Returns cols of shape (4, N*Hp*Wp, k*k*C); K ordering is (patch_pos,
    channel).  Pure data-movement glue handled by XLA outside the kernels.
    """
    n, h, w, c = x.shape
    ho, wo = h - k + 1, w - k + 1
    hp, wp = ho // 2, wo // 2              # floor, like nn.MaxPool2d(2, 2)
    corners = []
    for di in range(2):
        for dj in range(2):
            patches = []
            for ki in range(k):
                for kj in range(k):
                    patches.append(
                        x[:, di + ki: di + ki + 2 * hp: 2,
                             dj + kj: dj + kj + 2 * wp: 2, :])
            p = jnp.stack(patches, axis=3)              # (N, Hp, Wp, k*k, C)
            corners.append(p.reshape(n * hp * wp, k * k * c))
    return jnp.stack(corners, axis=0), (n, hp, wp)      # (4, M, k*k*C)


def _fold_corners_into_rows(cols, tm, m_pad):
    """(4, M, K) -> (ntiles*4*tm, K): each tile's 4*tm rows hold its 4 corners."""
    k = cols.shape[2]
    m = cols.shape[1]
    if m_pad != m:
        cols = jnp.pad(cols, ((0, 0), (0, m_pad - m), (0, 0)))
    nt = m_pad // tm
    cols = cols.reshape(4, nt, tm, k).transpose(1, 0, 2, 3)
    return cols.reshape(nt * 4 * tm, k), nt


# ------------------------------ kernel wrappers -----------------------------

def conv1_fused(x, w_bd, b):
    """conv1 + bias + ReLU + 2x2 pool; corners folded into K, lane-dense out."""
    cols, (n, hp, wp) = _im2col_pooled_corners(x, 3)      # (4, M, 9)
    m = cols.shape[1]
    kfold = 4 * cols.shape[2]                             # 36
    cols = jnp.transpose(cols, (1, 0, 2)).reshape(m, kfold).astype(jnp.bfloat16)
    tm, m_pad = _pick_m_tile(m)
    if m_pad != m:
        cols = jnp.pad(cols, ((0, m_pad - m), (0, 0)))
    cout = b.shape[1]                                     # 128 (padded)
    out = pl.pallas_call(
        _conv1_kernel,
        out_shape=jax.ShapeDtypeStruct((m_pad, cout), jnp.bfloat16),
        grid=(m_pad // tm,),
        in_specs=[
            pl.BlockSpec((tm, kfold), lambda i: (i, 0)),
            pl.BlockSpec((kfold, 4 * cout), lambda i: (0, 0)),   # resident
            pl.BlockSpec((1, cout), lambda i: (0, 0)),
        ],
        out_specs=pl.BlockSpec((tm, cout), lambda i: (i, 0)),
        compiler_params=pltpu.CompilerParams(
            dimension_semantics=("parallel",)),
    )(cols, w_bd, b)
    return out[:m].reshape(n, hp, wp, cout)


def conv_pool_rowfold(x, w, b):
    """conv + bias + ReLU + 2x2 pool; one matmul per block, corners in rows."""
    cols, (n, hp, wp) = _im2col_pooled_corners(x, 3)      # (4, M, K) bf16
    m, k = cols.shape[1], cols.shape[2]
    cols = cols.astype(jnp.bfloat16)
    tm, m_pad = _pick_m_tile(m)
    cols, nt = _fold_corners_into_rows(cols, tm, m_pad)
    cout = w.shape[1]
    out = pl.pallas_call(
        _conv_pool_kernel,
        out_shape=jax.ShapeDtypeStruct((m_pad, cout), jnp.bfloat16),
        grid=(nt,),
        in_specs=[
            pl.BlockSpec((4 * tm, k), lambda i: (i, 0)),
            pl.BlockSpec((k, cout), lambda i: (0, 0)),           # resident
            pl.BlockSpec((1, cout), lambda i: (0, 0)),
        ],
        out_specs=pl.BlockSpec((tm, cout), lambda i: (i, 0)),
        compiler_params=pltpu.CompilerParams(
            dimension_semantics=("parallel",)),
    )(cols, w, b)
    return out[:m].reshape(n, hp, wp, cout)


def tail_fused(x2, w3, b3, w_fc1, b_fc1, w_fc2, b_fc2, w_fc3, b_fc3):
    """Merged conv31/conv32 (+pool) + concat + fc1/fc2/fc3 + log_softmax."""
    cols, (n, hp, wp) = _im2col_pooled_corners(x2, 3)     # (4, N, 1152)
    m, k = cols.shape[1], cols.shape[2]
    cols = cols.astype(jnp.bfloat16)
    tm, m_pad = _pick_m_tile(m, target=256)
    cols, nt = _fold_corners_into_rows(cols, tm, m_pad)
    nout = w_fc3.shape[1]                                 # 128 (padded)
    out = pl.pallas_call(
        _tail_kernel,
        out_shape=jax.ShapeDtypeStruct((m_pad, nout), jnp.float32),
        grid=(nt,),
        in_specs=[
            pl.BlockSpec((4 * tm, k), lambda i: (i, 0)),
            pl.BlockSpec(w3.shape, lambda i: (0, 0)),
            pl.BlockSpec(b3.shape, lambda i: (0, 0)),
            pl.BlockSpec(w_fc1.shape, lambda i: (0, 0)),
            pl.BlockSpec(b_fc1.shape, lambda i: (0, 0)),
            pl.BlockSpec(w_fc2.shape, lambda i: (0, 0)),
            pl.BlockSpec(b_fc2.shape, lambda i: (0, 0)),
            pl.BlockSpec(w_fc3.shape, lambda i: (0, 0)),
            pl.BlockSpec(b_fc3.shape, lambda i: (0, 0)),
        ],
        out_specs=pl.BlockSpec((tm, nout), lambda i: (i, 0)),
        compiler_params=pltpu.CompilerParams(
            dimension_semantics=("parallel",)),
    )(cols, w3, b3, w_fc1, b_fc1, w_fc2, b_fc2, w_fc3, b_fc3)
    return out[:m, :NUM_CLASSES]


# ------------------------------- parameters ---------------------------------

def init_params(key):
    ks = jax.random.split(key, 16)
    f32 = jnp.float32

    def u(k, shape, bound):
        return jax.random.uniform(k, shape, f32, -bound, bound)

    p = {}

    # conv1: Conv2d(1, 32, 3); Cout padded 32->128 (lane-dense store) and made
    # block-diagonal over the 4 pool-window corners -> (36, 512).
    b1 = 1.0 / math.sqrt(1 * 9)
    w1 = jnp.pad(u(ks[0], (9, 32), b1), ((0, 0), (0, 96)))       # (9, 128)
    blocks = []
    for t in range(4):
        row = [jnp.zeros((9, 128), f32) for _ in range(4)]
        row[t] = w1
        blocks.append(jnp.concatenate(row, axis=1))
    p["conv1_w"] = jnp.concatenate(blocks, axis=0).astype(jnp.bfloat16)  # (36,512)
    p["conv1_b"] = jnp.pad(u(ks[1], (1, 32), b1), ((0, 0), (0, 96)))     # (1,128)

    # conv21 / conv22 share their input -> one (288, 128) matmul.
    b2 = 1.0 / math.sqrt(32 * 9)
    p["conv2_w"] = jnp.concatenate([u(ks[2], (288, 64), b2),
                                    u(ks[3], (288, 64), b2)],
                                   axis=1).astype(jnp.bfloat16)          # (288,128)
    p["conv2_b"] = jnp.concatenate([u(ks[4], (1, 64), b2),
                                    u(ks[5], (1, 64), b2)], axis=1)      # (1,128)

    # conv31 / conv32 as one block-diagonal (1152, 1024) matmul over the
    # branch-concatenated 128-channel input (K ordering = patch*128 + chan).
    b3 = 1.0 / math.sqrt(64 * 9)
    w31 = u(ks[6], (576, 512), b3).reshape(9, 64, 512)
    w32 = u(ks[7], (576, 512), b3).reshape(9, 64, 512)
    zblk = jnp.zeros((9, 64, 512), f32)
    top = jnp.concatenate([w31, zblk], axis=2)
    bot = jnp.concatenate([zblk, w32], axis=2)
    p["conv3_w"] = jnp.concatenate([top, bot], axis=1).reshape(
        1152, 1024).astype(jnp.bfloat16)                                 # (1152,1024)
    p["conv3_b"] = jnp.concatenate([u(ks[8], (1, 512), b3),
                                    u(ks[9], (1, 512), b3)], axis=1)     # (1,1024)

    def lin(kw, kb, fin, fout, fin_pad, fout_pad):
        bound = 1.0 / math.sqrt(fin)
        w = jnp.pad(u(kw, (fin, fout), bound),
                    ((0, fin_pad - fin), (0, fout_pad - fout)))
        b = jnp.pad(u(kb, (1, fout), bound), ((0, 0), (0, fout_pad - fout)))
        return w.astype(jnp.bfloat16), b

    p["fc1_w"], p["fc1_b"] = lin(ks[10], ks[11], 1024, 1000, 1024, 1024)
    p["fc2_w"], p["fc2_b"] = lin(ks[12], ks[13], 1000, 500, 1024, 512)
    p["fc3_w"], p["fc3_b"] = lin(ks[14], ks[15], 500, 10, 512, 128)
    return p


# ------------------------------ forward pass --------------------------------

def net_forward(x_nchw, p):
    x = jnp.transpose(x_nchw, (0, 2, 3, 1)).astype(jnp.bfloat16)   # NHWC bf16

    x1 = conv1_fused(x, p["conv1_w"], p["conv1_b"])     # (N, 13, 13, 128)
    x1 = x1[..., :32]                                   # real conv1 channels

    # fused conv21 + conv22 (channels 0:64 = branch 1, 64:128 = branch 2)
    x2 = conv_pool_rowfold(x1, p["conv2_w"], p["conv2_b"])   # (N, 5, 5, 128)

    # merged conv31/conv32 + pool + concat + fc1/fc2/fc3(+ReLU) + log_softmax
    return tail_fused(x2, p["conv3_w"], p["conv3_b"],
                      p["fc1_w"], p["fc1_b"],
                      p["fc2_w"], p["fc2_b"],
                      p["fc3_w"], p["fc3_b"])           # (N, 10) log-probs


# ----------------------------------- main ------------------------------------

if __name__ == "__main__":
    key = jax.random.PRNGKey(0)
    k_x, k_p = jax.random.split(key)

    # MNIST-shaped input implied by fc1 = Linear(1024, ...): 28x28 -> 1x1x512/branch
    x = jax.random.normal(k_x, (2, 1, 28, 28), dtype=jnp.float32)
    params = init_params(k_p)

    fwd = jax.jit(net_forward)
    logp = fwd(x, params)
    jax.block_until_ready(logp)

    assert logp.shape == (2, NUM_CLASSES) and logp.dtype == jnp.float32
    row_sums = jnp.exp(logp).sum(axis=1)          # log_softmax rows sum to 1
    assert bool(jnp.allclose(row_sums, 1.0, atol=1e-3))
    assert bool(jnp.all(jnp.isfinite(logp)))

    print("KERNEL_OK")
</pallas_src>

<mosaic_0001>
module attributes {stable_mosaic.version = 11 : i64} {
  func.func @_conv1_kernel(%arg0: i32, %arg1: memref<352x36xbf16, #tpu.memory_space<vmem>>, %arg2: memref<36x512xbf16, #tpu.memory_space<vmem>>, %arg3: memref<1x128xf32, #tpu.memory_space<vmem>>, %arg4: memref<352x128xbf16, #tpu.memory_space<vmem>>) attributes {dimension_semantics = [#tpu.dimension_semantics<parallel>], iteration_bounds = array<i64: 1>, scalar_prefetch = 0 : i64, scratch_operands = 0 : i64, tpu.core_type = #tpu.core_type<tc>, window_params = [{transform_indices = @transform_0, window_bounds = array<i64: 352, 36>}, {pipeline_mode = #tpu.pipeline_mode<synchronous>, transform_indices = @transform_1, window_bounds = array<i64: 36, 512>}, {pipeline_mode = #tpu.pipeline_mode<synchronous>, transform_indices = @transform_2, window_bounds = array<i64: 1, 128>}, {transform_indices = @transform_3, window_bounds = array<i64: 352, 128>}]} {
    %c0 = arith.constant 0 : index
    %c0_0 = arith.constant 0 : index
    %0 = vector.load %arg1[%c0, %c0_0] : memref<352x36xbf16, #tpu.memory_space<vmem>>, vector<352x36xbf16>
    %c0_1 = arith.constant 0 : index
    %c0_2 = arith.constant 0 : index
    %1 = vector.load %arg2[%c0_1, %c0_2] : memref<36x512xbf16, #tpu.memory_space<vmem>>, vector<36x512xbf16>
    %cst = arith.constant dense<0.000000e+00> : vector<352x512xf32>
    %2 = tpu.matmul %0, %1, %cst {dimension_numbers = #tpu.dot_dimension_numbers<[1], [0], [0], [1], [0, 0, 1, 1], [], []>} : vector<352x36xbf16>, vector<36x512xbf16>, vector<352x512xf32> -> vector<352x512xf32>
    %3 = vector.extract_strided_slice %2 {offsets = [0, 0], sizes = [352, 128], strides = [1, 1]} : vector<352x512xf32> to vector<352x128xf32>
    %4 = vector.extract_strided_slice %2 {offsets = [0, 128], sizes = [352, 128], strides = [1, 1]} : vector<352x512xf32> to vector<352x128xf32>
    %5 = arith.maximumf %3, %4 : vector<352x128xf32>
    %6 = vector.extract_strided_slice %2 {offsets = [0, 256], sizes = [352, 128], strides = [1, 1]} : vector<352x512xf32> to vector<352x128xf32>
    %7 = vector.extract_strided_slice %2 {offsets = [0, 384], sizes = [352, 128], strides = [1, 1]} : vector<352x512xf32> to vector<352x128xf32>
    %8 = arith.maximumf %6, %7 : vector<352x128xf32>
    %9 = arith.maximumf %5, %8 : vector<352x128xf32>
    %c0_3 = arith.constant 0 : index
    %c0_4 = arith.constant 0 : index
    %10 = vector.load %arg3[%c0_3, %c0_4] : memref<1x128xf32, #tpu.memory_space<vmem>>, vector<1x128xf32>
    %11 = vector.broadcast %10 : vector<1x128xf32> to vector<352x128xf32>
    %12 = arith.addf %9, %11 : vector<352x128xf32>
    %cst_5 = arith.constant 0.000000e+00 : f32
    %13 = vector.broadcast %cst_5 : f32 to vector<352x128xf32>
    %14 = arith.maximumf %12, %13 : vector<352x128xf32>
    %15 = arith.truncf %14 : vector<352x128xf32> to vector<352x128xbf16>
    %c0_6 = arith.constant 0 : index
    %c0_7 = arith.constant 0 : index
    %16 = vector.load %arg4[%c0_6, %c0_7] : memref<352x128xbf16, #tpu.memory_space<vmem>>, vector<352x128xbf16>
    tpu.vector_store %arg4[%c0_6, %c0_7], %15 {strides = array<i32>} : memref<352x128xbf16, #tpu.memory_space<vmem>>, vector<352x128xbf16>,
    return
  }
  func.func @transform_0(%arg0: i32) -> (i32, i32) {
    %c0_i32 = arith.constant 0 : i32
    %c0_i32_0 = arith.constant 0 : i32
    return %arg0, %c0_i32 : i32, i32
  }
  func.func @transform_1(%arg0: i32) -> (i32, i32) {
    %c0_i32 = arith.constant 0 : i32
    %c0_i32_0 = arith.constant 0 : i32
    %c0_i32_1 = arith.constant 0 : i32
    return %c0_i32, %c0_i32_0 : i32, i32
  }
  func.func @transform_2(%arg0: i32) -> (i32, i32) {
    %c0_i32 = arith.constant 0 : i32
    %c0_i32_0 = arith.constant 0 : i32
    %c0_i32_1 = arith.constant 0 : i32
    return %c0_i32, %c0_i32_0 : i32, i32
  }
  func.func @transform_3(%arg0: i32) -> (i32, i32) {
    %c0_i32 = arith.constant 0 : i32
    %c0_i32_0 = arith.constant 0 : i32
    return %arg0, %c0_i32 : i32, i32
  }
}

module attributes {stable_mosaic.version = 11 : i64} {
  func.func @_conv_pool_kernel(%arg0: i32, %arg1: memref<256x288xbf16, #tpu.memory_space<vmem>>, %arg2: memref<288x128xbf16, #tpu.memory_space<vmem>>, %arg3: memref<1x128xf32, #tpu.memory_space<vmem>>, %arg4: memref<64x128xbf16, #tpu.memory_space<vmem>>) attributes {dimension_semantics = [#tpu.dimension_semantics<parallel>], iteration_bounds = array<i64: 1>, scalar_prefetch = 0 : i64, scratch_operands = 0 : i64, tpu.core_type = #tpu.core_type<tc>, window_params = [{transform_indices = @transform_0, window_bounds = array<i64: 256, 288>}, {pipeline_mode = #tpu.pipeline_mode<synchronous>, transform_indices = @transform_1, window_bounds = array<i64: 288, 128>}, {pipeline_mode = #tpu.pipeline_mode<synchronous>, transform_indices = @transform_2, window_bounds = array<i64: 1, 128>}, {transform_indices = @transform_3, window_bounds = array<i64: 64, 128>}]} {
    %c0 = arith.constant 0 : index
    %c0_0 = arith.constant 0 : index
    %0 = vector.load %arg1[%c0, %c0_0] : memref<256x288xbf16, #tpu.memory_space<vmem>>, vector<256x288xbf16>
    %c0_1 = arith.constant 0 : index
    %c0_2 = arith.constant 0 : index
    %1 = vector.load %arg2[%c0_1, %c0_2] : memref<288x128xbf16, #tpu.memory_space<vmem>>, vector<288x128xbf16>
    %cst = arith.constant dense<0.000000e+00> : vector<256x128xf32>
    %2 = tpu.matmul %0, %1, %cst {dimension_numbers = #tpu.dot_dimension_numbers<[1], [0], [0], [1], [0, 0, 1, 1], [], []>} : vector<256x288xbf16>, vector<288x128xbf16>, vector<256x128xf32> -> vector<256x128xf32>
    %3 = vector.extract_strided_slice %2 {offsets = [0, 0], sizes = [64, 128], strides = [1, 1]} : vector<256x128xf32> to vector<64x128xf32>
    %4 = vector.extract_strided_slice %2 {offsets = [64, 0], sizes = [64, 128], strides = [1, 1]} : vector<256x128xf32> to vector<64x128xf32>
    %5 = arith.maximumf %3, %4 : vector<64x128xf32>
    %6 = vector.extract_strided_slice %2 {offsets = [128, 0], sizes = [64, 128], strides = [1, 1]} : vector<256x128xf32> to vector<64x128xf32>
    %7 = vector.extract_strided_slice %2 {offsets = [192, 0], sizes = [64, 128], strides = [1, 1]} : vector<256x128xf32> to vector<64x128xf32>
    %8 = arith.maximumf %6, %7 : vector<64x128xf32>
    %9 = arith.maximumf %5, %8 : vector<64x128xf32>
    %c0_3 = arith.constant 0 : index
    %c0_4 = arith.constant 0 : index
    %10 = vector.load %arg3[%c0_3, %c0_4] : memref<1x128xf32, #tpu.memory_space<vmem>>, vector<1x128xf32>
    %11 = vector.broadcast %10 : vector<1x128xf32> to vector<64x128xf32>
    %12 = arith.addf %9, %11 : vector<64x128xf32>
    %cst_5 = arith.constant 0.000000e+00 : f32
    %13 = vector.broadcast %cst_5 : f32 to vector<64x128xf32>
    %14 = arith.maximumf %12, %13 : vector<64x128xf32>
    %15 = arith.truncf %14 : vector<64x128xf32> to vector<64x128xbf16>
    %c0_6 = arith.constant 0 : index
    %c0_7 = arith.constant 0 : index
    %16 = vector.load %arg4[%c0_6, %c0_7] : memref<64x128xbf16, #tpu.memory_space<vmem>>, vector<64x128xbf16>
    tpu.vector_store %arg4[%c0_6, %c0_7], %15 {strides = array<i32>} : memref<64x128xbf16, #tpu.memory_space<vmem>>, vector<64x128xbf16>,
    return
  }
  func.func @transform_0(%arg0: i32) -> (i32, i32) {
    %c0_i32 = arith.constant 0 : i32
    %c0_i32_0 = arith.constant 0 : i32
    return %arg0, %c0_i32 : i32, i32
  }
  func.func @transform_1(%arg0: i32) -> (i32, i32) {
    %c0_i32 = arith.constant 0 : i32
    %c0_i32_0 = arith.constant 0 : i32
    %c0_i32_1 = arith.constant 0 : i32
    return %c0_i32, %c0_i32_0 : i32, i32
  }
  func.func @transform_2(%arg0: i32) -> (i32, i32) {
    %c0_i32 = arith.constant 0 : i32
    %c0_i32_0 = arith.constant 0 : i32
    %c0_i32_1 = arith.constant 0 : i32
    return %c0_i32, %c0_i32_0 : i32, i32
  }
  func.func @transform_3(%arg0: i32) -> (i32, i32) {
    %c0_i32 = arith.constant 0 : i32
    %c0_i32_0 = arith.constant 0 : i32
    return %arg0, %c0_i32 : i32, i32
  }
}

module attributes {stable_mosaic.version = 11 : i64} {
  func.func @_tail_kernel(%arg0: i32, %arg1: memref<64x1152xbf16, #tpu.memory_space<vmem>>, %arg2: memref<1152x1024xbf16, #tpu.memory_space<vmem>>, %arg3: memref<1x1024xf32, #tpu.memory_space<vmem>>, %arg4: memref<1024x1024xbf16, #tpu.memory_space<vmem>>, %arg5: memref<1x1024xf32, #tpu.memory_space<vmem>>, %arg6: memref<1024x512xbf16, #tpu.memory_space<vmem>>, %arg7: memref<1x512xf32, #tpu.memory_space<vmem>>, %arg8: memref<512x128xbf16, #tpu.memory_space<vmem>>, %arg9: memref<1x128xf32, #tpu.memory_space<vmem>>, %arg10: memref<16x128xf32, #tpu.memory_space<vmem>>) attributes {dimension_semantics = [#tpu.dimension_semantics<parallel>], iteration_bounds = array<i64: 1>, scalar_prefetch = 0 : i64, scratch_operands = 0 : i64, tpu.core_type = #tpu.core_type<tc>, window_params = [{transform_indices = @transform_0, window_bounds = array<i64: 64, 1152>}, {pipeline_mode = #tpu.pipeline_mode<synchronous>, transform_indices = @transform_1, window_bounds = array<i64: 1152, 1024>}, {pipeline_mode = #tpu.pipeline_mode<synchronous>, transform_indices = @transform_2, window_bounds = array<i64: 1, 1024>}, {pipeline_mode = #tpu.pipeline_mode<synchronous>, transform_indices = @transform_3, window_bounds = array<i64: 1024, 1024>}, {pipeline_mode = #tpu.pipeline_mode<synchronous>, transform_indices = @transform_4, window_bounds = array<i64: 1, 1024>}, {pipeline_mode = #tpu.pipeline_mode<synchronous>, transform_indices = @transform_5, window_bounds = array<i64: 1024, 512>}, {pipeline_mode = #tpu.pipeline_mode<synchronous>, transform_indices = @transform_6, window_bounds = array<i64: 1, 512>}, {pipeline_mode = #tpu.pipeline_mode<synchronous>, transform_indices = @transform_7, window_bounds = array<i64: 512, 128>}, {pipeline_mode = #tpu.pipeline_mode<synchronous>, transform_indices = @transform_8, window_bounds = array<i64: 1, 128>}, {transform_indices = @transform_9, window_bounds = array<i64: 16, 128>}]} {
    %c0 = arith.constant 0 : index
    %c0_0 = arith.constant 0 : index
    %0 = vector.load %arg1[%c0, %c0_0] : memref<64x1152xbf16, #tpu.memory_space<vmem>>, vector<64x1152xbf16>
    %c0_1 = arith.constant 0 : index
    %c0_2 = arith.constant 0 : index
    %1 = vector.load %arg2[%c0_1, %c0_2] : memref<1152x1024xbf16, #tpu.memory_space<vmem>>, vector<1152x1024xbf16>
    %cst = arith.constant dense<0.000000e+00> : vector<64x1024xf32>
    %2 = tpu.matmul %0, %1, %cst {dimension_numbers = #tpu.dot_dimension_numbers<[1], [0], [0], [1], [0, 0, 1, 1], [], []>} : vector<64x1152xbf16>, vector<1152x1024xbf16>, vector<64x1024xf32> -> vector<64x1024xf32>
    %3 = vector.extract_strided_slice %2 {offsets = [0, 0], sizes = [16, 1024], strides = [1, 1]} : vector<64x1024xf32> to vector<16x1024xf32>
    %4 = vector.extract_strided_slice %2 {offsets = [16, 0], sizes = [16, 1024], strides = [1, 1]} : vector<64x1024xf32> to vector<16x1024xf32>
    %5 = arith.maximumf %3, %4 : vector<16x1024xf32>
    %6 = vector.extract_strided_slice %2 {offsets = [32, 0], sizes = [16, 1024], strides = [1, 1]} : vector<64x1024xf32> to vector<16x1024xf32>
    %7 = vector.extract_strided_slice %2 {offsets = [48, 0], sizes = [16, 1024], strides = [1, 1]} : vector<64x1024xf32> to vector<16x1024xf32>
    %8 = arith.maximumf %6, %7 : vector<16x1024xf32>
    %9 = arith.maximumf %5, %8 : vector<16x1024xf32>
    %c0_3 = arith.constant 0 : index
    %c0_4 = arith.constant 0 : index
    %10 = vector.load %arg3[%c0_3, %c0_4] : memref<1x1024xf32, #tpu.memory_space<vmem>>, vector<1x1024xf32>
    %11 = vector.broadcast %10 : vector<1x1024xf32> to vector<16x1024xf32>
    %12 = arith.addf %9, %11 : vector<16x1024xf32>
    %cst_5 = arith.constant 0.000000e+00 : f32
    %13 = vector.broadcast %cst_5 : f32 to vector<16x1024xf32>
    %14 = arith.maximumf %12, %13 : vector<16x1024xf32>
    %15 = arith.truncf %14 : vector<16x1024xf32> to vector<16x1024xbf16>
    %c0_6 = arith.constant 0 : index
    %c0_7 = arith.constant 0 : index
    %16 = vector.load %arg4[%c0_6, %c0_7] : memref<1024x1024xbf16, #tpu.memory_space<vmem>>, vector<1024x1024xbf16>
    %cst_8 = arith.constant dense<0.000000e+00> : vector<16x1024xf32>
    %17 = tpu.matmul %15, %16, %cst_8 {dimension_numbers = #tpu.dot_dimension_numbers<[1], [0], [0], [1], [0, 0, 1, 1], [], []>} : vector<16x1024xbf16>, vector<1024x1024xbf16>, vector<16x1024xf32> -> vector<16x1024xf32>
    %c0_9 = arith.constant 0 : index
    %c0_10 = arith.constant 0 : index
    %18 = vector.load %arg5[%c0_9, %c0_10] : memref<1x1024xf32, #tpu.memory_space<vmem>>, vector<1x1024xf32>
    %19 = vector.broadcast %18 : vector<1x1024xf32> to vector<16x1024xf32>
    %20 = arith.addf %17, %19 : vector<16x1024xf32>
    %cst_11 = arith.constant 0.000000e+00 : f32
    %21 = vector.broadcast %cst_11 : f32 to vector<16x1024xf32>
    %22 = arith.maximumf %20, %21 : vector<16x1024xf32>
    %23 = arith.truncf %22 : vector<16x1024xf32> to vector<16x1024xbf16>
    %c0_12 = arith.constant 0 : index
    %c0_13 = arith.constant 0 : index
    %24 = vector.load %arg6[%c0_12, %c0_13] : memref<1024x512xbf16, #tpu.memory_space<vmem>>, vector<1024x512xbf16>
    %cst_14 = arith.constant dense<0.000000e+00> : vector<16x512xf32>
    %25 = tpu.matmul %23, %24, %cst_14 {dimension_numbers = #tpu.dot_dimension_numbers<[1], [0], [0], [1], [0, 0, 1, 1], [], []>} : vector<16x1024xbf16>, vector<1024x512xbf16>, vector<16x512xf32> -> vector<16x512xf32>
    %c0_15 = arith.constant 0 : index
    %c0_16 = arith.constant 0 : index
    %26 = vector.load %arg7[%c0_15, %c0_16] : memref<1x512xf32, #tpu.memory_space<vmem>>, vector<1x512xf32>
    %27 = vector.broadcast %26 : vector<1x512xf32> to vector<16x512xf32>
    %28 = arith.addf %25, %27 : vector<16x512xf32>
    %cst_17 = arith.constant 0.000000e+00 : f32
    %29 = vector.broadcast %cst_17 : f32 to vector<16x512xf32>
    %30 = arith.maximumf %28, %29 : vector<16x512xf32>
    %31 = arith.truncf %30 : vector<16x512xf32> to vector<16x512xbf16>
    %c0_18 = arith.constant 0 : index
    %c0_19 = arith.constant 0 : index
    %32 = vector.load %arg8[%c0_18, %c0_19] : memref<512x128xbf16, #tpu.memory_space<vmem>>, vector<512x128xbf16>
    %cst_20 = arith.constant dense<0.000000e+00> : vector<16x128xf32>
    %33 = tpu.matmul %31, %32, %cst_20 {dimension_numbers = #tpu.dot_dimension_numbers<[1], [0], [0], [1], [0, 0, 1, 1], [], []>} : vector<16x512xbf16>, vector<512x128xbf16>, vector<16x128xf32> -> vector<16x128xf32>
    %c0_21 = arith.constant 0 : index
    %c0_22 = arith.constant 0 : index
    %34 = vector.load %arg9[%c0_21, %c0_22] : memref<1x128xf32, #tpu.memory_space<vmem>>, vector<1x128xf32>
    %35 = vector.broadcast %34 : vector<1x128xf32> to vector<16x128xf32>
    %36 = arith.addf %33, %35 : vector<16x128xf32>
    %cst_23 = arith.constant 0.000000e+00 : f32
    %37 = vector.broadcast %cst_23 : f32 to vector<16x128xf32>
    %38 = arith.maximumf %36, %37 : vector<16x128xf32>
    %39 = tpu.iota {dimensions = array<i32: 1>} : vector<16x128xi32>
    %c10_i32 = arith.constant 10 : i32
    %40 = vector.broadcast %c10_i32 : i32 to vector<16x128xi32>
    %41 = arith.cmpi slt, %39, %40 : vector<16x128xi32>
    %cst_24 = arith.constant -1.000000e+30 : f32
    %42 = vector.broadcast %cst_24 : f32 to vector<16x128xf32>
    %43 = arith.select %41, %38, %42 : vector<16x128xi1>, vector<16x128xf32>
    %cst_25 = arith.constant dense<0xFF800000> : vector<16xf32>
    %44 = vector.multi_reduction <maximumf>, %43, %cst_25 [1] : vector<16x128xf32> to vector<16xf32>
    %45 = vector.shape_cast %44 : vector<16xf32> to vector<16x1xf32>
    %46 = vector.broadcast %45 : vector<16x1xf32> to vector<16x128xf32>
    %47 = arith.subf %43, %46 : vector<16x128xf32>
    %48 = math.exp %47 : vector<16x128xf32>
    %cst_26 = arith.constant 0.000000e+00 : f32
    %49 = vector.broadcast %cst_26 : f32 to vector<16x128xf32>
    %50 = arith.select %41, %48, %49 : vector<16x128xi1>, vector<16x128xf32>
    %cst_27 = arith.constant dense<0.000000e+00> : vector<16xf32>
    %51 = vector.multi_reduction <add>, %50, %cst_27 [1] : vector<16x128xf32> to vector<16xf32>
    %52 = vector.shape_cast %51 : vector<16xf32> to vector<16x1xf32>
    %53 = vector.broadcast %45 : vector<16x1xf32> to vector<16x128xf32>
    %54 = arith.subf %43, %53 : vector<16x128xf32>
    %55 = math.log %52 : vector<16x1xf32>
    %56 = vector.broadcast %55 : vector<16x1xf32> to vector<16x128xf32>
    %57 = arith.subf %54, %56 : vector<16x128xf32>
    %c0_28 = arith.constant 0 : index
    %c0_29 = arith.constant 0 : index
    %58 = vector.load %arg10[%c0_28, %c0_29] : memref<16x128xf32, #tpu.memory_space<vmem>>, vector<16x128xf32>
    tpu.vector_store %arg10[%c0_28, %c0_29], %57 {strides = array<i32>} : memref<16x128xf32, #tpu.memory_space<vmem>>, vector<16x128xf32>,
    return
  }
  func.func @transform_0(%arg0: i32) -> (i32, i32) {
    %c0_i32 = arith.constant 0 : i32
    %c0_i32_0 = arith.constant 0 : i32
    return %arg0, %c0_i32 : i32, i32
  }
  func.func @transform_1(%arg0: i32) -> (i32, i32) {
    %c0_i32 = arith.constant 0 : i32
    %c0_i32_0 = arith.constant 0 : i32
    %c0_i32_1 = arith.constant 0 : i32
    return %c0_i32, %c0_i32_0 : i32, i32
  }
  func.func @transform_2(%arg0: i32) -> (i32, i32) {
    %c0_i32 = arith.constant 0 : i32
    %c0_i32_0 = arith.constant 0 : i32
    %c0_i32_1 = arith.constant 0 : i32
    return %c0_i32, %c0_i32_0 : i32, i32
  }
  func.func @transform_3(%arg0: i32) -> (i32, i32) {
    %c0_i32 = arith.constant 0 : i32
    %c0_i32_0 = arith.constant 0 : i32
    %c0_i32_1 = arith.constant 0 : i32
    return %c0_i32, %c0_i32_0 : i32, i32
  }
  func.func @transform_4(%arg0: i32) -> (i32, i32) {
    %c0_i32 = arith.constant 0 : i32
    %c0_i32_0 = arith.constant 0 : i32
    %c0_i32_1 = arith.constant 0 : i32
    return %c0_i32, %c0_i32_0 : i32, i32
  }
  func.func @transform_5(%arg0: i32) -> (i32, i32) {
    %c0_i32 = arith.constant 0 : i32
    %c0_i32_0 = arith.constant 0 : i32
    %c0_i32_1 = arith.constant 0 : i32
    return %c0_i32, %c0_i32_0 : i32, i32
  }
  func.func @transform_6(%arg0: i32) -> (i32, i32) {
    %c0_i32 = arith.constant 0 : i32
    %c0_i32_0 = arith.constant 0 : i32
    %c0_i32_1 = arith.constant 0 : i32
    return %c0_i32, %c0_i32_0 : i32, i32
  }
  func.func @transform_7(%arg0: i32) -> (i32, i32) {
    %c0_i32 = arith.constant 0 : i32
    %c0_i32_0 = arith.constant 0 : i32
    %c0_i32_1 = arith.constant 0 : i32
    return %c0_i32, %c0_i32_0 : i32, i32
  }
  func.func @transform_8(%arg0: i32) -> (i32, i32) {
    %c0_i32 = arith.constant 0 : i32
    %c0_i32_0 = arith.constant 0 : i32
    %c0_i32_1 = arith.constant 0 : i32
    return %c0_i32, %c0_i32_0 : i32, i32
  }
  func.func @transform_9(%arg0: i32) -> (i32, i32) {
    %c0_i32 = arith.constant 0 : i32
    %c0_i32_0 = arith.constant 0 : i32
    return %arg0, %c0_i32 : i32, i32
  }
}

</mosaic_0001>

<bundles_post_ra>
// kernel: net_forward.3
= control target key start
LH: loop header
LB: loop body
LE: loop exit
PB: predicated region body
PF: predicated region fallthrough
CT: control target
= control target key end

     0   :  { %8 = vsyncpa [#allocation3], 0  ;;  %s1978_s0 = inlined_call_operand.vmem [shape: bf16[352,36], index: 0, kind: input, shape index: {}]   ;;  %s1979_s1 = inlined_call_operand.hbm [shape: bf16[36,512], index: 1, kind: input, shape index: {}]   ;;  %s1980_s2 = inlined_call_operand.hbm [shape: f32[1,128], index: 2, kind: input, shape index: {}]   ;;  %s1981_s3 = inlined_call_operand.vmem [shape: bf16[352,128], index: 3, kind: output, shape index: {}]  }
   0x1   :  { %9 = vsyncpa [#allocation5], 0  ;;  %s1681_s12 = smov [#allocation2]  }
   0x2   :  { %s17_s13 = sshll.u32 %s1681_s12, 4  ;;  %s18_s13 = int_to_ptr.vmem [resolvable:$true] %s17_s13 }
   0x3   :  { %s1645_s14 = scalar_lea.vmem %s18_s13, 1280  ;;  %p1650_p1 = scmp.lt.s32.totalorder %s18_s13, %s18_s13 }
   0x4   :  { %p1646_p0 = scmp.ne.s32.totalorder %s18_s13, %s1645_s14  ;;  %p1651_p2 = scmp.lt.s32.totalorder %s1645_s14, %s1645_s14 }
   0x6   :  { %p1652_p3 = por %p1651_p2, %p1650_p1 }
   0x8   :  { %p1653_p4 = pnand %p1652_p3, %p1646_p0 }
   0xa   :  { %1656 = shalt.err (!%p1653_p4)
}
   0xb   :  { %s1682_s15 = smov 256   ;;  %s1683_s16 = smov 16  }
   0xc   :  { %23 = dma.hbm_to_vmem [thread:$0]  %s1979_s1, 1280, %s18_s13, [#allocation3], %s1682_s15, %s1682_s15, %s1683_s16  }
   0xd   :  { %s1684_s19 = smov [#allocation4]  }
   0xe   :  { %s30_s20 = sshll.u32 %s1684_s19, 4  ;;  %s31_s20 = int_to_ptr.vmem [resolvable:$true] %s30_s20 }
   0xf   :  { %s1665_s21 = scalar_lea.vmem %s31_s20, 16  ;;  %s1669_s22 = scalar_lea.vmem %s31_s20, 32 }
  0x10   :  { %p1666_p5 = scmp.ne.s32.totalorder %s31_s20, %s1665_s21  ;;  %p1670_p6 = scmp.lt.s32.totalorder %s31_s20, %s31_s20 }
  0x11   :  { %p1671_p7 = scmp.lt.s32.totalorder %s1669_s22, %s1665_s21 }
  0x13   :  { %p1672_p8 = por %p1671_p7, %p1670_p6 }
  0x15   :  { %p1673_p9 = pnand %p1672_p8, %p1666_p5 }
  0x17   :  { %1676 = shalt.err (!%p1673_p9)
}
  0x18   :  { %33 = dma.hbm_to_vmem [thread:$0]  %s1980_s2, 16, %s31_s20, [#allocation5]  }
  0x19   :  { %1677 = dma.done.wait [#allocation3], 1280  }
  0x1a   :  { %1678 = vsyncadd [#allocation3], 4294966016 }
  0x1b   :  { %1679 = dma.done.wait [#allocation5], 16  }
  0x1c   :  { %1680 = vsyncadd [#allocation5], 4294967280  ;;  %v1685_v0 = vmov 0   ;;  %v93_v1 = vld [vmem:[#allocation2 + $0x40] sm:$0x33]  ;;  %vm322_vm0 = vcmask 1041408  }
  0x1d   :  { %367 = vmatprep.mubr.bf16.mxu0 %v1685_v0  ;;  %620 = vmatprep.mubr.bf16.mxu1 %v1685_v0  ;;  %v94_v2 = vld [vmem:[#allocation2 + $0x48] sm:$0x33]  ;;  %v1325_v3 = vcombine.high %v93_v1, %v93_v1  ;;  %v1324_v5 = vcombine.low %v93_v1, %v93_v1  ;;  %v1603_v7 = vld [vmem:[#allocation2 + $0x24] ss:$16 sps:$4 sm:$0xff]   ;;  %v1607_v11 = vld [vmem:[#allocation2 + $0x20] ss:$16 sps:$4 sm:$0xff]  }
  0x1e   :  { %v1327_v4 = vcombine.high %v94_v2, %v94_v2  ;;  %v1326_v6 = vcombine.low %v94_v2, %v94_v2  ;;  %v1605_v8 = vld [vmem:[#allocation2 + $0x2c] ss:$16 sps:$4 sm:$0xff]   ;;  %v1608_v12 = vld [vmem:[#allocation2 + $0x28] ss:$16 sps:$4 sm:$0xff]   ;;  %v1609_v13 = vld [vmem:[#allocation2 + $0x4] ss:$16 sps:$4 sm:$0xff]  }
  0x1f   :  { %1328 = vmatprep.subr.msk.bf16.mxu0 %vm322_vm0, %v1325_v3  ;;  %v324_v9 = vsel %vm322_vm0, %v1324_v5, 0  ;;  %v1611_v14 = vld [vmem:[#allocation2 + $0xc] ss:$16 sps:$4 sm:$0xff]   ;;  %v1613_v15 = vld [vmem:[#allocation2] ss:$16 sps:$4 sm:$0xff]   ;;  %vm255_vm1 = vcmask 293888  }
  0x20   :  { %1351 = vmatprep.subr.msk.bf16.mxu1 %vm322_vm0, %v1327_v4  ;;  %v330_v10 = vsel %vm322_vm0, %v1326_v6, 0  ;;  %346 = vmatpush1.bf16.msra.mxu0 %v324_v9  ;;  %v1614_v16 = vld [vmem:[#allocation2 + $0x8] ss:$16 sps:$4 sm:$0xff]   ;;  %v1615_v17 = vld [vmem:[%s1978_s0] sm:$0xff]   ;;  %v1617_v19 = vld [vmem:[%s1978_s0 + $0x10] sm:$0xff]  }
  0x21   :  { %599 = vmatpush1.bf16.msra.mxu1 %v330_v10  ;;  %347 = vmatprep.subr.bf16.mxu0 %v1603_v7  ;;  %v1616_v18 = vld [vmem:[%s1978_s0 + $0x8] sm:$0xff]   ;;  %v1618_v20 = vld [vmem:[%s1978_s0 + $0x18] sm:$0xff]   ;;  %v1619_v21 = vld [vmem:[%s1978_s0 + $0x20] sm:$0xff]  }
  0x22   :  { %600 = vmatprep.subr.bf16.mxu1 %v1605_v8  ;;  %v1620_v22 = vld [vmem:[%s1978_s0 + $0x28] sm:$0xff]   ;;  %v1621_v23 = vld [vmem:[%s1978_s0 + $0x30] sm:$0xff]   ;;  %v1622_v24 = vld [vmem:[%s1978_s0 + $0x38] sm:$0xff]  }
  0x23   :  { %v1623_v25 = vld [vmem:[%s1978_s0 + $0x40] sm:$0xff]   ;;  %v1624_v26 = vld [vmem:[%s1978_s0 + $0x48] sm:$0xff]   ;;  %v1625_v27 = vld [vmem:[%s1978_s0 + $0x50] sm:$0xff]  }
  0x24   :  { %348 = vmatpush1.bf16.msra.mxu0 %v1607_v11  ;;  %v1626_v28 = vld [vmem:[%s1978_s0 + $0x58] sm:$0xff]   ;;  %v1627_v29 = vld [vmem:[%s1978_s0 + $0x60] sm:$0xff]   ;;  %v1628_v30 = vld [vmem:[%s1978_s0 + $0x68] sm:$0xff]  }
  0x25   :  { %601 = vmatpush1.bf16.msra.mxu1 %v1608_v12  ;;  %349 = vmatprep.subr.bf16.mxu0 %v1609_v13  ;;  %v1629_v31 = vld [vmem:[%s1978_s0 + $0x70] sm:$0xff]   ;;  %v1630_v32 = vld [vmem:[%s1978_s0 + $0x78] sm:$0xff]   ;;  %v1631_v33 = vld [vmem:[%s1978_s0 + $0x80] sm:$0xff]  }
  0x26   :  { %602 = vmatprep.subr.bf16.mxu1 %v1611_v14  ;;  %v1632_v34 = vld [vmem:[%s1978_s0 + $0x88] sm:$0xff]   ;;  %v1633_v35 = vld [vmem:[%s1978_s0 + $0x90] sm:$0xff]   ;;  %v1634_v36 = vld [vmem:[%s1978_s0 + $0x98] sm:$0xff]  }
  0x27   :  { %v1635_v37 = vld [vmem:[%s1978_s0 + $0xa0] sm:$0xff]   ;;  %v1636_v38 = vld [vmem:[%s1978_s0 + $0xa8] sm:$0xff]   ;;  %v1866_v48 = vld [vmem:[#allocation4] ss:$0 sm:$0xff] }
  0x28   :  { %350 = vmatpush1.bf16.msra.mxu0 %v1613_v15 }
  0x29   :  { %603 = vmatpush1.bf16.msra.mxu1 %v1614_v16 }
  0x2b   :  { %1329 = vmatmul.mubr.msk.bf16.vlgmr.msra.gmra.mxu0 %vm255_vm1, %v1615_v17 }
  0x2c   :  { %1352 = vmatmul.mubr.msk.bf16.vlgmr.msra.gmra.mxu1 %vm255_vm1, %v1615_v17  ;;  %377 = vmatprep.mubr.bf16.mxu0 %v1685_v0 }
  0x2d   :  { %630 = vmatprep.mubr.bf16.mxu1 %v1685_v0 }
  0x33   :  { %1330 = vmatmul.mubr.msk.bf16.gmra.mxu0 %vm255_vm1, %v1616_v18 }
  0x34   :  { %1353 = vmatmul.mubr.msk.bf16.gmra.mxu1 %vm255_vm1, %v1616_v18  ;;  %387 = vmatprep.mubr.bf16.mxu0 %v1685_v0 }
  0x35   :  { %640 = vmatprep.mubr.bf16.mxu1 %v1685_v0 }
  0x3b   :  { %1331 = vmatmul.mubr.msk.bf16.gmra.mxu0 %vm255_vm1, %v1617_v19 }
  0x3c   :  { %1354 = vmatmul.mubr.msk.bf16.gmra.mxu1 %vm255_vm1, %v1617_v19  ;;  %397 = vmatprep.mubr.bf16.mxu0 %v1685_v0 }
  0x3d   :  { %650 = vmatprep.mubr.bf16.mxu1 %v1685_v0 }
  0x43   :  { %1332 = vmatmul.mubr.msk.bf16.gmra.mxu0 %vm255_vm1, %v1618_v20 }
  0x44   :  { %1355 = vmatmul.mubr.msk.bf16.gmra.mxu1 %vm255_vm1, %v1618_v20  ;;  %407 = vmatprep.mubr.bf16.mxu0 %v1685_v0 }
  0x45   :  { %660 = vmatprep.mubr.bf16.mxu1 %v1685_v0 }
  0x4b   :  { %1333 = vmatmul.mubr.msk.bf16.gmra.mxu0 %vm255_vm1, %v1619_v21 }
  0x4c   :  { %1356 = vmatmul.mubr.msk.bf16.gmra.mxu1 %vm255_vm1, %v1619_v21  ;;  %417 = vmatprep.mubr.bf16.mxu0 %v1685_v0 }
  0x4d   :  { %670 = vmatprep.mubr.bf16.mxu1 %v1685_v0 }
  0x53   :  { %1334 = vmatmul.mubr.msk.bf16.gmra.mxu0 %vm255_vm1, %v1620_v22 }
  0x54   :  { %1357 = vmatmul.mubr.msk.bf16.gmra.mxu1 %vm255_vm1, %v1620_v22  ;;  %427 = vmatprep.mubr.bf16.mxu0 %v1685_v0 }
  0x55   :  { %680 = vmatprep.mubr.bf16.mxu1 %v1685_v0 }
  0x5b   :  { %1335 = vmatmul.mubr.msk.bf16.gmra.mxu0 %vm255_vm1, %v1621_v23 }
  0x5c   :  { %1358 = vmatmul.mubr.msk.bf16.gmra.mxu1 %vm255_vm1, %v1621_v23  ;;  %437 = vmatprep.mubr.bf16.mxu0 %v1685_v0 }
  0x5d   :  { %690 = vmatprep.mubr.bf16.mxu1 %v1685_v0 }
  0x63   :  { %1336 = vmatmul.mubr.msk.bf16.gmra.mxu0 %vm255_vm1, %v1622_v24 }
  0x64   :  { %1359 = vmatmul.mubr.msk.bf16.gmra.mxu1 %vm255_vm1, %v1622_v24  ;;  %447 = vmatprep.mubr.bf16.mxu0 %v1685_v0 }
  0x65   :  { %700 = vmatprep.mubr.bf16.mxu1 %v1685_v0 }
  0x6b   :  { %1337 = vmatmul.mubr.msk.bf16.gmra.mxu0 %vm255_vm1, %v1623_v25 }
  0x6c   :  { %1360 = vmatmul.mubr.msk.bf16.gmra.mxu1 %vm255_vm1, %v1623_v25  ;;  %457 = vmatprep.mubr.bf16.mxu0 %v1685_v0 }
  0x6d   :  { %710 = vmatprep.mubr.bf16.mxu1 %v1685_v0 }
  0x73   :  { %1338 = vmatmul.mubr.msk.bf16.gmra.mxu0 %vm255_vm1, %v1624_v26 }
  0x74   :  { %1361 = vmatmul.mubr.msk.bf16.gmra.mxu1 %vm255_vm1, %v1624_v26  ;;  %467 = vmatprep.mubr.bf16.mxu0 %v1685_v0 }
  0x75   :  { %720 = vmatprep.mubr.bf16.mxu1 %v1685_v0 }
  0x7b   :  { %1339 = vmatmul.mubr.msk.bf16.gmra.mxu0 %vm255_vm1, %v1625_v27 }
  0x7c   :  { %1362 = vmatmul.mubr.msk.bf16.gmra.mxu1 %vm255_vm1, %v1625_v27  ;;  %477 = vmatprep.mubr.bf16.mxu0 %v1685_v0 }
  0x7d   :  { %730 = vmatprep.mubr.bf16.mxu1 %v1685_v0 }
  0x83   :  { %1340 = vmatmul.mubr.msk.bf16.gmra.mxu0 %vm255_vm1, %v1626_v28 }
  0x84   :  { %1363 = vmatmul.mubr.msk.bf16.gmra.mxu1 %vm255_vm1, %v1626_v28  ;;  %487 = vmatprep.mubr.bf16.mxu0 %v1685_v0 }
  0x85   :  { %740 = vmatprep.mubr.bf16.mxu1 %v1685_v0 }
  0x8b   :  { %1341 = vmatmul.mubr.msk.bf16.gmra.mxu0 %vm255_vm1, %v1627_v29 }
  0x8c   :  { %1364 = vmatmul.mubr.msk.bf16.gmra.mxu1 %vm255_vm1, %v1627_v29  ;;  %497 = vmatprep.mubr.bf16.mxu0 %v1685_v0 }
  0x8d   :  { %750 = vmatprep.mubr.bf16.mxu1 %v1685_v0 }
  0x93   :  { %1342 = vmatmul.mubr.msk.bf16.gmra.mxu0 %vm255_vm1, %v1628_v30 }
  0x94   :  { %1365 = vmatmul.mubr.msk.bf16.gmra.mxu1 %vm255_vm1, %v1628_v30  ;;  %507 = vmatprep.mubr.bf16.mxu0 %v1685_v0 }
  0x95   :  { %760 = vmatprep.mubr.bf16.mxu1 %v1685_v0 }
  0x9b   :  { %1343 = vmatmul.mubr.msk.bf16.gmra.mxu0 %vm255_vm1, %v1629_v31 }
  0x9c   :  { %1366 = vmatmul.mubr.msk.bf16.gmra.mxu1 %vm255_vm1, %v1629_v31  ;;  %517 = vmatprep.mubr.bf16.mxu0 %v1685_v0 }
  0x9d   :  { %770 = vmatprep.mubr.bf16.mxu1 %v1685_v0 }
  0xa3   :  { %1344 = vmatmul.mubr.msk.bf16.gmra.mxu0 %vm255_vm1, %v1630_v32 }
  0xa4   :  { %1367 = vmatmul.mubr.msk.bf16.gmra.mxu1 %vm255_vm1, %v1630_v32  ;;  %527 = vmatprep.mubr.bf16.mxu0 %v1685_v0 }
  0xa5   :  { %780 = vmatprep.mubr.bf16.mxu1 %v1685_v0 }
  0xab   :  { %1345 = vmatmul.mubr.msk.bf16.gmra.mxu0 %vm255_vm1, %v1631_v33 }
  0xac   :  { %1368 = vmatmul.mubr.msk.bf16.gmra.mxu1 %vm255_vm1, %v1631_v33  ;;  %537 = vmatprep.mubr.bf16.mxu0 %v1685_v0 }
  0xad   :  { %790 = vmatprep.mubr.bf16.mxu1 %v1685_v0 }
  0xb3   :  { %1346 = vmatmul.mubr.msk.bf16.gmra.mxu0 %vm255_vm1, %v1632_v34 }
  0xb4   :  { %1369 = vmatmul.mubr.msk.bf16.gmra.mxu1 %vm255_vm1, %v1632_v34  ;;  %547 = vmatprep.mubr.bf16.mxu0 %v1685_v0 }
  0xb5   :  { %800 = vmatprep.mubr.bf16.mxu1 %v1685_v0 }
  0xbb   :  { %1347 = vmatmul.mubr.msk.bf16.gmra.mxu0 %vm255_vm1, %v1633_v35 }
  0xbc   :  { %1370 = vmatmul.mubr.msk.bf16.gmra.mxu1 %vm255_vm1, %v1633_v35  ;;  %557 = vmatprep.mubr.bf16.mxu0 %v1685_v0 }
  0xbd   :  { %810 = vmatprep.mubr.bf16.mxu1 %v1685_v0 }
  0xc3   :  { %1348 = vmatmul.mubr.msk.bf16.gmra.mxu0 %vm255_vm1, %v1634_v36 }
  0xc4   :  { %1371 = vmatmul.mubr.msk.bf16.gmra.mxu1 %vm255_vm1, %v1634_v36  ;;  %567 = vmatprep.mubr.bf16.mxu0 %v1685_v0 }
  0xc5   :  { %820 = vmatprep.mubr.bf16.mxu1 %v1685_v0 }
  0xcb   :  { %1349 = vmatmul.mubr.msk.bf16.gmra.mxu0 %vm255_vm1, %v1635_v37 }
  0xcc   :  { %1372 = vmatmul.mubr.msk.bf16.gmra.mxu1 %vm255_vm1, %v1635_v37  ;;  %577 = vmatprep.mubr.bf16.mxu0 %v1685_v0 }
  0xcd   :  { %830 = vmatprep.mubr.bf16.mxu1 %v1685_v0 }
  0xd3   :  { %1350 = vmatmul.mubr.msk.bf16.gmra.mxu0 %vm255_vm1, %v1636_v38 }
  0xd4   :  { %1373 = vmatmul.mubr.msk.bf16.gmra.mxu1 %vm255_vm1, %v1636_v38 }
  0xeb   :  { %v369_v39 = vpop.f32.mrf.mxu0 }
  0xec   :  { %v622_v40 = vpop.f32.mrf.mxu1 }
  0xed   :  { %v371_v41 = vpop.f32.mrf.mxu0 }
  0xee   :  { %v624_v42 = vpop.f32.mrf.mxu1  ;;  %v841_v43 = vmax.f32 %v369_v39, %v371_v41 }
  0xef   :  { %v885_v44 = vmax.f32 %v622_v40, %v624_v42  ;;  %v373_v45 = vpop.f32.mrf.mxu0 }
  0xf0   :  { %v626_v46 = vpop.f32.mrf.mxu1 }
  0xf1   :  { %v929_v47 = vmax.f32 %v841_v43, %v885_v44  ;;  %v375_v49 = vpop.f32.mrf.mxu0 }
  0xf2   :  { %v628_v50 = vpop.f32.mrf.mxu1  ;;  %v842_v51 = vmax.f32 %v373_v45, %v375_v49 }
  0xf3   :  { %v886_v52 = vmax.f32 %v626_v46, %v628_v50  ;;  %v379_v53 = vpop.f32.mrf.mxu0  ;;  %v980_v55 = vadd.f32 %v1866_v48, %v929_v47 }
  0xf4   :  { %v632_v54 = vpop.f32.mrf.mxu1 }
  0xf5   :  { %v930_v56 = vmax.f32 %v842_v51, %v886_v52  ;;  %v381_v57 = vpop.f32.mrf.mxu0  ;;  %v1024_v0 = vmax.f32 %v980_v55, 0.0 }
  0xf6   :  { %v634_v58 = vpop.f32.mrf.mxu1  ;;  %v843_v60 = vmax.f32 %v379_v53, %v381_v57 }
  0xf7   :  { %v981_v59 = vadd.f32 %v1866_v48, %v930_v56  ;;  %v887_v61 = vmax.f32 %v632_v54, %v634_v58  ;;  %v383_v62 = vpop.f32.mrf.mxu0 }
  0xf8   :  { %v636_v63 = vpop.f32.mrf.mxu1 }
  0xf9   :  { %v1025_v1 = vmax.f32 %v981_v59, 0.0  ;;  %v931_v2 = vmax.f32 %v843_v60, %v887_v61  ;;  %v385_v3 = vpop.f32.mrf.mxu0 }
  0xfa   :  { %v638_v4 = vpop.f32.mrf.mxu1  ;;  %v844_v6 = vmax.f32 %v383_v62, %v385_v3 }
  0xfb   :  { %v1466_v5 = vpack.c.bf16 %v1025_v1, %v1024_v0  ;;  %v888_v7 = vmax.f32 %v636_v63, %v638_v4  ;;  %v389_v8 = vpop.f32.mrf.mxu0  ;;  %v982_v10 = vadd.f32 %v1866_v48, %v931_v2 }
  0xfc   :  { %v642_v9 = vpop.f32.mrf.mxu1 }
  0xfd   :  { %1467 = vst [vmem:[%s1981_s3] sm:$0xff] %v1466_v5   ;;  %v932_v11 = vmax.f32 %v844_v6, %v888_v7  ;;  %v391_v12 = vpop.f32.mrf.mxu0  ;;  %v1026_v19 = vmax.f32 %v982_v10, 0.0 }
  0xfe   :  { %v644_v13 = vpop.f32.mrf.mxu1  ;;  %v845_v15 = vmax.f32 %v389_v8, %v391_v12 }
  0xff   :  { %v983_v14 = vadd.f32 %v1866_v48, %v932_v11  ;;  %v889_v16 = vmax.f32 %v642_v9, %v644_v13  ;;  %v393_v17 = vpop.f32.mrf.mxu0 }
 0x100   :  { %v646_v18 = vpop.f32.mrf.mxu1 }
 0x101   :  { %v1027_v20 = vmax.f32 %v983_v14, 0.0  ;;  %v933_v21 = vmax.f32 %v845_v15, %v889_v16  ;;  %v395_v22 = vpop.f32.mrf.mxu0 }
 0x102   :  { %v648_v23 = vpop.f32.mrf.mxu1  ;;  %v846_v25 = vmax.f32 %v393_v17, %v395_v22 }
 0x103   :  { %v1471_v24 = vpack.c.bf16 %v1027_v20, %v1026_v19  ;;  %v890_v26 = vmax.f32 %v646_v18, %v648_v23  ;;  %v399_v27 = vpop.f32.mrf.mxu0  ;;  %v984_v29 = vadd.f32 %v1866_v48, %v933_v21 }
 0x104   :  { %v652_v28 = vpop.f32.mrf.mxu1 }
 0x105   :  { %1573 = vst [vmem:[%s1981_s3 + $0x8] sm:$0xff] %v1471_v24   ;;  %v934_v30 = vmax.f32 %v846_v25, %v890_v26  ;;  %v401_v31 = vpop.f32.mrf.mxu0  ;;  %v1028_v38 = vmax.f32 %v984_v29, 0.0 }
 0x106   :  { %v654_v32 = vpop.f32.mrf.mxu1  ;;  %v847_v34 = vmax.f32 %v399_v27, %v401_v31 }
 0x107   :  { %v985_v33 = vadd.f32 %v1866_v48, %v934_v30  ;;  %v891_v35 = vmax.f32 %v652_v28, %v654_v32  ;;  %v403_v36 = vpop.f32.mrf.mxu0 }
 0x108   :  { %v656_v37 = vpop.f32.mrf.mxu1 }
 0x109   :  { %v1029_v39 = vmax.f32 %v985_v33, 0.0  ;;  %v935_v40 = vmax.f32 %v847_v34, %v891_v35  ;;  %v405_v41 = vpop.f32.mrf.mxu0 }
 0x10a   :  { %v658_v42 = vpop.f32.mrf.mxu1  ;;  %v848_v44 = vmax.f32 %v403_v36, %v405_v41 }
 0x10b   :  { %v1476_v43 = vpack.c.bf16 %v1029_v39, %v1028_v38  ;;  %v892_v45 = vmax.f32 %v656_v37, %v658_v42  ;;  %v409_v46 = vpop.f32.mrf.mxu0  ;;  %v986_v49 = vadd.f32 %v1866_v48, %v935_v40 }
 0x10c   :  { %v662_v47 = vpop.f32.mrf.mxu1 }
 0x10d   :  { %1574 = vst [vmem:[%s1981_s3 + $0x10] sm:$0xff] %v1476_v43   ;;  %v936_v50 = vmax.f32 %v848_v44, %v892_v45  ;;  %v411_v51 = vpop.f32.mrf.mxu0  ;;  %v1030_v58 = vmax.f32 %v986_v49, 0.0 }
 0x10e   :  { %v664_v52 = vpop.f32.mrf.mxu1  ;;  %v849_v54 = vmax.f32 %v409_v46, %v411_v51 }
 0x10f   :  { %v987_v53 = vadd.f32 %v1866_v48, %v936_v50  ;;  %v893_v55 = vmax.f32 %v662_v47, %v664_v52  ;;  %v413_v56 = vpop.f32.mrf.mxu0 }
 0x110   :  { %v666_v57 = vpop.f32.mrf.mxu1 }
 0x111   :  { %v1031_v59 = vmax.f32 %v987_v53, 0.0  ;;  %v937_v60 = vmax.f32 %v849_v54, %v893_v55  ;;  %v415_v61 = vpop.f32.mrf.mxu0 }
 0x112   :  { %v668_v62 = vpop.f32.mrf.mxu1  ;;  %v850_v0 = vmax.f32 %v413_v56, %v415_v61 }
 0x113   :  { %v1481_v63 = vpack.c.bf16 %v1031_v59, %v1030_v58  ;;  %v894_v1 = vmax.f32 %v666_v57, %v668_v62  ;;  %v419_v2 = vpop.f32.mrf.mxu0  ;;  %v988_v4 = vadd.f32 %v1866_v48, %v937_v60 }
 0x114   :  { %v672_v3 = vpop.f32.mrf.mxu1 }
 0x115   :  { %1575 = vst [vmem:[%s1981_s3 + $0x18] sm:$0xff] %v1481_v63   ;;  %v938_v5 = vmax.f32 %v850_v0, %v894_v1  ;;  %v421_v6 = vpop.f32.mrf.mxu0  ;;  %v1032_v13 = vmax.f32 %v988_v4, 0.0 }
 0x116   :  { %v674_v7 = vpop.f32.mrf.mxu1  ;;  %v851_v9 = vmax.f32 %v419_v2, %v421_v6 }
 0x117   :  { %v989_v8 = vadd.f32 %v1866_v48, %v938_v5  ;;  %v895_v10 = vmax.f32 %v672_v3, %v674_v7  ;;  %v423_v11 = vpop.f32.mrf.mxu0 }
 0x118   :  { %v676_v12 = vpop.f32.mrf.mxu1 }
 0x119   :  { %v1033_v14 = vmax.f32 %v989_v8, 0.0  ;;  %v939_v15 = vmax.f32 %v851_v9, %v895_v10  ;;  %v425_v16 = vpop.f32.mrf.mxu0 }
 0x11a   :  { %v678_v17 = vpop.f32.mrf.mxu1  ;;  %v852_v19 = vmax.f32 %v423_v11, %v425_v16 }
 0x11b   :  { %v1486_v18 = vpack.c.bf16 %v1033_v14, %v1032_v13  ;;  %v896_v20 = vmax.f32 %v676_v12, %v678_v17  ;;  %v429_v21 = vpop.f32.mrf.mxu0  ;;  %v990_v23 = vadd.f32 %v1866_v48, %v939_v15 }
 0x11c   :  { %v682_v22 = vpop.f32.mrf.mxu1 }
 0x11d   :  { %1576 = vst [vmem:[%s1981_s3 + $0x20] sm:$0xff] %v1486_v18   ;;  %v940_v24 = vmax.f32 %v852_v19, %v896_v20  ;;  %v431_v25 = vpop.f32.mrf.mxu0  ;;  %v1034_v32 = vmax.f32 %v990_v23, 0.0 }
 0x11e   :  { %v684_v26 = vpop.f32.mrf.mxu1  ;;  %v853_v28 = vmax.f32 %v429_v21, %v431_v25 }
 0x11f   :  { %v991_v27 = vadd.f32 %v1866_v48, %v940_v24  ;;  %v897_v29 = vmax.f32 %v682_v22, %v684_v26  ;;  %v433_v30 = vpop.f32.mrf.mxu0 }
 0x120   :  { %v686_v31 = vpop.f32.mrf.mxu1 }
 0x121   :  { %v1035_v33 = vmax.f32 %v991_v27, 0.0  ;;  %v941_v34 = vmax.f32 %v853_v28, %v897_v29  ;;  %v435_v35 = vpop.f32.mrf.mxu0 }
 0x122   :  { %v688_v36 = vpop.f32.mrf.mxu1  ;;  %v854_v38 = vmax.f32 %v433_v30, %v435_v35 }
 0x123   :  { %v1491_v37 = vpack.c.bf16 %v1035_v33, %v1034_v32  ;;  %v898_v39 = vmax.f32 %v686_v31, %v688_v36  ;;  %v439_v40 = vpop.f32.mrf.mxu0  ;;  %v992_v42 = vadd.f32 %v1866_v48, %v941_v34 }
 0x124   :  { %v692_v41 = vpop.f32.mrf.mxu1 }
 0x125   :  { %1577 = vst [vmem:[%s1981_s3 + $0x28] sm:$0xff] %v1491_v37   ;;  %v942_v43 = vmax.f32 %v854_v38, %v898_v39  ;;  %v441_v44 = vpop.f32.mrf.mxu0  ;;  %v1036_v52 = vmax.f32 %v992_v42, 0.0 }
 0x126   :  { %v694_v45 = vpop.f32.mrf.mxu1  ;;  %v855_v47 = vmax.f32 %v439_v40, %v441_v44 }
 0x127   :  { %v993_v46 = vadd.f32 %v1866_v48, %v942_v43  ;;  %v899_v49 = vmax.f32 %v692_v41, %v694_v45  ;;  %v443_v50 = vpop.f32.mrf.mxu0 }
 0x128   :  { %v696_v51 = vpop.f32.mrf.mxu1 }
 0x129   :  { %v1037_v53 = vmax.f32 %v993_v46, 0.0  ;;  %v943_v54 = vmax.f32 %v855_v47, %v899_v49  ;;  %v445_v55 = vpop.f32.mrf.mxu0 }
 0x12a   :  { %v698_v56 = vpop.f32.mrf.mxu1  ;;  %v856_v58 = vmax.f32 %v443_v50, %v445_v55 }
 0x12b   :  { %v1496_v57 = vpack.c.bf16 %v1037_v53, %v1036_v52  ;;  %v900_v59 = vmax.f32 %v696_v51, %v698_v56  ;;  %v449_v60 = vpop.f32.mrf.mxu0  ;;  %v994_v62 = vadd.f32 %v1866_v48, %v943_v54 }
 0x12c   :  { %v702_v61 = vpop.f32.mrf.mxu1 }
 0x12d   :  { %1578 = vst [vmem:[%s1981_s3 + $0x30] sm:$0xff] %v1496_v57   ;;  %v944_v63 = vmax.f32 %v856_v58, %v900_v59  ;;  %v451_v0 = vpop.f32.mrf.mxu0  ;;  %v1038_v7 = vmax.f32 %v994_v62, 0.0 }
 0x12e   :  { %v704_v1 = vpop.f32.mrf.mxu1  ;;  %v857_v3 = vmax.f32 %v449_v60, %v451_v0 }
 0x12f   :  { %v995_v2 = vadd.f32 %v1866_v48, %v944_v63  ;;  %v901_v4 = vmax.f32 %v702_v61, %v704_v1  ;;  %v453_v5 = vpop.f32.mrf.mxu0 }
 0x130   :  { %v706_v6 = vpop.f32.mrf.mxu1 }
 0x131   :  { %v1039_v8 = vmax.f32 %v995_v2, 0.0  ;;  %v945_v9 = vmax.f32 %v857_v3, %v901_v4  ;;  %v455_v10 = vpop.f32.mrf.mxu0 }
 0x132   :  { %v708_v11 = vpop.f32.mrf.mxu1  ;;  %v858_v13 = vmax.f32 %v453_v5, %v455_v10 }
 0x133   :  { %v1501_v12 = vpack.c.bf16 %v1039_v8, %v1038_v7  ;;  %v902_v14 = vmax.f32 %v706_v6, %v708_v11  ;;  %v459_v15 = vpop.f32.mrf.mxu0  ;;  %v996_v17 = vadd.f32 %v1866_v48, %v945_v9 }
 0x134   :  { %v712_v16 = vpop.f32.mrf.mxu1 }
 0x135   :  { %1579 = vst [vmem:[%s1981_s3 + $0x38] sm:$0xff] %v1501_v12   ;;  %v946_v18 = vmax.f32 %v858_v13, %v902_v14  ;;  %v461_v19 = vpop.f32.mrf.mxu0  ;;  %v1040_v26 = vmax.f32 %v996_v17, 0.0 }
 0x136   :  { %v714_v20 = vpop.f32.mrf.mxu1  ;;  %v859_v22 = vmax.f32 %v459_v15, %v461_v19 }
 0x137   :  { %v997_v21 = vadd.f32 %v1866_v48, %v946_v18  ;;  %v903_v23 = vmax.f32 %v712_v16, %v714_v20  ;;  %v463_v24 = vpop.f32.mrf.mxu0 }
 0x138   :  { %v716_v25 = vpop.f32.mrf.mxu1 }
 0x139   :  { %v1041_v27 = vmax.f32 %v997_v21, 0.0  ;;  %v947_v28 = vmax.f32 %v859_v22, %v903_v23  ;;  %v465_v29 = vpop.f32.mrf.mxu0 }
 0x13a   :  { %v718_v30 = vpop.f32.mrf.mxu1  ;;  %v860_v32 = vmax.f32 %v463_v24, %v465_v29 }
 0x13b   :  { %v1506_v31 = vpack.c.bf16 %v1041_v27, %v1040_v26  ;;  %v904_v33 = vmax.f32 %v716_v25, %v718_v30  ;;  %v469_v34 = vpop.f32.mrf.mxu0  ;;  %v998_v36 = vadd.f32 %v1866_v48, %v947_v28 }
 0x13c   :  { %v722_v35 = vpop.f32.mrf.mxu1 }
 0x13d   :  { %1580 = vst [vmem:[%s1981_s3 + $0x40] sm:$0xff] %v1506_v31   ;;  %v948_v37 = vmax.f32 %v860_v32, %v904_v33  ;;  %v471_v38 = vpop.f32.mrf.mxu0  ;;  %v1042_v45 = vmax.f32 %v998_v36, 0.0 }
 0x13e   :  { %v724_v39 = vpop.f32.mrf.mxu1  ;;  %v861_v41 = vmax.f32 %v469_v34, %v471_v38 }
 0x13f   :  { %v999_v40 = vadd.f32 %v1866_v48, %v948_v37  ;;  %v905_v42 = vmax.f32 %v722_v35, %v724_v39  ;;  %v473_v43 = vpop.f32.mrf.mxu0 }
 0x140   :  { %v726_v44 = vpop.f32.mrf.mxu1 }
 0x141   :  { %v1043_v46 = vmax.f32 %v999_v40, 0.0  ;;  %v949_v47 = vmax.f32 %v861_v41, %v905_v42  ;;  %v475_v49 = vpop.f32.mrf.mxu0 }
 0x142   :  { %v728_v50 = vpop.f32.mrf.mxu1  ;;  %v862_v52 = vmax.f32 %v473_v43, %v475_v49 }
 0x143   :  { %v1511_v51 = vpack.c.bf16 %v1043_v46, %v1042_v45  ;;  %v906_v53 = vmax.f32 %v726_v44, %v728_v50  ;;  %v479_v54 = vpop.f32.mrf.mxu0  ;;  %v1000_v56 = vadd.f32 %v1866_v48, %v949_v47 }
 0x144   :  { %v732_v55 = vpop.f32.mrf.mxu1 }
 0x145   :  { %1581 = vst [vmem:[%s1981_s3 + $0x48] sm:$0xff] %v1511_v51   ;;  %v950_v57 = vmax.f32 %v862_v52, %v906_v53  ;;  %v481_v58 = vpop.f32.mrf.mxu0  ;;  %v1044_v1 = vmax.f32 %v1000_v56, 0.0 }
 0x146   :  { %v734_v59 = vpop.f32.mrf.mxu1  ;;  %v863_v61 = vmax.f32 %v479_v54, %v481_v58 }
 0x147   :  { %v1001_v60 = vadd.f32 %v1866_v48, %v950_v57  ;;  %v907_v62 = vmax.f32 %v732_v55, %v734_v59  ;;  %v483_v63 = vpop.f32.mrf.mxu0 }
 0x148   :  { %v736_v0 = vpop.f32.mrf.mxu1 }
 0x149   :  { %v1045_v2 = vmax.f32 %v1001_v60, 0.0  ;;  %v951_v3 = vmax.f32 %v863_v61, %v907_v62  ;;  %v485_v4 = vpop.f32.mrf.mxu0 }
 0x14a   :  { %v738_v5 = vpop.f32.mrf.mxu1  ;;  %v864_v7 = vmax.f32 %v483_v63, %v485_v4 }
 0x14b   :  { %v1516_v6 = vpack.c.bf16 %v1045_v2, %v1044_v1  ;;  %v908_v8 = vmax.f32 %v736_v0, %v738_v5  ;;  %v489_v9 = vpop.f32.mrf.mxu0  ;;  %v1002_v11 = vadd.f32 %v1866_v48, %v951_v3 }
 0x14c   :  { %v742_v10 = vpop.f32.mrf.mxu1 }
 0x14d   :  { %1582 = vst [vmem:[%s1981_s3 + $0x50] sm:$0xff] %v1516_v6   ;;  %v952_v12 = vmax.f32 %v864_v7, %v908_v8  ;;  %v491_v13 = vpop.f32.mrf.mxu0  ;;  %v1046_v20 = vmax.f32 %v1002_v11, 0.0 }
 0x14e   :  { %v744_v14 = vpop.f32.mrf.mxu1  ;;  %v865_v16 = vmax.f32 %v489_v9, %v491_v13 }
 0x14f   :  { %v1003_v15 = vadd.f32 %v1866_v48, %v952_v12  ;;  %v909_v17 = vmax.f32 %v742_v10, %v744_v14  ;;  %v493_v18 = vpop.f32.mrf.mxu0 }
 0x150   :  { %v746_v19 = vpop.f32.mrf.mxu1 }
 0x151   :  { %v1047_v21 = vmax.f32 %v1003_v15, 0.0  ;;  %v953_v22 = vmax.f32 %v865_v16, %v909_v17  ;;  %v495_v23 = vpop.f32.mrf.mxu0 }
 0x152   :  { %v748_v24 = vpop.f32.mrf.mxu1  ;;  %v866_v26 = vmax.f32 %v493_v18, %v495_v23 }
 0x153   :  { %v1521_v25 = vpack.c.bf16 %v1047_v21, %v1046_v20  ;;  %v910_v27 = vmax.f32 %v746_v19, %v748_v24  ;;  %v499_v28 = vpop.f32.mrf.mxu0  ;;  %v1004_v30 = vadd.f32 %v1866_v48, %v953_v22 }
 0x154   :  { %v752_v29 = vpop.f32.mrf.mxu1 }
 0x155   :  { %1583 = vst [vmem:[%s1981_s3 + $0x58] sm:$0xff] %v1521_v25   ;;  %v954_v31 = vmax.f32 %v866_v26, %v910_v27  ;;  %v501_v32 = vpop.f32.mrf.mxu0  ;;  %v1048_v39 = vmax.f32 %v1004_v30, 0.0 }
 0x156   :  { %v754_v33 = vpop.f32.mrf.mxu1  ;;  %v867_v35 = vmax.f32 %v499_v28, %v501_v32 }
 0x157   :  { %v1005_v34 = vadd.f32 %v1866_v48, %v954_v31  ;;  %v911_v36 = vmax.f32 %v752_v29, %v754_v33  ;;  %v503_v37 = vpop.f32.mrf.mxu0 }
 0x158   :  { %v756_v38 = vpop.f32.mrf.mxu1 }
 0x159   :  { %v1049_v40 = vmax.f32 %v1005_v34, 0.0  ;;  %v955_v41 = vmax.f32 %v867_v35, %v911_v36  ;;  %v505_v42 = vpop.f32.mrf.mxu0 }
 0x15a   :  { %v758_v43 = vpop.f32.mrf.mxu1  ;;  %v868_v45 = vmax.f32 %v503_v37, %v505_v42 }
 0x15b   :  { %v1526_v44 = vpack.c.bf16 %v1049_v40, %v1048_v39  ;;  %v912_v46 = vmax.f32 %v756_v38, %v758_v43  ;;  %v509_v47 = vpop.f32.mrf.mxu0  ;;  %v1006_v50 = vadd.f32 %v1866_v48, %v955_v41 }
 0x15c   :  { %v762_v49 = vpop.f32.mrf.mxu1 }
 0x15d   :  { %1584 = vst [vmem:[%s1981_s3 + $0x60] sm:$0xff] %v1526_v44   ;;  %v956_v51 = vmax.f32 %v868_v45, %v912_v46  ;;  %v511_v52 = vpop.f32.mrf.mxu0  ;;  %v1050_v59 = vmax.f32 %v1006_v50, 0.0 }
 0x15e   :  { %v764_v53 = vpop.f32.mrf.mxu1  ;;  %v869_v55 = vmax.f32 %v509_v47, %v511_v52 }
 0x15f   :  { %v1007_v54 = vadd.f32 %v1866_v48, %v956_v51  ;;  %v913_v56 = vmax.f32 %v762_v49, %v764_v53  ;;  %v513_v57 = vpop.f32.mrf.mxu0 }
 0x160   :  { %v766_v58 = vpop.f32.mrf.mxu1 }
 0x161   :  { %v1051_v60 = vmax.f32 %v1007_v54, 0.0  ;;  %v957_v61 = vmax.f32 %v869_v55, %v913_v56  ;;  %v515_v62 = vpop.f32.mrf.mxu0 }
 0x162   :  { %v768_v63 = vpop.f32.mrf.mxu1  ;;  %v870_v1 = vmax.f32 %v513_v57, %v515_v62 }
 0x163   :  { %v1531_v0 = vpack.c.bf16 %v1051_v60, %v1050_v59  ;;  %v914_v2 = vmax.f32 %v766_v58, %v768_v63  ;;  %v519_v3 = vpop.f32.mrf.mxu0  ;;  %v1008_v5 = vadd.f32 %v1866_v48, %v957_v61 }
 0x164   :  { %v772_v4 = vpop.f32.mrf.mxu1 }
 0x165   :  { %1585 = vst [vmem:[%s1981_s3 + $0x68] sm:$0xff] %v1531_v0   ;;  %v958_v6 = vmax.f32 %v870_v1, %v914_v2  ;;  %v521_v7 = vpop.f32.mrf.mxu0  ;;  %v1052_v14 = vmax.f32 %v1008_v5, 0.0 }
 0x166   :  { %v774_v8 = vpop.f32.mrf.mxu1  ;;  %v871_v10 = vmax.f32 %v519_v3, %v521_v7 }
 0x167   :  { %v1009_v9 = vadd.f32 %v1866_v48, %v958_v6  ;;  %v915_v11 = vmax.f32 %v772_v4, %v774_v8  ;;  %v523_v12 = vpop.f32.mrf.mxu0 }
 0x168   :  { %v776_v13 = vpop.f32.mrf.mxu1 }
 0x169   :  { %v1053_v15 = vmax.f32 %v1009_v9, 0.0  ;;  %v959_v16 = vmax.f32 %v871_v10, %v915_v11  ;;  %v525_v17 = vpop.f32.mrf.mxu0 }
 0x16a   :  { %v778_v18 = vpop.f32.mrf.mxu1  ;;  %v872_v20 = vmax.f32 %v523_v12, %v525_v17 }
 0x16b   :  { %v1536_v19 = vpack.c.bf16 %v1053_v15, %v1052_v14  ;;  %v916_v21 = vmax.f32 %v776_v13, %v778_v18  ;;  %v529_v22 = vpop.f32.mrf.mxu0  ;;  %v1010_v24 = vadd.f32 %v1866_v48, %v959_v16 }
 0x16c   :  { %v782_v23 = vpop.f32.mrf.mxu1 }
 0x16d   :  { %1586 = vst [vmem:[%s1981_s3 + $0x70] sm:$0xff] %v1536_v19   ;;  %v960_v25 = vmax.f32 %v872_v20, %v916_v21  ;;  %v531_v26 = vpop.f32.mrf.mxu0  ;;  %v1054_v33 = vmax.f32 %v1010_v24, 0.0 }
 0x16e   :  { %v784_v27 = vpop.f32.mrf.mxu1  ;;  %v873_v29 = vmax.f32 %v529_v22, %v531_v26 }
 0x16f   :  { %v1011_v28 = vadd.f32 %v1866_v48, %v960_v25  ;;  %v917_v30 = vmax.f32 %v782_v23, %v784_v27  ;;  %v533_v31 = vpop.f32.mrf.mxu0 }
 0x170   :  { %v786_v32 = vpop.f32.mrf.mxu1 }
 0x171   :  { %v1055_v34 = vmax.f32 %v1011_v28, 0.0  ;;  %v961_v35 = vmax.f32 %v873_v29, %v917_v30  ;;  %v535_v36 = vpop.f32.mrf.mxu0 }
 0x172   :  { %v788_v37 = vpop.f32.mrf.mxu1  ;;  %v874_v39 = vmax.f32 %v533_v31, %v535_v36 }
 0x173   :  { %v1541_v38 = vpack.c.bf16 %v1055_v34, %v1054_v33  ;;  %v918_v40 = vmax.f32 %v786_v32, %v788_v37  ;;  %v539_v41 = vpop.f32.mrf.mxu0  ;;  %v1012_v43 = vadd.f32 %v1866_v48, %v961_v35 }
 0x174   :  { %v792_v42 = vpop.f32.mrf.mxu1 }
 0x175   :  { %1587 = vst [vmem:[%s1981_s3 + $0x78] sm:$0xff] %v1541_v38   ;;  %v962_v44 = vmax.f32 %v874_v39, %v918_v40  ;;  %v541_v45 = vpop.f32.mrf.mxu0  ;;  %v1056_v53 = vmax.f32 %v1012_v43, 0.0 }
 0x176   :  { %v794_v46 = vpop.f32.mrf.mxu1  ;;  %v875_v49 = vmax.f32 %v539_v41, %v541_v45 }
 0x177   :  { %v1013_v47 = vadd.f32 %v1866_v48, %v962_v44  ;;  %v919_v50 = vmax.f32 %v792_v42, %v794_v46  ;;  %v543_v51 = vpop.f32.mrf.mxu0 }
 0x178   :  { %v796_v52 = vpop.f32.mrf.mxu1 }
 0x179   :  { %v1057_v54 = vmax.f32 %v1013_v47, 0.0  ;;  %v963_v55 = vmax.f32 %v875_v49, %v919_v50  ;;  %v545_v56 = vpop.f32.mrf.mxu0 }
 0x17a   :  { %v798_v57 = vpop.f32.mrf.mxu1  ;;  %v876_v59 = vmax.f32 %v543_v51, %v545_v56 }
 0x17b   :  { %v1546_v58 = vpack.c.bf16 %v1057_v54, %v1056_v53  ;;  %v920_v60 = vmax.f32 %v796_v52, %v798_v57  ;;  %v549_v61 = vpop.f32.mrf.mxu0  ;;  %v1014_v63 = vadd.f32 %v1866_v48, %v963_v55 }
 0x17c   :  { %v802_v62 = vpop.f32.mrf.mxu1 }
 0x17d   :  { %1588 = vst [vmem:[%s1981_s3 + $0x80] sm:$0xff] %v1546_v58   ;;  %v964_v0 = vmax.f32 %v876_v59, %v920_v60  ;;  %v551_v1 = vpop.f32.mrf.mxu0  ;;  %v1058_v8 = vmax.f32 %v1014_v63, 0.0 }
 0x17e   :  { %v804_v2 = vpop.f32.mrf.mxu1  ;;  %v877_v4 = vmax.f32 %v549_v61, %v551_v1 }
 0x17f   :  { %v1015_v3 = vadd.f32 %v1866_v48, %v964_v0  ;;  %v921_v5 = vmax.f32 %v802_v62, %v804_v2  ;;  %v553_v6 = vpop.f32.mrf.mxu0 }
 0x180   :  { %v806_v7 = vpop.f32.mrf.mxu1 }
 0x181   :  { %v1059_v9 = vmax.f32 %v1015_v3, 0.0  ;;  %v965_v10 = vmax.f32 %v877_v4, %v921_v5  ;;  %v555_v11 = vpop.f32.mrf.mxu0 }
 0x182   :  { %v808_v12 = vpop.f32.mrf.mxu1  ;;  %v878_v14 = vmax.f32 %v553_v6, %v555_v11 }
 0x183   :  { %v1551_v13 = vpack.c.bf16 %v1059_v9, %v1058_v8  ;;  %v922_v15 = vmax.f32 %v806_v7, %v808_v12  ;;  %v559_v16 = vpop.f32.mrf.mxu0  ;;  %v1016_v18 = vadd.f32 %v1866_v48, %v965_v10 }
 0x184   :  { %v812_v17 = vpop.f32.mrf.mxu1 }
 0x185   :  { %1589 = vst [vmem:[%s1981_s3 + $0x88] sm:$0xff] %v1551_v13   ;;  %v966_v19 = vmax.f32 %v878_v14, %v922_v15  ;;  %v561_v20 = vpop.f32.mrf.mxu0  ;;  %v1060_v27 = vmax.f32 %v1016_v18, 0.0 }
 0x186   :  { %v814_v21 = vpop.f32.mrf.mxu1  ;;  %v879_v23 = vmax.f32 %v559_v16, %v561_v20 }
 0x187   :  { %v1017_v22 = vadd.f32 %v1866_v48, %v966_v19  ;;  %v923_v24 = vmax.f32 %v812_v17, %v814_v21  ;;  %v563_v25 = vpop.f32.mrf.mxu0 }
 0x188   :  { %v816_v26 = vpop.f32.mrf.mxu1 }
 0x189   :  { %v1061_v28 = vmax.f32 %v1017_v22, 0.0  ;;  %v967_v29 = vmax.f32 %v879_v23, %v923_v24  ;;  %v565_v30 = vpop.f32.mrf.mxu0 }
 0x18a   :  { %v818_v31 = vpop.f32.mrf.mxu1  ;;  %v880_v33 = vmax.f32 %v563_v25, %v565_v30 }
 0x18b   :  { %v1556_v32 = vpack.c.bf16 %v1061_v28, %v1060_v27  ;;  %v924_v34 = vmax.f32 %v816_v26, %v818_v31  ;;  %v569_v35 = vpop.f32.mrf.mxu0  ;;  %v1018_v37 = vadd.f32 %v1866_v48, %v967_v29 }
 0x18c   :  { %v822_v36 = vpop.f32.mrf.mxu1 }
 0x18d   :  { %1590 = vst [vmem:[%s1981_s3 + $0x90] sm:$0xff] %v1556_v32   ;;  %v968_v38 = vmax.f32 %v880_v33, %v924_v34  ;;  %v571_v39 = vpop.f32.mrf.mxu0  ;;  %v1062_v46 = vmax.f32 %v1018_v37, 0.0 }
 0x18e   :  { %v824_v40 = vpop.f32.mrf.mxu1  ;;  %v881_v42 = vmax.f32 %v569_v35, %v571_v39 }
 0x18f   :  { %v1019_v41 = vadd.f32 %v1866_v48, %v968_v38  ;;  %v925_v43 = vmax.f32 %v822_v36, %v824_v40  ;;  %v573_v44 = vpop.f32.mrf.mxu0 }
 0x190   :  { %v826_v45 = vpop.f32.mrf.mxu1 }
 0x191   :  { %v1063_v47 = vmax.f32 %v1019_v41, 0.0  ;;  %v969_v49 = vmax.f32 %v881_v42, %v925_v43  ;;  %v575_v50 = vpop.f32.mrf.mxu0 }
 0x192   :  { %v828_v51 = vpop.f32.mrf.mxu1  ;;  %v882_v53 = vmax.f32 %v573_v44, %v575_v50 }
 0x193   :  { %v1561_v52 = vpack.c.bf16 %v1063_v47, %v1062_v46  ;;  %v926_v54 = vmax.f32 %v826_v45, %v828_v51  ;;  %v579_v55 = vpop.f32.mrf.mxu0  ;;  %v1020_v57 = vadd.f32 %v1866_v48, %v969_v49 }
 0x194   :  { %v832_v56 = vpop.f32.mrf.mxu1 }
 0x195   :  { %1591 = vst [vmem:[%s1981_s3 + $0x98] sm:$0xff] %v1561_v52   ;;  %v970_v58 = vmax.f32 %v882_v53, %v926_v54  ;;  %v581_v59 = vpop.f32.mrf.mxu0  ;;  %v1064_v2 = vmax.f32 %v1020_v57, 0.0 }
 0x196   :  { %v834_v60 = vpop.f32.mrf.mxu1  ;;  %v883_v62 = vmax.f32 %v579_v55, %v581_v59 }
 0x197   :  { %v1021_v61 = vadd.f32 %v1866_v48, %v970_v58  ;;  %v927_v63 = vmax.f32 %v832_v56, %v834_v60  ;;  %v583_v0 = vpop.f32.mrf.mxu0 }
 0x198   :  { %v836_v1 = vpop.f32.mrf.mxu1 }
 0x199   :  { %v1065_v3 = vmax.f32 %v1021_v61, 0.0  ;;  %v971_v4 = vmax.f32 %v883_v62, %v927_v63  ;;  %v585_v5 = vpop.f32.mrf.mxu0 }
 0x19a   :  { %v838_v6 = vpop.f32.mrf.mxu1  ;;  %v884_v8 = vmax.f32 %v583_v0, %v585_v5 }
 0x19b   :  { %v1566_v7 = vpack.c.bf16 %v1065_v3, %v1064_v2  ;;  %v928_v9 = vmax.f32 %v836_v1, %v838_v6  ;;  %v1022_v10 = vadd.f32 %v1866_v48, %v971_v4 }
 0x19d   :  { %1592 = vst [vmem:[%s1981_s3 + $0xa0] sm:$0xff] %v1566_v7   ;;  %v972_v11 = vmax.f32 %v884_v8, %v928_v9  ;;  %v1066_v13 = vmax.f32 %v1022_v10, 0.0 }
 0x19f   :  { %v1023_v12 = vadd.f32 %v1866_v48, %v972_v11 }
 0x1a1   :  { %v1067_v14 = vmax.f32 %v1023_v12, 0.0 }
 0x1a3   :  { %v1571_v15 = vpack.c.bf16 %v1067_v14, %v1066_v13 }
 0x1a5   :  { %1593 = vst [vmem:[%s1981_s3 + $0xa8] sm:$0xff] %v1571_v15  }
 0x1a6   :  { %1292 = vsyncpa [#allocation3], 1 }
 0x1a7   :  { %1293 = vsyncpa [#allocation5], 1 }

// kernel: net_forward.4
= control target key start
LH: loop header
LB: loop body
LE: loop exit
PB: predicated region body
PF: predicated region fallthrough
CT: control target
= control target key end

     0   :  { %vm463_vm0 = vcmask 261120   ;;  %s1666_s1 = inlined_call_operand.vmem [shape: bf16[288,128], index: 1, kind: input, shape index: {}]   ;;  %s1667_s0 = inlined_call_operand.vmem [shape: bf16[256,288], index: 0, kind: input, shape index: {}]   ;;  %s1668_s2 = inlined_call_operand.vmem [shape: f32[1,128], index: 2, kind: input, shape index: {}]   ;;  %s1669_s3 = inlined_call_operand.vmem [shape: bf16[64,128], index: 3, kind: output, shape index: {}]  }
   0x1   :  { %v1229_v0 = vld [vmem:[%s1666_s1 + $0x78] sm:$0xff]   ;;  %v1231_v2 = vld [vmem:[%s1666_s1 + $0x70] sm:$0xff]   ;;  %v1233_v4 = vld [vmem:[%s1666_s1 + $0x68] sm:$0xff]  }
   0x2   :  { %v1230_v1 = vld [vmem:[%s1666_s1 + $0x38] sm:$0xff]   ;;  %1047 = vmatprep.subr.bf16.mxu0 %v1229_v0  ;;  %1213 = vmatprep.subr.bf16.mxu1 %v1229_v0  ;;  %v1232_v3 = vld [vmem:[%s1666_s1 + $0x30] sm:$0xff]   ;;  %v1234_v5 = vld [vmem:[%s1666_s1 + $0x28] sm:$0xff]  }
   0x3   :  { %1048 = vmatpush3.bf16.msra.mxu0 %v1230_v1  ;;  %1221 = vmatpush3.bf16.msra.mxu1 %v1230_v1  ;;  %v1235_v6 = vld [vmem:[%s1666_s1 + $0x60] sm:$0xff]   ;;  %v1237_v8 = vld [vmem:[%s1666_s1 + $0x58] sm:$0xff]   ;;  %v1239_v10 = vld [vmem:[%s1666_s1 + $0x50] sm:$0xff]  }
   0x4   :  { %1049 = vmatprep.subr.bf16.mxu0 %v1231_v2  ;;  %1214 = vmatprep.subr.bf16.mxu1 %v1231_v2  ;;  %v1236_v7 = vld [vmem:[%s1666_s1 + $0x20] sm:$0xff]   ;;  %v1238_v9 = vld [vmem:[%s1666_s1 + $0x18] sm:$0xff]   ;;  %v1240_v13 = vld [vmem:[%s1666_s1 + $0x10] sm:$0xff]  }
   0x5   :  { %v1247_v11 = vld [vmem:[%s1667_s0 + $0x4] ss:$12 sps:$4 sm:$0xff]   ;;  %v1241_v14 = vld [vmem:[%s1666_s1 + $0x48] sm:$0xff]   ;;  %v1258_v26 = vld [vmem:[%s1667_s0 + $0x34] ss:$12 sps:$4 sm:$0xff]  }
   0x6   :  { %v1250_v12 = vld [vmem:[%s1667_s0 + $0x124] ss:$12 sps:$4 sm:$0xff]   ;;  %544 = vmatprep.mubr.bf16.mxu0 %v1247_v11  ;;  %v1242_v15 = vld [vmem:[%s1666_s1 + $0x8] sm:$0xff]   ;;  %v1260_v27 = vld [vmem:[%s1667_s0 + $0x154] ss:$12 sps:$4 sm:$0xff]  }
   0x7   :  { %1050 = vmatpush3.bf16.msra.mxu0 %v1232_v3  ;;  %1222 = vmatpush3.bf16.msra.mxu1 %v1232_v3  ;;  %v1243_v16 = vld [vmem:[%s1666_s1 + $0x40] sm:$0xff]   ;;  %v1251_v18 = vld [vmem:[%s1666_s1 + $0x88] sm:$0xff]   ;;  %v1262_v28 = vld [vmem:[%s1667_s0 + $0x30] ss:$12 sps:$4 sm:$0xff]  }
   0x8   :  { %1051 = vmatprep.subr.bf16.mxu0 %v1233_v4  ;;  %1215 = vmatprep.subr.bf16.mxu1 %v1233_v4  ;;  %v1244_v17 = vld [vmem:[%s1666_s1] sm:$0xff]   ;;  %v1252_v21 = vld [vmem:[%s1667_s0 + $0x1c] ss:$12 sps:$4 sm:$0xff]   ;;  %v1265_v30 = vld [vmem:[%s1667_s0 + $0x4c] ss:$12 sps:$4 sm:$0xff]  }
   0x9   :  { %640 = vmatprep.mubr.bf16.mxu1 %v1250_v12  ;;  %v1245_v19 = vld [vmem:[%s1667_s0] ss:$12 sps:$4 sm:$0xff]   ;;  %v1254_v22 = vld [vmem:[%s1667_s0 + $0x13c] ss:$12 sps:$4 sm:$0xff]   ;;  %v1256_v24 = vld [vmem:[%s1667_s0 + $0x18] ss:$12 sps:$4 sm:$0xff]  }
   0xa   :  { %v1248_v20 = vld [vmem:[%s1667_s0 + $0x120] ss:$12 sps:$4 sm:$0xff]   ;;  %v1257_v25 = vld [vmem:[%s1667_s0 + $0x138] ss:$12 sps:$4 sm:$0xff]   ;;  %v1263_v29 = vld [vmem:[%s1667_s0 + $0x150] ss:$12 sps:$4 sm:$0xff]  }
   0xb   :  { %1052 = vmatpush3.bf16.msra.mxu0 %v1234_v5  ;;  %1223 = vmatpush3.bf16.msra.mxu1 %v1234_v5  ;;  %v1264_v23 = vld [vmem:[%s1666_s1 + $0x80] sm:$0xff]   ;;  %v1267_v31 = vld [vmem:[%s1667_s0 + $0x16c] ss:$12 sps:$4 sm:$0xff]   ;;  %v1269_v32 = vld [vmem:[%s1667_s0 + $0x48] ss:$12 sps:$4 sm:$0xff]  }
   0xc   :  { %1053 = vmatprep.subr.bf16.mxu0 %v1235_v6  ;;  %1216 = vmatprep.subr.bf16.mxu1 %v1235_v6  ;;  %v1270_v33 = vld [vmem:[%s1667_s0 + $0x168] ss:$12 sps:$4 sm:$0xff]   ;;  %v1271_v34 = vld [vmem:[%s1667_s0 + $0x64] ss:$12 sps:$4 sm:$0xff]   ;;  %v1274_v36 = vld [vmem:[%s1667_s0 + $0x60] ss:$12 sps:$4 sm:$0xff]  }
   0xd   :  { %v1273_v35 = vld [vmem:[%s1667_s0 + $0x8] ss:$12 sps:$4 sm:$0xff]   ;;  %v1275_v37 = vld [vmem:[%s1667_s0 + $0x20] ss:$12 sps:$4 sm:$0xff]   ;;  %v1278_v39 = vld [vmem:[%s1667_s0 + $0x38] ss:$12 sps:$4 sm:$0xff]  }
   0xe   :  { %v1276_v38 = vld [vmem:[%s1667_s0 + $0x7c] ss:$12 sps:$4 sm:$0xff]   ;;  %v1279_v40 = vld [vmem:[%s1667_s0 + $0x78] ss:$12 sps:$4 sm:$0xff]   ;;  %v1281_v42 = vld [vmem:[%s1667_s0 + $0x94] ss:$12 sps:$4 sm:$0xff]  }
   0xf   :  { %1054 = vmatpush3.bf16.msra.mxu0 %v1236_v7  ;;  %1224 = vmatpush3.bf16.msra.mxu1 %v1236_v7  ;;  %v1280_v41 = vld [vmem:[%s1667_s0 + $0x50] ss:$12 sps:$4 sm:$0xff]   ;;  %v1283_v43 = vld [vmem:[%s1667_s0 + $0x68] ss:$12 sps:$4 sm:$0xff]   ;;  %v1285_v45 = vld [vmem:[%s1667_s0 + $0x80] ss:$12 sps:$4 sm:$0xff]  }
  0x10   :  { %1055 = vmatprep.subr.bf16.mxu0 %v1237_v8  ;;  %1217 = vmatprep.subr.bf16.mxu1 %v1237_v8  ;;  %v1284_v44 = vld [vmem:[%s1667_s0 + $0x90] ss:$12 sps:$4 sm:$0xff]   ;;  %v1286_v46 = vld [vmem:[%s1667_s0 + $0xac] ss:$12 sps:$4 sm:$0xff]   ;;  %v1289_v48 = vld [vmem:[%s1667_s0 + $0xa8] ss:$12 sps:$4 sm:$0xff]  }
  0x11   :  { %v1288_v47 = vld [vmem:[%s1667_s0 + $0x98] ss:$12 sps:$4 sm:$0xff]   ;;  %v1290_v49 = vld [vmem:[%s1667_s0 + $0xb0] ss:$12 sps:$4 sm:$0xff]   ;;  %v1293_v51 = vld [vmem:[%s1667_s0 + $0xc8] ss:$12 sps:$4 sm:$0xff]  }
  0x12   :  { %v1291_v50 = vld [vmem:[%s1667_s0 + $0xc4] ss:$12 sps:$4 sm:$0xff]   ;;  %v1294_v52 = vld [vmem:[%s1667_s0 + $0xc0] ss:$12 sps:$4 sm:$0xff]   ;;  %v1296_v54 = vld [vmem:[%s1667_s0 + $0xdc] ss:$12 sps:$4 sm:$0xff]  }
  0x13   :  { %1056 = vmatpush3.bf16.msra.mxu0 %v1238_v9  ;;  %1225 = vmatpush3.bf16.msra.mxu1 %v1238_v9  ;;  %v1295_v53 = vld [vmem:[%s1667_s0 + $0xe0] ss:$12 sps:$4 sm:$0xff]   ;;  %v1298_v55 = vld [vmem:[%s1667_s0 + $0xf8] ss:$12 sps:$4 sm:$0xff]   ;;  %v1300_v57 = vld [vmem:[%s1667_s0 + $0x110] ss:$12 sps:$4 sm:$0xff]  }
  0x14   :  { %1057 = vmatprep.subr.bf16.mxu0 %v1239_v10  ;;  %1218 = vmatprep.subr.bf16.mxu1 %v1239_v10  ;;  %v1299_v56 = vld [vmem:[%s1667_s0 + $0xd8] ss:$12 sps:$4 sm:$0xff]   ;;  %v1301_v58 = vld [vmem:[%s1667_s0 + $0xf4] ss:$12 sps:$4 sm:$0xff]   ;;  %v1304_v60 = vld [vmem:[%s1667_s0 + $0xf0] ss:$12 sps:$4 sm:$0xff]  }
  0x15   :  { %v1303_v59 = vld [vmem:[%s1667_s0 + $0x128] ss:$12 sps:$4 sm:$0xff]   ;;  %v1305_v61 = vld [vmem:[%s1667_s0 + $0x140] ss:$12 sps:$4 sm:$0xff]   ;;  %v1308_v63 = vld [vmem:[%s1667_s0 + $0x158] ss:$12 sps:$4 sm:$0xff]  }
  0x16   :  { %v1306_v62 = vld [vmem:[%s1667_s0 + $0x10c] ss:$12 sps:$4 sm:$0xff]   ;;  %v1309_v0 = vld [vmem:[%s1667_s0 + $0x108] ss:$12 sps:$4 sm:$0xff]   ;;  %v1310_v1 = vld [vmem:[%s1667_s0 + $0x170] ss:$12 sps:$4 sm:$0xff]  }
  0x17   :  { %1058 = vmatpush3.bf16.msra.mxu0 %v1240_v13  ;;  %1226 = vmatpush3.bf16.msra.mxu1 %v1240_v13 }
  0x18   :  { %1059 = vmatprep.subr.bf16.mxu0 %v1241_v14  ;;  %1219 = vmatprep.subr.bf16.mxu1 %v1241_v14 }
  0x1b   :  { %1060 = vmatpush3.bf16.msra.mxu0 %v1242_v15  ;;  %1227 = vmatpush3.bf16.msra.mxu1 %v1242_v15 }
  0x1c   :  { %1061 = vmatprep.subr.bf16.mxu0 %v1243_v16  ;;  %1220 = vmatprep.subr.bf16.mxu1 %v1243_v16 }
  0x1f   :  { %1062 = vmatpush3.bf16.msra.mxu0 %v1244_v17  ;;  %1228 = vmatpush3.bf16.msra.mxu1 %v1244_v17 }
  0x20   :  { %1177 = vmatprep.subr.bf16.mxu1 %v1251_v18 }
  0x22   :  { %545 = vmatmul.mubr.bf16.vlgmr.msra.gmra.mxu0 %v1245_v19  ;;  %641 = vmatmul.mubr.bf16.vlgmr.msra.gmra.mxu1 %v1248_v20 }
  0x23   :  { %1178 = vmatpush3.bf16.msra.mxu1 %v1251_v18  ;;  %552 = vmatprep.mubr.bf16.mxu0 %v1252_v21 }
  0x24   :  { %648 = vmatprep.mubr.bf16.mxu1 %v1254_v22  ;;  %1179 = vmatprep.subr.bf16.mxu1 %v1264_v23 }
  0x27   :  { %1180 = vmatpush3.bf16.msra.mxu1 %v1264_v23 }
  0x2a   :  { %553 = vmatmul.mubr.bf16.gmra.mxu0 %v1256_v24  ;;  %649 = vmatmul.mubr.bf16.gmra.mxu1 %v1257_v25 }
  0x2b   :  { %560 = vmatprep.mubr.bf16.mxu0 %v1258_v26  ;;  %656 = vmatprep.mubr.bf16.mxu1 %v1260_v27 }
  0x32   :  { %561 = vmatmul.mubr.bf16.gmra.mxu0 %v1262_v28  ;;  %657 = vmatmul.mubr.bf16.gmra.mxu1 %v1263_v29 }
  0x33   :  { %568 = vmatprep.mubr.bf16.mxu0 %v1265_v30  ;;  %664 = vmatprep.mubr.bf16.mxu1 %v1267_v31 }
  0x3a   :  { %569 = vmatmul.mubr.bf16.gmra.mxu0 %v1269_v32  ;;  %665 = vmatmul.mubr.bf16.gmra.mxu1 %v1270_v33 }
  0x3b   :  { %576 = vmatprep.mubr.bf16.mxu0 %v1271_v34  ;;  %1181 = vmatprep.mubr.msk.bf16.mxu1 %vm463_vm0, %v1273_v35 }
  0x42   :  { %577 = vmatmul.mubr.bf16.gmra.mxu0 %v1274_v36  ;;  %1182 = vmatmul.mubr.msk.bf16.vlgmr.msra.gmra.mxu1 %vm463_vm0, %v1275_v37 }
  0x43   :  { %584 = vmatprep.mubr.bf16.mxu0 %v1276_v38  ;;  %1185 = vmatprep.mubr.msk.bf16.mxu1 %vm463_vm0, %v1278_v39 }
  0x4a   :  { %585 = vmatmul.mubr.bf16.gmra.mxu0 %v1279_v40  ;;  %1186 = vmatmul.mubr.msk.bf16.gmra.mxu1 %vm463_vm0, %v1280_v41 }
  0x4b   :  { %592 = vmatprep.mubr.bf16.mxu0 %v1281_v42  ;;  %1189 = vmatprep.mubr.msk.bf16.mxu1 %vm463_vm0, %v1283_v43 }
  0x52   :  { %593 = vmatmul.mubr.bf16.gmra.mxu0 %v1284_v44  ;;  %1190 = vmatmul.mubr.msk.bf16.gmra.mxu1 %vm463_vm0, %v1285_v45 }
  0x53   :  { %600 = vmatprep.mubr.bf16.mxu0 %v1286_v46  ;;  %1193 = vmatprep.mubr.msk.bf16.mxu1 %vm463_vm0, %v1288_v47 }
  0x5a   :  { %601 = vmatmul.mubr.bf16.gmra.mxu0 %v1289_v48  ;;  %1194 = vmatmul.mubr.msk.bf16.gmra.mxu1 %vm463_vm0, %v1290_v49 }
  0x5b   :  { %608 = vmatprep.mubr.bf16.mxu0 %v1291_v50  ;;  %1197 = vmatprep.mubr.msk.bf16.mxu1 %vm463_vm0, %v1293_v51 }
  0x62   :  { %609 = vmatmul.mubr.bf16.gmra.mxu0 %v1294_v52  ;;  %1198 = vmatmul.mubr.msk.bf16.gmra.mxu1 %vm463_vm0, %v1295_v53 }
  0x63   :  { %616 = vmatprep.mubr.bf16.mxu0 %v1296_v54  ;;  %1201 = vmatprep.mubr.msk.bf16.mxu1 %vm463_vm0, %v1298_v55 }
  0x6a   :  { %617 = vmatmul.mubr.bf16.gmra.mxu0 %v1299_v56  ;;  %1202 = vmatmul.mubr.msk.bf16.gmra.mxu1 %vm463_vm0, %v1300_v57 }
  0x6b   :  { %624 = vmatprep.mubr.bf16.mxu0 %v1301_v58  ;;  %1205 = vmatprep.mubr.msk.bf16.mxu1 %vm463_vm0, %v1303_v59 }
  0x72   :  { %625 = vmatmul.mubr.bf16.gmra.mxu0 %v1304_v60  ;;  %1206 = vmatmul.mubr.msk.bf16.gmra.mxu1 %vm463_vm0, %v1305_v61 }
  0x73   :  { %632 = vmatprep.mubr.bf16.mxu0 %v1306_v62  ;;  %1209 = vmatprep.mubr.msk.bf16.mxu1 %vm463_vm0, %v1308_v63 }
  0x7a   :  { %633 = vmatmul.mubr.bf16.gmra.mxu0 %v1309_v0  ;;  %1210 = vmatmul.mubr.msk.bf16.gmra.mxu1 %vm463_vm0, %v1310_v1 }
  0xe2   :  { %v1063_v2 = vpop.f32.mrf.mxu0  ;;  %v1135_v3 = vpop.f32.mrf.mxu1 }
  0xe4   :  { %v1064_v4 = vpop.f32.mrf.mxu0  ;;  %v1136_v5 = vpop.f32.mrf.mxu1 }
  0xe5   :  { %v1545_v6 = vadd.f32 %v1064_v4, %v1063_v2  ;;  %v1547_v7 = vadd.f32 %v1136_v5, %v1135_v3 }
  0xe6   :  { %v1066_v8 = vpop.f32.mrf.mxu0  ;;  %v1138_v9 = vpop.f32.mrf.mxu1 }
  0xe8   :  { %v1067_v10 = vpop.f32.mrf.mxu0  ;;  %v1139_v11 = vpop.f32.mrf.mxu1 }
  0xe9   :  { %v1549_v12 = vadd.f32 %v1067_v10, %v1066_v8  ;;  %v1551_v13 = vadd.f32 %v1139_v11, %v1138_v9 }
  0xea   :  { %v1069_v14 = vpop.f32.mrf.mxu0  ;;  %v1141_v15 = vpop.f32.mrf.mxu1 }
  0xec   :  { %v1070_v16 = vpop.f32.mrf.mxu0  ;;  %v1142_v17 = vpop.f32.mrf.mxu1 }
  0xed   :  { %v1553_v18 = vadd.f32 %v1070_v16, %v1069_v14  ;;  %v1555_v19 = vadd.f32 %v1142_v17, %v1141_v15 }
  0xee   :  { %v1072_v20 = vpop.f32.mrf.mxu0  ;;  %v1144_v21 = vpop.f32.mrf.mxu1 }
  0xf0   :  { %v1073_v22 = vpop.f32.mrf.mxu0  ;;  %v1145_v23 = vpop.f32.mrf.mxu1 }
  0xf1   :  { %v1557_v24 = vadd.f32 %v1073_v22, %v1072_v20  ;;  %v1559_v25 = vadd.f32 %v1145_v23, %v1144_v21 }
  0xf2   :  { %v1075_v26 = vpop.f32.mrf.mxu0  ;;  %v1147_v27 = vpop.f32.mrf.mxu1 }
  0xf4   :  { %v1076_v28 = vpop.f32.mrf.mxu0  ;;  %v1148_v29 = vpop.f32.mrf.mxu1 }
  0xf5   :  { %v1561_v30 = vadd.f32 %v1076_v28, %v1075_v26  ;;  %v1563_v31 = vadd.f32 %v1148_v29, %v1147_v27 }
  0xf6   :  { %v1078_v32 = vpop.f32.mrf.mxu0  ;;  %v1150_v33 = vpop.f32.mrf.mxu1 }
  0xf7   :  { %1670 = vst [vmem:[#allocation2_spill] sm:$0xff] %v1563_v31 }
  0xf8   :  { %v1079_v34 = vpop.f32.mrf.mxu0  ;;  %v1151_v35 = vpop.f32.mrf.mxu1 }
  0xf9   :  { %v1565_v36 = vadd.f32 %v1079_v34, %v1078_v32  ;;  %v1567_v37 = vadd.f32 %v1151_v35, %v1150_v33 }
  0xfa   :  { %v1081_v38 = vpop.f32.mrf.mxu0  ;;  %v1153_v39 = vpop.f32.mrf.mxu1 }
  0xfb   :  { %1671 = vst [vmem:[#allocation3_spill] sm:$0xff] %v1567_v37 }
  0xfc   :  { %v1082_v40 = vpop.f32.mrf.mxu0  ;;  %v1154_v41 = vpop.f32.mrf.mxu1 }
  0xfd   :  { %v1569_v42 = vadd.f32 %v1082_v40, %v1081_v38  ;;  %v1571_v43 = vadd.f32 %v1154_v41, %v1153_v39 }
  0xfe   :  { %v1084_v44 = vpop.f32.mrf.mxu0  ;;  %v1156_v45 = vpop.f32.mrf.mxu1 }
  0xff   :  { %1672 = vst [vmem:[#allocation4_spill] sm:$0xff] %v1571_v43 }
 0x100   :  { %v1085_v46 = vpop.f32.mrf.mxu0  ;;  %v1157_v47 = vpop.f32.mrf.mxu1 }
 0x101   :  { %v1573_v48 = vadd.f32 %v1085_v46, %v1084_v44  ;;  %v1575_v49 = vadd.f32 %v1157_v47, %v1156_v45 }
 0x102   :  { %v1087_v50 = vpop.f32.mrf.mxu0  ;;  %v1183_v51 = vpop.f32.mrf.mxu1 }
 0x103   :  { %1673 = vst [vmem:[#allocation5_spill] sm:$0xff] %v1573_v48  ;;  %1674 = vst [vmem:[#allocation6_spill] sm:$0xff] %v1575_v49 }
 0x104   :  { %v1088_v52 = vpop.f32.mrf.mxu0  ;;  %v707_v53 = vpop.f32.mrf.mxu1 }
 0x105   :  { %v1089_v49 = vadd.f32 %v1088_v52, %v1087_v50 }
 0x106   :  { %v1090_v54 = vpop.f32.mrf.mxu0  ;;  %v1184_v55 = vpop.f32.mrf.mxu1 }
 0x108   :  { %v1091_v56 = vpop.f32.mrf.mxu0  ;;  %v1577_v57 = vpop.f32.mrf.mxu1 }
 0x109   :  { %v1092_v50 = vadd.f32 %v1091_v56, %v1090_v54  ;;  %v711_v54 = vadd.f32 %v1549_v12, %v1577_v57 }
 0x10a   :  { %v1093_v58 = vpop.f32.mrf.mxu0  ;;  %v1579_v59 = vpop.f32.mrf.mxu1 }
 0x10c   :  { %v1094_v60 = vpop.f32.mrf.mxu0  ;;  %v1581_v61 = vpop.f32.mrf.mxu1 }
 0x10d   :  { %v1095_v44 = vadd.f32 %v1094_v60, %v1093_v58  ;;  %v708_v60 = vadd.f32 %v1545_v6, %v707_v53  ;;  %v1617_v6 = vld [vmem:[%s1668_s2] ss:$0 sm:$0xff] }
 0x10e   :  { %v1096_v62 = vpop.f32.mrf.mxu0  ;;  %v1583_v63 = vpop.f32.mrf.mxu1 }
 0x10f   :  { %1675 = vst [vmem:[#allocation7_spill] sm:$0xff] %v1583_v63 }
 0x110   :  { %v1097_v0 = vpop.f32.mrf.mxu0  ;;  %v1585_v1 = vpop.f32.mrf.mxu1 }
 0x112   :  { %v1099_v2 = vpop.f32.mrf.mxu0  ;;  %v1191_v3 = vpop.f32.mrf.mxu1 }
 0x113   :  { %v748_v63 = vadd.f32 %v1191_v3, %v1095_v44 }
 0x114   :  { %v1100_v4 = vpop.f32.mrf.mxu0  ;;  %v739_v5 = vpop.f32.mrf.mxu1 }
 0x115   :  { %v740_v43 = vadd.f32 %v1089_v49, %v739_v5  ;;  %v1101_v49 = vadd.f32 %v1100_v4, %v1099_v2 }
 0x116   :  { %v1587_v8 = vpop.f32.mrf.mxu0  ;;  %v1192_v9 = vpop.f32.mrf.mxu1 }
 0x118   :  { %v1589_v10 = vpop.f32.mrf.mxu0  ;;  %v742_v11 = vpop.f32.mrf.mxu1 }
 0x11a   :  { %v1105_v14 = vpop.f32.mrf.mxu0  ;;  %v1591_v15 = vpop.f32.mrf.mxu1 }
 0x11b   :  { %1676 = vst [vmem:[#allocation8_spill] sm:$0xff] %v1591_v15 }
 0x11c   :  { %v1106_v16 = vpop.f32.mrf.mxu0  ;;  %v755_v17 = vpop.f32.mrf.mxu1 }
 0x11e   :  { %v1593_v20 = vpop.f32.mrf.mxu0  ;;  %v1595_v21 = vpop.f32.mrf.mxu1 }
 0x11f   :  { %1677 = vst [vmem:[#allocation9_spill] sm:$0xff] %v1593_v20  ;;  %1678 = vst [vmem:[#allocation10_spill] sm:$0xff] %v1595_v21  ;;  %v716_v21 = vadd.f32 %v1183_v51, %v1553_v18  ;;  %v834_v51 = vmax.f32 %v708_v60, %v740_v43  ;;  %v1107_v43 = vadd.f32 %v1106_v16, %v1105_v14 }
 0x120   :  { %v1597_v22 = vpop.f32.mrf.mxu0  ;;  %v1599_v23 = vpop.f32.mrf.mxu1 }
 0x121   :  { %1679 = vst [vmem:[#allocation11_spill] sm:$0xff] %v1597_v22  ;;  %1680 = vst [vmem:[#allocation12_spill] sm:$0xff] %v1599_v23  ;;  %v836_v52 = vmax.f32 %v716_v21, %v748_v63 }
 0x122   :  { %v1111_v26 = vpop.f32.mrf.mxu0  ;;  %v1199_v27 = vpop.f32.mrf.mxu1  ;;  %v1682_v16 = vld [vmem:[#allocation8_spill] sm:$0xff] }
 0x124   :  { %v1112_v28 = vpop.f32.mrf.mxu0  ;;  %v771_v29 = vpop.f32.mrf.mxu1 }
 0x125   :  { %v1113_v23 = vadd.f32 %v1112_v28, %v1111_v26 }
 0x126   :  { %v1114_v32 = vpop.f32.mrf.mxu0  ;;  %v1200_v33 = vpop.f32.mrf.mxu1 }
 0x127   :  { %v772_v26 = vadd.f32 %v1113_v23, %v771_v29 }
 0x128   :  { %v1115_v34 = vpop.f32.mrf.mxu0  ;;  %v774_v35 = vpop.f32.mrf.mxu1 }
 0x12a   :  { %v1117_v38 = vpop.f32.mrf.mxu0  ;;  %v1601_v39 = vpop.f32.mrf.mxu1 }
 0x12b   :  { %1681 = vst [vmem:[#allocation13_spill] sm:$0xff] %v1601_v39  ;;  %v1098_v39 = vadd.f32 %v1097_v0, %v1096_v62  ;;  %v743_v62 = vadd.f32 %v1092_v50, %v742_v11  ;;  %v1116_v0 = vadd.f32 %v1115_v34, %v1114_v32 }
 0x12c   :  { %v1118_v40 = vpop.f32.mrf.mxu0  ;;  %v1603_v41 = vpop.f32.mrf.mxu1 }
 0x12d   :  { %v1119_v47 = vadd.f32 %v1118_v40, %v1117_v38  ;;  %v719_v38 = vadd.f32 %v1184_v55, %v1557_v24  ;;  %v751_v44 = vadd.f32 %v1192_v9, %v1098_v39  ;;  %v756_v55 = vadd.f32 %v1101_v49, %v755_v17 }
 0x12e   :  { %v1120_v45 = vpop.f32.mrf.mxu0  ;;  %v1605_v46 = vpop.f32.mrf.mxu1  ;;  %v835_v14 = vmax.f32 %v711_v54, %v743_v62  ;;  %v764_v17 = vadd.f32 %v1682_v16, %v1107_v43  ;;  %v1690_v54 = vld [vmem:[#allocation3_spill] sm:$0xff] }
 0x12f   :  { %v780_v20 = vadd.f32 %v1199_v27, %v1119_v47  ;;  %v837_v2 = vmax.f32 %v719_v38, %v751_v44  ;;  %v1683_v27 = vld [vmem:[#allocation9_spill] sm:$0xff]  ;;  %v1686_v38 = vld [vmem:[#allocation4_spill] sm:$0xff] }
 0x130   :  { %v1121_v48 = vpop.f32.mrf.mxu0  ;;  %v1607_v37 = vpop.f32.mrf.mxu1 }
 0x131   :  { %v1122_v15 = vadd.f32 %v1121_v48, %v1120_v45 }
 0x132   :  { %v1123_v31 = vpop.f32.mrf.mxu0  ;;  %v1207_v22 = vpop.f32.mrf.mxu1 }
 0x133   :  { %v812_v58 = vadd.f32 %v1207_v22, %v1555_v19  ;;  %v783_v19 = vadd.f32 %v1200_v33, %v1122_v15  ;;  %v724_v15 = vadd.f32 %v1561_v30, %v1581_v61  ;;  %v1684_v30 = vld [vmem:[#allocation11_spill] sm:$0xff] }
 0x134   :  { %v1124_v3 = vpop.f32.mrf.mxu0  ;;  %v803_v40 = vpop.f32.mrf.mxu1  ;;  %v1110_v61 = vadd.f32 %v1684_v30, %v1683_v27 }
 0x135   :  { %v844_v28 = vmax.f32 %v780_v20, %v812_v58  ;;  %v804_v18 = vadd.f32 %v1547_v7, %v803_v40  ;;  %v732_v7 = vadd.f32 %v1579_v59, %v1569_v42  ;;  %v1125_v4 = vadd.f32 %v1124_v3, %v1123_v31 }
 0x136   :  { %v1126_v48 = vpop.f32.mrf.mxu0  ;;  %v1208_v5 = vpop.f32.mrf.mxu1  ;;  %v775_v20 = vadd.f32 %v1116_v0, %v774_v35  ;;  %v727_v42 = vadd.f32 %v1565_v36, %v1585_v1  ;;  %v1104_v59 = vadd.f32 %v1589_v10, %v1587_v8  ;;  %v838_v23 = vmax.f32 %v724_v15, %v756_v55  ;;  %v1685_v36 = vld [vmem:[#allocation2_spill] sm:$0xff]  ;;  %v1691_v55 = vld [vmem:[#allocation5_spill] sm:$0xff] }
 0x137   :  { %v852_v22 = vmax.f32 %v836_v52, %v844_v28  ;;  %v842_v24 = vmax.f32 %v772_v26, %v804_v18  ;;  %v815_v53 = vadd.f32 %v1208_v5, %v1559_v25  ;;  %v1687_v52 = vld [vmem:[#allocation13_spill] sm:$0xff]  ;;  %v840_v44 = vmax.f32 %v732_v7, %v764_v17  ;;  %v1689_v28 = vld [vmem:[#allocation12_spill] sm:$0xff]  ;;  %v1692_v7 = vld [vmem:[#allocation7_spill] sm:$0xff] }
 0x138   :  { %v1127_v56 = vpop.f32.mrf.mxu0  ;;  %v806_v63 = vpop.f32.mrf.mxu1  ;;  %v759_v18 = vadd.f32 %v1104_v59, %v1689_v28 }
 0x139   :  { %v850_v9 = vmax.f32 %v834_v51, %v842_v24  ;;  %v845_v11 = vmax.f32 %v783_v19, %v815_v53  ;;  %v867_v25 = vadd.f32 %v1617_v6, %v852_v22  ;;  %v807_v21 = vadd.f32 %v1551_v13, %v806_v63 }
 0x13a   :  { %v1129_v12 = vpop.f32.mrf.mxu0  ;;  %v1211_v57 = vpop.f32.mrf.mxu1  ;;  %v788_v13 = vadd.f32 %v1125_v4, %v1603_v41  ;;  %v1128_v10 = vadd.f32 %v1127_v56, %v1126_v48  ;;  %v1688_v41 = vld [vmem:[#allocation10_spill] sm:$0xff]  ;;  %v735_v56 = vadd.f32 %v1692_v7, %v1691_v55 }
 0x13b   :  { %v853_v31 = vmax.f32 %v837_v2, %v845_v11  ;;  %v843_v29 = vmax.f32 %v775_v20, %v807_v21  ;;  %v875_v39 = vmax.f32 %v867_v25, 0.0  ;;  %v865_v8 = vadd.f32 %v1617_v6, %v850_v9  ;;  %v1693_v2 = vld [vmem:[#allocation6_spill] sm:$0xff] }
 0x13c   :  { %v1130_v32 = vpop.f32.mrf.mxu0  ;;  %v819_v33 = vpop.f32.mrf.mxu1  ;;  %v828_v50 = vadd.f32 %v1211_v57, %v1686_v38  ;;  %v767_v26 = vadd.f32 %v1688_v41, %v1110_v61  ;;  %v791_v24 = vadd.f32 %v1128_v10, %v1607_v37  ;;  %v839_v11 = vmax.f32 %v727_v42, %v759_v18 }
 0x13d   :  { %v868_v34 = vadd.f32 %v1617_v6, %v853_v31  ;;  %v1131_v35 = vadd.f32 %v1130_v32, %v1129_v12  ;;  %v820_v1 = vadd.f32 %v1685_v36, %v819_v33  ;;  %v851_v45 = vmax.f32 %v835_v14, %v843_v29 }
 0x13e   :  { %v1132_v47 = vpop.f32.mrf.mxu0  ;;  %v1212_v58 = vpop.f32.mrf.mxu1  ;;  %v873_v22 = vmax.f32 %v865_v8, 0.0  ;;  %v841_v25 = vmax.f32 %v735_v56, %v767_v26 }
 0x13f   :  { %v876_v60 = vmax.f32 %v868_v34, 0.0  ;;  %v796_v3 = vadd.f32 %v1687_v52, %v1131_v35  ;;  %v846_v40 = vmax.f32 %v788_v13, %v820_v1  ;;  %v866_v49 = vadd.f32 %v1617_v6, %v851_v45 }
 0x140   :  { %v1133_v51 = vpop.f32.mrf.mxu0  ;;  %v822_v62 = vpop.f32.mrf.mxu1  ;;  %v831_v4 = vadd.f32 %v1212_v58, %v1693_v2 }
 0x141   :  { %v1032_v0 = vpack.c.bf16 %v876_v60, %v875_v39  ;;  %v848_v48 = vmax.f32 %v796_v3, %v828_v50  ;;  %v854_v5 = vmax.f32 %v838_v23, %v846_v40  ;;  %v1134_v19 = vadd.f32 %v1133_v51, %v1132_v47 }
 0x142   :  { %v874_v53 = vmax.f32 %v866_v49, 0.0  ;;  %v823_v43 = vadd.f32 %v1690_v54, %v822_v62 }
 0x143   :  { %1044 = vst [vmem:[%s1669_s3 + $0x8] sm:$0xff] %v1032_v0   ;;  %v856_v63 = vmax.f32 %v840_v44, %v848_v48  ;;  %v799_v9 = vadd.f32 %v1605_v46, %v1134_v19  ;;  %v869_v21 = vadd.f32 %v1617_v6, %v854_v5 }
 0x144   :  { %v1027_v15 = vpack.c.bf16 %v874_v53, %v873_v22  ;;  %v847_v20 = vmax.f32 %v791_v24, %v823_v43 }
 0x145   :  { %v849_v37 = vmax.f32 %v799_v9, %v831_v4  ;;  %v871_v57 = vadd.f32 %v1617_v6, %v856_v63  ;;  %v877_v46 = vmax.f32 %v869_v21, 0.0 }
 0x146   :  { %1028 = vst [vmem:[%s1669_s3] sm:$0xff] %v1027_v15   ;;  %v855_v12 = vmax.f32 %v839_v11, %v847_v20 }
 0x147   :  { %v857_v59 = vmax.f32 %v841_v25, %v849_v37  ;;  %v879_v16 = vmax.f32 %v871_v57, 0.0 }
 0x148   :  { %v870_v14 = vadd.f32 %v1617_v6, %v855_v12 }
 0x149   :  { %v872_v31 = vadd.f32 %v1617_v6, %v857_v59 }
 0x14a   :  { %v878_v42 = vmax.f32 %v870_v14, 0.0 }
 0x14b   :  { %v880_v17 = vmax.f32 %v872_v31, 0.0 }
 0x14c   :  { %v1037_v23 = vpack.c.bf16 %v878_v42, %v877_v46 }
 0x14d   :  { %v1042_v27 = vpack.c.bf16 %v880_v17, %v879_v16 }
 0x14e   :  { %1045 = vst [vmem:[%s1669_s3 + $0x10] sm:$0xff] %v1037_v23  }
 0x14f   :  { %1046 = vst [vmem:[%s1669_s3 + $0x18] sm:$0xff] %v1042_v27  }

// kernel: net_forward.5
= control target key start
LH: loop header
LB: loop body
LE: loop exit
PB: predicated region body
PF: predicated region fallthrough
CT: control target
= control target key end

     0   :  { %s19188_s1 = inlined_call_operand.vmem [shape: bf16[1152,1024], index: 1, kind: input, shape index: {}]   ;;  %s19189_s0 = inlined_call_operand.vmem [shape: bf16[64,1152], index: 0, kind: input, shape index: {}]   ;;  %s19190_s2 = inlined_call_operand.vmem [shape: f32[1,1024], index: 2, kind: input, shape index: {}]   ;;  %s19191_s3 = inlined_call_operand.vmem [shape: bf16[1024,1024], index: 3, kind: input, shape index: {}]   ;;  %s19192_s4 = inlined_call_operand.vmem [shape: f32[1,1024], index: 4, kind: input, shape index: {}]   ;;  %s19193_s5 = inlined_call_operand.vmem [shape: bf16[1024,512], index: 5, kind: input, shape index: {}]   ;;  %s19194_s7 = inlined_call_operand.vmem [shape: bf16[512,128], index: 7, kind: input, shape index: {}]   ;;  %s19195_s6 = inlined_call_operand.vmem [shape: f32[1,512], index: 6, kind: input, shape index: {}]   ;;  %s19196_s8 = inlined_call_operand.vmem [shape: f32[1,128], index: 8, kind: input, shape index: {}]   ;;  %s19197_s9 = inlined_call_operand.vmem [shape: f32[16,128], index: 9, kind: output, shape index: {}]  }
   0x1   :  { %v129_v0 = vld [vmem:[%s19188_s1 + $0x1c0] sm:$0xff]  ;;  %v12883_v59 = vld [vmem:[%s19189_s0 + $0xc] ss:$36 sps:$4 sm:$0xff]  }
   0x2   :  { %v133_v1 = vld [vmem:[%s19188_s1 + $0x1e0] sm:$0xff]  ;;  %3818 = vmatprep.mubr.bf16.mxu1 %v12883_v59 }
   0x3   :  { %v257_v2 = vld [vmem:[%s19188_s1 + $0x5c0] sm:$0xff]  ;;  %v11516_v3 = vcombine.high %v129_v0, %v133_v1  ;;  %v11515_v5 = vcombine.low %v129_v0, %v133_v1 }
   0x4   :  { %v261_v4 = vld [vmem:[%s19188_s1 + $0x5e0] sm:$0xff] }
   0x5   :  { %v121_v6 = vld [vmem:[%s19188_s1 + $0x180] sm:$0xff]  ;;  %v11644_v8 = vcombine.high %v257_v2, %v261_v4  ;;  %v11643_v9 = vcombine.low %v257_v2, %v261_v4  ;;  %3713 = vmatprep.subr.bf16.mxu0 %v11516_v3 }
   0x6   :  { %v125_v7 = vld [vmem:[%s19188_s1 + $0x1a0] sm:$0xff]  ;;  %3714 = vmatpush1.bf16.msra.mxu0 %v11515_v5 }
   0x7   :  { %v11508_v10 = vcombine.high %v121_v6, %v125_v7  ;;  %v249_v11 = vld [vmem:[%s19188_s1 + $0x580] sm:$0xff]  ;;  %3786 = vmatprep.subr.bf16.mxu1 %v11644_v8  ;;  %v11507_v18 = vcombine.low %v121_v6, %v125_v7 }
   0x8   :  { %v253_v12 = vld [vmem:[%s19188_s1 + $0x5a0] sm:$0xff]  ;;  %3787 = vmatpush1.bf16.msra.mxu1 %v11643_v9 }
   0x9   :  { %v113_v13 = vld [vmem:[%s19188_s1 + $0x140] sm:$0xff]  ;;  %v11636_v14 = vcombine.high %v249_v11, %v253_v12  ;;  %3715 = vmatprep.subr.bf16.mxu0 %v11508_v10  ;;  %v11635_v19 = vcombine.low %v249_v11, %v253_v12 }
   0xa   :  { %v117_v15 = vld [vmem:[%s19188_s1 + $0x160] sm:$0xff]  ;;  %3716 = vmatpush1.bf16.msra.mxu0 %v11507_v18 }
   0xb   :  { %v241_v16 = vld [vmem:[%s19188_s1 + $0x540] sm:$0xff]  ;;  %v11500_v20 = vcombine.high %v113_v13, %v117_v15  ;;  %3788 = vmatprep.subr.bf16.mxu1 %v11636_v14  ;;  %v11499_v26 = vcombine.low %v113_v13, %v117_v15 }
   0xc   :  { %v245_v17 = vld [vmem:[%s19188_s1 + $0x560] sm:$0xff]  ;;  %3789 = vmatpush1.bf16.msra.mxu1 %v11635_v19 }
   0xd   :  { %v11628_v21 = vcombine.high %v241_v16, %v245_v17  ;;  %v105_v22 = vld [vmem:[%s19188_s1 + $0x100] sm:$0xff]  ;;  %3717 = vmatprep.subr.bf16.mxu0 %v11500_v20  ;;  %v11627_v27 = vcombine.low %v241_v16, %v245_v17 }
   0xe   :  { %v109_v23 = vld [vmem:[%s19188_s1 + $0x120] sm:$0xff]  ;;  %3718 = vmatpush1.bf16.msra.mxu0 %v11499_v26 }
   0xf   :  { %v233_v24 = vld [vmem:[%s19188_s1 + $0x500] sm:$0xff]  ;;  %v11492_v28 = vcombine.high %v105_v22, %v109_v23  ;;  %3790 = vmatprep.subr.bf16.mxu1 %v11628_v21  ;;  %v11491_v34 = vcombine.low %v105_v22, %v109_v23 }
  0x10   :  { %v237_v25 = vld [vmem:[%s19188_s1 + $0x520] sm:$0xff]  ;;  %3791 = vmatpush1.bf16.msra.mxu1 %v11627_v27 }
  0x11   :  { %v11620_v29 = vcombine.high %v233_v24, %v237_v25  ;;  %v97_v30 = vld [vmem:[%s19188_s1 + $0xc0] sm:$0xff]  ;;  %3719 = vmatprep.subr.bf16.mxu0 %v11492_v28  ;;  %v11619_v35 = vcombine.low %v233_v24, %v237_v25 }
  0x12   :  { %v101_v31 = vld [vmem:[%s19188_s1 + $0xe0] sm:$0xff]  ;;  %3720 = vmatpush1.bf16.msra.mxu0 %v11491_v34 }
  0x13   :  { %v225_v32 = vld [vmem:[%s19188_s1 + $0x4c0] sm:$0xff]  ;;  %v11484_v36 = vcombine.high %v97_v30, %v101_v31  ;;  %3792 = vmatprep.subr.bf16.mxu1 %v11620_v29  ;;  %v11483_v42 = vcombine.low %v97_v30, %v101_v31 }
  0x14   :  { %v229_v33 = vld [vmem:[%s19188_s1 + $0x4e0] sm:$0xff]  ;;  %3793 = vmatpush1.bf16.msra.mxu1 %v11619_v35 }
  0x15   :  { %v11612_v37 = vcombine.high %v225_v32, %v229_v33  ;;  %v89_v38 = vld [vmem:[%s19188_s1 + $0x80] sm:$0xff]  ;;  %3721 = vmatprep.subr.bf16.mxu0 %v11484_v36  ;;  %v11611_v43 = vcombine.low %v225_v32, %v229_v33 }
  0x16   :  { %v93_v39 = vld [vmem:[%s19188_s1 + $0xa0] sm:$0xff]  ;;  %3722 = vmatpush1.bf16.msra.mxu0 %v11483_v42 }
  0x17   :  { %v217_v40 = vld [vmem:[%s19188_s1 + $0x480] sm:$0xff]  ;;  %v11476_v44 = vcombine.high %v89_v38, %v93_v39  ;;  %3794 = vmatprep.subr.bf16.mxu1 %v11612_v37  ;;  %v11475_v50 = vcombine.low %v89_v38, %v93_v39 }
  0x18   :  { %v221_v41 = vld [vmem:[%s19188_s1 + $0x4a0] sm:$0xff]  ;;  %3795 = vmatpush1.bf16.msra.mxu1 %v11611_v43 }
  0x19   :  { %v11604_v45 = vcombine.high %v217_v40, %v221_v41  ;;  %v81_v46 = vld [vmem:[%s19188_s1 + $0x40] sm:$0xff]  ;;  %3723 = vmatprep.subr.bf16.mxu0 %v11476_v44  ;;  %v11603_v52 = vcombine.low %v217_v40, %v221_v41 }
  0x1a   :  { %v85_v47 = vld [vmem:[%s19188_s1 + $0x60] sm:$0xff]  ;;  %3724 = vmatpush1.bf16.msra.mxu0 %v11475_v50 }
  0x1b   :  { %v209_v48 = vld [vmem:[%s19188_s1 + $0x440] sm:$0xff]  ;;  %v11468_v53 = vcombine.high %v81_v46, %v85_v47  ;;  %3796 = vmatprep.subr.bf16.mxu1 %v11604_v45  ;;  %v11467_v60 = vcombine.low %v81_v46, %v85_v47 }
  0x1c   :  { %v213_v49 = vld [vmem:[%s19188_s1 + $0x460] sm:$0xff]  ;;  %3797 = vmatpush1.bf16.msra.mxu1 %v11603_v52 }
  0x1d   :  { %v73_v51 = vld [vmem:[%s19188_s1] sm:$0xff]  ;;  %v11596_v55 = vcombine.high %v209_v48, %v213_v49  ;;  %3725 = vmatprep.subr.bf16.mxu0 %v11468_v53  ;;  %v11595_v61 = vcombine.low %v209_v48, %v213_v49 }
  0x1e   :  { %v77_v54 = vld [vmem:[%s19188_s1 + $0x20] sm:$0xff]  ;;  %3726 = vmatpush1.bf16.msra.mxu0 %v11467_v60 }
  0x1f   :  { %v12881_v56 = vld [vmem:[%s19189_s0 + $0x4] ss:$36 sps:$4 sm:$0xff]   ;;  %v11460_v62 = vcombine.high %v73_v51, %v77_v54  ;;  %3798 = vmatprep.subr.bf16.mxu1 %v11596_v55  ;;  %v11459_v4 = vcombine.low %v73_v51, %v77_v54 }
  0x20   :  { %v201_v57 = vld [vmem:[%s19188_s1 + $0x400] sm:$0xff]  ;;  %3745 = vmatprep.mubr.bf16.mxu0 %v12881_v56  ;;  %3799 = vmatpush1.bf16.msra.mxu1 %v11595_v61 }
  0x21   :  { %v205_v58 = vld [vmem:[%s19188_s1 + $0x420] sm:$0xff]  ;;  %3727 = vmatprep.subr.bf16.mxu0 %v11460_v62 }
  0x22   :  { %v11588_v63 = vcombine.high %v201_v57, %v205_v58  ;;  %v193_v0 = vld [vmem:[%s19188_s1 + $0x3c0] sm:$0xff]  ;;  %v11587_v5 = vcombine.low %v201_v57, %v205_v58  ;;  %3728 = vmatpush1.bf16.msra.mxu0 %v11459_v4 }
  0x23   :  { %v197_v1 = vld [vmem:[%s19188_s1 + $0x3e0] sm:$0xff] }
  0x24   :  { %v321_v2 = vld [vmem:[%s19188_s1 + $0x7c0] sm:$0xff]  ;;  %v11580_v6 = vcombine.high %v193_v0, %v197_v1  ;;  %3800 = vmatprep.subr.bf16.mxu1 %v11588_v63  ;;  %v11579_v12 = vcombine.low %v193_v0, %v197_v1 }
  0x25   :  { %v325_v3 = vld [vmem:[%s19188_s1 + $0x7e0] sm:$0xff]  ;;  %3801 = vmatpush1.bf16.msra.mxu1 %v11587_v5 }
  0x26   :  { %v11708_v7 = vcombine.high %v321_v2, %v325_v3  ;;  %v185_v8 = vld [vmem:[%s19188_s1 + $0x380] sm:$0xff]  ;;  %3729 = vmatprep.subr.bf16.mxu0 %v11580_v6  ;;  %v11707_v13 = vcombine.low %v321_v2, %v325_v3 }
  0x27   :  { %v189_v9 = vld [vmem:[%s19188_s1 + $0x3a0] sm:$0xff]  ;;  %3730 = vmatpush2.bf16.msra.mxu0 %v11579_v12 }
  0x28   :  { %v313_v10 = vld [vmem:[%s19188_s1 + $0x780] sm:$0xff]  ;;  %v11572_v14 = vcombine.high %v185_v8, %v189_v9  ;;  %3802 = vmatprep.subr.bf16.mxu1 %v11708_v7  ;;  %v11571_v20 = vcombine.low %v185_v8, %v189_v9 }
  0x29   :  { %v317_v11 = vld [vmem:[%s19188_s1 + $0x7a0] sm:$0xff]  ;;  %3803 = vmatpush2.bf16.msra.mxu1 %v11707_v13  ;;  %v12886_v13 = vld [vmem:[%s19189_s0 + $0x8] ss:$36 sps:$4 sm:$0xff]  }
  0x2a   :  { %v11700_v15 = vcombine.high %v313_v10, %v317_v11  ;;  %v177_v16 = vld [vmem:[%s19188_s1 + $0x340] sm:$0xff]  ;;  %3731 = vmatprep.subr.bf16.mxu0 %v11572_v14  ;;  %v11699_v21 = vcombine.low %v313_v10, %v317_v11 }
  0x2b   :  { %v181_v17 = vld [vmem:[%s19188_s1 + $0x360] sm:$0xff]  ;;  %3732 = vmatpush2.bf16.msra.mxu0 %v11571_v20 }
  0x2c   :  { %v305_v18 = vld [vmem:[%s19188_s1 + $0x740] sm:$0xff]  ;;  %v11564_v22 = vcombine.high %v177_v16, %v181_v17  ;;  %3804 = vmatprep.subr.bf16.mxu1 %v11700_v15  ;;  %v11563_v28 = vcombine.low %v177_v16, %v181_v17 }
  0x2d   :  { %v309_v19 = vld [vmem:[%s19188_s1 + $0x760] sm:$0xff]  ;;  %3805 = vmatpush2.bf16.msra.mxu1 %v11699_v21  ;;  %v13742_v21 = vld [vmem:[%s19189_s0 + $0x4c] ss:$36 sps:$4 sm:$0xff]  }
  0x2e   :  { %v11692_v23 = vcombine.high %v305_v18, %v309_v19  ;;  %v169_v24 = vld [vmem:[%s19188_s1 + $0x300] sm:$0xff]  ;;  %3733 = vmatprep.subr.bf16.mxu0 %v11564_v22  ;;  %v11691_v29 = vcombine.low %v305_v18, %v309_v19 }
  0x2f   :  { %v173_v25 = vld [vmem:[%s19188_s1 + $0x320] sm:$0xff]  ;;  %3734 = vmatpush2.bf16.msra.mxu0 %v11563_v28 }
  0x30   :  { %v297_v26 = vld [vmem:[%s19188_s1 + $0x700] sm:$0xff]  ;;  %v11556_v30 = vcombine.high %v169_v24, %v173_v25  ;;  %3806 = vmatprep.subr.bf16.mxu1 %v11692_v23  ;;  %v11555_v36 = vcombine.low %v169_v24, %v173_v25  ;;  %v12889_v23 = vld [vmem:[%s19189_s0 + $0x54] ss:$36 sps:$4 sm:$0xff]  }
  0x31   :  { %v301_v27 = vld [vmem:[%s19188_s1 + $0x720] sm:$0xff]  ;;  %3807 = vmatpush2.bf16.msra.mxu1 %v11691_v29 }
  0x32   :  { %v161_v31 = vld [vmem:[%s19188_s1 + $0x2c0] sm:$0xff]  ;;  %v11684_v32 = vcombine.high %v297_v26, %v301_v27  ;;  %3735 = vmatprep.subr.bf16.mxu0 %v11556_v30  ;;  %v11683_v37 = vcombine.low %v297_v26, %v301_v27 }
  0x33   :  { %v165_v33 = vld [vmem:[%s19188_s1 + $0x2e0] sm:$0xff]  ;;  %3736 = vmatpush2.bf16.msra.mxu0 %v11555_v36 }
  0x34   :  { %v289_v34 = vld [vmem:[%s19188_s1 + $0x6c0] sm:$0xff]  ;;  %v11548_v38 = vcombine.high %v161_v31, %v165_v33  ;;  %3808 = vmatprep.subr.bf16.mxu1 %v11684_v32  ;;  %v11547_v44 = vcombine.low %v161_v31, %v165_v33  ;;  %v13767_v32 = vld [vmem:[%s19189_s0 + $0x48] ss:$36 sps:$4 sm:$0xff]  }
  0x35   :  { %v293_v35 = vld [vmem:[%s19188_s1 + $0x6e0] sm:$0xff]  ;;  %3809 = vmatpush2.bf16.msra.mxu1 %v11683_v37 }
  0x36   :  { %v153_v39 = vld [vmem:[%s19188_s1 + $0x280] sm:$0xff]  ;;  %v11676_v40 = vcombine.high %v289_v34, %v293_v35  ;;  %3737 = vmatprep.subr.bf16.mxu0 %v11548_v38  ;;  %v11675_v45 = vcombine.low %v289_v34, %v293_v35  ;;  %v12892_v34 = vld [vmem:[%s19189_s0 + $0x50] ss:$36 sps:$4 sm:$0xff]  }
  0x37   :  { %v157_v41 = vld [vmem:[%s19188_s1 + $0x2a0] sm:$0xff]  ;;  %3738 = vmatpush2.bf16.msra.mxu0 %v11547_v44 }
  0x38   :  { %v281_v42 = vld [vmem:[%s19188_s1 + $0x680] sm:$0xff]  ;;  %v11540_v46 = vcombine.high %v153_v39, %v157_v41  ;;  %3810 = vmatprep.subr.bf16.mxu1 %v11676_v40  ;;  %v11539_v52 = vcombine.low %v153_v39, %v157_v41  ;;  %v13784_v41 = vld [vmem:[%s19189_s0 + $0x94] ss:$36 sps:$4 sm:$0xff]  }
  0x39   :  { %v285_v43 = vld [vmem:[%s19188_s1 + $0x6a0] sm:$0xff]  ;;  %3811 = vmatpush2.bf16.msra.mxu1 %v11675_v45 }
  0x3a   :  { %v11668_v47 = vcombine.high %v281_v42, %v285_v43  ;;  %v145_v48 = vld [vmem:[%s19188_s1 + $0x240] sm:$0xff]  ;;  %3739 = vmatprep.subr.bf16.mxu0 %v11540_v46  ;;  %v11667_v53 = vcombine.low %v281_v42, %v285_v43 }
  0x3b   :  { %v149_v49 = vld [vmem:[%s19188_s1 + $0x260] sm:$0xff]  ;;  %3740 = vmatpush2.bf16.msra.mxu0 %v11539_v52  ;;  %v13809_v52 = vld [vmem:[%s19189_s0 + $0x90] ss:$36 sps:$4 sm:$0xff]  }
  0x3c   :  { %v273_v50 = vld [vmem:[%s19188_s1 + $0x640] sm:$0xff]  ;;  %v11532_v54 = vcombine.high %v145_v48, %v149_v49  ;;  %3812 = vmatprep.subr.bf16.mxu1 %v11668_v47  ;;  %v11531_v60 = vcombine.low %v145_v48, %v149_v49 }
  0x3d   :  { %v277_v51 = vld [vmem:[%s19188_s1 + $0x660] sm:$0xff]  ;;  %3813 = vmatpush2.bf16.msra.mxu1 %v11667_v53 }
  0x3e   :  { %v11660_v55 = vcombine.high %v273_v50, %v277_v51  ;;  %v137_v56 = vld [vmem:[%s19188_s1 + $0x200] sm:$0xff]  ;;  %3741 = vmatprep.subr.bf16.mxu0 %v11532_v54  ;;  %v11659_v61 = vcombine.low %v273_v50, %v277_v51  ;;  %v12898_v54 = vld [vmem:[%s19189_s0 + $0x98] ss:$36 sps:$4 sm:$0xff]  }
  0x3f   :  { %v141_v57 = vld [vmem:[%s19188_s1 + $0x220] sm:$0xff]  ;;  %3742 = vmatpush2.bf16.msra.mxu0 %v11531_v60 }
  0x40   :  { %v265_v58 = vld [vmem:[%s19188_s1 + $0x600] sm:$0xff]  ;;  %v11524_v62 = vcombine.high %v137_v56, %v141_v57  ;;  %3814 = vmatprep.subr.bf16.mxu1 %v11660_v55  ;;  %v11523_v4 = vcombine.low %v137_v56, %v141_v57 }
  0x41   :  { %v269_v59 = vld [vmem:[%s19188_s1 + $0x620] sm:$0xff]  ;;  %3815 = vmatpush2.bf16.msra.mxu1 %v11659_v61 }
  0x42   :  { %v11652_v63 = vcombine.high %v265_v58, %v269_v59  ;;  %v385_v0 = vld [vmem:[%s19188_s1 + $0x9c0] sm:$0xff]  ;;  %3743 = vmatprep.subr.bf16.mxu0 %v11524_v62  ;;  %v11651_v5 = vcombine.low %v265_v58, %v269_v59 }
  0x43   :  { %v389_v1 = vld [vmem:[%s19188_s1 + $0x9e0] sm:$0xff]  ;;  %3744 = vmatpush2.bf16.msra.mxu0 %v11523_v4 }
  0x44   :  { %v513_v2 = vld [vmem:[%s19188_s1 + $0xdc0] sm:$0xff]  ;;  %v11772_v6 = vcombine.high %v385_v0, %v389_v1  ;;  %3816 = vmatprep.subr.bf16.mxu1 %v11652_v63  ;;  %v11771_v14 = vcombine.low %v385_v0, %v389_v1 }
  0x45   :  { %v517_v3 = vld [vmem:[%s19188_s1 + $0xde0] sm:$0xff]  ;;  %3817 = vmatpush2.bf16.msra.mxu1 %v11651_v5 }
  0x46   :  { %v11900_v7 = vcombine.high %v513_v2, %v517_v3  ;;  %v377_v8 = vld [vmem:[%s19188_s1 + $0x980] sm:$0xff]  ;;  %3859 = vmatprep.subr.bf16.mxu0 %v11772_v6  ;;  %v11899_v15 = vcombine.low %v513_v2, %v517_v3 }
  0x47   :  { %v381_v9 = vld [vmem:[%s19188_s1 + $0x9a0] sm:$0xff] }
  0x48   :  { %v13719_v10 = vld [vmem:[%s19189_s0] ss:$36 sps:$4 sm:$0xff]   ;;  %v11764_v16 = vcombine.high %v377_v8, %v381_v9  ;;  %3932 = vmatprep.subr.bf16.mxu1 %v11900_v7  ;;  %3819 = vmatmul.mubr.bf16.vlgmr.msra.gmra.mxu1 %v12886_v13  ;;  %v11763_v24 = vcombine.low %v377_v8, %v381_v9  ;;  %v13851_v8 = vld [vmem:[%s19189_s0 + $0xd8] ss:$36 sps:$4 sm:$0xff]  }
  0x49   :  { %v505_v11 = vld [vmem:[%s19188_s1 + $0xd80] sm:$0xff]  ;;  %3746 = vmatmul.mubr.bf16.vlgmr.msra.gmra.mxu0 %v13719_v10  ;;  %3933 = vmatpush1.bf16.msra.mxu1 %v11899_v15 }
  0x4a   :  { %v509_v12 = vld [vmem:[%s19188_s1 + $0xda0] sm:$0xff]  ;;  %3860 = vmatpush1.bf16.msra.mxu0 %v11771_v14  ;;  %3755 = vmatprep.mubr.bf16.mxu0 %v13742_v21 }
  0x4b   :  { %v369_v17 = vld [vmem:[%s19188_s1 + $0x940] sm:$0xff]  ;;  %v11892_v19 = vcombine.high %v505_v11, %v509_v12  ;;  %3861 = vmatprep.subr.bf16.mxu0 %v11764_v16  ;;  %v11891_v25 = vcombine.low %v505_v11, %v509_v12  ;;  %3828 = vmatprep.mubr.bf16.mxu1 %v12889_v23 }
  0x4c   :  { %v373_v18 = vld [vmem:[%s19188_s1 + $0x960] sm:$0xff] }
  0x4d   :  { %v497_v20 = vld [vmem:[%s19188_s1 + $0xd40] sm:$0xff]  ;;  %v11756_v26 = vcombine.high %v369_v17, %v373_v18  ;;  %3934 = vmatprep.subr.bf16.mxu1 %v11892_v19  ;;  %v11755_v33 = vcombine.low %v369_v17, %v373_v18  ;;  %v13865_v17 = vld [vmem:[%s19189_s0 + $0x14] ss:$36 sps:$4 sm:$0xff]  }
  0x4e   :  { %v501_v22 = vld [vmem:[%s19188_s1 + $0xd60] sm:$0xff]  ;;  %3862 = vmatpush1.bf16.msra.mxu0 %v11763_v24  ;;  %3935 = vmatpush1.bf16.msra.mxu1 %v11891_v25 }
  0x4f   :  { %v11884_v27 = vcombine.high %v497_v20, %v501_v22  ;;  %v361_v28 = vld [vmem:[%s19188_s1 + $0x900] sm:$0xff]  ;;  %3863 = vmatprep.subr.bf16.mxu0 %v11756_v26  ;;  %v11883_v35 = vcombine.low %v497_v20, %v501_v22 }
  0x50   :  { %v365_v29 = vld [vmem:[%s19188_s1 + $0x920] sm:$0xff]  ;;  %3829 = vmatmul.mubr.bf16.gmra.mxu1 %v12892_v34 }
  0x51   :  { %v489_v30 = vld [vmem:[%s19188_s1 + $0xd00] sm:$0xff]  ;;  %v11748_v36 = vcombine.high %v361_v28, %v365_v29  ;;  %3936 = vmatprep.subr.bf16.mxu1 %v11884_v27  ;;  %3756 = vmatmul.mubr.bf16.gmra.mxu0 %v13767_v32  ;;  %v11747_v44 = vcombine.low %v361_v28, %v365_v29 }
  0x52   :  { %v493_v31 = vld [vmem:[%s19188_s1 + $0xd20] sm:$0xff]  ;;  %3864 = vmatpush1.bf16.msra.mxu0 %v11755_v33  ;;  %3937 = vmatpush1.bf16.msra.mxu1 %v11883_v35 }
  0x53   :  { %v353_v37 = vld [vmem:[%s19188_s1 + $0x8c0] sm:$0xff]  ;;  %v11876_v39 = vcombine.high %v489_v30, %v493_v31  ;;  %3865 = vmatprep.subr.bf16.mxu0 %v11748_v36  ;;  %v11875_v45 = vcombine.low %v489_v30, %v493_v31  ;;  %3765 = vmatprep.mubr.bf16.mxu0 %v13784_v41 }
  0x54   :  { %v357_v38 = vld [vmem:[%s19188_s1 + $0x8e0] sm:$0xff] }
  0x55   :  { %v481_v40 = vld [vmem:[%s19188_s1 + $0xcc0] sm:$0xff]  ;;  %v11740_v46 = vcombine.high %v353_v37, %v357_v38  ;;  %3938 = vmatprep.subr.bf16.mxu1 %v11876_v39  ;;  %v11739_v53 = vcombine.low %v353_v37, %v357_v38 }
  0x56   :  { %v485_v42 = vld [vmem:[%s19188_s1 + $0xce0] sm:$0xff]  ;;  %3866 = vmatpush1.bf16.msra.mxu0 %v11747_v44  ;;  %3939 = vmatpush1.bf16.msra.mxu1 %v11875_v45 }
  0x57   :  { %v12895_v43 = vld [vmem:[%s19189_s0 + $0x9c] ss:$36 sps:$4 sm:$0xff]   ;;  %v11868_v48 = vcombine.high %v481_v40, %v485_v42  ;;  %3867 = vmatprep.subr.bf16.mxu0 %v11740_v46  ;;  %v11867_v55 = vcombine.low %v481_v40, %v485_v42  ;;  %v12901_v63 = vld [vmem:[%s19189_s0 + $0xe4] ss:$36 sps:$4 sm:$0xff]  }
  0x58   :  { %v345_v47 = vld [vmem:[%s19188_s1 + $0x880] sm:$0xff]  ;;  %3838 = vmatprep.mubr.bf16.mxu1 %v12895_v43 }
  0x59   :  { %v349_v49 = vld [vmem:[%s19188_s1 + $0x8a0] sm:$0xff]  ;;  %3940 = vmatprep.subr.bf16.mxu1 %v11868_v48  ;;  %3766 = vmatmul.mubr.bf16.gmra.mxu0 %v13809_v52 }
  0x5a   :  { %v473_v50 = vld [vmem:[%s19188_s1 + $0xc80] sm:$0xff]  ;;  %v11732_v56 = vcombine.high %v345_v47, %v349_v49  ;;  %3868 = vmatpush1.bf16.msra.mxu0 %v11739_v53  ;;  %v11731_v0 = vcombine.low %v345_v47, %v349_v49  ;;  %3839 = vmatmul.mubr.bf16.gmra.mxu1 %v12898_v54 }
  0x5b   :  { %v477_v51 = vld [vmem:[%s19188_s1 + $0xca0] sm:$0xff]  ;;  %3941 = vmatpush1.bf16.msra.mxu1 %v11867_v55  ;;  %3848 = vmatprep.mubr.bf16.mxu1 %v12901_v63 }
  0x5c   :  { %v337_v57 = vld [vmem:[%s19188_s1 + $0x840] sm:$0xff]  ;;  %v11860_v59 = vcombine.high %v473_v50, %v477_v51  ;;  %3869 = vmatprep.subr.bf16.mxu0 %v11732_v56  ;;  %v11859_v1 = vcombine.low %v473_v50, %v477_v51 }
  0x5d   :  { %v341_v58 = vld [vmem:[%s19188_s1 + $0x860] sm:$0xff] }
  0x5e   :  { %v13823_v60 = vld [vmem:[%s19189_s0 + $0xdc] ss:$36 sps:$4 sm:$0xff]   ;;  %v11724_v2 = vcombine.high %v337_v57, %v341_v58  ;;  %3942 = vmatprep.subr.bf16.mxu1 %v11860_v59  ;;  %3870 = vmatpush1.bf16.msra.mxu0 %v11731_v0  ;;  %v11723_v9 = vcombine.low %v337_v57, %v341_v58 }
  0x5f   :  { %v465_v61 = vld [vmem:[%s19188_s1 + $0xc40] sm:$0xff]  ;;  %3775 = vmatprep.mubr.bf16.mxu0 %v13823_v60  ;;  %3943 = vmatpush1.bf16.msra.mxu1 %v11859_v1 }
  0x60   :  { %v469_v62 = vld [vmem:[%s19188_s1 + $0xc60] sm:$0xff]  ;;  %3871 = vmatprep.subr.bf16.mxu0 %v11724_v2 }
  0x61   :  { %v11852_v3 = vcombine.high %v465_v61, %v469_v62  ;;  %v329_v4 = vld [vmem:[%s19188_s1 + $0x800] sm:$0xff]  ;;  %v11851_v12 = vcombine.low %v465_v61, %v469_v62  ;;  %3776 = vmatmul.mubr.bf16.gmra.mxu0 %v13851_v8 }
  0x62   :  { %v333_v5 = vld [vmem:[%s19188_s1 + $0x820] sm:$0xff]  ;;  %3872 = vmatpush1.bf16.msra.mxu0 %v11723_v9  ;;  %3891 = vmatprep.mubr.bf16.mxu0 %v13865_v17 }
  0x63   :  { %v457_v6 = vld [vmem:[%s19188_s1 + $0xc00] sm:$0xff]  ;;  %v11716_v13 = vcombine.high %v329_v4, %v333_v5  ;;  %3944 = vmatprep.subr.bf16.mxu1 %v11852_v3  ;;  %v11715_v22 = vcombine.low %v329_v4, %v333_v5 }
  0x64   :  { %v461_v7 = vld [vmem:[%s19188_s1 + $0xc20] sm:$0xff]  ;;  %3945 = vmatpush1.bf16.msra.mxu1 %v11851_v12 }
  0x65   :  { %v12904_v11 = vld [vmem:[%s19189_s0 + $0xe0] ss:$36 sps:$4 sm:$0xff]   ;;  %v11844_v14 = vcombine.high %v457_v6, %v461_v7  ;;  %3873 = vmatprep.subr.bf16.mxu0 %v11716_v13  ;;  %v11843_v23 = vcombine.low %v457_v6, %v461_v7 }
  0x66   :  { %v449_v15 = vld [vmem:[%s19188_s1 + $0xbc0] sm:$0xff]  ;;  %3849 = vmatmul.mubr.bf16.gmra.mxu1 %v12904_v11  ;;  %3874 = vmatpush1.bf16.msra.mxu0 %v11715_v22 }
  0x67   :  { %v453_v16 = vld [vmem:[%s19188_s1 + $0xbe0] sm:$0xff]  ;;  %3946 = vmatprep.subr.bf16.mxu1 %v11844_v14 }
  0x68   :  { %v577_v18 = vld [vmem:[%s19188_s1 + $0xfc0] sm:$0xff]  ;;  %v11836_v24 = vcombine.high %v449_v15, %v453_v16  ;;  %v11835_v30 = vcombine.low %v449_v15, %v453_v16  ;;  %3947 = vmatpush1.bf16.msra.mxu1 %v11843_v23 }
  0x69   :  { %v581_v19 = vld [vmem:[%s19188_s1 + $0xfe0] sm:$0xff] }
  0x6a   :  { %v12910_v20 = vld [vmem:[%s19189_s0 + $0x1c] ss:$36 sps:$4 sm:$0xff]   ;;  %v11964_v25 = vcombine.high %v577_v18, %v581_v19  ;;  %3875 = vmatprep.subr.bf16.mxu0 %v11836_v24  ;;  %v11963_v31 = vcombine.low %v577_v18, %v581_v19 }
  0x6b   :  { %v441_v26 = vld [vmem:[%s19188_s1 + $0xb80] sm:$0xff]  ;;  %3964 = vmatprep.mubr.bf16.mxu1 %v12910_v20  ;;  %3876 = vmatpush2.bf16.msra.mxu0 %v11835_v30 }
  0x6c   :  { %v445_v27 = vld [vmem:[%s19188_s1 + $0xba0] sm:$0xff]  ;;  %3948 = vmatprep.subr.bf16.mxu1 %v11964_v25 }
  0x6d   :  { %v569_v28 = vld [vmem:[%s19188_s1 + $0xf80] sm:$0xff]  ;;  %v11828_v33 = vcombine.high %v441_v26, %v445_v27  ;;  %v11827_v39 = vcombine.low %v441_v26, %v445_v27  ;;  %3949 = vmatpush2.bf16.msra.mxu1 %v11963_v31 }
  0x6e   :  { %v573_v29 = vld [vmem:[%s19188_s1 + $0xfa0] sm:$0xff] }
  0x6f   :  { %v11956_v34 = vcombine.high %v569_v28, %v573_v29  ;;  %v433_v35 = vld [vmem:[%s19188_s1 + $0xb40] sm:$0xff]  ;;  %3877 = vmatprep.subr.bf16.mxu0 %v11828_v33  ;;  %v11955_v40 = vcombine.low %v569_v28, %v573_v29  ;;  %v130_v28 = vld [vmem:[%s19188_s1 + $0x1c8] sm:$0xff] }
  0x70   :  { %v437_v36 = vld [vmem:[%s19188_s1 + $0xb60] sm:$0xff]  ;;  %3878 = vmatpush2.bf16.msra.mxu0 %v11827_v39  ;;  %v134_v29 = vld [vmem:[%s19188_s1 + $0x1e8] sm:$0xff] }
  0x71   :  { %v561_v37 = vld [vmem:[%s19188_s1 + $0xf40] sm:$0xff]  ;;  %v11820_v42 = vcombine.high %v433_v35, %v437_v36  ;;  %3950 = vmatprep.subr.bf16.mxu1 %v11956_v34  ;;  %v11819_v48 = vcombine.low %v433_v35, %v437_v36  ;;  %v11518_v34 = vcombine.high %v130_v28, %v134_v29  ;;  %v126_v39 = vld [vmem:[%s19188_s1 + $0x1a8] sm:$0xff] }
  0x72   :  { %v565_v38 = vld [vmem:[%s19188_s1 + $0xf60] sm:$0xff]  ;;  %3951 = vmatpush2.bf16.msra.mxu1 %v11955_v40  ;;  %v12908_v40 = vld [vmem:[%s19189_s0 + $0x18] ss:$36 sps:$4 sm:$0xff]  }
  0x73   :  { %v11948_v43 = vcombine.high %v561_v37, %v565_v38  ;;  %v425_v44 = vld [vmem:[%s19188_s1 + $0xb00] sm:$0xff]  ;;  %3879 = vmatprep.subr.bf16.mxu0 %v11820_v42  ;;  %v11947_v49 = vcombine.low %v561_v37, %v565_v38  ;;  %v13983_v37 = vld [vmem:[%s19189_s0 + $0x10] ss:$36 sps:$4 sm:$0xff]   ;;  %v122_v38 = vld [vmem:[%s19188_s1 + $0x188] sm:$0xff] }
  0x74   :  { %v429_v45 = vld [vmem:[%s19188_s1 + $0xb20] sm:$0xff]  ;;  %3880 = vmatpush2.bf16.msra.mxu0 %v11819_v48 }
  0x75   :  { %v553_v46 = vld [vmem:[%s19188_s1 + $0xf00] sm:$0xff]  ;;  %v11812_v50 = vcombine.high %v425_v44, %v429_v45  ;;  %3952 = vmatprep.subr.bf16.mxu1 %v11948_v43  ;;  %v11811_v57 = vcombine.low %v425_v44, %v429_v45  ;;  %v11517_v43 = vcombine.low %v130_v28, %v134_v29  ;;  %v11510_v45 = vcombine.high %v122_v38, %v126_v39  ;;  %v14081_v28 = vld [vmem:[%s19189_s0 + $0xec] ss:$36 sps:$4 sm:$0xff]  }
  0x76   :  { %v557_v47 = vld [vmem:[%s19188_s1 + $0xf20] sm:$0xff]  ;;  %3953 = vmatpush2.bf16.msra.mxu1 %v11947_v49  ;;  %v114_v49 = vld [vmem:[%s19188_s1 + $0x148] sm:$0xff] }
  0x77   :  { %v11940_v51 = vcombine.high %v553_v46, %v557_v47  ;;  %v417_v53 = vld [vmem:[%s19188_s1 + $0xac0] sm:$0xff]  ;;  %3881 = vmatprep.subr.bf16.mxu0 %v11812_v50  ;;  %v11939_v58 = vcombine.low %v553_v46, %v557_v47  ;;  %v118_v50 = vld [vmem:[%s19188_s1 + $0x168] sm:$0xff] }
  0x78   :  { %v421_v54 = vld [vmem:[%s19188_s1 + $0xae0] sm:$0xff]  ;;  %3882 = vmatpush2.bf16.msra.mxu0 %v11811_v57 }
  0x79   :  { %v545_v55 = vld [vmem:[%s19188_s1 + $0xec0] sm:$0xff]  ;;  %v11804_v59 = vcombine.high %v417_v53, %v421_v54  ;;  %3954 = vmatprep.subr.bf16.mxu1 %v11940_v51  ;;  %v11803_v2 = vcombine.low %v417_v53, %v421_v54  ;;  %v11509_v54 = vcombine.low %v122_v38, %v126_v39 }
  0x7a   :  { %v549_v56 = vld [vmem:[%s19188_s1 + $0xee0] sm:$0xff]  ;;  %3955 = vmatpush2.bf16.msra.mxu1 %v11939_v58 }
  0x7b   :  { %v11932_v61 = vcombine.high %v545_v55, %v549_v56  ;;  %v409_v62 = vld [vmem:[%s19188_s1 + $0xa80] sm:$0xff]  ;;  %3883 = vmatprep.subr.bf16.mxu0 %v11804_v59  ;;  %v11931_v3 = vcombine.low %v545_v55, %v549_v56  ;;  %v11502_v56 = vcombine.high %v114_v49, %v118_v50  ;;  %v14025_v59 = vld [vmem:[%s19189_s0 + $0x58] ss:$36 sps:$4 sm:$0xff]  }
  0x7c   :  { %v413_v63 = vld [vmem:[%s19188_s1 + $0xaa0] sm:$0xff]  ;;  %3884 = vmatpush2.bf16.msra.mxu0 %v11803_v2 }
  0x7d   :  { %v537_v0 = vld [vmem:[%s19188_s1 + $0xe80] sm:$0xff]  ;;  %v11796_v4 = vcombine.high %v409_v62, %v413_v63  ;;  %3956 = vmatprep.subr.bf16.mxu1 %v11932_v61  ;;  %v11795_v12 = vcombine.low %v409_v62, %v413_v63  ;;  %v106_v61 = vld [vmem:[%s19188_s1 + $0x108] sm:$0xff] }
  0x7e   :  { %v541_v1 = vld [vmem:[%s19188_s1 + $0xea0] sm:$0xff]  ;;  %3957 = vmatpush2.bf16.msra.mxu1 %v11931_v3  ;;  %v110_v62 = vld [vmem:[%s19188_s1 + $0x128] sm:$0xff] }
  0x7f   :  { %v11924_v5 = vcombine.high %v537_v0, %v541_v1  ;;  %v401_v6 = vld [vmem:[%s19188_s1 + $0xa40] sm:$0xff]  ;;  %3885 = vmatprep.subr.bf16.mxu0 %v11796_v4  ;;  %v11923_v13 = vcombine.low %v537_v0, %v541_v1  ;;  %v11501_v1 = vcombine.low %v114_v49, %v118_v50  ;;  %v11494_v3 = vcombine.high %v106_v61, %v110_v62 }
  0x80   :  { %v405_v7 = vld [vmem:[%s19188_s1 + $0xa60] sm:$0xff]  ;;  %3886 = vmatpush2.bf16.msra.mxu0 %v11795_v12 }
  0x81   :  { %v529_v9 = vld [vmem:[%s19188_s1 + $0xe40] sm:$0xff]  ;;  %v11788_v14 = vcombine.high %v401_v6, %v405_v7  ;;  %3958 = vmatprep.subr.bf16.mxu1 %v11924_v5  ;;  %v11787_v22 = vcombine.low %v401_v6, %v405_v7  ;;  %v98_v7 = vld [vmem:[%s19188_s1 + $0xc8] sm:$0xff] }
  0x82   :  { %v533_v11 = vld [vmem:[%s19188_s1 + $0xe60] sm:$0xff]  ;;  %3959 = vmatpush2.bf16.msra.mxu1 %v11923_v13  ;;  %v11493_v13 = vcombine.low %v106_v61, %v110_v62  ;;  %v19201_v62 = vmov 0  }
  0x83   :  { %v11916_v15 = vcombine.high %v529_v9, %v533_v11  ;;  %v393_v16 = vld [vmem:[%s19188_s1 + $0xa00] sm:$0xff]  ;;  %3887 = vmatprep.subr.bf16.mxu0 %v11788_v14  ;;  %v11915_v23 = vcombine.low %v529_v9, %v533_v11  ;;  %v102_v9 = vld [vmem:[%s19188_s1 + $0xe8] sm:$0xff] }
  0x84   :  { %v397_v18 = vld [vmem:[%s19188_s1 + $0xa20] sm:$0xff]  ;;  %3888 = vmatpush2.bf16.msra.mxu0 %v11787_v22  ;;  %v12920_v11 = vld [vmem:[%s19189_s0 + $0xac] ss:$36 sps:$4 sm:$0xff]  }
  0x85   :  { %v521_v19 = vld [vmem:[%s19188_s1 + $0xe00] sm:$0xff]  ;;  %v11780_v24 = vcombine.high %v393_v16, %v397_v18  ;;  %3960 = vmatprep.subr.bf16.mxu1 %v11916_v15  ;;  %v11779_v30 = vcombine.low %v393_v16, %v397_v18  ;;  %v11486_v15 = vcombine.high %v98_v7, %v102_v9  ;;  %v94_v22 = vld [vmem:[%s19188_s1 + $0xa8] sm:$0xff] }
  0x86   :  { %v525_v20 = vld [vmem:[%s19188_s1 + $0xe20] sm:$0xff]  ;;  %3961 = vmatpush2.bf16.msra.mxu1 %v11915_v23 }
  0x87   :  { %v11908_v25 = vcombine.high %v521_v19, %v525_v20  ;;  %v641_v26 = vld [vmem:[%s19188_s1 + $0x11c0] sm:$0xff]  ;;  %3889 = vmatprep.subr.bf16.mxu0 %v11780_v24  ;;  %v11907_v31 = vcombine.low %v521_v19, %v525_v20  ;;  %v90_v20 = vld [vmem:[%s19188_s1 + $0x88] sm:$0xff] }
  0x88   :  { %v645_v27 = vld [vmem:[%s19188_s1 + $0x11e0] sm:$0xff]  ;;  %3890 = vmatpush2.bf16.msra.mxu0 %v11779_v30  ;;  %v12922_v24 = vld [vmem:[%s19189_s0 + $0xa8] ss:$36 sps:$4 sm:$0xff]  }
  0x89   :  { %v12028_v33 = vcombine.high %v641_v26, %v645_v27  ;;  %3962 = vmatprep.subr.bf16.mxu1 %v11908_v25  ;;  %v633_v35 = vld [vmem:[%s19188_s1 + $0x1180] sm:$0xff]  ;;  %v12027_v42 = vcombine.low %v641_v26, %v645_v27  ;;  %v11485_v25 = vcombine.low %v98_v7, %v102_v9  ;;  %v11478_v27 = vcombine.high %v90_v20, %v94_v22 }
  0x8a   :  { %v637_v36 = vld [vmem:[%s19188_s1 + $0x11a0] sm:$0xff]  ;;  %3963 = vmatpush2.bf16.msra.mxu1 %v11907_v31  ;;  %v82_v31 = vld [vmem:[%s19188_s1 + $0x48] sm:$0xff] }
  0x8b   :  { %4005 = vmatprep.subr.bf16.mxu0 %v12028_v33  ;;  %v12020_v44 = vcombine.high %v633_v35, %v637_v36  ;;  %4078 = vmatprep.subr.bf16.mxu1 %v11518_v34  ;;  %v13997_v46 = vld [vmem:[%s19189_s0 + $0x5c] ss:$36 sps:$4 sm:$0xff]   ;;  %v12914_v51 = vld [vmem:[%s19189_s0 + $0x64] ss:$36 sps:$4 sm:$0xff]   ;;  %v12019_v53 = vcombine.low %v633_v35, %v637_v36  ;;  %v12926_v34 = vld [vmem:[%s19189_s0 + $0xf4] ss:$36 sps:$4 sm:$0xff]   ;;  %v11477_v36 = vcombine.low %v90_v20, %v94_v22 }
  0x8c   :  { %v625_v47 = vld [vmem:[%s19188_s1 + $0x1140] sm:$0xff]  ;;  %3892 = vmatmul.mubr.bf16.vlgmr.msra.gmra.mxu0 %v13983_v37  ;;  %v86_v33 = vld [vmem:[%s19188_s1 + $0x68] sm:$0xff] }
  0x8d   :  { %v629_v48 = vld [vmem:[%s19188_s1 + $0x1160] sm:$0xff]  ;;  %3965 = vmatmul.mubr.bf16.vlgmr.msra.gmra.mxu1 %v12908_v40  ;;  %4006 = vmatpush1.bf16.msra.mxu0 %v12027_v42  ;;  %v11470_v39 = vcombine.high %v82_v31, %v86_v33  ;;  %v11469_v49 = vcombine.low %v82_v31, %v86_v33 }
  0x8e   :  { %4079 = vmatpush1.bf16.msra.mxu1 %v11517_v43  ;;  %4007 = vmatprep.subr.bf16.mxu0 %v12020_v44  ;;  %v12012_v55 = vcombine.high %v625_v47, %v629_v48  ;;  %v617_v57 = vld [vmem:[%s19188_s1 + $0x1100] sm:$0xff]  ;;  %v12011_v63 = vcombine.low %v625_v47, %v629_v48  ;;  %v14109_v43 = vld [vmem:[%s19189_s0 + $0xe8] ss:$36 sps:$4 sm:$0xff]   ;;  %v12928_v48 = vld [vmem:[%s19189_s0 + $0xf0] ss:$36 sps:$4 sm:$0xff]  }
  0x8f   :  { %4080 = vmatprep.subr.bf16.mxu1 %v11510_v45  ;;  %3901 = vmatprep.mubr.bf16.mxu0 %v13997_v46  ;;  %v621_v58 = vld [vmem:[%s19188_s1 + $0x1120] sm:$0xff]  ;;  %v74_v44 = vld [vmem:[%s19188_s1 + $0x8] sm:$0xff] }
  0x90   :  { %3974 = vmatprep.mubr.bf16.mxu1 %v12914_v51  ;;  %v12916_v0 = vld [vmem:[%s19189_s0 + $0x60] ss:$36 sps:$4 sm:$0xff]   ;;  %v12004_v2 = vcombine.high %v617_v57, %v621_v58  ;;  %v12003_v12 = vcombine.low %v617_v57, %v621_v58  ;;  %v78_v45 = vld [vmem:[%s19188_s1 + $0x28] sm:$0xff] }
  0x91   :  { %4008 = vmatpush1.bf16.msra.mxu0 %v12019_v53  ;;  %v14039_v4 = vld [vmem:[%s19189_s0 + $0xa4] ss:$36 sps:$4 sm:$0xff]   ;;  %v11462_v51 = vcombine.high %v74_v44, %v78_v45  ;;  %v11461_v58 = vcombine.low %v74_v44, %v78_v45 }
  0x92   :  { %4081 = vmatpush1.bf16.msra.mxu1 %v11509_v54  ;;  %4009 = vmatprep.subr.bf16.mxu0 %v12012_v55  ;;  %v609_v5 = vld [vmem:[%s19188_s1 + $0x10c0] sm:$0xff]  ;;  %v258_v53 = vld [vmem:[%s19188_s1 + $0x5c8] sm:$0xff] }
  0x93   :  { %4082 = vmatprep.subr.bf16.mxu1 %v11502_v56  ;;  %v613_v6 = vld [vmem:[%s19188_s1 + $0x10e0] sm:$0xff]  ;;  %v262_v54 = vld [vmem:[%s19188_s1 + $0x5e8] sm:$0xff] }
  0x94   :  { %3902 = vmatmul.mubr.bf16.gmra.mxu0 %v14025_v59  ;;  %v11996_v14 = vcombine.high %v609_v5, %v613_v6  ;;  %v601_v16 = vld [vmem:[%s19188_s1 + $0x1080] sm:$0xff]  ;;  %v11995_v23 = vcombine.low %v609_v5, %v613_v6  ;;  %v194_v55 = vld [vmem:[%s19188_s1 + $0x3c8] sm:$0xff]  ;;  %v11646_v61 = vcombine.high %v258_v53, %v262_v54  ;;  %v11645_v7 = vcombine.low %v258_v53, %v262_v54 }
  0x95   :  { %4010 = vmatpush1.bf16.msra.mxu0 %v12011_v63  ;;  %3975 = vmatmul.mubr.bf16.gmra.mxu1 %v12916_v0  ;;  %v605_v18 = vld [vmem:[%s19188_s1 + $0x10a0] sm:$0xff]  ;;  %v198_v56 = vld [vmem:[%s19188_s1 + $0x3e8] sm:$0xff] }
  0x96   :  { %4083 = vmatpush1.bf16.msra.mxu1 %v11501_v1  ;;  %4011 = vmatprep.subr.bf16.mxu0 %v12004_v2  ;;  %v14067_v19 = vld [vmem:[%s19189_s0 + $0xa0] ss:$36 sps:$4 sm:$0xff]   ;;  %v11988_v26 = vcombine.high %v601_v16, %v605_v18  ;;  %v11987_v35 = vcombine.low %v601_v16, %v605_v18  ;;  %v11582_v63 = vcombine.high %v194_v55, %v198_v56  ;;  %v250_v0 = vld [vmem:[%s19188_s1 + $0x588] sm:$0xff] }
  0x97   :  { %4084 = vmatprep.subr.bf16.mxu1 %v11494_v3  ;;  %3911 = vmatprep.mubr.bf16.mxu0 %v14039_v4  ;;  %v593_v29 = vld [vmem:[%s19188_s1 + $0x1040] sm:$0xff]  ;;  %v254_v1 = vld [vmem:[%s19188_s1 + $0x5a8] sm:$0xff]  ;;  %v11581_v9 = vcombine.low %v194_v55, %v198_v56 }
  0x98   :  { %3984 = vmatprep.mubr.bf16.mxu1 %v12920_v11  ;;  %v597_v30 = vld [vmem:[%s19188_s1 + $0x1060] sm:$0xff]  ;;  %v186_v3 = vld [vmem:[%s19188_s1 + $0x388] sm:$0xff]  ;;  %v11638_v11 = vcombine.high %v250_v0, %v254_v1  ;;  %v11637_v18 = vcombine.low %v250_v0, %v254_v1 }
  0x99   :  { %4012 = vmatpush1.bf16.msra.mxu0 %v12003_v12  ;;  %v11980_v38 = vcombine.high %v593_v29, %v597_v30  ;;  %v585_v40 = vld [vmem:[%s19188_s1 + $0x1000] sm:$0xff]  ;;  %v11979_v47 = vcombine.low %v593_v29, %v597_v30  ;;  %v190_v5 = vld [vmem:[%s19188_s1 + $0x3a8] sm:$0xff] }
  0x9a   :  { %4085 = vmatpush1.bf16.msra.mxu1 %v11493_v13  ;;  %4013 = vmatprep.subr.bf16.mxu0 %v11996_v14  ;;  %v589_v42 = vld [vmem:[%s19188_s1 + $0x1020] sm:$0xff]  ;;  %v11574_v12 = vcombine.high %v186_v3, %v190_v5  ;;  %v242_v13 = vld [vmem:[%s19188_s1 + $0x548] sm:$0xff]  ;;  %v11573_v20 = vcombine.low %v186_v3, %v190_v5 }
  0x9b   :  { %4086 = vmatprep.subr.bf16.mxu1 %v11486_v15  ;;  %v11972_v50 = vcombine.high %v585_v40, %v589_v42  ;;  %v11971_v57 = vcombine.low %v585_v40, %v589_v42  ;;  %v14143_v2 = vld [vmem:[%s19189_s0 + $0x20] ss:$36 sps:$4 sm:$0xff]   ;;  %v246_v14 = vld [vmem:[%s19188_s1 + $0x568] sm:$0xff] }
  0x9c   :  { %3912 = vmatmul.mubr.bf16.gmra.mxu0 %v14067_v19  ;;  %v13357_v6 = vld [vmem:[%s19189_s0 + $0x4] ss:$36 sps:$4 sm:$0xff]   ;;  %v11630_v22 = vcombine.high %v242_v13, %v246_v14  ;;  %v11629_v30 = vcombine.low %v242_v13, %v246_v14 }
  0x9d   :  { %4014 = vmatpush1.bf16.msra.mxu0 %v11995_v23  ;;  %3985 = vmatmul.mubr.bf16.gmra.mxu1 %v12922_v24  ;;  %v178_v15 = vld [vmem:[%s19188_s1 + $0x348] sm:$0xff] }
  0x9e   :  { %4087 = vmatpush1.bf16.msra.mxu1 %v11485_v25  ;;  %4015 = vmatprep.subr.bf16.mxu0 %v11988_v26  ;;  %v182_v16 = vld [vmem:[%s19188_s1 + $0x368] sm:$0xff] }
  0x9f   :  { %4088 = vmatprep.subr.bf16.mxu1 %v11478_v27  ;;  %3921 = vmatprep.mubr.bf16.mxu0 %v14081_v28  ;;  %v11566_v23 = vcombine.high %v178_v15, %v182_v16  ;;  %v234_v24 = vld [vmem:[%s19188_s1 + $0x508] sm:$0xff]  ;;  %v11565_v31 = vcombine.low %v178_v15, %v182_v16 }
  0xa0   :  { %3994 = vmatprep.mubr.bf16.mxu1 %v12926_v34  ;;  %v238_v25 = vld [vmem:[%s19188_s1 + $0x528] sm:$0xff] }
  0xa1   :  { %4016 = vmatpush1.bf16.msra.mxu0 %v11987_v35  ;;  %v14177_v26 = vld [vmem:[%s19189_s0 + $0x68] ss:$36 sps:$4 sm:$0xff]   ;;  %v11622_v33 = vcombine.high %v234_v24, %v238_v25  ;;  %v11621_v40 = vcombine.low %v234_v24, %v238_v25 }
  0xa2   :  { %4089 = vmatpush1.bf16.msra.mxu1 %v11477_v36  ;;  %4017 = vmatprep.subr.bf16.mxu0 %v11980_v38  ;;  %v170_v27 = vld [vmem:[%s19188_s1 + $0x308] sm:$0xff] }
  0xa3   :  { %4090 = vmatprep.subr.bf16.mxu1 %v11470_v39  ;;  %v174_v29 = vld [vmem:[%s19188_s1 + $0x328] sm:$0xff] }
  0xa4   :  { %3922 = vmatmul.mubr.bf16.gmra.mxu0 %v14109_v43  ;;  %v11558_v34 = vcombine.high %v170_v27, %v174_v29  ;;  %v226_v35 = vld [vmem:[%s19188_s1 + $0x4c8] sm:$0xff]  ;;  %v11557_v42 = vcombine.low %v170_v27, %v174_v29 }
  0xa5   :  { %4018 = vmatpush1.bf16.msra.mxu0 %v11979_v47  ;;  %3995 = vmatmul.mubr.bf16.gmra.mxu1 %v12928_v48  ;;  %v230_v36 = vld [vmem:[%s19188_s1 + $0x4e8] sm:$0xff] }
  0xa6   :  { %4091 = vmatpush1.bf16.msra.mxu1 %v11469_v49  ;;  %4019 = vmatprep.subr.bf16.mxu0 %v11972_v50  ;;  %v162_v38 = vld [vmem:[%s19188_s1 + $0x2c8] sm:$0xff]  ;;  %v11614_v44 = vcombine.high %v226_v35, %v230_v36  ;;  %v14208_v49 = vld [vmem:[%s19189_s0 + $0xb0] ss:$36 sps:$4 sm:$0xff]   ;;  %v11613_v53 = vcombine.low %v226_v35, %v230_v36 }
  0xa7   :  { %4092 = vmatprep.subr.bf16.mxu1 %v11462_v51  ;;  %4037 = vmatprep.mubr.bf16.mxu0 %v19201_v62  ;;  %v166_v39 = vld [vmem:[%s19188_s1 + $0x2e8] sm:$0xff] }
  0xa8   :  { %4110 = vmatprep.mubr.bf16.mxu1 %v13357_v6  ;;  %v11550_v45 = vcombine.high %v162_v38, %v166_v39  ;;  %v218_v47 = vld [vmem:[%s19188_s1 + $0x488] sm:$0xff]  ;;  %v11549_v54 = vcombine.low %v162_v38, %v166_v39 }
  0xa9   :  { %4020 = vmatpush1.bf16.msra.mxu0 %v11971_v57  ;;  %v222_v48 = vld [vmem:[%s19188_s1 + $0x4a8] sm:$0xff] }
  0xaa   :  { %4093 = vmatpush1.bf16.msra.mxu1 %v11461_v58  ;;  %4151 = vmatprep.subr.bf16.mxu0 %v11646_v61  ;;  %v154_v50 = vld [vmem:[%s19188_s1 + $0x288] sm:$0xff]  ;;  %v11606_v55 = vcombine.high %v218_v47, %v222_v48  ;;  %v11605_v0 = vcombine.low %v218_v47, %v222_v48 }
  0xab   :  { %4094 = vmatprep.subr.bf16.mxu1 %v11582_v63  ;;  %v158_v51 = vld [vmem:[%s19188_s1 + $0x2a8] sm:$0xff] }
  0xac   :  { %4038 = vmatmul.mubr.bf16.vlgmr.msra.gmra.mxu0 %v14143_v2  ;;  %v11542_v56 = vcombine.high %v154_v50, %v158_v51  ;;  %v210_v57 = vld [vmem:[%s19188_s1 + $0x448] sm:$0xff]  ;;  %v11541_v1 = vcombine.low %v154_v50, %v158_v51 }
  0xad   :  { %4152 = vmatpush1.bf16.msra.mxu0 %v11645_v7  ;;  %4047 = vmatprep.mubr.bf16.mxu0 %v19201_v62  ;;  %v214_v58 = vld [vmem:[%s19188_s1 + $0x468] sm:$0xff] }
  0xae   :  { %4095 = vmatpush2.bf16.msra.mxu1 %v11581_v9  ;;  %4153 = vmatprep.subr.bf16.mxu0 %v11638_v11  ;;  %v146_v61 = vld [vmem:[%s19188_s1 + $0x248] sm:$0xff]  ;;  %v11598_v3 = vcombine.high %v210_v57, %v214_v58  ;;  %v14239_v9 = vld [vmem:[%s19189_s0 + $0xf8] ss:$36 sps:$4 sm:$0xff]   ;;  %v11597_v13 = vcombine.low %v210_v57, %v214_v58 }
  0xaf   :  { %4096 = vmatprep.subr.bf16.mxu1 %v11574_v12  ;;  %v150_v63 = vld [vmem:[%s19188_s1 + $0x268] sm:$0xff] }
  0xb0   :  { %v11534_v5 = vcombine.high %v146_v61, %v150_v63  ;;  %v202_v6 = vld [vmem:[%s19188_s1 + $0x408] sm:$0xff]  ;;  %v11533_v14 = vcombine.low %v146_v61, %v150_v63 }
  0xb1   :  { %4154 = vmatpush1.bf16.msra.mxu0 %v11637_v18  ;;  %v206_v7 = vld [vmem:[%s19188_s1 + $0x428] sm:$0xff] }
  0xb2   :  { %4097 = vmatpush2.bf16.msra.mxu1 %v11573_v20  ;;  %4155 = vmatprep.subr.bf16.mxu0 %v11630_v22  ;;  %v138_v11 = vld [vmem:[%s19188_s1 + $0x208] sm:$0xff]  ;;  %v11590_v15 = vcombine.high %v202_v6, %v206_v7  ;;  %v11589_v24 = vcombine.low %v202_v6, %v206_v7 }
  0xb3   :  { %4098 = vmatprep.subr.bf16.mxu1 %v11566_v23  ;;  %v142_v12 = vld [vmem:[%s19188_s1 + $0x228] sm:$0xff] }
  0xb4   :  { %4048 = vmatmul.mubr.bf16.gmra.mxu0 %v14177_v26  ;;  %v11526_v16 = vcombine.high %v138_v11, %v142_v12  ;;  %v322_v18 = vld [vmem:[%s19188_s1 + $0x7c8] sm:$0xff]  ;;  %v11525_v27 = vcombine.low %v138_v11, %v142_v12 }
  0xb5   :  { %4156 = vmatpush1.bf16.msra.mxu0 %v11629_v30  ;;  %4057 = vmatprep.mubr.bf16.mxu0 %v19201_v62  ;;  %v326_v20 = vld [vmem:[%s19188_s1 + $0x7e8] sm:$0xff] }
  0xb6   :  { %4099 = vmatpush2.bf16.msra.mxu1 %v11565_v31  ;;  %4157 = vmatprep.subr.bf16.mxu0 %v11622_v33  ;;  %v386_v22 = vld [vmem:[%s19188_s1 + $0x9c8] sm:$0xff]  ;;  %v11710_v29 = vcombine.high %v322_v18, %v326_v20  ;;  %v11709_v36 = vcombine.low %v322_v18, %v326_v20 }
  0xb7   :  { %4100 = vmatprep.subr.bf16.mxu1 %v11558_v34  ;;  %v390_v23 = vld [vmem:[%s19188_s1 + $0x9e8] sm:$0xff] }
  0xb8   :  { %v14263_v25 = vld [vmem:[%s19189_s0 + $0xc] ss:$36 sps:$4 sm:$0xff]   ;;  %v11774_v30 = vcombine.high %v386_v22, %v390_v23  ;;  %v11773_v38 = vcombine.low %v386_v22, %v390_v23 }
  0xb9   :  { %4158 = vmatpush1.bf16.msra.mxu0 %v11621_v40  ;;  %v314_v31 = vld [vmem:[%s19188_s1 + $0x788] sm:$0xff] }
  0xba   :  { %4101 = vmatpush2.bf16.msra.mxu1 %v11557_v42  ;;  %4159 = vmatprep.subr.bf16.mxu0 %v11614_v44  ;;  %v318_v33 = vld [vmem:[%s19188_s1 + $0x7a8] sm:$0xff] }
  0xbb   :  { %4102 = vmatprep.subr.bf16.mxu1 %v11550_v45  ;;  %v378_v34 = vld [vmem:[%s19188_s1 + $0x988] sm:$0xff]  ;;  %v11702_v39 = vcombine.high %v314_v31, %v318_v33  ;;  %v11701_v48 = vcombine.low %v314_v31, %v318_v33 }
  0xbc   :  { %4058 = vmatmul.mubr.bf16.gmra.mxu0 %v14208_v49  ;;  %v382_v35 = vld [vmem:[%s19188_s1 + $0x9a8] sm:$0xff] }
  0xbd   :  { %4160 = vmatpush1.bf16.msra.mxu0 %v11613_v53  ;;  %4067 = vmatprep.mubr.bf16.mxu0 %v19201_v62  ;;  %v11766_v40 = vcombine.high %v378_v34, %v382_v35  ;;  %v306_v42 = vld [vmem:[%s19188_s1 + $0x748] sm:$0xff]  ;;  %v11765_v50 = vcombine.low %v378_v34, %v382_v35 }
  0xbe   :  { %4103 = vmatpush2.bf16.msra.mxu1 %v11549_v54  ;;  %4161 = vmatprep.subr.bf16.mxu0 %v11606_v55  ;;  %v310_v44 = vld [vmem:[%s19188_s1 + $0x768] sm:$0xff] }
  0xbf   :  { %4104 = vmatprep.subr.bf16.mxu1 %v11542_v56  ;;  %v370_v45 = vld [vmem:[%s19188_s1 + $0x948] sm:$0xff]  ;;  %v11694_v51 = vcombine.high %v306_v42, %v310_v44  ;;  %v11693_v57 = vcombine.low %v306_v42, %v310_v44 }
  0xc0   :  { %v374_v47 = vld [vmem:[%s19188_s1 + $0x968] sm:$0xff] }
  0xc1   :  { %4162 = vmatpush1.bf16.msra.mxu0 %v11605_v0  ;;  %v11758_v53 = vcombine.high %v370_v45, %v374_v47  ;;  %v298_v54 = vld [vmem:[%s19188_s1 + $0x708] sm:$0xff]  ;;  %v11757_v58 = vcombine.low %v370_v45, %v374_v47 }
  0xc2   :  { %4105 = vmatpush2.bf16.msra.mxu1 %v11541_v1  ;;  %4163 = vmatprep.subr.bf16.mxu0 %v11598_v3  ;;  %v302_v55 = vld [vmem:[%s19188_s1 + $0x728] sm:$0xff] }
  0xc3   :  { %4106 = vmatprep.subr.bf16.mxu1 %v11534_v5  ;;  %v366_v56 = vld [vmem:[%s19188_s1 + $0x928] sm:$0xff]  ;;  %v11686_v61 = vcombine.high %v298_v54, %v302_v55  ;;  %v11685_v5 = vcombine.low %v298_v54, %v302_v55 }
  0xc4   :  { %4068 = vmatmul.mubr.bf16.gmra.mxu0 %v14239_v9  ;;  %v294_v0 = vld [vmem:[%s19188_s1 + $0x6e8] sm:$0xff] }
  0xc5   :  { %4164 = vmatpush1.bf16.msra.mxu0 %v11597_v13  ;;  %4183 = vmatprep.mubr.bf16.mxu0 %v14263_v25  ;;  %v354_v1 = vld [vmem:[%s19188_s1 + $0x8c8] sm:$0xff] }
  0xc6   :  { %4107 = vmatpush2.bf16.msra.mxu1 %v11533_v14  ;;  %4165 = vmatprep.subr.bf16.mxu0 %v11590_v15  ;;  %v358_v3 = vld [vmem:[%s19188_s1 + $0x8e8] sm:$0xff] }
  0xc7   :  { %4108 = vmatprep.subr.bf16.mxu1 %v11526_v16  ;;  %v11742_v11 = vcombine.high %v354_v1, %v358_v3  ;;  %v282_v12 = vld [vmem:[%s19188_s1 + $0x688] sm:$0xff]  ;;  %v11741_v16 = vcombine.low %v354_v1, %v358_v3  ;;  %v13360_v3 = vld [vmem:[%s19189_s0 + $0x54] ss:$36 sps:$4 sm:$0xff]  }
  0xc8   :  { %v286_v13 = vld [vmem:[%s19188_s1 + $0x6a8] sm:$0xff] }
  0xc9   :  { %4166 = vmatpush1.bf16.msra.mxu0 %v11589_v24  ;;  %v350_v14 = vld [vmem:[%s19188_s1 + $0x8a8] sm:$0xff]  ;;  %v11670_v18 = vcombine.high %v282_v12, %v286_v13 }
  0xca   :  { %4109 = vmatpush2.bf16.msra.mxu1 %v11525_v27  ;;  %4167 = vmatprep.subr.bf16.mxu0 %v11710_v29  ;;  %v278_v22 = vld [vmem:[%s19188_s1 + $0x668] sm:$0xff]  ;;  %v11669_v27 = vcombine.low %v282_v12, %v286_v13 }
  0xcb   :  { %4224 = vmatprep.subr.bf16.mxu1 %v11774_v30  ;;  %v338_v23 = vld [vmem:[%s19188_s1 + $0x848] sm:$0xff] }
  0xcc   :  { %v342_v24 = vld [vmem:[%s19188_s1 + $0x868] sm:$0xff] }
  0xcd   :  { %4111 = vmatmul.mubr.bf16.vlgmr.msra.gmra.mxu1 %v13719_v10  ;;  %4168 = vmatpush2.bf16.msra.mxu0 %v11709_v36  ;;  %v362_v10 = vld [vmem:[%s19188_s1 + $0x908] sm:$0xff]  ;;  %v11726_v31 = vcombine.high %v338_v23, %v342_v24 }
  0xce   :  { %4225 = vmatpush1.bf16.msra.mxu1 %v11773_v38  ;;  %4169 = vmatprep.subr.bf16.mxu0 %v11702_v39  ;;  %v11750_v63 = vcombine.high %v362_v10, %v366_v56  ;;  %v11749_v6 = vcombine.low %v362_v10, %v366_v56  ;;  %v266_v33 = vld [vmem:[%s19188_s1 + $0x608] sm:$0xff]  ;;  %v11725_v38 = vcombine.low %v338_v23, %v342_v24 }
  0xcf   :  { %4226 = vmatprep.subr.bf16.mxu1 %v11766_v40  ;;  %4120 = vmatprep.mubr.bf16.mxu1 %v13742_v21  ;;  %v290_v21 = vld [vmem:[%s19188_s1 + $0x6c8] sm:$0xff] }
  0xd0   :  { %v11678_v7 = vcombine.high %v290_v21, %v294_v0  ;;  %v11677_v15 = vcombine.low %v290_v21, %v294_v0  ;;  %v270_v34 = vld [vmem:[%s19188_s1 + $0x628] sm:$0xff] }
  0xd1   :  { %4170 = vmatpush2.bf16.msra.mxu0 %v11701_v48  ;;  %v334_v35 = vld [vmem:[%s19188_s1 + $0x828] sm:$0xff]  ;;  %v11654_v39 = vcombine.high %v266_v33, %v270_v34  ;;  %v11653_v47 = vcombine.low %v266_v33, %v270_v34 }
  0xd2   :  { %4227 = vmatpush1.bf16.msra.mxu1 %v11765_v50  ;;  %4171 = vmatprep.subr.bf16.mxu0 %v11694_v51  ;;  %v518_v42 = vld [vmem:[%s19188_s1 + $0xde8] sm:$0xff] }
  0xd3   :  { %4228 = vmatprep.subr.bf16.mxu1 %v11758_v53  ;;  %v450_v44 = vld [vmem:[%s19188_s1 + $0xbc8] sm:$0xff] }
  0xd4   :  { %v454_v45 = vld [vmem:[%s19188_s1 + $0xbe8] sm:$0xff] }
  0xd5   :  { %4172 = vmatpush2.bf16.msra.mxu0 %v11693_v57  ;;  %4121 = vmatmul.mubr.bf16.gmra.mxu1 %v13767_v32  ;;  %v346_v32 = vld [vmem:[%s19188_s1 + $0x888] sm:$0xff]  ;;  %v11838_v51 = vcombine.high %v450_v44, %v454_v45  ;;  %v11837_v56 = vcombine.low %v450_v44, %v454_v45  ;;  %v13363_v45 = vld [vmem:[%s19189_s0 + $0x98] ss:$36 sps:$4 sm:$0xff]  }
  0xd6   :  { %4229 = vmatpush1.bf16.msra.mxu1 %v11757_v58  ;;  %4173 = vmatprep.subr.bf16.mxu0 %v11686_v61  ;;  %v11734_v20 = vcombine.high %v346_v32, %v350_v14  ;;  %v11733_v29 = vcombine.low %v346_v32, %v350_v14  ;;  %v506_v53 = vld [vmem:[%s19188_s1 + $0xd88] sm:$0xff] }
  0xd7   :  { %4230 = vmatprep.subr.bf16.mxu1 %v11750_v63  ;;  %4130 = vmatprep.mubr.bf16.mxu1 %v13784_v41  ;;  %v274_v41 = vld [vmem:[%s19188_s1 + $0x648] sm:$0xff] }
  0xd8   :  { %v11662_v30 = vcombine.high %v274_v41, %v278_v22  ;;  %v11661_v36 = vcombine.low %v274_v41, %v278_v22  ;;  %v510_v54 = vld [vmem:[%s19188_s1 + $0xda8] sm:$0xff]  ;;  %v13361_v22 = vld [vmem:[%s19189_s0 + $0x50] ss:$36 sps:$4 sm:$0xff]  }
  0xd9   :  { %4174 = vmatpush2.bf16.msra.mxu0 %v11685_v5  ;;  %v446_v55 = vld [vmem:[%s19188_s1 + $0xba8] sm:$0xff]  ;;  %v11894_v57 = vcombine.high %v506_v53, %v510_v54  ;;  %v11893_v1 = vcombine.low %v506_v53, %v510_v54 }
  0xda   :  { %4231 = vmatpush1.bf16.msra.mxu1 %v11749_v6  ;;  %4175 = vmatprep.subr.bf16.mxu0 %v11678_v7  ;;  %v502_v61 = vld [vmem:[%s19188_s1 + $0xd68] sm:$0xff] }
  0xdb   :  { %4232 = vmatprep.subr.bf16.mxu1 %v11742_v11  ;;  %v13359_v63 = vld [vmem:[%s19189_s0 + $0x8] ss:$36 sps:$4 sm:$0xff]  }
  0xdc   :  { %v434_v21 = vld [vmem:[%s19188_s1 + $0xb48] sm:$0xff] }
  0xdd   :  { %4176 = vmatpush2.bf16.msra.mxu0 %v11677_v15  ;;  %4131 = vmatmul.mubr.bf16.gmra.mxu1 %v13809_v52  ;;  %v330_v52 = vld [vmem:[%s19188_s1 + $0x808] sm:$0xff] }
  0xde   :  { %4233 = vmatpush1.bf16.msra.mxu1 %v11741_v16  ;;  %4177 = vmatprep.subr.bf16.mxu0 %v11670_v18  ;;  %v11718_v40 = vcombine.high %v330_v52, %v334_v35  ;;  %v11717_v48 = vcombine.low %v330_v52, %v334_v35  ;;  %v438_v0 = vld [vmem:[%s19188_s1 + $0xb68] sm:$0xff] }
  0xdf   :  { %4234 = vmatprep.subr.bf16.mxu1 %v11734_v20  ;;  %4140 = vmatprep.mubr.bf16.mxu1 %v13823_v60  ;;  %v514_v60 = vld [vmem:[%s19188_s1 + $0xdc8] sm:$0xff]  ;;  %v11822_v7 = vcombine.high %v434_v21, %v438_v0  ;;  %v11821_v15 = vcombine.low %v434_v21, %v438_v0 }
  0xe0   :  { %v11902_v50 = vcombine.high %v514_v60, %v518_v42  ;;  %v11901_v10 = vcombine.low %v514_v60, %v518_v42  ;;  %v490_v11 = vld [vmem:[%s19188_s1 + $0xd08] sm:$0xff] }
  0xe1   :  { %4178 = vmatpush2.bf16.msra.mxu0 %v11669_v27  ;;  %v494_v12 = vld [vmem:[%s19188_s1 + $0xd28] sm:$0xff] }
  0xe2   :  { %4235 = vmatpush1.bf16.msra.mxu1 %v11733_v29  ;;  %4179 = vmatprep.subr.bf16.mxu0 %v11662_v30  ;;  %v426_v13 = vld [vmem:[%s19188_s1 + $0xb08] sm:$0xff]  ;;  %v11878_v16 = vcombine.high %v490_v11, %v494_v12  ;;  %v11877_v27 = vcombine.low %v490_v11, %v494_v12  ;;  %v13362_v29 = vld [vmem:[%s19189_s0 + $0x9c] ss:$36 sps:$4 sm:$0xff]  }
  0xe3   :  { %4236 = vmatprep.subr.bf16.mxu1 %v11726_v31  ;;  %v430_v32 = vld [vmem:[%s19188_s1 + $0xb28] sm:$0xff] }
  0xe4   :  { %v11814_v18 = vcombine.high %v426_v13, %v430_v32  ;;  %v482_v20 = vld [vmem:[%s19188_s1 + $0xcc8] sm:$0xff]  ;;  %v11813_v30 = vcombine.low %v426_v13, %v430_v32 }
  0xe5   :  { %4180 = vmatpush2.bf16.msra.mxu0 %v11661_v36  ;;  %4141 = vmatmul.mubr.bf16.gmra.mxu1 %v13851_v8  ;;  %v442_v8 = vld [vmem:[%s19188_s1 + $0xb88] sm:$0xff] }
  0xe6   :  { %4237 = vmatpush1.bf16.msra.mxu1 %v11725_v38  ;;  %4181 = vmatprep.subr.bf16.mxu0 %v11654_v39  ;;  %v11830_v58 = vcombine.high %v442_v8, %v446_v55  ;;  %v11829_v5 = vcombine.low %v442_v8, %v446_v55  ;;  %v486_v41 = vld [vmem:[%s19188_s1 + $0xce8] sm:$0xff] }
  0xe7   :  { %4238 = vmatprep.subr.bf16.mxu1 %v11718_v40  ;;  %4256 = vmatprep.mubr.bf16.mxu1 %v13865_v17  ;;  %v498_v17 = vld [vmem:[%s19188_s1 + $0xd48] sm:$0xff]  ;;  %v11870_v31 = vcombine.high %v482_v20, %v486_v41  ;;  %v11869_v38 = vcombine.low %v482_v20, %v486_v41 }
  0xe8   :  { %v11886_v6 = vcombine.high %v498_v17, %v502_v61  ;;  %v11885_v14 = vcombine.low %v498_v17, %v502_v61  ;;  %v418_v23 = vld [vmem:[%s19188_s1 + $0xac8] sm:$0xff] }
  0xe9   :  { %4182 = vmatpush2.bf16.msra.mxu0 %v11653_v47  ;;  %v422_v24 = vld [vmem:[%s19188_s1 + $0xae8] sm:$0xff] }
  0xea   :  { %4239 = vmatpush1.bf16.msra.mxu1 %v11717_v48  ;;  %4297 = vmatprep.subr.bf16.mxu0 %v11902_v50  ;;  %v11806_v33 = vcombine.high %v418_v23, %v422_v24  ;;  %v474_v34 = vld [vmem:[%s19188_s1 + $0xc88] sm:$0xff]  ;;  %v11805_v39 = vcombine.low %v418_v23, %v422_v24 }
  0xeb   :  { %4240 = vmatprep.subr.bf16.mxu1 %v11838_v51  ;;  %v478_v52 = vld [vmem:[%s19188_s1 + $0xca8] sm:$0xff] }
  0xec   :  { %4184 = vmatmul.mubr.bf16.vlgmr.msra.gmra.mxu0 %v13359_v63  ;;  %v410_v35 = vld [vmem:[%s19188_s1 + $0xa88] sm:$0xff]  ;;  %v11862_v40 = vcombine.high %v474_v34, %v478_v52  ;;  %v11861_v50 = vcombine.low %v474_v34, %v478_v52 }
  0xed   :  { %4298 = vmatpush1.bf16.msra.mxu0 %v11901_v10  ;;  %4193 = vmatprep.mubr.bf16.mxu0 %v13360_v3  ;;  %v414_v36 = vld [vmem:[%s19188_s1 + $0xaa8] sm:$0xff] }
  0xee   :  { %4241 = vmatpush2.bf16.msra.mxu1 %v11837_v56  ;;  %4299 = vmatprep.subr.bf16.mxu0 %v11894_v57  ;;  %v11798_v60 = vcombine.high %v410_v35, %v414_v36  ;;  %v466_v42 = vld [vmem:[%s19188_s1 + $0xc48] sm:$0xff]  ;;  %v11797_v53 = vcombine.low %v410_v35, %v414_v36 }
  0xef   :  { %4242 = vmatprep.subr.bf16.mxu1 %v11830_v58  ;;  %v470_v44 = vld [vmem:[%s19188_s1 + $0xc68] sm:$0xff] }
  0xf0   :  { %v402_v47 = vld [vmem:[%s19188_s1 + $0xa48] sm:$0xff]  ;;  %v11854_v54 = vcombine.high %v466_v42, %v470_v44  ;;  %v11853_v58 = vcombine.low %v466_v42, %v470_v44 }
  0xf1   :  { %4300 = vmatpush1.bf16.msra.mxu0 %v11893_v1  ;;  %v406_v48 = vld [vmem:[%s19188_s1 + $0xa68] sm:$0xff]  ;;  %v13365_v1 = vld [vmem:[%s19189_s0 + $0xe0] ss:$36 sps:$4 sm:$0xff]  }
  0xf2   :  { %4243 = vmatpush2.bf16.msra.mxu1 %v11829_v5  ;;  %4301 = vmatprep.subr.bf16.mxu0 %v11886_v6  ;;  %v13364_v51 = vld [vmem:[%s19189_s0 + $0xe4] ss:$36 sps:$4 sm:$0xff]   ;;  %v11790_v8 = vcombine.high %v402_v47, %v406_v48  ;;  %v11789_v17 = vcombine.low %v402_v47, %v406_v48 }
  0xf3   :  { %4244 = vmatprep.subr.bf16.mxu1 %v11822_v7  ;;  %v458_v55 = vld [vmem:[%s19188_s1 + $0xc08] sm:$0xff]  ;;  %v13366_v7 = vld [vmem:[%s19189_s0 + $0x1c] ss:$36 sps:$4 sm:$0xff]  }
  0xf4   :  { %4194 = vmatmul.mubr.bf16.gmra.mxu0 %v13361_v22  ;;  %v462_v10 = vld [vmem:[%s19188_s1 + $0xc28] sm:$0xff] }
  0xf5   :  { %4302 = vmatpush1.bf16.msra.mxu0 %v11885_v14  ;;  %4203 = vmatprep.mubr.bf16.mxu0 %v13362_v29  ;;  %v394_v56 = vld [vmem:[%s19188_s1 + $0xa08] sm:$0xff]  ;;  %v11846_v61 = vcombine.high %v458_v55, %v462_v10  ;;  %v11845_v6 = vcombine.low %v458_v55, %v462_v10 }
  0xf6   :  { %4245 = vmatpush2.bf16.msra.mxu1 %v11821_v15  ;;  %4303 = vmatprep.subr.bf16.mxu0 %v11878_v16  ;;  %v398_v57 = vld [vmem:[%s19188_s1 + $0xa28] sm:$0xff] }
  0xf7   :  { %4246 = vmatprep.subr.bf16.mxu1 %v11814_v18  ;;  %v11782_v63 = vcombine.high %v394_v56, %v398_v57  ;;  %v578_v21 = vld [vmem:[%s19188_s1 + $0xfc8] sm:$0xff]  ;;  %v11781_v11 = vcombine.low %v394_v56, %v398_v57 }
  0xf8   :  { %v582_v0 = vld [vmem:[%s19188_s1 + $0xfe8] sm:$0xff] }
  0xf9   :  { %4304 = vmatpush1.bf16.msra.mxu0 %v11877_v27  ;;  %v642_v3 = vld [vmem:[%s19188_s1 + $0x11c8] sm:$0xff]  ;;  %v11966_v12 = vcombine.high %v578_v21, %v582_v0  ;;  %v11965_v18 = vcombine.low %v578_v21, %v582_v0 }
  0xfa   :  { %4247 = vmatpush2.bf16.msra.mxu1 %v11813_v30  ;;  %4305 = vmatprep.subr.bf16.mxu0 %v11870_v31  ;;  %v646_v5 = vld [vmem:[%s19188_s1 + $0x11e8] sm:$0xff] }
  0xfb   :  { %4248 = vmatprep.subr.bf16.mxu1 %v11806_v33  ;;  %v12030_v13 = vcombine.high %v642_v3, %v646_v5  ;;  %v570_v32 = vld [vmem:[%s19188_s1 + $0xf88] sm:$0xff]  ;;  %v12029_v20 = vcombine.low %v642_v3, %v646_v5 }
  0xfc   :  { %4204 = vmatmul.mubr.bf16.gmra.mxu0 %v13363_v45  ;;  %v574_v14 = vld [vmem:[%s19188_s1 + $0xfa8] sm:$0xff] }
  0xfd   :  { %4306 = vmatpush1.bf16.msra.mxu0 %v11869_v38  ;;  %4213 = vmatprep.mubr.bf16.mxu0 %v13364_v51  ;;  %v634_v15 = vld [vmem:[%s19188_s1 + $0x1188] sm:$0xff]  ;;  %v11958_v41 = vcombine.high %v570_v32, %v574_v14  ;;  %v11957_v33 = vcombine.low %v570_v32, %v574_v14 }
  0xfe   :  { %4249 = vmatpush2.bf16.msra.mxu1 %v11805_v39  ;;  %4307 = vmatprep.subr.bf16.mxu0 %v11862_v40  ;;  %v638_v16 = vld [vmem:[%s19188_s1 + $0x11a8] sm:$0xff] }
  0xff   :  { %4250 = vmatprep.subr.bf16.mxu1 %v11798_v60  ;;  %v12022_v22 = vcombine.high %v634_v15, %v638_v16  ;;  %v562_v23 = vld [vmem:[%s19188_s1 + $0xf48] sm:$0xff]  ;;  %v12021_v35 = vcombine.low %v634_v15, %v638_v16 }
 0x100   :  { %v566_v24 = vld [vmem:[%s19188_s1 + $0xf68] sm:$0xff] }
 0x101   :  { %4308 = vmatpush1.bf16.msra.mxu0 %v11861_v50  ;;  %v626_v29 = vld [vmem:[%s19188_s1 + $0x1148] sm:$0xff]  ;;  %v11950_v36 = vcombine.high %v562_v23, %v566_v24  ;;  %v11949_v47 = vcombine.low %v562_v23, %v566_v24 }
 0x102   :  { %4251 = vmatpush2.bf16.msra.mxu1 %v11797_v53  ;;  %4309 = vmatprep.subr.bf16.mxu0 %v11854_v54  ;;  %v630_v30 = vld [vmem:[%s19188_s1 + $0x1168] sm:$0xff] }
 0x103   :  { %4252 = vmatprep.subr.bf16.mxu1 %v11790_v8  ;;  %v12014_v39 = vcombine.high %v626_v29, %v630_v30  ;;  %v554_v40 = vld [vmem:[%s19188_s1 + $0xf08] sm:$0xff]  ;;  %v12013_v51 = vcombine.low %v626_v29, %v630_v30 }
 0x104   :  { %4214 = vmatmul.mubr.bf16.gmra.mxu0 %v13365_v1  ;;  %v618_v44 = vld [vmem:[%s19188_s1 + $0x1108] sm:$0xff] }
 0x105   :  { %4310 = vmatpush1.bf16.msra.mxu0 %v11853_v58  ;;  %4329 = vmatprep.mubr.bf16.mxu0 %v13366_v7  ;;  %v546_v55 = vld [vmem:[%s19188_s1 + $0xec8] sm:$0xff] }
 0x106   :  { %4253 = vmatpush2.bf16.msra.mxu1 %v11789_v17  ;;  %4311 = vmatprep.subr.bf16.mxu0 %v11846_v61  ;;  %v550_v10 = vld [vmem:[%s19188_s1 + $0xee8] sm:$0xff] }
 0x107   :  { %4254 = vmatprep.subr.bf16.mxu1 %v11782_v63  ;;  %v610_v56 = vld [vmem:[%s19188_s1 + $0x10c8] sm:$0xff]  ;;  %v11934_v21 = vcombine.high %v546_v55, %v550_v10 }
 0x108   :  { %v3820_v31 = vpop.f32.mrf.mxu1  ;;  %v614_v57 = vld [vmem:[%s19188_s1 + $0x10e8] sm:$0xff] }
 0x109   :  { %4312 = vmatpush1.bf16.msra.mxu0 %v11845_v6  ;;  %v3747_v27 = vpop.f32.mrf.mxu0  ;;  %v11998_v3 = vcombine.high %v610_v56, %v614_v57  ;;  %v538_v5 = vld [vmem:[%s19188_s1 + $0xe88] sm:$0xff]  ;;  %v11997_v14 = vcombine.low %v610_v56, %v614_v57  ;;  %v135_v56 = vld [vmem:[%s19188_s1 + $0x1f0] sm:$0xff] }
 0x10a   :  { %4255 = vmatpush2.bf16.msra.mxu1 %v11781_v11  ;;  %4313 = vmatprep.subr.bf16.mxu0 %v11966_v12  ;;  %v14515_v34 = vadd.f32 %v3820_v31, %v3747_v27  ;;  %v3822_v38 = vpop.f32.mrf.mxu1  ;;  %v602_v7 = vld [vmem:[%s19188_s1 + $0x1088] sm:$0xff] }
 0x10b   :  { %4370 = vmatprep.subr.bf16.mxu1 %v12030_v13  ;;  %v3749_v52 = vpop.f32.mrf.mxu0  ;;  %v606_v11 = vld [vmem:[%s19188_s1 + $0x10a8] sm:$0xff]  ;;  %v11933_v13 = vcombine.low %v546_v55, %v550_v10  ;;  %v131_v10 = vld [vmem:[%s19188_s1 + $0x1d0] sm:$0xff] }
 0x10c   :  { %v14524_v60 = vadd.f32 %v3822_v38, %v3749_v52  ;;  %v3824_v45 = vpop.f32.mrf.mxu1  ;;  %v594_v24 = vld [vmem:[%s19188_s1 + $0x1048] sm:$0xff] }
 0x10d   :  { %4257 = vmatmul.mubr.bf16.vlgmr.msra.gmra.mxu1 %v13983_v37  ;;  %4314 = vmatpush2.bf16.msra.mxu0 %v11965_v18  ;;  %v558_v37 = vld [vmem:[%s19188_s1 + $0xf28] sm:$0xff]  ;;  %v3751_v42 = vpop.f32.mrf.mxu0 }
 0x10e   :  { %4371 = vmatpush1.bf16.msra.mxu1 %v12029_v20  ;;  %4315 = vmatprep.subr.bf16.mxu0 %v11958_v41  ;;  %v14532_v48 = vadd.f32 %v3824_v45, %v3751_v42  ;;  %v11942_v53 = vcombine.high %v554_v40, %v558_v37  ;;  %v14536_v54 = vpop.f32.mrf.mxu1  ;;  %v11941_v17 = vcombine.low %v554_v40, %v558_v37  ;;  %v530_v41 = vld [vmem:[%s19188_s1 + $0xe48] sm:$0xff] }
 0x10f   :  { %4372 = vmatprep.subr.bf16.mxu1 %v12022_v22  ;;  %4266 = vmatprep.mubr.bf16.mxu1 %v13997_v46  ;;  %v622_v46 = vld [vmem:[%s19188_s1 + $0x1128] sm:$0xff]  ;;  %v14534_v50 = vpop.f32.mrf.mxu0  ;;  %v11990_v20 = vcombine.high %v602_v7, %v606_v11 }
 0x110   :  { %v12006_v8 = vcombine.high %v618_v44, %v622_v46  ;;  %v3830_v61 = vpop.f32.mrf.mxu1  ;;  %v12005_v63 = vcombine.low %v618_v44, %v622_v46  ;;  %v534_v22 = vld [vmem:[%s19188_s1 + $0xe68] sm:$0xff] }
 0x111   :  { %4316 = vmatpush2.bf16.msra.mxu0 %v11957_v33  ;;  %v3757_v58 = vpop.f32.mrf.mxu0  ;;  %v598_v27 = vld [vmem:[%s19188_s1 + $0x1068] sm:$0xff]  ;;  %v11989_v33 = vcombine.low %v602_v7, %v606_v11  ;;  %v11918_v52 = vcombine.high %v530_v41, %v534_v22  ;;  %v11917_v46 = vcombine.low %v530_v41, %v534_v22  ;;  %v123_v7 = vld [vmem:[%s19188_s1 + $0x190] sm:$0xff] }
 0x112   :  { %4373 = vmatpush1.bf16.msra.mxu1 %v12021_v35  ;;  %4317 = vmatprep.subr.bf16.mxu0 %v11950_v36  ;;  %v14551_v0 = vadd.f32 %v3830_v61, %v3757_v58  ;;  %v3832_v6 = vpop.f32.mrf.mxu1  ;;  %v11982_v38 = vcombine.high %v594_v24, %v598_v27  ;;  %v586_v37 = vld [vmem:[%s19188_s1 + $0x1008] sm:$0xff]  ;;  %v259_v58 = vld [vmem:[%s19188_s1 + $0x5d0] sm:$0xff] }
 0x113   :  { %4374 = vmatprep.subr.bf16.mxu1 %v12014_v39  ;;  %v3759_v1 = vpop.f32.mrf.mxu0  ;;  %v522_v39 = vld [vmem:[%s19188_s1 + $0xe08] sm:$0xff] }
 0x114   :  { %v14566_v12 = vadd.f32 %v3832_v6, %v3759_v1  ;;  %v3834_v32 = vpop.f32.mrf.mxu1  ;;  %v590_v42 = vld [vmem:[%s19188_s1 + $0x1028] sm:$0xff] }
 0x115   :  { %4267 = vmatmul.mubr.bf16.gmra.mxu1 %v14025_v59  ;;  %4318 = vmatpush2.bf16.msra.mxu0 %v11949_v47  ;;  %v542_v59 = vld [vmem:[%s19188_s1 + $0xea8] sm:$0xff]  ;;  %v11981_v47 = vcombine.low %v594_v24, %v598_v27  ;;  %v11974_v55 = vcombine.high %v586_v37, %v590_v42  ;;  %v11973_v1 = vcombine.low %v586_v37, %v590_v42  ;;  %v107_v37 = vld [vmem:[%s19188_s1 + $0x110] sm:$0xff] }
 0x116   :  { %4375 = vmatpush1.bf16.msra.mxu1 %v12013_v51  ;;  %4319 = vmatprep.subr.bf16.mxu0 %v11942_v53  ;;  %v11926_v15 = vcombine.high %v538_v5, %v542_v59  ;;  %v14578_v23 = vpop.f32.mrf.mxu1  ;;  %v11925_v30 = vcombine.low %v538_v5, %v542_v59  ;;  %v235_v42 = vld [vmem:[%s19188_s1 + $0x510] sm:$0xff] }
 0x117   :  { %4376 = vmatprep.subr.bf16.mxu1 %v12006_v8  ;;  %4276 = vmatprep.mubr.bf16.mxu1 %v14039_v4  ;;  %v3761_v4 = vpop.f32.mrf.mxu0 }
 0x118   :  { %v14568_v16 = vadd.f32 %v3834_v32, %v3761_v4  ;;  %v251_v4 = vld [vmem:[%s19188_s1 + $0x590] sm:$0xff] }
 0x119   :  { %4320 = vmatpush2.bf16.msra.mxu0 %v11941_v17  ;;  %v14570_v18 = vpop.f32.mrf.mxu0  ;;  %v263_v17 = vld [vmem:[%s19188_s1 + $0x5f0] sm:$0xff] }
 0x11a   :  { %4377 = vmatpush1.bf16.msra.mxu1 %v12005_v63  ;;  %4321 = vmatprep.subr.bf16.mxu0 %v11934_v21  ;;  %v3840_v31 = vpop.f32.mrf.mxu1  ;;  %v11648_v6 = vcombine.high %v259_v58, %v263_v17  ;;  %v11647_v41 = vcombine.low %v259_v58, %v263_v17  ;;  %v227_v58 = vld [vmem:[%s19188_s1 + $0x4d0] sm:$0xff] }
 0x11b   :  { %4378 = vmatprep.subr.bf16.mxu1 %v11998_v3  ;;  %v3767_v29 = vpop.f32.mrf.mxu0  ;;  %v11520_v3 = vcombine.high %v131_v10, %v135_v56  ;;  %v231_v17 = vld [vmem:[%s19188_s1 + $0x4f0] sm:$0xff] }
 0x11c   :  { %v14587_v35 = vadd.f32 %v3840_v31, %v3767_v29  ;;  %v3842_v40 = vpop.f32.mrf.mxu1  ;;  %v115_v29 = vld [vmem:[%s19188_s1 + $0x150] sm:$0xff]  ;;  %v13367_v31 = vld [vmem:[%s19189_s0 + $0x18] ss:$36 sps:$4 sm:$0xff]  }
 0x11d   :  { %4277 = vmatmul.mubr.bf16.gmra.mxu1 %v14067_v19  ;;  %4322 = vmatpush2.bf16.msra.mxu0 %v11933_v13  ;;  %v3769_v36 = vpop.f32.mrf.mxu0  ;;  %v526_v19 = vld [vmem:[%s19188_s1 + $0xe28] sm:$0xff]  ;;  %v255_v13 = vld [vmem:[%s19188_s1 + $0x5b0] sm:$0xff] }
 0x11e   :  { %4379 = vmatpush1.bf16.msra.mxu1 %v11997_v14  ;;  %4323 = vmatprep.subr.bf16.mxu0 %v11926_v15  ;;  %v14602_v44 = vadd.f32 %v3842_v40, %v3769_v36  ;;  %v3844_v45 = vpop.f32.mrf.mxu1  ;;  %v11910_v51 = vcombine.high %v522_v39, %v526_v19  ;;  %v11909_v63 = vcombine.low %v522_v39, %v526_v19  ;;  %v13368_v19 = vld [vmem:[%s19189_s0 + $0x64] ss:$36 sps:$4 sm:$0xff]  }
 0x11f   :  { %4380 = vmatprep.subr.bf16.mxu1 %v11990_v20  ;;  %4286 = vmatprep.mubr.bf16.mxu1 %v14081_v28  ;;  %v3771_v28 = vpop.f32.mrf.mxu0  ;;  %v11519_v14 = vcombine.low %v131_v10, %v135_v56  ;;  %v11640_v27 = vcombine.high %v251_v4, %v255_v13  ;;  %v103_v10 = vld [vmem:[%s19188_s1 + $0xf0] sm:$0xff]  ;;  %v13369_v56 = vld [vmem:[%s19189_s0 + $0x60] ss:$36 sps:$4 sm:$0xff]  }
 0x120   :  { %v14604_v53 = vadd.f32 %v3844_v45, %v3771_v28  ;;  %v14614_v57 = vpop.f32.mrf.mxu1  ;;  %v239_v28 = vld [vmem:[%s19188_s1 + $0x530] sm:$0xff] }
 0x121   :  { %4324 = vmatpush2.bf16.msra.mxu0 %v11925_v30  ;;  %v14606_v8 = vpop.f32.mrf.mxu0  ;;  %v119_v30 = vld [vmem:[%s19188_s1 + $0x170] sm:$0xff] }
 0x122   :  { %4381 = vmatpush1.bf16.msra.mxu1 %v11989_v33  ;;  %4325 = vmatprep.subr.bf16.mxu0 %v11918_v52  ;;  %v243_v33 = vld [vmem:[%s19188_s1 + $0x550] sm:$0xff]  ;;  %v11504_v39 = vcombine.high %v115_v29, %v119_v30 }
 0x123   :  { %4382 = vmatprep.subr.bf16.mxu1 %v11982_v38  ;;  %v3777_v61 = vpop.f32.mrf.mxu0  ;;  %v247_v52 = vld [vmem:[%s19188_s1 + $0x570] sm:$0xff]  ;;  %v11639_v38 = vcombine.low %v251_v4, %v255_v13 }
 0x124   :  { %v11632_v40 = vcombine.high %v243_v33, %v247_v52  ;;  %v11631_v45 = vcombine.low %v243_v33, %v247_v52  ;;  %v75_v52 = vld [vmem:[%s19188_s1 + $0x10] sm:$0xff] }
 0x125   :  { %4287 = vmatmul.mubr.bf16.gmra.mxu1 %v14109_v43  ;;  %4326 = vmatpush2.bf16.msra.mxu0 %v11917_v46  ;;  %v3779_v59 = vpop.f32.mrf.mxu0  ;;  %v127_v43 = vld [vmem:[%s19188_s1 + $0x1b0] sm:$0xff]  ;;  %v11503_v46 = vcombine.low %v115_v29, %v119_v30 }
 0x126   :  { %v3850_v21 = vpop.f32.mrf.mxu1  ;;  %4383 = vmatpush1.bf16.msra.mxu1 %v11981_v47  ;;  %4327 = vmatprep.subr.bf16.mxu0 %v11910_v51  ;;  %v11512_v22 = vcombine.high %v123_v7, %v127_v43  ;;  %v11511_v36 = vcombine.low %v123_v7, %v127_v43  ;;  %v11624_v51 = vcombine.high %v235_v42, %v239_v28  ;;  %v223_v7 = vld [vmem:[%s19188_s1 + $0x4b0] sm:$0xff] }
 0x127   :  { %v14623_v5 = vadd.f32 %v3850_v21, %v3777_v61  ;;  %4384 = vmatprep.subr.bf16.mxu1 %v11974_v55  ;;  %4402 = vmatprep.mubr.bf16.mxu1 %v19201_v62  ;;  %v3781_v15 = vpop.f32.mrf.mxu0  ;;  %v99_v55 = vld [vmem:[%s19188_s1 + $0xd0] sm:$0xff] }
 0x128   :  { %v3852_v11 = vpop.f32.mrf.mxu1  ;;  %v11488_v21 = vcombine.high %v99_v55, %v103_v10  ;;  %v11487_v43 = vcombine.low %v99_v55, %v103_v10 }
 0x129   :  { %v14638_v32 = vadd.f32 %v3852_v11, %v3779_v59  ;;  %4328 = vmatpush2.bf16.msra.mxu0 %v11909_v63  ;;  %v11623_v63 = vcombine.low %v235_v42, %v239_v28  ;;  %v91_v59 = vld [vmem:[%s19188_s1 + $0x90] sm:$0xff]  ;;  %v11615_v11 = vcombine.low %v227_v58, %v231_v17 }
 0x12a   :  { %v3854_v20 = vpop.f32.mrf.mxu1  ;;  %4385 = vmatpush1.bf16.msra.mxu1 %v11973_v1  ;;  %4443 = vmatprep.subr.bf16.mxu0 %v11520_v3  ;;  %v13370_v1 = vld [vmem:[%s19189_s0 + $0xac] ss:$36 sps:$4 sm:$0xff]   ;;  %v11616_v3 = vcombine.high %v227_v58, %v231_v17  ;;  %v13374_v17 = vld [vmem:[%s19189_s0 + $0x4] ss:$36 sps:$4 sm:$0xff]  }
 0x12b   :  { %v14640_v24 = vadd.f32 %v3854_v20, %v3781_v15  ;;  %4516 = vmatprep.subr.bf16.mxu1 %v11648_v6  ;;  %v219_v6 = vld [vmem:[%s19188_s1 + $0x490] sm:$0xff]  ;;  %v13371_v20 = vld [vmem:[%s19189_s0 + $0xa8] ss:$36 sps:$4 sm:$0xff]  }
 0x12c   :  { %4330 = vmatmul.mubr.bf16.vlgmr.msra.gmra.mxu0 %v13367_v31  ;;  %v11608_v13 = vcombine.high %v219_v6, %v223_v7  ;;  %v87_v15 = vld [vmem:[%s19188_s1 + $0x70] sm:$0xff]  ;;  %v11607_v29 = vcombine.low %v219_v6, %v223_v7 }
 0x12d   :  { %4403 = vmatmul.mubr.bf16.vlgmr.msra.gmra.mxu1 %v14143_v2  ;;  %4444 = vmatpush1.bf16.msra.mxu0 %v11519_v14  ;;  %v111_v2 = vld [vmem:[%s19188_s1 + $0x130] sm:$0xff] }
 0x12e   :  { %4517 = vmatpush1.bf16.msra.mxu1 %v11647_v41  ;;  %4445 = vmatprep.subr.bf16.mxu0 %v11512_v22  ;;  %v11496_v47 = vcombine.high %v107_v37, %v111_v2  ;;  %v11495_v61 = vcombine.low %v107_v37, %v111_v2  ;;  %v83_v14 = vld [vmem:[%s19188_s1 + $0x50] sm:$0xff] }
 0x12f   :  { %4518 = vmatprep.subr.bf16.mxu1 %v11640_v27  ;;  %4339 = vmatprep.mubr.bf16.mxu0 %v13368_v19  ;;  %v211_v41 = vld [vmem:[%s19188_s1 + $0x450] sm:$0xff]  ;;  %v11472_v30 = vcombine.high %v83_v14, %v87_v15 }
 0x130   :  { %4412 = vmatprep.mubr.bf16.mxu1 %v19201_v62  ;;  %v215_v22 = vld [vmem:[%s19188_s1 + $0x470] sm:$0xff] }
 0x131   :  { %4446 = vmatpush1.bf16.msra.mxu0 %v11511_v36  ;;  %v13372_v31 = vld [vmem:[%s19189_s0 + $0xf4] ss:$36 sps:$4 sm:$0xff]   ;;  %v11600_v33 = vcombine.high %v211_v41, %v215_v22  ;;  %v11599_v19 = vcombine.low %v211_v41, %v215_v22 }
 0x132   :  { %4519 = vmatpush1.bf16.msra.mxu1 %v11639_v38  ;;  %4447 = vmatprep.subr.bf16.mxu0 %v11504_v39  ;;  %v203_v36 = vld [vmem:[%s19188_s1 + $0x410] sm:$0xff]  ;;  %v11471_v39 = vcombine.low %v83_v14, %v87_v15 }
 0x133   :  { %4520 = vmatprep.subr.bf16.mxu1 %v11632_v40  ;;  %v207_v38 = vld [vmem:[%s19188_s1 + $0x430] sm:$0xff] }
 0x134   :  { %4340 = vmatmul.mubr.bf16.gmra.mxu0 %v13369_v56  ;;  %v11592_v37 = vcombine.high %v203_v36, %v207_v38  ;;  %v195_v2 = vld [vmem:[%s19188_s1 + $0x3d0] sm:$0xff] }
 0x135   :  { %4448 = vmatpush1.bf16.msra.mxu0 %v11503_v46  ;;  %4413 = vmatmul.mubr.bf16.gmra.mxu1 %v14177_v26  ;;  %v95_v26 = vld [vmem:[%s19188_s1 + $0xb0] sm:$0xff] }
 0x136   :  { %4521 = vmatpush1.bf16.msra.mxu1 %v11631_v45  ;;  %4449 = vmatprep.subr.bf16.mxu0 %v11496_v47  ;;  %v11480_v4 = vcombine.high %v91_v59, %v95_v26  ;;  %v11479_v27 = vcombine.low %v91_v59, %v95_v26  ;;  %v199_v42 = vld [vmem:[%s19188_s1 + $0x3f0] sm:$0xff]  ;;  %v14772_v59 = vpop.f32.mrf.mxu1 }
 0x137   :  { %4522 = vmatprep.subr.bf16.mxu1 %v11624_v51  ;;  %4349 = vmatprep.mubr.bf16.mxu0 %v13370_v1  ;;  %v13373_v28 = vld [vmem:[%s19189_s0 + $0xf0] ss:$36 sps:$4 sm:$0xff]   ;;  %v11591_v51 = vcombine.low %v203_v36, %v207_v38  ;;  %v11584_v55 = vcombine.high %v195_v2, %v199_v42 }
 0x138   :  { %4422 = vmatprep.mubr.bf16.mxu1 %v19201_v62  ;;  %v323_v46 = vld [vmem:[%s19188_s1 + $0x7d0] sm:$0xff] }
 0x139   :  { %4450 = vmatpush1.bf16.msra.mxu0 %v11495_v61  ;;  %v327_v45 = vld [vmem:[%s19188_s1 + $0x7f0] sm:$0xff] }
 0x13a   :  { %4523 = vmatpush1.bf16.msra.mxu1 %v11623_v63  ;;  %4451 = vmatprep.subr.bf16.mxu0 %v11488_v21  ;;  %v11712_v10 = vcombine.high %v323_v46, %v327_v45  ;;  %v187_v56 = vld [vmem:[%s19188_s1 + $0x390] sm:$0xff]  ;;  %v11583_v63 = vcombine.low %v195_v2, %v199_v42  ;;  %v14770_v21 = vpop.f32.mrf.mxu0  ;;  %v11711_v1 = vcombine.low %v323_v46, %v327_v45 }
 0x13b   :  { %4524 = vmatprep.subr.bf16.mxu1 %v11616_v3  ;;  %v191_v58 = vld [vmem:[%s19188_s1 + $0x3b0] sm:$0xff] }
 0x13c   :  { %4350 = vmatmul.mubr.bf16.gmra.mxu0 %v13371_v20  ;;  %v319_v61 = vld [vmem:[%s19188_s1 + $0x7b0] sm:$0xff]  ;;  %v11576_v3 = vcombine.high %v187_v56, %v191_v58  ;;  %v11575_v14 = vcombine.low %v187_v56, %v191_v58 }
 0x13d   :  { %4452 = vmatpush1.bf16.msra.mxu0 %v11487_v43  ;;  %4423 = vmatmul.mubr.bf16.gmra.mxu1 %v14208_v49  ;;  %v79_v49 = vld [vmem:[%s19188_s1 + $0x30] sm:$0xff] }
 0x13e   :  { %4525 = vmatpush1.bf16.msra.mxu1 %v11615_v11  ;;  %4453 = vmatprep.subr.bf16.mxu0 %v11480_v4  ;;  %v11464_v40 = vcombine.high %v75_v52, %v79_v49  ;;  %v11463_v47 = vcombine.low %v75_v52, %v79_v49  ;;  %v179_v6 = vld [vmem:[%s19188_s1 + $0x350] sm:$0xff] }
 0x13f   :  { %4526 = vmatprep.subr.bf16.mxu1 %v11608_v13  ;;  %4359 = vmatprep.mubr.bf16.mxu0 %v13372_v31  ;;  %v307_v43 = vld [vmem:[%s19188_s1 + $0x750] sm:$0xff] }
 0x140   :  { %4432 = vmatprep.mubr.bf16.mxu1 %v19201_v62  ;;  %v311_v11 = vld [vmem:[%s19188_s1 + $0x770] sm:$0xff] }
 0x141   :  { %4454 = vmatpush1.bf16.msra.mxu0 %v11479_v27  ;;  %v171_v31 = vld [vmem:[%s19188_s1 + $0x310] sm:$0xff] }
 0x142   :  { %4527 = vmatpush1.bf16.msra.mxu1 %v11607_v29  ;;  %4455 = vmatprep.subr.bf16.mxu0 %v11472_v30  ;;  %v11696_v30 = vcombine.high %v307_v43, %v311_v11  ;;  %v299_v52 = vld [vmem:[%s19188_s1 + $0x710] sm:$0xff] }
 0x143   :  { %4528 = vmatprep.subr.bf16.mxu1 %v11600_v33  ;;  %v163_v46 = vld [vmem:[%s19188_s1 + $0x2d0] sm:$0xff] }
 0x144   :  { %4360 = vmatmul.mubr.bf16.gmra.mxu0 %v13373_v28 }
 0x145   :  { %4456 = vmatpush1.bf16.msra.mxu0 %v11471_v39  ;;  %4433 = vmatmul.mubr.bf16.gmra.mxu1 %v14239_v9  ;;  %v315_v9 = vld [vmem:[%s19188_s1 + $0x790] sm:$0xff] }
 0x146   :  { %4529 = vmatpush1.bf16.msra.mxu1 %v11599_v19  ;;  %4457 = vmatprep.subr.bf16.mxu0 %v11464_v40  ;;  %v11704_v26 = vcombine.high %v315_v9, %v319_v61  ;;  %v11703_v20 = vcombine.low %v315_v9, %v319_v61  ;;  %v11695_v40 = vcombine.low %v307_v43, %v311_v11 }
 0x147   :  { %4530 = vmatprep.subr.bf16.mxu1 %v11592_v37  ;;  %4475 = vmatprep.mubr.bf16.mxu0 %v13374_v17 }
 0x148   :  { %4548 = vmatprep.mubr.bf16.mxu1 %v14263_v25  ;;  %v183_v25 = vld [vmem:[%s19188_s1 + $0x370] sm:$0xff] }
 0x149   :  { %4458 = vmatpush1.bf16.msra.mxu0 %v11463_v47  ;;  %v11568_v41 = vcombine.high %v179_v6, %v183_v25  ;;  %v11567_v39 = vcombine.low %v179_v6, %v183_v25  ;;  %v291_v47 = vld [vmem:[%s19188_s1 + $0x6d0] sm:$0xff] }
 0x14a   :  { %4531 = vmatpush1.bf16.msra.mxu1 %v11591_v51  ;;  %4459 = vmatprep.subr.bf16.mxu0 %v11584_v55  ;;  %v295_v51 = vld [vmem:[%s19188_s1 + $0x6f0] sm:$0xff] }
 0x14b   :  { %4532 = vmatprep.subr.bf16.mxu1 %v11712_v10  ;;  %v283_v25 = vld [vmem:[%s19188_s1 + $0x690] sm:$0xff] }
 0x14c   :  { %v3893_v7 = vpop.f32.mrf.mxu0 }
 0x14d   :  { %v3894_v4 = vadd.f32 %v3893_v7, %v14515_v34  ;;  %v3966_v13 = vpop.f32.mrf.mxu1  ;;  %4460 = vmatpush2.bf16.msra.mxu0 %v11583_v63  ;;  %v175_v34 = vld [vmem:[%s19188_s1 + $0x330] sm:$0xff] }
 0x14e   :  { %4533 = vmatpush2.bf16.msra.mxu1 %v11711_v1  ;;  %v3895_v15 = vpop.f32.mrf.mxu0  ;;  %4461 = vmatprep.subr.bf16.mxu0 %v11576_v3  ;;  %v11560_v37 = vcombine.high %v171_v31, %v175_v34  ;;  %v11559_v56 = vcombine.low %v171_v31, %v175_v34  ;;  %v11680_v3 = vcombine.high %v291_v47, %v295_v51  ;;  %v275_v31 = vld [vmem:[%s19188_s1 + $0x650] sm:$0xff] }
 0x14f   :  { %v14787_v22 = vadd.f32 %v3966_v13, %v3894_v4  ;;  %v3896_v27 = vadd.f32 %v3895_v15, %v14524_v60  ;;  %v3968_v29 = vpop.f32.mrf.mxu1  ;;  %4534 = vmatprep.subr.bf16.mxu1 %v11704_v26  ;;  %v303_v60 = vld [vmem:[%s19188_s1 + $0x730] sm:$0xff] }
 0x150   :  { %v3897_v33 = vpop.f32.mrf.mxu0  ;;  %v11688_v28 = vcombine.high %v299_v52, %v303_v60  ;;  %v11687_v17 = vcombine.low %v299_v52, %v303_v60  ;;  %v155_v26 = vld [vmem:[%s19188_s1 + $0x290] sm:$0xff] }
 0x151   :  { %v14802_v49 = vadd.f32 %v3968_v29, %v3896_v27  ;;  %v3898_v36 = vadd.f32 %v3897_v33, %v14532_v48  ;;  %v3970_v38 = vpop.f32.mrf.mxu1  ;;  %4462 = vmatpush2.bf16.msra.mxu0 %v11575_v14  ;;  %v167_v48 = vld [vmem:[%s19188_s1 + $0x2f0] sm:$0xff]  ;;  %v11679_v14 = vcombine.low %v291_v47, %v295_v51 }
 0x152   :  { %4535 = vmatpush2.bf16.msra.mxu1 %v11703_v20  ;;  %v14805_v19 = vpop.f32.mrf.mxu0  ;;  %4463 = vmatprep.subr.bf16.mxu0 %v11568_v41  ;;  %v11552_v9 = vcombine.high %v163_v46, %v167_v48  ;;  %v11551_v4 = vcombine.low %v163_v46, %v167_v48  ;;  %v151_v29 = vld [vmem:[%s19188_s1 + $0x270] sm:$0xff] }
 0x153   :  { %v14807_v2 = vadd.f32 %v3970_v38, %v3898_v36  ;;  %v14809_v42 = vpop.f32.mrf.mxu1  ;;  %4536 = vmatprep.subr.bf16.mxu1 %v11696_v30  ;;  %v279_v34 = vld [vmem:[%s19188_s1 + $0x670] sm:$0xff] }
 0x154   :  { %19232 = vst [vmem:[#allocation2_spill] sm:$0xff] %v14809_v42  ;;  %v3903_v45 = vpop.f32.mrf.mxu0  ;;  %v11664_v46 = vcombine.high %v275_v31, %v279_v34  ;;  %v139_v48 = vld [vmem:[%s19188_s1 + $0x210] sm:$0xff] }
 0x155   :  { %v3904_v55 = vadd.f32 %v3903_v45, %v14551_v0  ;;  %4464 = vmatpush2.bf16.msra.mxu0 %v11567_v39  ;;  %v3976_v10 = vpop.f32.mrf.mxu1  ;;  %v159_v0 = vld [vmem:[%s19188_s1 + $0x2b0] sm:$0xff] }
 0x156   :  { %4537 = vmatpush2.bf16.msra.mxu1 %v11695_v40  ;;  %v3905_v58 = vpop.f32.mrf.mxu0  ;;  %4465 = vmatprep.subr.bf16.mxu0 %v11560_v37  ;;  %v11544_v15 = vcombine.high %v155_v26, %v159_v0  ;;  %v11543_v60 = vcombine.low %v155_v26, %v159_v0  ;;  %v267_v47 = vld [vmem:[%s19188_s1 + $0x610] sm:$0xff] }
 0x157   :  { %v3906_v61 = vadd.f32 %v3905_v58, %v14566_v12  ;;  %v14825_v63 = vadd.f32 %v3976_v10, %v3904_v55  ;;  %v3978_v1 = vpop.f32.mrf.mxu1  ;;  %4538 = vmatprep.subr.bf16.mxu1 %v11688_v28  ;;  %v287_v12 = vld [vmem:[%s19188_s1 + $0x6b0] sm:$0xff] }
 0x158   :  { %v3907_v6 = vpop.f32.mrf.mxu0  ;;  %v11672_v27 = vcombine.high %v283_v25, %v287_v12  ;;  %v11671_v38 = vcombine.low %v283_v25, %v287_v12  ;;  %v391_v26 = vld [vmem:[%s19188_s1 + $0x9f0] sm:$0xff] }
 0x159   :  { %v3908_v7 = vadd.f32 %v3907_v6, %v14568_v16  ;;  %v14840_v43 = vadd.f32 %v3978_v1, %v3906_v61  ;;  %4466 = vmatpush2.bf16.msra.mxu0 %v11559_v56  ;;  %v3980_v11 = vpop.f32.mrf.mxu1  ;;  %v147_v16 = vld [vmem:[%s19188_s1 + $0x250] sm:$0xff] }
 0x15a   :  { %4539 = vmatpush2.bf16.msra.mxu1 %v11687_v17  ;;  %v14842_v13 = vpop.f32.mrf.mxu0  ;;  %4467 = vmatprep.subr.bf16.mxu0 %v11552_v9  ;;  %v11536_v39 = vcombine.high %v147_v16, %v151_v29  ;;  %v11535_v56 = vcombine.low %v147_v16, %v151_v29  ;;  %v11663_v17 = vcombine.low %v275_v31, %v279_v34  ;;  %v515_v6 = vld [vmem:[%s19188_s1 + $0xdd0] sm:$0xff] }
 0x15b   :  { %v14844_v20 = vadd.f32 %v3980_v11, %v3908_v7  ;;  %v14846_v41 = vpop.f32.mrf.mxu1  ;;  %4540 = vmatprep.subr.bf16.mxu1 %v11680_v3  ;;  %v519_v25 = vld [vmem:[%s19188_s1 + $0xdf0] sm:$0xff] }
 0x15c   :  { %v3913_v30 = vpop.f32.mrf.mxu0  ;;  %v379_v31 = vld [vmem:[%s19188_s1 + $0x990] sm:$0xff] }
 0x15d   :  { %v3914_v33 = vadd.f32 %v3913_v30, %v14587_v35  ;;  %4468 = vmatpush2.bf16.msra.mxu0 %v11551_v4  ;;  %v3986_v52 = vpop.f32.mrf.mxu1  ;;  %v143_v35 = vld [vmem:[%s19188_s1 + $0x230] sm:$0xff]  ;;  %v11904_v30 = vcombine.high %v515_v6, %v519_v25 }
 0x15e   :  { %4541 = vmatpush2.bf16.msra.mxu1 %v11679_v14  ;;  %v3915_v36 = vpop.f32.mrf.mxu0  ;;  %4469 = vmatprep.subr.bf16.mxu0 %v11544_v15  ;;  %v11528_v9 = vcombine.high %v139_v48, %v143_v35  ;;  %v11527_v11 = vcombine.low %v139_v48, %v143_v35  ;;  %v371_v35 = vld [vmem:[%s19188_s1 + $0x950] sm:$0xff] }
 0x15f   :  { %v3916_v40 = vadd.f32 %v3915_v36, %v14602_v44  ;;  %v14862_v37 = vadd.f32 %v3986_v52, %v3914_v33  ;;  %v3988_v28 = vpop.f32.mrf.mxu1  ;;  %4542 = vmatprep.subr.bf16.mxu1 %v11672_v27  ;;  %v271_v44 = vld [vmem:[%s19188_s1 + $0x630] sm:$0xff] }
 0x160   :  { %v3917_v45 = vpop.f32.mrf.mxu0  ;;  %v11656_v3 = vcombine.high %v267_v47, %v271_v44  ;;  %v11655_v14 = vcombine.low %v267_v47, %v271_v44  ;;  %v507_v33 = vld [vmem:[%s19188_s1 + $0xd90] sm:$0xff]  ;;  %v13375_v47 = vld [vmem:[%s19189_s0] ss:$36 sps:$4 sm:$0xff]  }
 0x161   :  { %v3918_v51 = vadd.f32 %v3917_v45, %v14604_v53  ;;  %v14877_v55 = vadd.f32 %v3988_v28, %v3916_v40  ;;  %4470 = vmatpush2.bf16.msra.mxu0 %v11543_v60  ;;  %v3990_v10 = vpop.f32.mrf.mxu1  ;;  %v387_v53 = vld [vmem:[%s19188_s1 + $0x9d0] sm:$0xff]  ;;  %v11903_v40 = vcombine.low %v515_v6, %v519_v25 }
 0x162   :  { %4543 = vmatpush2.bf16.msra.mxu1 %v11671_v38  ;;  %v14879_v58 = vpop.f32.mrf.mxu0  ;;  %4471 = vmatprep.subr.bf16.mxu0 %v11536_v39  ;;  %v11776_v15 = vcombine.high %v387_v53, %v391_v26  ;;  %v11775_v38 = vcombine.low %v387_v53, %v391_v26  ;;  %v499_v44 = vld [vmem:[%s19188_s1 + $0xd50] sm:$0xff] }
 0x163   :  { %19233 = vst [vmem:[#allocation3_spill] sm:$0xff] %v14879_v58  ;;  %v14881_v61 = vadd.f32 %v3990_v10, %v3918_v51  ;;  %v14883_v1 = vpop.f32.mrf.mxu1  ;;  %4544 = vmatprep.subr.bf16.mxu1 %v11664_v46  ;;  %v503_v51 = vld [vmem:[%s19188_s1 + $0xd70] sm:$0xff] }
 0x164   :  { %19234 = vst [vmem:[#allocation4_spill] sm:$0xff] %v14883_v1  ;;  %v3923_v0 = vpop.f32.mrf.mxu0  ;;  %v367_v6 = vld [vmem:[%s19188_s1 + $0x930] sm:$0xff]  ;;  %v324_v1 = vld [vmem:[%s19188_s1 + $0x7d8] sm:$0xff] }
 0x165   :  { %v3924_v12 = vadd.f32 %v3923_v0, %v14623_v5  ;;  %4472 = vmatpush2.bf16.msra.mxu0 %v11535_v56  ;;  %v3996_v7 = vpop.f32.mrf.mxu1  ;;  %v383_v5 = vld [vmem:[%s19188_s1 + $0x9b0] sm:$0xff]  ;;  %v13376_v56 = vld [vmem:[%s19189_s0 + $0x8] ss:$36 sps:$4 sm:$0xff]   ;;  %v11888_v0 = vcombine.high %v499_v44, %v503_v51 }
 0x166   :  { %4545 = vmatpush2.bf16.msra.mxu1 %v11663_v17  ;;  %v3925_v4 = vpop.f32.mrf.mxu0  ;;  %4473 = vmatprep.subr.bf16.mxu0 %v11528_v9  ;;  %v11768_v28 = vcombine.high %v379_v31, %v383_v5  ;;  %v11767_v17 = vcombine.low %v379_v31, %v383_v5  ;;  %v13377_v25 = vld [vmem:[%s19189_s0 + $0x4c] ss:$36 sps:$4 sm:$0xff]  }
 0x167   :  { %v3926_v27 = vadd.f32 %v3925_v4, %v14638_v32  ;;  %v14899_v16 = vadd.f32 %v3996_v7, %v3924_v12  ;;  %v3998_v29 = vpop.f32.mrf.mxu1  ;;  %4546 = vmatprep.subr.bf16.mxu1 %v11656_v3  ;;  %v511_v32 = vld [vmem:[%s19188_s1 + $0xdb0] sm:$0xff] }
 0x168   :  { %v3927_v34 = vpop.f32.mrf.mxu0  ;;  %v11896_v48 = vcombine.high %v507_v33, %v511_v32  ;;  %v11895_v3 = vcombine.low %v507_v33, %v511_v32  ;;  %v495_v7 = vld [vmem:[%s19188_s1 + $0xd30] sm:$0xff]  ;;  %v13379_v32 = vld [vmem:[%s19189_s0 + $0x48] ss:$36 sps:$4 sm:$0xff]  }
 0x169   :  { %v3928_v52 = vadd.f32 %v3927_v34, %v14640_v24  ;;  %v14914_v60 = vadd.f32 %v3998_v29, %v3926_v27  ;;  %4474 = vmatpush2.bf16.msra.mxu0 %v11527_v11  ;;  %v4000_v36 = vpop.f32.mrf.mxu1  ;;  %v375_v24 = vld [vmem:[%s19188_s1 + $0x970] sm:$0xff]  ;;  %v11887_v27 = vcombine.low %v499_v44, %v503_v51 }
 0x16a   :  { %4547 = vmatpush2.bf16.msra.mxu1 %v11655_v14  ;;  %v14916_v39 = vpop.f32.mrf.mxu0  ;;  %4589 = vmatprep.subr.bf16.mxu0 %v11776_v15  ;;  %v11760_v53 = vcombine.high %v371_v35, %v375_v24  ;;  %v13378_v11 = vld [vmem:[%s19189_s0 + $0x54] ss:$36 sps:$4 sm:$0xff]   ;;  %v11759_v14 = vcombine.low %v371_v35, %v375_v24 }
 0x16b   :  { %v14918_v46 = vadd.f32 %v4000_v36, %v3928_v52  ;;  %4662 = vmatprep.subr.bf16.mxu1 %v11904_v30  ;;  %v355_v31 = vld [vmem:[%s19188_s1 + $0x8d0] sm:$0xff] }
 0x16c   :  { %v4039_v45 = vpop.f32.mrf.mxu0  ;;  %4476 = vmatmul.mubr.bf16.vlgmr.msra.gmra.mxu0 %v13375_v47  ;;  %v359_v5 = vld [vmem:[%s19188_s1 + $0x8f0] sm:$0xff] }
 0x16d   :  { %v14936_v10 = vadd.f32 %v4039_v45, %v14787_v22  ;;  %4549 = vmatmul.mubr.bf16.vlgmr.msra.gmra.mxu1 %v13376_v56  ;;  %4590 = vmatpush1.bf16.msra.mxu0 %v11775_v38  ;;  %v363_v22 = vld [vmem:[%s19188_s1 + $0x910] sm:$0xff] }
 0x16e   :  { %4663 = vmatpush1.bf16.msra.mxu1 %v11903_v40  ;;  %v4041_v9 = vpop.f32.mrf.mxu0  ;;  %4591 = vmatprep.subr.bf16.mxu0 %v11768_v28  ;;  %v11752_v29 = vcombine.high %v363_v22, %v367_v6  ;;  %v483_v34 = vld [vmem:[%s19188_s1 + $0xcd0] sm:$0xff]  ;;  %v11751_v36 = vcombine.low %v363_v22, %v367_v6 }
 0x16f   :  { %v14942_v26 = vadd.f32 %v4041_v9, %v14802_v49  ;;  %4664 = vmatprep.subr.bf16.mxu1 %v11896_v48  ;;  %4485 = vmatprep.mubr.bf16.mxu0 %v13377_v25  ;;  %v491_v49 = vld [vmem:[%s19188_s1 + $0xd10] sm:$0xff]  ;;  %v11744_v48 = vcombine.high %v355_v31, %v359_v5 }
 0x170   :  { %v4043_v12 = vpop.f32.mrf.mxu0  ;;  %4558 = vmatprep.mubr.bf16.mxu1 %v13378_v11  ;;  %v11880_v30 = vcombine.high %v491_v49, %v495_v7  ;;  %v487_v33 = vld [vmem:[%s19188_s1 + $0xcf0] sm:$0xff]  ;;  %v11879_v28 = vcombine.low %v491_v49, %v495_v7  ;;  %v19198_v11 = vlaneseq }
 0x171   :  { %v14963_v4 = vadd.f32 %v4043_v12, %v14807_v2  ;;  %4592 = vmatpush1.bf16.msra.mxu0 %v11767_v17  ;;  %v13380_v38 = vld [vmem:[%s19189_s0 + $0x50] ss:$36 sps:$4 sm:$0xff]   ;;  %v13382_v17 = vld [vmem:[%s19189_s0 + $0x9c] ss:$36 sps:$4 sm:$0xff]   ;;  %v11871_v22 = vcombine.low %v483_v34, %v487_v33 }
 0x172   :  { %4665 = vmatpush1.bf16.msra.mxu1 %v11895_v3  ;;  %v14965_v15 = vpop.f32.mrf.mxu0  ;;  %4593 = vmatprep.subr.bf16.mxu0 %v11760_v53  ;;  %v347_v45 = vld [vmem:[%s19188_s1 + $0x890] sm:$0xff]  ;;  %v11743_v53 = vcombine.low %v355_v31, %v359_v5  ;;  %v13384_v5 = vld [vmem:[%s19189_s0 + $0x98] ss:$36 sps:$4 sm:$0xff]  }
 0x173   :  { %19235 = vst [vmem:[#allocation5_spill] sm:$0xff] %v14965_v15  ;;  %4666 = vmatprep.subr.bf16.mxu1 %v11888_v0  ;;  %v351_v47 = vld [vmem:[%s19188_s1 + $0x8b0] sm:$0xff]  ;;  %v228_v15 = vld [vmem:[%s19188_s1 + $0x4d8] sm:$0xff] }
 0x174   :  { %v4049_v2 = vpop.f32.mrf.mxu0  ;;  %4486 = vmatmul.mubr.bf16.gmra.mxu0 %v13379_v32  ;;  %v13381_v44 = vld [vmem:[%s19189_s0 + $0x94] ss:$36 sps:$4 sm:$0xff]   ;;  %v11736_v6 = vcombine.high %v347_v45, %v351_v47  ;;  %v11735_v31 = vcombine.low %v347_v45, %v351_v47  ;;  %v13386_v45 = vld [vmem:[%s19189_s0 + $0xe4] ss:$36 sps:$4 sm:$0xff]  }
 0x175   :  { %v14983_v52 = vadd.f32 %v4049_v2, %v14825_v63  ;;  %4594 = vmatpush1.bf16.msra.mxu0 %v11759_v14  ;;  %4559 = vmatmul.mubr.bf16.gmra.mxu1 %v13380_v38  ;;  %v11872_v63 = vcombine.high %v483_v34, %v487_v33  ;;  %v479_v56 = vld [vmem:[%s19188_s1 + $0xcb0] sm:$0xff] }
 0x176   :  { %4667 = vmatpush1.bf16.msra.mxu1 %v11887_v27  ;;  %v4051_v40 = vpop.f32.mrf.mxu0  ;;  %4595 = vmatprep.subr.bf16.mxu0 %v11752_v29  ;;  %v339_v49 = vld [vmem:[%s19188_s1 + $0x850] sm:$0xff] }
 0x177   :  { %v5173_v35 = vmax.f32 %v14936_v10, %v14983_v52  ;;  %v14991_v24 = vadd.f32 %v4051_v40, %v14840_v43  ;;  %4668 = vmatprep.subr.bf16.mxu1 %v11880_v30  ;;  %4495 = vmatprep.mubr.bf16.mxu0 %v13381_v44  ;;  %v475_v43 = vld [vmem:[%s19188_s1 + $0xc90] sm:$0xff]  ;;  %v13385_v40 = vld [vmem:[%s19189_s0 + $0xdc] ss:$36 sps:$4 sm:$0xff]  }
 0x178   :  { %v4053_v51 = vpop.f32.mrf.mxu0  ;;  %4568 = vmatprep.mubr.bf16.mxu1 %v13382_v17  ;;  %v11864_v12 = vcombine.high %v475_v43, %v479_v56  ;;  %v467_v14 = vld [vmem:[%s19188_s1 + $0xc50] sm:$0xff]  ;;  %v11863_v34 = vcombine.low %v475_v43, %v479_v56 }
 0x179   :  { %v5174_v9 = vmax.f32 %v14942_v26, %v14991_v24  ;;  %v15014_v3 = vadd.f32 %v4053_v51, %v14844_v20  ;;  %4596 = vmatpush1.bf16.msra.mxu0 %v11751_v36  ;;  %v343_v20 = vld [vmem:[%s19188_s1 + $0x870] sm:$0xff] }
 0x17a   :  { %4669 = vmatpush1.bf16.msra.mxu1 %v11879_v28  ;;  %v15016_v0 = vpop.f32.mrf.mxu0  ;;  %4597 = vmatprep.subr.bf16.mxu0 %v11744_v48  ;;  %v471_v27 = vld [vmem:[%s19188_s1 + $0xc70] sm:$0xff]  ;;  %v11728_v33 = vcombine.high %v339_v49, %v343_v20  ;;  %v15054_v48 = vshrl.u32 %v19198_v11, 7  ;;  %v11727_v44 = vcombine.low %v339_v49, %v343_v20  ;;  %v13387_v20 = vld [vmem:[%s19189_s0 + $0xd8] ss:$36 sps:$4 sm:$0xff]  }
 0x17b   :  { %19236 = vst [vmem:[#allocation6_spill] sm:$0xff] %v15016_v0  ;;  %v5181_v25 = vmax.f32 %v14963_v4, %v15014_v3  ;;  %4670 = vmatprep.subr.bf16.mxu1 %v11872_v63  ;;  %v13383_v29 = vld [vmem:[%s19189_s0 + $0x90] ss:$36 sps:$4 sm:$0xff]   ;;  %v11856_v36 = vcombine.high %v467_v14, %v471_v27  ;;  %v11855_v43 = vcombine.low %v467_v14, %v471_v27  ;;  %v5221_v14 = vld [vmem:[%s19190_s2] sm:$0xff]  ;;  %v212_v0 = vld [vmem:[%s19188_s1 + $0x458] sm:$0xff] }
 0x17c   :  { %v4059_v7 = vpop.f32.mrf.mxu0  ;;  %4496 = vmatmul.mubr.bf16.gmra.mxu0 %v13383_v29  ;;  %v335_v38 = vld [vmem:[%s19188_s1 + $0x830] sm:$0xff]  ;;  %19237 = vst [vmem:[#allocation7_spill] sm:$0xff] %v15054_v48  ;;  %v13388_v29 = vld [vmem:[%s19189_s0 + $0xe0] ss:$36 sps:$4 sm:$0xff]  }
 0x17d   :  { %v15036_v30 = vadd.f32 %v4059_v7, %v14862_v37  ;;  %4598 = vmatpush1.bf16.msra.mxu0 %v11743_v53  ;;  %4569 = vmatmul.mubr.bf16.gmra.mxu1 %v13384_v5  ;;  %v331_v37 = vld [vmem:[%s19188_s1 + $0x810] sm:$0xff] }
 0x17e   :  { %4671 = vmatpush1.bf16.msra.mxu1 %v11871_v22  ;;  %v4061_v2 = vpop.f32.mrf.mxu0  ;;  %4599 = vmatprep.subr.bf16.mxu0 %v11736_v6  ;;  %v463_v63 = vld [vmem:[%s19188_s1 + $0xc30] sm:$0xff]  ;;  %v11720_v56 = vcombine.high %v331_v37, %v335_v38  ;;  %v15077_v6 = vsub.s32 0, %v15054_v48  ;;  %v11719_v27 = vcombine.low %v331_v37, %v335_v38 }
 0x17f   :  { %v15042_v32 = vadd.f32 %v4061_v2, %v14877_v55  ;;  %4672 = vmatprep.subr.bf16.mxu1 %v11864_v12  ;;  %4505 = vmatprep.mubr.bf16.mxu0 %v13385_v40  ;;  %v459_v55 = vld [vmem:[%s19188_s1 + $0xc10] sm:$0xff] }
 0x180   :  { %v4063_v28 = vpop.f32.mrf.mxu0  ;;  %4578 = vmatprep.mubr.bf16.mxu1 %v13386_v45  ;;  %v11848_v17 = vcombine.high %v459_v55, %v463_v63  ;;  %v451_v53 = vld [vmem:[%s19188_s1 + $0xbd0] sm:$0xff]  ;;  %19239 = vst [vmem:[#allocation9_spill] sm:$0xff] %v15077_v6  ;;  %v11847_v5 = vcombine.low %v459_v55, %v463_v63  ;;  %v5226_v40 = vrot.slane %v5221_v14, %v15077_v6  ;;  %v13390_v55 = vld [vmem:[%s19189_s0 + $0x1c] ss:$36 sps:$4 sm:$0xff]  }
 0x181   :  { %v15066_v47 = vadd.f32 %v4063_v28, %v14881_v61  ;;  %4600 = vmatpush1.bf16.msra.mxu0 %v11735_v31  ;;  %v455_v22 = vld [vmem:[%s19188_s1 + $0xbf0] sm:$0xff] }
 0x182   :  { %4673 = vmatpush1.bf16.msra.mxu1 %v11863_v34  ;;  %v15068_v51 = vpop.f32.mrf.mxu0  ;;  %4601 = vmatprep.subr.bf16.mxu0 %v11728_v33  ;;  %v579_v12 = vld [vmem:[%s19188_s1 + $0xfd0] sm:$0xff]  ;;  %v11840_v2 = vcombine.high %v451_v53, %v455_v22 }
 0x183   :  { %19238 = vst [vmem:[#allocation8_spill] sm:$0xff] %v15068_v51  ;;  %4674 = vmatprep.subr.bf16.mxu1 %v11856_v36  ;;  %v583_v49 = vld [vmem:[%s19188_s1 + $0xff0] sm:$0xff]  ;;  %v220_v51 = vld [vmem:[%s19188_s1 + $0x498] sm:$0xff] }
 0x184   :  { %v4069_v61 = vpop.f32.mrf.mxu0  ;;  %4506 = vmatmul.mubr.bf16.gmra.mxu0 %v13387_v20  ;;  %v11968_v33 = vcombine.high %v579_v12, %v583_v49  ;;  %v443_v36 = vld [vmem:[%s19188_s1 + $0xb90] sm:$0xff] }
 0x185   :  { %v4070_v7 = vadd.f32 %v4069_v61, %v14899_v16  ;;  %4602 = vmatpush1.bf16.msra.mxu0 %v11727_v44  ;;  %4579 = vmatmul.mubr.bf16.gmra.mxu1 %v13388_v29  ;;  %v447_v37 = vld [vmem:[%s19188_s1 + $0xbb0] sm:$0xff] }
 0x186   :  { %4675 = vmatpush1.bf16.msra.mxu1 %v11855_v43  ;;  %v4071_v31 = vpop.f32.mrf.mxu0  ;;  %4603 = vmatprep.subr.bf16.mxu0 %v11720_v56  ;;  %v13389_v38 = vld [vmem:[%s19189_s0 + $0x14] ss:$36 sps:$4 sm:$0xff]   ;;  %v11839_v43 = vcombine.low %v451_v53, %v455_v22  ;;  %v11967_v56 = vcombine.low %v579_v12, %v583_v49  ;;  %v15142_v22 = vpop.f32.mrf.mxu1 }
 0x187   :  { %v5189_v34 = vmax.f32 %v15036_v30, %v4070_v7  ;;  %v4072_v16 = vadd.f32 %v4071_v31, %v14914_v60  ;;  %4676 = vmatprep.subr.bf16.mxu1 %v11848_v17  ;;  %4621 = vmatprep.mubr.bf16.mxu0 %v13389_v38  ;;  %v571_v60 = vld [vmem:[%s19188_s1 + $0xf90] sm:$0xff]  ;;  %v11832_v17 = vcombine.high %v443_v36, %v447_v37 }
 0x188   :  { %v4073_v30 = vpop.f32.mrf.mxu0  ;;  %v575_v28 = vld [vmem:[%s19188_s1 + $0xfb0] sm:$0xff]  ;;  %4694 = vmatprep.mubr.bf16.mxu1 %v13390_v55  ;;  %19241 = vst [vmem:[#allocation11_spill] sm:$0xff] %v15142_v22 }
 0x189   :  { %v5205_v63 = vmax.f32 %v5173_v35, %v5189_v34  ;;  %v5190_v45 = vmax.f32 %v15042_v32, %v4072_v16  ;;  %v4074_v44 = vadd.f32 %v4073_v30, %v14918_v46  ;;  %4604 = vmatpush1.bf16.msra.mxu0 %v11719_v27  ;;  %v11960_v10 = vcombine.high %v571_v60, %v575_v28  ;;  %v435_v52 = vld [vmem:[%s19188_s1 + $0xb50] sm:$0xff] }
 0x18a   :  { %4677 = vmatpush1.bf16.msra.mxu1 %v11847_v5  ;;  %4605 = vmatprep.subr.bf16.mxu0 %v11840_v2  ;;  %v439_v46 = vld [vmem:[%s19188_s1 + $0xb70] sm:$0xff]  ;;  %v11831_v32 = vcombine.low %v443_v36, %v447_v37 }
 0x18b   :  { %v15124_v61 = vmax.f32 %v5174_v9, %v5190_v45  ;;  %v5197_v20 = vmax.f32 %v15066_v47, %v4074_v44  ;;  %4678 = vmatprep.subr.bf16.mxu1 %v11968_v33  ;;  %v563_v35 = vld [vmem:[%s19188_s1 + $0xf50] sm:$0xff]  ;;  %v5263_v24 = vadd.f32 %v5226_v40, %v5205_v63  ;;  %v11959_v47 = vcombine.low %v571_v60, %v575_v28 }
 0x18c   :  { %v567_v26 = vld [vmem:[%s19188_s1 + $0xf70] sm:$0xff]  ;;  %v11824_v53 = vcombine.high %v435_v52, %v439_v46  ;;  %v11823_v31 = vcombine.low %v435_v52, %v439_v46 }
 0x18d   :  { %19240 = vst [vmem:[#allocation10_spill] sm:$0xff] %v15124_v61  ;;  %v5213_v9 = vmax.f32 %v5181_v25, %v5197_v20  ;;  %4606 = vmatpush2.bf16.msra.mxu0 %v11839_v43  ;;  %v11952_v49 = vcombine.high %v563_v35, %v567_v26  ;;  %v427_v7 = vld [vmem:[%s19188_s1 + $0xb10] sm:$0xff]  ;;  %v5279_v14 = vmax.f32 %v5263_v24, 0.0  ;;  %v15156_v29 = vpop.f32.mrf.mxu1  ;;  %v11951_v5 = vcombine.low %v563_v35, %v567_v26  ;;  %v236_v61 = vld [vmem:[%s19188_s1 + $0x518] sm:$0xff] }
 0x18e   :  { %4679 = vmatpush2.bf16.msra.mxu1 %v11967_v56  ;;  %4607 = vmatprep.subr.bf16.mxu0 %v11832_v17  ;;  %v431_v4 = vld [vmem:[%s19188_s1 + $0xb30] sm:$0xff] }
 0x18f   :  { %v5271_v12 = vadd.f32 %v5226_v40, %v5213_v9  ;;  %4680 = vmatprep.subr.bf16.mxu1 %v11960_v10  ;;  %v555_v3 = vld [vmem:[%s19188_s1 + $0xf10] sm:$0xff]  ;;  %v11816_v2 = vcombine.high %v427_v7, %v431_v4  ;;  %v15172_v40 = vpop.f32.mrf.mxu1  ;;  %v11815_v30 = vcombine.low %v427_v7, %v431_v4 }
 0x190   :  { %v559_v25 = vld [vmem:[%s19188_s1 + $0xf30] sm:$0xff] }
 0x191   :  { %v5287_v27 = vmax.f32 %v5271_v12, 0.0  ;;  %4608 = vmatpush2.bf16.msra.mxu0 %v11831_v32  ;;  %v11944_v16 = vcombine.high %v555_v3, %v559_v25  ;;  %v419_v33 = vld [vmem:[%s19188_s1 + $0xad0] sm:$0xff]  ;;  %v11943_v60 = vcombine.low %v555_v3, %v559_v25  ;;  %v15186_v56 = vpop.f32.mrf.mxu1 }
 0x192   :  { %4681 = vmatpush2.bf16.msra.mxu1 %v11959_v47  ;;  %4609 = vmatprep.subr.bf16.mxu0 %v11824_v53  ;;  %v423_v36 = vld [vmem:[%s19188_s1 + $0xaf0] sm:$0xff] }
 0x193   :  { %v15158_v34 = vpack.c.bf16 %v5287_v27, %v5279_v14  ;;  %4682 = vmatprep.subr.bf16.mxu1 %v11952_v49  ;;  %v547_v37 = vld [vmem:[%s19188_s1 + $0xed0] sm:$0xff]  ;;  %v11808_v28 = vcombine.high %v419_v33, %v423_v36  ;;  %v11807_v17 = vcombine.low %v419_v33, %v423_v36  ;;  %v15200_v9 = vpop.f32.mrf.mxu1  ;;  %v132_v36 = vld [vmem:[%s19188_s1 + $0x1d8] sm:$0xff] }
 0x194   :  { %v551_v38 = vld [vmem:[%s19188_s1 + $0xef0] sm:$0xff]  ;;  %19243 = vst [vmem:[#allocation13_spill] sm:$0xff] %v15200_v9 }
 0x195   :  { %19242 = vst [vmem:[#allocation12_spill] sm:$0xff] %v15158_v34  ;;  %4610 = vmatpush2.bf16.msra.mxu0 %v11823_v31  ;;  %v11936_v55 = vcombine.high %v547_v37, %v551_v38  ;;  %v411_v63 = vld [vmem:[%s19188_s1 + $0xa90] sm:$0xff]  ;;  %v11935_v20 = vcombine.low %v547_v37, %v551_v38  ;;  %v15208_v4 = vpop.f32.mrf.mxu1  ;;  %v136_v37 = vld [vmem:[%s19188_s1 + $0x1f8] sm:$0xff] }
 0x196   :  { %4683 = vmatpush2.bf16.msra.mxu1 %v11951_v5  ;;  %4611 = vmatprep.subr.bf16.mxu0 %v11816_v2  ;;  %v415_v45 = vld [vmem:[%s19188_s1 + $0xab0] sm:$0xff]  ;;  %v244_v34 = vld [vmem:[%s19188_s1 + $0x558] sm:$0xff] }
 0x197   :  { %4684 = vmatprep.subr.bf16.mxu1 %v11944_v16  ;;  %v539_v44 = vld [vmem:[%s19188_s1 + $0xe90] sm:$0xff]  ;;  %v11800_v10 = vcombine.high %v411_v63, %v415_v45  ;;  %v11799_v32 = vcombine.low %v411_v63, %v415_v45  ;;  %v15222_v33 = vpop.f32.mrf.mxu1 }
 0x198   :  { %v543_v43 = vld [vmem:[%s19188_s1 + $0xeb0] sm:$0xff] }
 0x199   :  { %4612 = vmatpush2.bf16.msra.mxu0 %v11815_v30  ;;  %v11928_v52 = vcombine.high %v539_v44, %v543_v43  ;;  %v403_v46 = vld [vmem:[%s19188_s1 + $0xa50] sm:$0xff]  ;;  %v11927_v47 = vcombine.low %v539_v44, %v543_v43  ;;  %v15236_v45 = vpop.f32.mrf.mxu1  ;;  %v124_v44 = vld [vmem:[%s19188_s1 + $0x198] sm:$0xff] }
 0x19a   :  { %4685 = vmatpush2.bf16.msra.mxu1 %v11943_v60  ;;  %4613 = vmatprep.subr.bf16.mxu0 %v11808_v28  ;;  %v407_v35 = vld [vmem:[%s19188_s1 + $0xa70] sm:$0xff]  ;;  %v11522_v28 = vcombine.high %v132_v36, %v136_v37  ;;  %v128_v43 = vld [vmem:[%s19188_s1 + $0x1b8] sm:$0xff] }
 0x19b   :  { %4686 = vmatprep.subr.bf16.mxu1 %v11936_v55  ;;  %v531_v26 = vld [vmem:[%s19188_s1 + $0xe50] sm:$0xff]  ;;  %v11792_v53 = vcombine.high %v403_v46, %v407_v35  ;;  %v11791_v14 = vcombine.low %v403_v46, %v407_v35  ;;  %v11514_v46 = vcombine.high %v124_v44, %v128_v43 }
 0x19c   :  { %v535_v24 = vld [vmem:[%s19188_s1 + $0xe70] sm:$0xff] }
 0x19d   :  { %4614 = vmatpush2.bf16.msra.mxu0 %v11807_v17  ;;  %v11920_v12 = vcombine.high %v531_v26, %v535_v24  ;;  %v395_v49 = vld [vmem:[%s19188_s1 + $0xa10] sm:$0xff]  ;;  %v11919_v27 = vcombine.low %v531_v26, %v535_v24  ;;  %v15252_v24 = vpop.f32.mrf.mxu1 }
 0x19e   :  { %4687 = vmatpush2.bf16.msra.mxu1 %v11935_v20  ;;  %4615 = vmatprep.subr.bf16.mxu0 %v11800_v10  ;;  %v399_v7 = vld [vmem:[%s19188_s1 + $0xa30] sm:$0xff]  ;;  %v15244_v20 = vpop.f32.mrf.mxu0  ;;  %v11521_v10 = vcombine.low %v132_v36, %v136_v37 }
 0x19f   :  { %4688 = vmatprep.subr.bf16.mxu1 %v11928_v52  ;;  %v523_v3 = vld [vmem:[%s19188_s1 + $0xe10] sm:$0xff]  ;;  %v11784_v31 = vcombine.high %v395_v49, %v399_v7  ;;  %v11783_v38 = vcombine.low %v395_v49, %v399_v7  ;;  %19244 = vst [vmem:[#allocation14_spill] sm:$0xff] %v15244_v20  ;;  %v13392_v7 = vld [vmem:[%s19189_s0 + $0x18] ss:$36 sps:$4 sm:$0xff]  }
 0x1a0   :  { %v527_v25 = vld [vmem:[%s19188_s1 + $0xe30] sm:$0xff]  ;;  %v204_v20 = vld [vmem:[%s19188_s1 + $0x418] sm:$0xff] }
 0x1a1   :  { %4616 = vmatpush2.bf16.msra.mxu0 %v11799_v32  ;;  %v11912_v5 = vcombine.high %v523_v3, %v527_v25  ;;  %v643_v2 = vld [vmem:[%s19188_s1 + $0x11d0] sm:$0xff]  ;;  %v11911_v30 = vcombine.low %v523_v3, %v527_v25 }
 0x1a2   :  { %4689 = vmatpush2.bf16.msra.mxu1 %v11927_v47  ;;  %4617 = vmatprep.subr.bf16.mxu0 %v11792_v53  ;;  %v647_v16 = vld [vmem:[%s19188_s1 + $0x11f0] sm:$0xff]  ;;  %v116_v53 = vld [vmem:[%s19188_s1 + $0x158] sm:$0xff] }
 0x1a3   :  { %4690 = vmatprep.subr.bf16.mxu1 %v11920_v12  ;;  %v12032_v60 = vcombine.high %v643_v2, %v647_v16  ;;  %v635_v55 = vld [vmem:[%s19188_s1 + $0x1190] sm:$0xff]  ;;  %v12031_v17 = vcombine.low %v643_v2, %v647_v16  ;;  %v120_v12 = vld [vmem:[%s19188_s1 + $0x178] sm:$0xff]  ;;  %v15275_v2 = vpop.f32.mrf.mxu1 }
 0x1a4   :  { %v639_v63 = vld [vmem:[%s19188_s1 + $0x11b0] sm:$0xff] }
 0x1a5   :  { %4618 = vmatpush2.bf16.msra.mxu0 %v11791_v14  ;;  %v12024_v52 = vcombine.high %v635_v55, %v639_v63  ;;  %v627_v35 = vld [vmem:[%s19188_s1 + $0x1150] sm:$0xff]  ;;  %v12023_v3 = vcombine.low %v635_v55, %v639_v63  ;;  %v11513_v14 = vcombine.low %v124_v44, %v128_v43  ;;  %v11505_v63 = vcombine.low %v116_v53, %v120_v12 }
 0x1a6   :  { %4691 = vmatpush2.bf16.msra.mxu1 %v11919_v27  ;;  %4619 = vmatprep.subr.bf16.mxu0 %v11784_v31  ;;  %v631_v26 = vld [vmem:[%s19188_s1 + $0x1170] sm:$0xff] }
 0x1a7   :  { %4692 = vmatprep.subr.bf16.mxu1 %v11912_v5  ;;  %v13391_v47 = vld [vmem:[%s19189_s0 + $0x10] ss:$36 sps:$4 sm:$0xff]   ;;  %v12016_v27 = vcombine.high %v627_v35, %v631_v26  ;;  %v11506_v5 = vcombine.high %v116_v53, %v120_v12 }
 0x1a8   :  { %v619_v16 = vld [vmem:[%s19188_s1 + $0x1110] sm:$0xff] }
 0x1a9   :  { %4620 = vmatpush2.bf16.msra.mxu0 %v11783_v38  ;;  %v623_v36 = vld [vmem:[%s19188_s1 + $0x1130] sm:$0xff]  ;;  %v108_v38 = vld [vmem:[%s19188_s1 + $0x118] sm:$0xff] }
 0x1aa   :  { %4693 = vmatpush2.bf16.msra.mxu1 %v11911_v30  ;;  %4735 = vmatprep.subr.bf16.mxu0 %v12032_v60  ;;  %v112_v30 = vld [vmem:[%s19188_s1 + $0x138] sm:$0xff]  ;;  %v12008_v44 = vcombine.high %v619_v16, %v623_v36  ;;  %v12007_v53 = vcombine.low %v619_v16, %v623_v36  ;;  %v13398_v16 = vld [vmem:[%s19189_s0 + $0xac] ss:$36 sps:$4 sm:$0xff]  }
 0x1ab   :  { %4808 = vmatprep.subr.bf16.mxu1 %v11522_v28  ;;  %v12015_v28 = vcombine.low %v627_v35, %v631_v26  ;;  %v11498_v43 = vcombine.high %v108_v38, %v112_v30  ;;  %v100_v35 = vld [vmem:[%s19188_s1 + $0xd8] sm:$0xff] }
 0x1ac   :  { %v4185_v32 = vpop.f32.mrf.mxu0  ;;  %4622 = vmatmul.mubr.bf16.vlgmr.msra.gmra.mxu0 %v13391_v47  ;;  %v104_v26 = vld [vmem:[%s19188_s1 + $0xf8] sm:$0xff]  ;;  %v13396_v47 = vld [vmem:[%s19189_s0 + $0x60] ss:$36 sps:$4 sm:$0xff]  }
 0x1ad   :  { %v15264_v49 = vadd.f32 %v4185_v32, %v15156_v29  ;;  %4695 = vmatmul.mubr.bf16.vlgmr.msra.gmra.mxu1 %v13392_v7  ;;  %4736 = vmatpush1.bf16.msra.mxu0 %v12031_v17  ;;  %v13393_v29 = vld [vmem:[%s19189_s0 + $0x5c] ss:$36 sps:$4 sm:$0xff]   ;;  %v15297_v17 = vpop.f32.mrf.mxu1  ;;  %v11497_v7 = vcombine.low %v108_v38, %v112_v30 }
 0x1ae   :  { %4809 = vmatpush1.bf16.msra.mxu1 %v11521_v10  ;;  %v4187_v25 = vpop.f32.mrf.mxu0  ;;  %4737 = vmatprep.subr.bf16.mxu0 %v12024_v52  ;;  %v611_v10 = vld [vmem:[%s19188_s1 + $0x10d0] sm:$0xff]  ;;  %v92_v36 = vld [vmem:[%s19188_s1 + $0x98] sm:$0xff] }
 0x1af   :  { %v15270_v31 = vadd.f32 %v4187_v25, %v15172_v40  ;;  %4810 = vmatprep.subr.bf16.mxu1 %v11514_v46  ;;  %4631 = vmatprep.mubr.bf16.mxu0 %v13393_v29  ;;  %v13394_v40 = vld [vmem:[%s19189_s0 + $0x64] ss:$36 sps:$4 sm:$0xff]   ;;  %v13395_v46 = vld [vmem:[%s19189_s0 + $0x58] ss:$36 sps:$4 sm:$0xff]   ;;  %v607_v29 = vld [vmem:[%s19188_s1 + $0x10b0] sm:$0xff] }
 0x1b0   :  { %v4189_v37 = vpop.f32.mrf.mxu0  ;;  %4704 = vmatprep.mubr.bf16.mxu1 %v13394_v40  ;;  %v13397_v25 = vld [vmem:[%s19189_s0 + $0xa4] ss:$36 sps:$4 sm:$0xff]  }
 0x1b1   :  { %v15293_v60 = vadd.f32 %v4189_v37, %v15186_v56  ;;  %4738 = vmatpush1.bf16.msra.mxu0 %v12023_v3  ;;  %v615_v56 = vld [vmem:[%s19188_s1 + $0x10f0] sm:$0xff]  ;;  %v96_v37 = vld [vmem:[%s19188_s1 + $0xb8] sm:$0xff] }
 0x1b2   :  { %4811 = vmatpush1.bf16.msra.mxu1 %v11513_v14  ;;  %v15295_v55 = vpop.f32.mrf.mxu0  ;;  %4739 = vmatprep.subr.bf16.mxu0 %v12016_v27  ;;  %v12000_v3 = vcombine.high %v611_v10, %v615_v56  ;;  %v11490_v14 = vcombine.high %v100_v35, %v104_v26  ;;  %v603_v27 = vld [vmem:[%s19188_s1 + $0x1090] sm:$0xff]  ;;  %v11999_v38 = vcombine.low %v611_v10, %v615_v56  ;;  %v13399_v10 = vld [vmem:[%s19189_s0 + $0xa0] ss:$36 sps:$4 sm:$0xff]   ;;  %v84_v56 = vld [vmem:[%s19188_s1 + $0x58] sm:$0xff] }
 0x1b3   :  { %19245 = vst [vmem:[#allocation15_spill] sm:$0xff] %v15295_v55  ;;  %4812 = vmatprep.subr.bf16.mxu1 %v11506_v5 }
 0x1b4   :  { %v4195_v52 = vpop.f32.mrf.mxu0  ;;  %4632 = vmatmul.mubr.bf16.gmra.mxu0 %v13395_v46 }
 0x1b5   :  { %v15315_v32 = vadd.f32 %v4195_v52, %v15208_v4  ;;  %4740 = vmatpush1.bf16.msra.mxu0 %v12015_v28  ;;  %4705 = vmatmul.mubr.bf16.gmra.mxu1 %v13396_v47  ;;  %v4136_v4 = vpop.f32.mrf.mxu1  ;;  %v11489_v28 = vcombine.low %v100_v35, %v104_v26  ;;  %v595_v52 = vld [vmem:[%s19188_s1 + $0x1050] sm:$0xff]  ;;  %v88_v35 = vld [vmem:[%s19188_s1 + $0x78] sm:$0xff]  ;;  %v13400_v47 = vld [vmem:[%s19189_s0 + $0xa8] ss:$36 sps:$4 sm:$0xff]  }
 0x1b6   :  { %4813 = vmatpush1.bf16.msra.mxu1 %v11505_v63  ;;  %v15320_v12 = vpop.f32.mrf.mxu0  ;;  %4741 = vmatprep.subr.bf16.mxu0 %v12008_v44  ;;  %v11992_v63 = vcombine.high %v603_v27, %v607_v29 }
 0x1b7   :  { %4814 = vmatprep.subr.bf16.mxu1 %v11498_v43  ;;  %4641 = vmatprep.mubr.bf16.mxu0 %v13397_v25  ;;  %v15345_v44 = vpop.f32.mrf.mxu1  ;;  %v11482_v43 = vcombine.high %v92_v36, %v96_v37 }
 0x1b8   :  { %v4199_v5 = vpop.f32.mrf.mxu0  ;;  %4714 = vmatprep.mubr.bf16.mxu1 %v13398_v16  ;;  %v587_v16 = vld [vmem:[%s19188_s1 + $0x1010] sm:$0xff] }
 0x1b9   :  { %v15341_v40 = vadd.f32 %v4199_v5, %v15236_v45  ;;  %4742 = vmatpush1.bf16.msra.mxu0 %v12007_v53  ;;  %v599_v45 = vld [vmem:[%s19188_s1 + $0x1070] sm:$0xff]  ;;  %v11991_v53 = vcombine.low %v603_v27, %v607_v29  ;;  %v11474_v5 = vcombine.high %v84_v56, %v88_v35 }
 0x1ba   :  { %4815 = vmatpush1.bf16.msra.mxu1 %v11497_v7  ;;  %v15343_v30 = vpop.f32.mrf.mxu0  ;;  %4743 = vmatprep.subr.bf16.mxu0 %v12000_v3  ;;  %v11481_v3 = vcombine.low %v92_v36, %v96_v37  ;;  %v11984_v25 = vcombine.high %v595_v52, %v599_v45  ;;  %v591_v27 = vld [vmem:[%s19188_s1 + $0x1030] sm:$0xff]  ;;  %v76_v37 = vld [vmem:[%s19188_s1 + $0x18] sm:$0xff] }
 0x1bb   :  { %4816 = vmatprep.subr.bf16.mxu1 %v11490_v14  ;;  %v4142_v14 = vpop.f32.mrf.mxu1  ;;  %v13402_v36 = vld [vmem:[%s19189_s0 + $0xf4] ss:$36 sps:$4 sm:$0xff]  }
 0x1bc   :  { %v4205_v46 = vpop.f32.mrf.mxu0  ;;  %4642 = vmatmul.mubr.bf16.gmra.mxu0 %v13399_v10  ;;  %v11976_v10 = vcombine.high %v587_v16, %v591_v27 }
 0x1bd   :  { %v15363_v26 = vadd.f32 %v4205_v46, %v15275_v2  ;;  %4744 = vmatpush1.bf16.msra.mxu0 %v11999_v38  ;;  %4715 = vmatmul.mubr.bf16.gmra.mxu1 %v13400_v47  ;;  %v13401_v2 = vld [vmem:[%s19189_s0 + $0xec] ss:$36 sps:$4 sm:$0xff]   ;;  %v80_v38 = vld [vmem:[%s19188_s1 + $0x38] sm:$0xff]  ;;  %v11473_v46 = vcombine.low %v84_v56, %v88_v35  ;;  %v15392_v47 = vpop.f32.mrf.mxu1 }
 0x1be   :  { %4817 = vmatpush1.bf16.msra.mxu1 %v11489_v28  ;;  %v15368_v7 = vpop.f32.mrf.mxu0  ;;  %4745 = vmatprep.subr.bf16.mxu0 %v11992_v63  ;;  %v11983_v63 = vcombine.low %v595_v52, %v599_v45  ;;  %v13403_v52 = vld [vmem:[%s19189_s0 + $0xe8] ss:$36 sps:$4 sm:$0xff]   ;;  %v196_v45 = vld [vmem:[%s19188_s1 + $0x3d8] sm:$0xff] }
 0x1bf   :  { %4818 = vmatprep.subr.bf16.mxu1 %v11482_v43  ;;  %4651 = vmatprep.mubr.bf16.mxu0 %v13401_v2  ;;  %v11466_v2 = vcombine.high %v76_v37, %v80_v38  ;;  %v200_v56 = vld [vmem:[%s19188_s1 + $0x3f8] sm:$0xff]  ;;  %v4146_v11 = vpop.f32.mrf.mxu1 }
 0x1c0   :  { %v4209_v29 = vpop.f32.mrf.mxu0  ;;  %4724 = vmatprep.mubr.bf16.mxu1 %v13402_v36  ;;  %v260_v36 = vld [vmem:[%s19188_s1 + $0x5d8] sm:$0xff]  ;;  %v11586_v6 = vcombine.high %v196_v45, %v200_v56 }
 0x1c1   :  { %v15388_v28 = vadd.f32 %v4209_v29, %v4136_v4  ;;  %4746 = vmatpush1.bf16.msra.mxu0 %v11991_v53  ;;  %v264_v4 = vld [vmem:[%s19188_s1 + $0x5f8] sm:$0xff]  ;;  %v11465_v29 = vcombine.low %v76_v37, %v80_v38  ;;  %v13405_v38 = vld [vmem:[%s19189_s0 + $0x4] ss:$36 sps:$4 sm:$0xff]  }
 0x1c2   :  { %4819 = vmatpush1.bf16.msra.mxu1 %v11481_v3  ;;  %v15390_v43 = vpop.f32.mrf.mxu0  ;;  %4747 = vmatprep.subr.bf16.mxu0 %v11984_v25  ;;  %v13404_v3 = vld [vmem:[%s19189_s0 + $0xf0] ss:$36 sps:$4 sm:$0xff]   ;;  %v11975_v25 = vcombine.low %v587_v16, %v591_v27  ;;  %v188_v27 = vld [vmem:[%s19188_s1 + $0x398] sm:$0xff] }
 0x1c3   :  { %4820 = vmatprep.subr.bf16.mxu1 %v11474_v5  ;;  %v192_v37 = vld [vmem:[%s19188_s1 + $0x3b8] sm:$0xff] }
 0x1c4   :  { %v4215_v53 = vpop.f32.mrf.mxu0  ;;  %4652 = vmatmul.mubr.bf16.gmra.mxu0 %v13403_v52  ;;  %v11650_v52 = vcombine.high %v260_v36, %v264_v4 }
 0x1c5   :  { %v15409_v35 = vadd.f32 %v4215_v53, %v4142_v14  ;;  %4748 = vmatpush1.bf16.msra.mxu0 %v11983_v63  ;;  %4725 = vmatmul.mubr.bf16.gmra.mxu1 %v13404_v3  ;;  %v252_v14 = vld [vmem:[%s19188_s1 + $0x598] sm:$0xff]  ;;  %v15434_v3 = vpop.f32.mrf.mxu1 }
 0x1c6   :  { %4821 = vmatpush1.bf16.msra.mxu1 %v11473_v46  ;;  %v15414_v5 = vpop.f32.mrf.mxu0  ;;  %4749 = vmatprep.subr.bf16.mxu0 %v11976_v10  ;;  %v256_v63 = vld [vmem:[%s19188_s1 + $0x5b8] sm:$0xff]  ;;  %v11649_v10 = vcombine.low %v260_v36, %v264_v4 }
 0x1c7   :  { %4822 = vmatprep.subr.bf16.mxu1 %v11466_v2  ;;  %4767 = vmatprep.mubr.bf16.mxu0 %v19201_v62  ;;  %v11585_v2 = vcombine.low %v196_v45, %v200_v56  ;;  %v11642_v53 = vcombine.high %v252_v14, %v256_v63  ;;  %v11578_v62 = vcombine.high %v188_v27, %v192_v37  ;;  %v180_v36 = vld [vmem:[%s19188_s1 + $0x358] sm:$0xff]  ;;  %v19246_v56 = vmov 0  }
 0x1c8   :  { %v4219_v16 = vpop.f32.mrf.mxu0  ;;  %4840 = vmatprep.mubr.bf16.mxu1 %v13405_v38  ;;  %v248_v38 = vld [vmem:[%s19188_s1 + $0x578] sm:$0xff]  ;;  %v11641_v45 = vcombine.low %v252_v14, %v256_v63 }
 0x1c9   :  { %v15432_v46 = vadd.f32 %v4219_v16, %v4146_v11  ;;  %4750 = vmatpush1.bf16.msra.mxu0 %v11975_v25  ;;  %v13406_v11 = vld [vmem:[%s19189_s0 + $0x20] ss:$36 sps:$4 sm:$0xff]   ;;  %v240_v14 = vld [vmem:[%s19188_s1 + $0x538] sm:$0xff] }
 0x1ca   :  { %4823 = vmatpush1.bf16.msra.mxu1 %v11465_v29  ;;  %4881 = vmatprep.subr.bf16.mxu0 %v11650_v52  ;;  %v11577_v29 = vcombine.low %v188_v27, %v192_v37  ;;  %v11634_v52 = vcombine.high %v244_v34, %v248_v38  ;;  %v176_v63 = vld [vmem:[%s19188_s1 + $0x338] sm:$0xff] }
 0x1cb   :  { %4824 = vmatprep.subr.bf16.mxu1 %v11586_v6  ;;  %v184_v6 = vld [vmem:[%s19188_s1 + $0x378] sm:$0xff] }
 0x1cc   :  { %4768 = vmatmul.mubr.bf16.vlgmr.msra.gmra.mxu0 %v13406_v11  ;;  %v11570_v11 = vcombine.high %v180_v36, %v184_v6 }
 0x1cd   :  { %v4258_v4 = vpop.f32.mrf.mxu1  ;;  %4882 = vmatpush1.bf16.msra.mxu0 %v11649_v10  ;;  %4777 = vmatprep.mubr.bf16.mxu0 %v19246_v56  ;;  %v11569_v10 = vcombine.low %v180_v36, %v184_v6  ;;  %v11625_v6 = vcombine.low %v236_v61, %v240_v14 }
 0x1ce   :  { %v15453_v25 = vadd.f32 %v4258_v4, %v15264_v49  ;;  %4825 = vmatpush2.bf16.msra.mxu1 %v11585_v2  ;;  %4883 = vmatprep.subr.bf16.mxu0 %v11642_v53  ;;  %v172_v49 = vld [vmem:[%s19188_s1 + $0x318] sm:$0xff]  ;;  %v11626_v2 = vcombine.high %v236_v61, %v240_v14 }
 0x1cf   :  { %v15455_v16 = vpop.f32.mrf.mxu1  ;;  %4826 = vmatprep.subr.bf16.mxu1 %v11578_v62  ;;  %v11633_v62 = vcombine.low %v244_v34, %v248_v38  ;;  %v11562_v4 = vcombine.high %v172_v49, %v176_v63  ;;  %v13407_v34 = vld [vmem:[%s19189_s0 + $0x68] ss:$36 sps:$4 sm:$0xff]   ;;  %v168_v38 = vld [vmem:[%s19188_s1 + $0x2f8] sm:$0xff] }
 0x1d0   :  { %v224_v61 = vld [vmem:[%s19188_s1 + $0x4b8] sm:$0xff] }
 0x1d1   :  { %v4262_v27 = vpop.f32.mrf.mxu1  ;;  %4884 = vmatpush1.bf16.msra.mxu0 %v11641_v45  ;;  %v232_v45 = vld [vmem:[%s19188_s1 + $0x4f8] sm:$0xff] }
 0x1d2   :  { %v15470_v37 = vadd.f32 %v4262_v27, %v15293_v60  ;;  %4827 = vmatpush2.bf16.msra.mxu1 %v11577_v29  ;;  %4885 = vmatprep.subr.bf16.mxu0 %v11634_v52  ;;  %v164_v60 = vld [vmem:[%s19188_s1 + $0x2d8] sm:$0xff]  ;;  %v11561_v52 = vcombine.low %v172_v49, %v176_v63  ;;  %v11617_v63 = vcombine.low %v228_v15, %v232_v45 }
 0x1d3   :  { %v15472_v53 = vpop.f32.mrf.mxu1  ;;  %4828 = vmatprep.subr.bf16.mxu1 %v11570_v11  ;;  %v11618_v11 = vcombine.high %v228_v15, %v232_v45  ;;  %v160_v14 = vld [vmem:[%s19188_s1 + $0x2b8] sm:$0xff]  ;;  %v13408_v15 = vld [vmem:[%s19189_s0 + $0xb0] ss:$36 sps:$4 sm:$0xff]  }
 0x1d4   :  { %19247 = vst [vmem:[#allocation16_spill] sm:$0xff] %v15472_v53  ;;  %4778 = vmatmul.mubr.bf16.gmra.mxu0 %v13407_v34  ;;  %v11554_v34 = vcombine.high %v164_v60, %v168_v38  ;;  %v152_v45 = vld [vmem:[%s19188_s1 + $0x278] sm:$0xff] }
 0x1d5   :  { %v4268_v36 = vpop.f32.mrf.mxu1  ;;  %4886 = vmatpush1.bf16.msra.mxu0 %v11633_v62  ;;  %4787 = vmatprep.mubr.bf16.mxu0 %v19246_v56 }
 0x1d6   :  { %v15491_v29 = vadd.f32 %v4268_v36, %v15315_v32  ;;  %4829 = vmatpush2.bf16.msra.mxu1 %v11569_v10  ;;  %4887 = vmatprep.subr.bf16.mxu0 %v11626_v2  ;;  %v156_v32 = vld [vmem:[%s19188_s1 + $0x298] sm:$0xff]  ;;  %v11553_v10 = vcombine.low %v164_v60, %v168_v38  ;;  %v11610_v2 = vcombine.high %v220_v51, %v224_v61 }
 0x1d7   :  { %v15493_v27 = vpop.f32.mrf.mxu1  ;;  %4830 = vmatprep.subr.bf16.mxu1 %v11562_v4  ;;  %v11546_v36 = vcombine.high %v156_v32, %v160_v14  ;;  %v11609_v38 = vcombine.low %v220_v51, %v224_v61  ;;  %v208_v51 = vld [vmem:[%s19188_s1 + $0x438] sm:$0xff] }
 0x1d8   :  { %v144_v61 = vld [vmem:[%s19188_s1 + $0x238] sm:$0xff] }
 0x1d9   :  { %v4272_v49 = vpop.f32.mrf.mxu1  ;;  %4888 = vmatpush1.bf16.msra.mxu0 %v11625_v6  ;;  %v216_v6 = vld [vmem:[%s19188_s1 + $0x478] sm:$0xff] }
 0x1da   :  { %v15508_v62 = vadd.f32 %v4272_v49, %v15341_v40  ;;  %4831 = vmatpush2.bf16.msra.mxu1 %v11561_v52  ;;  %4889 = vmatprep.subr.bf16.mxu0 %v11618_v11  ;;  %v148_v40 = vld [vmem:[%s19188_s1 + $0x258] sm:$0xff]  ;;  %v11545_v11 = vcombine.low %v156_v32, %v160_v14  ;;  %v11601_v14 = vcombine.low %v212_v0, %v216_v6 }
 0x1db   :  { %v15510_v4 = vpop.f32.mrf.mxu1  ;;  %4832 = vmatprep.subr.bf16.mxu1 %v11554_v34  ;;  %v11602_v34 = vcombine.high %v212_v0, %v216_v6  ;;  %v13409_v0 = vld [vmem:[%s19189_s0 + $0xf8] ss:$36 sps:$4 sm:$0xff]  }
 0x1dc   :  { %19248 = vst [vmem:[#allocation17_spill] sm:$0xff] %v15510_v4  ;;  %4788 = vmatmul.mubr.bf16.gmra.mxu0 %v13408_v15  ;;  %v11538_v15 = vcombine.high %v148_v40, %v152_v45  ;;  %v392_v6 = vld [vmem:[%s19188_s1 + $0x9f8] sm:$0xff] }
 0x1dd   :  { %v4278_v60 = vpop.f32.mrf.mxu1  ;;  %4890 = vmatpush1.bf16.msra.mxu0 %v11617_v63  ;;  %4797 = vmatprep.mubr.bf16.mxu0 %v19246_v56 }
 0x1de   :  { %v15529_v52 = vadd.f32 %v4278_v60, %v15363_v26  ;;  %4833 = vmatpush2.bf16.msra.mxu1 %v11553_v10  ;;  %4891 = vmatprep.subr.bf16.mxu0 %v11610_v2  ;;  %v140_v26 = vld [vmem:[%s19188_s1 + $0x218] sm:$0xff]  ;;  %v11537_v10 = vcombine.low %v148_v40, %v152_v45  ;;  %v11594_v2 = vcombine.high %v204_v20, %v208_v51 }
 0x1df   :  { %v15531_v49 = vpop.f32.mrf.mxu1  ;;  %4834 = vmatprep.subr.bf16.mxu1 %v11546_v36  ;;  %v11530_v60 = vcombine.high %v140_v26, %v144_v61  ;;  %v11593_v45 = vcombine.low %v204_v20, %v208_v51  ;;  %v316_v20 = vld [vmem:[%s19188_s1 + $0x798] sm:$0xff] }
 0x1e0   :  { %v320_v51 = vld [vmem:[%s19188_s1 + $0x7b8] sm:$0xff] }
 0x1e1   :  { %v4282_v32 = vpop.f32.mrf.mxu1  ;;  %4892 = vmatpush1.bf16.msra.mxu0 %v11609_v38  ;;  %v328_v38 = vld [vmem:[%s19188_s1 + $0x7f8] sm:$0xff] }
 0x1e2   :  { %v15546_v63 = vadd.f32 %v4282_v32, %v15388_v28  ;;  %4835 = vmatpush2.bf16.msra.mxu1 %v11545_v11  ;;  %4893 = vmatprep.subr.bf16.mxu0 %v11602_v34  ;;  %v388_v28 = vld [vmem:[%s19188_s1 + $0x9d8] sm:$0xff]  ;;  %v13410_v11 = vld [vmem:[%s19189_s0 + $0xc] ss:$36 sps:$4 sm:$0xff]   ;;  %v11714_v32 = vcombine.high %v324_v1, %v328_v38 }
 0x1e3   :  { %v15548_v36 = vpop.f32.mrf.mxu1  ;;  %4836 = vmatprep.subr.bf16.mxu1 %v11538_v15  ;;  %v11529_v15 = vcombine.low %v140_v26, %v144_v61  ;;  %v11778_v42 = vcombine.high %v388_v28, %v392_v6  ;;  %v384_v26 = vld [vmem:[%s19188_s1 + $0x9b8] sm:$0xff] }
 0x1e4   :  { %19249 = vst [vmem:[#allocation18_spill] sm:$0xff] %v15548_v36  ;;  %4798 = vmatmul.mubr.bf16.gmra.mxu0 %v13409_v0  ;;  %v308_v36 = vld [vmem:[%s19188_s1 + $0x758] sm:$0xff] }
 0x1e5   :  { %v4288_v40 = vpop.f32.mrf.mxu1  ;;  %4894 = vmatpush1.bf16.msra.mxu0 %v11601_v14  ;;  %4913 = vmatprep.mubr.bf16.mxu0 %v13410_v11  ;;  %v11713_v14 = vcombine.low %v324_v1, %v328_v38  ;;  %v312_v1 = vld [vmem:[%s19188_s1 + $0x778] sm:$0xff] }
 0x1e6   :  { %v15569_v34 = vadd.f32 %v4288_v40, %v15409_v35  ;;  %4837 = vmatpush2.bf16.msra.mxu1 %v11537_v10  ;;  %4895 = vmatprep.subr.bf16.mxu0 %v11594_v2  ;;  %v380_v35 = vld [vmem:[%s19188_s1 + $0x998] sm:$0xff]  ;;  %v15585_v10 = vpop.f32.mrf.mxu0  ;;  %v11706_v40 = vcombine.high %v316_v20, %v320_v51  ;;  %v11698_v4 = vcombine.high %v308_v36, %v312_v1 }
 0x1e7   :  { %v15571_v0 = vpop.f32.mrf.mxu1  ;;  %4838 = vmatprep.subr.bf16.mxu1 %v11530_v60  ;;  %v11777_v60 = vcombine.low %v388_v28, %v392_v6  ;;  %v11770_v53 = vcombine.high %v380_v35, %v384_v26  ;;  %v376_v28 = vld [vmem:[%s19188_s1 + $0x978] sm:$0xff] }
 0x1e9   :  { %v4292_v61 = vpop.f32.mrf.mxu1  ;;  %4896 = vmatpush1.bf16.msra.mxu0 %v11593_v45  ;;  %v13411_v45 = vld [vmem:[%s19189_s0] ss:$36 sps:$4 sm:$0xff]  }
 0x1ea   :  { %v15588_v2 = vadd.f32 %v4292_v61, %v15432_v46  ;;  %4839 = vmatpush2.bf16.msra.mxu1 %v11529_v15  ;;  %4897 = vmatprep.subr.bf16.mxu0 %v11714_v32  ;;  %v372_v46 = vld [vmem:[%s19188_s1 + $0x958] sm:$0xff]  ;;  %v11705_v15 = vcombine.low %v316_v20, %v320_v51  ;;  %v11769_v61 = vcombine.low %v380_v35, %v384_v26  ;;  %v13412_v20 = vld [vmem:[%s19189_s0 + $0x4c] ss:$36 sps:$4 sm:$0xff]  }
 0x1eb   :  { %v15590_v11 = vpop.f32.mrf.mxu1  ;;  %4954 = vmatprep.subr.bf16.mxu1 %v11778_v42  ;;  %v11762_v22 = vcombine.high %v372_v46, %v376_v28  ;;  %v364_v35 = vld [vmem:[%s19188_s1 + $0x918] sm:$0xff] }
 0x1ec   :  { %19250 = vst [vmem:[#allocation19_spill] sm:$0xff] %v15590_v11  ;;  %v4331_v38 = vpop.f32.mrf.mxu0 }
 0x1ed   :  { %v4332_v42 = vadd.f32 %v4331_v38, %v15453_v25  ;;  %v4404_v6 = vpop.f32.mrf.mxu1  ;;  %4841 = vmatmul.mubr.bf16.vlgmr.msra.gmra.mxu1 %v13411_v45  ;;  %4898 = vmatpush2.bf16.msra.mxu0 %v11713_v14  ;;  %v300_v25 = vld [vmem:[%s19188_s1 + $0x718] sm:$0xff]  ;;  %v4198_v45 = vadd.f32 %v15320_v12, %v15222_v33 }
 0x1ee   :  { %4955 = vmatpush1.bf16.msra.mxu1 %v11777_v60  ;;  %v4333_v32 = vpop.f32.mrf.mxu0  ;;  %4899 = vmatprep.subr.bf16.mxu0 %v11706_v40  ;;  %v304_v38 = vld [vmem:[%s19188_s1 + $0x738] sm:$0xff]  ;;  %v11697_v60 = vcombine.low %v308_v36, %v312_v1 }
 0x1ef   :  { %v15608_v55 = vadd.f32 %v4404_v6, %v4332_v42  ;;  %v4406_v9 = vpop.f32.mrf.mxu1  ;;  %4956 = vmatprep.subr.bf16.mxu1 %v11770_v53  ;;  %4850 = vmatprep.mubr.bf16.mxu1 %v13412_v20  ;;  %v368_v53 = vld [vmem:[%s19188_s1 + $0x938] sm:$0xff]  ;;  %v11761_v42 = vcombine.low %v372_v46, %v376_v28  ;;  %v11690_v6 = vcombine.high %v300_v25, %v304_v38 }
 0x1f0   :  { %v4335_v51 = vpop.f32.mrf.mxu0  ;;  %v4261_v20 = vadd.f32 %v15455_v16, %v15270_v31  ;;  %v292_v36 = vld [vmem:[%s19188_s1 + $0x6d8] sm:$0xff]  ;;  %v11689_v46 = vcombine.low %v300_v25, %v304_v38  ;;  %v11753_v25 = vcombine.low %v364_v35, %v368_v53 }
 0x1f1   :  { %v4336_v26 = vadd.f32 %v4335_v51, %v15470_v37  ;;  %v4408_v14 = vpop.f32.mrf.mxu1  ;;  %4900 = vmatpush2.bf16.msra.mxu0 %v11705_v15  ;;  %v11754_v37 = vcombine.high %v364_v35, %v368_v53  ;;  %v356_v33 = vld [vmem:[%s19188_s1 + $0x8d8] sm:$0xff]  ;;  %v13413_v15 = vld [vmem:[%s19189_s0 + $0x48] ss:$36 sps:$4 sm:$0xff]  }
 0x1f2   :  { %4957 = vmatpush1.bf16.msra.mxu1 %v11769_v61  ;;  %v15626_v40 = vpop.f32.mrf.mxu0  ;;  %4901 = vmatprep.subr.bf16.mxu0 %v11698_v4  ;;  %v296_v4 = vld [vmem:[%s19188_s1 + $0x6f8] sm:$0xff]  ;;  %v4334_v12 = vadd.f32 %v4333_v32, %v4261_v20  ;;  %v4218_v20 = vadd.f32 %v15414_v5, %v15392_v47  ;;  %v15742_v47 = vsub.s32 2, %v15054_v48 }
 0x1f3   :  { %v15632_v58 = vadd.f32 %v4408_v14, %v4336_v26  ;;  %v15634_v11 = vpop.f32.mrf.mxu1  ;;  %4958 = vmatprep.subr.bf16.mxu1 %v11762_v22  ;;  %v360_v31 = vld [vmem:[%s19188_s1 + $0x8f8] sm:$0xff]  ;;  %v4271_v22 = vadd.f32 %v15493_v27, %v4198_v45  ;;  %v11682_v38 = vcombine.high %v292_v36, %v296_v4  ;;  %v11681_v53 = vcombine.low %v292_v36, %v296_v4 }
 0x1f4   :  { %19251 = vst [vmem:[#allocation20_spill] sm:$0xff] %v15634_v11  ;;  %v4341_v1 = vpop.f32.mrf.mxu0  ;;  %v11746_v27 = vcombine.high %v356_v33, %v360_v31  ;;  %v288_v32 = vld [vmem:[%s19188_s1 + $0x6b8] sm:$0xff]  ;;  %v15670_v45 = vadd.f32 %v4406_v9, %v4334_v12  ;;  %v11745_v4 = vcombine.low %v356_v33, %v360_v31  ;;  %19254 = vst [vmem:[#allocation23_spill] sm:$0xff] %v15742_v47 }
 0x1f5   :  { %v4342_v16 = vadd.f32 %v4341_v1, %v15491_v29  ;;  %4902 = vmatpush2.bf16.msra.mxu0 %v11697_v60  ;;  %v4414_v28 = vpop.f32.mrf.mxu1  ;;  %4851 = vmatmul.mubr.bf16.gmra.mxu1 %v13413_v15  ;;  %v284_v29 = vld [vmem:[%s19188_s1 + $0x698] sm:$0xff] }
 0x1f6   :  { %4959 = vmatpush1.bf16.msra.mxu1 %v11761_v42  ;;  %v4343_v61 = vpop.f32.mrf.mxu0  ;;  %4903 = vmatprep.subr.bf16.mxu0 %v11690_v6  ;;  %v13414_v60 = vld [vmem:[%s19189_s0 + $0x94] ss:$36 sps:$4 sm:$0xff]  }
 0x1f7   :  { %v4344_v51 = vadd.f32 %v4343_v61, %v4271_v22  ;;  %v15653_v26 = vadd.f32 %v4414_v28, %v4342_v16  ;;  %v4416_v14 = vpop.f32.mrf.mxu1  ;;  %4960 = vmatprep.subr.bf16.mxu1 %v11754_v37  ;;  %4860 = vmatprep.mubr.bf16.mxu1 %v13414_v60  ;;  %v348_v42 = vld [vmem:[%s19188_s1 + $0x898] sm:$0xff]  ;;  %v11674_v16 = vcombine.high %v284_v29, %v288_v32 }
 0x1f8   :  { %v4345_v35 = vpop.f32.mrf.mxu0  ;;  %v352_v6 = vld [vmem:[%s19188_s1 + $0x8b8] sm:$0xff] }
 0x1f9   :  { %v4346_v37 = vadd.f32 %v4345_v35, %v15508_v62  ;;  %v15675_v1 = vadd.f32 %v4416_v14, %v4344_v51  ;;  %4904 = vmatpush2.bf16.msra.mxu0 %v11689_v46  ;;  %v4418_v22 = vpop.f32.mrf.mxu1  ;;  %v11738_v15 = vcombine.high %v348_v42, %v352_v6  ;;  %v276_v62 = vld [vmem:[%s19188_s1 + $0x658] sm:$0xff]  ;;  %v11673_v14 = vcombine.low %v284_v29, %v288_v32 }
 0x1fa   :  { %4961 = vmatpush1.bf16.msra.mxu1 %v11753_v25  ;;  %v15677_v36 = vpop.f32.mrf.mxu0  ;;  %4905 = vmatprep.subr.bf16.mxu0 %v11682_v38  ;;  %v280_v46 = vld [vmem:[%s19188_s1 + $0x678] sm:$0xff]  ;;  %v11737_v35 = vcombine.low %v348_v42, %v352_v6 }
 0x1fb   :  { %v15681_v9 = vadd.f32 %v4418_v22, %v4346_v37  ;;  %v15683_v12 = vpop.f32.mrf.mxu1  ;;  %4962 = vmatprep.subr.bf16.mxu1 %v11746_v27  ;;  %v340_v33 = vld [vmem:[%s19188_s1 + $0x858] sm:$0xff]  ;;  %v13415_v27 = vld [vmem:[%s19189_s0 + $0x90] ss:$36 sps:$4 sm:$0xff]   ;;  %v11666_v37 = vcombine.high %v276_v62, %v280_v46 }
 0x1fc   :  { %19252 = vst [vmem:[#allocation21_spill] sm:$0xff] %v15683_v12  ;;  %v4351_v61 = vpop.f32.mrf.mxu0  ;;  %v344_v31 = vld [vmem:[%s19188_s1 + $0x878] sm:$0xff] }
 0x1fd   :  { %v4352_v38 = vadd.f32 %v4351_v61, %v15529_v52  ;;  %4906 = vmatpush2.bf16.msra.mxu0 %v11681_v53  ;;  %v4424_v51 = vpop.f32.mrf.mxu1  ;;  %4861 = vmatmul.mubr.bf16.gmra.mxu1 %v13415_v27  ;;  %v11730_v28 = vcombine.high %v340_v33, %v344_v31  ;;  %v268_v52 = vld [vmem:[%s19188_s1 + $0x618] sm:$0xff]  ;;  %v11729_v27 = vcombine.low %v340_v33, %v344_v31 }
 0x1fe   :  { %4963 = vmatpush1.bf16.msra.mxu1 %v11745_v4  ;;  %v4353_v60 = vpop.f32.mrf.mxu0  ;;  %4907 = vmatprep.subr.bf16.mxu0 %v11674_v16  ;;  %v272_v29 = vld [vmem:[%s19188_s1 + $0x638] sm:$0xff]  ;;  %v4208_v4 = vadd.f32 %v15368_v7, %v15297_v17 }
 0x1ff   :  { %v4426_v22 = vpop.f32.mrf.mxu1  ;;  %4964 = vmatprep.subr.bf16.mxu1 %v11738_v15  ;;  %v13416_v32 = vld [vmem:[%s19189_s0 + $0xdc] ss:$36 sps:$4 sm:$0xff]   ;;  %v11665_v15 = vcombine.low %v276_v62, %v280_v46  ;;  %v11657_v5 = vcombine.low %v268_v52, %v272_v29 }
 0x200   :  { %4870 = vmatprep.mubr.bf16.mxu1 %v13416_v32  ;;  %v4355_v53 = vpop.f32.mrf.mxu0  ;;  %v332_v42 = vld [vmem:[%s19188_s1 + $0x818] sm:$0xff]  ;;  %v11658_v32 = vcombine.high %v268_v52, %v272_v29  ;;  %v4281_v11 = vadd.f32 %v15531_v49, %v4208_v4 }
 0x201   :  { %v336_v6 = vld [vmem:[%s19188_s1 + $0x838] sm:$0xff]  ;;  %4908 = vmatpush2.bf16.msra.mxu0 %v11673_v14  ;;  %v4428_v16 = vpop.f32.mrf.mxu1 }
 0x202   :  { %4965 = vmatpush1.bf16.msra.mxu1 %v11737_v35  ;;  %v15720_v61 = vpop.f32.mrf.mxu0  ;;  %4909 = vmatprep.subr.bf16.mxu0 %v11666_v37  ;;  %v15725_v25 = vld [vmem:[%s19188_s1 + $0xbd8] sm:$0xff]  ;;  %v11722_v7 = vcombine.high %v332_v42, %v336_v6  ;;  %v11721_v49 = vcombine.low %v332_v42, %v336_v6  ;;  %v4354_v14 = vadd.f32 %v4353_v60, %v4281_v11 }
 0x203   :  { %v15730_v17 = vpop.f32.mrf.mxu1  ;;  %4966 = vmatprep.subr.bf16.mxu1 %v11730_v28  ;;  %v456_v62 = vld [vmem:[%s19188_s1 + $0xbf8] sm:$0xff]  ;;  %v4291_v28 = vadd.f32 %v15571_v0, %v4218_v20 }
 0x204   :  { %19253 = vst [vmem:[#allocation22_spill] sm:$0xff] %v15730_v17  ;;  %v516_v46 = vld [vmem:[%s19188_s1 + $0xdd8] sm:$0xff]  ;;  %v4361_v31 = vpop.f32.mrf.mxu0  ;;  %v4425_v17 = vadd.f32 %v4424_v51, %v4352_v38  ;;  %v11842_v48 = vcombine.high %v15725_v25, %v456_v62 }
 0x205   :  { %v520_v33 = vld [vmem:[%s19188_s1 + $0xdf8] sm:$0xff]  ;;  %v4362_v35 = vadd.f32 %v4361_v31, %v15569_v34  ;;  %4910 = vmatpush2.bf16.msra.mxu0 %v11665_v15  ;;  %v4434_v37 = vpop.f32.mrf.mxu1  ;;  %v4356_v34 = vadd.f32 %v4355_v53, %v15546_v63  ;;  %v4427_v15 = vadd.f32 %v4426_v22, %v4354_v14  ;;  %v19258_v14 = vmax.f32 %v15632_v58, %v15681_v9 }
 0x206   :  { %v13417_v4 = vld [vmem:[%s19189_s0 + $0xd8] ss:$36 sps:$4 sm:$0xff]   ;;  %4967 = vmatpush1.bf16.msra.mxu1 %v11729_v27  ;;  %v4363_v12 = vpop.f32.mrf.mxu0  ;;  %4911 = vmatprep.subr.bf16.mxu0 %v11658_v32  ;;  %v11906_v52 = vcombine.high %v516_v46, %v520_v33  ;;  %v11905_v6 = vcombine.low %v516_v46, %v520_v33 }
 0x207   :  { %4871 = vmatmul.mubr.bf16.gmra.mxu1 %v13417_v4  ;;  %v444_v0 = vld [vmem:[%s19188_s1 + $0xb98] sm:$0xff]  ;;  %v4364_v11 = vadd.f32 %v4363_v12, %v4291_v28  ;;  %v4435_v20 = vadd.f32 %v4434_v37, %v4362_v35  ;;  %v4436_v60 = vpop.f32.mrf.mxu1  ;;  %4968 = vmatprep.subr.bf16.mxu1 %v11722_v7  ;;  %v15769_v12 = vld [vmem:[%s19190_s2] sm:$0xff]  ;;  %v11841_v28 = vcombine.low %v15725_v25, %v456_v62  ;;  %v13420_v25 = vld [vmem:[%s19189_s0 + $0x8] ss:$36 sps:$4 sm:$0xff]  }
 0x208   :  { %v448_v38 = vld [vmem:[%s19188_s1 + $0xbb8] sm:$0xff]  ;;  %19255 = vst [vmem:[#allocation24_spill] sm:$0xff] %v15769_v12  ;;  %v5234_v53 = vrot.slane %v15769_v12, %v15742_v47  ;;  %v4365_v42 = vpop.f32.mrf.mxu0  ;;  %v4429_v4 = vadd.f32 %v4428_v16, %v4356_v34 }
 0x209   :  { %v508_v51 = vld [vmem:[%s19188_s1 + $0xd98] sm:$0xff]  ;;  %v5191_v27 = vmax.f32 %v4425_v17, %v4435_v20  ;;  %v4366_v32 = vadd.f32 %v4365_v42, %v15588_v2  ;;  %v4437_v7 = vadd.f32 %v4436_v60, %v4364_v11  ;;  %4912 = vmatpush2.bf16.msra.mxu0 %v11657_v5  ;;  %v4438_v31 = vpop.f32.mrf.mxu1  ;;  %v11834_v35 = vcombine.high %v444_v0, %v448_v38 }
 0x20a   :  { %v512_v29 = vld [vmem:[%s19188_s1 + $0xdb8] sm:$0xff]  ;;  %4969 = vmatpush1.bf16.msra.mxu1 %v11721_v49  ;;  %5027 = vmatprep.subr.bf16.mxu0 %v11906_v52  ;;  %v11833_v33 = vcombine.low %v444_v0, %v448_v38 }
 0x20b   :  { %v13418_v63 = vld [vmem:[%s19189_s0 + $0x14] ss:$36 sps:$4 sm:$0xff]   ;;  %v11898_v37 = vcombine.high %v508_v51, %v512_v29  ;;  %v5192_v12 = vmax.f32 %v4427_v15, %v4437_v7  ;;  %v4439_v46 = vadd.f32 %v4438_v31, %v4366_v32  ;;  %4970 = vmatprep.subr.bf16.mxu1 %v11842_v48  ;;  %v11897_v62 = vcombine.low %v508_v51, %v512_v29  ;;  %v13423_v7 = vld [vmem:[%s19189_s0 + $0x9c] ss:$36 sps:$4 sm:$0xff]  }
 0x20c   :  { %4986 = vmatprep.mubr.bf16.mxu1 %v13418_v63  ;;  %v19256_v63 = vmax.f32 %v15608_v55, %v15653_v26  ;;  %v500_v2 = vld [vmem:[%s19188_s1 + $0xd58] sm:$0xff]  ;;  %4914 = vmatmul.mubr.bf16.vlgmr.msra.gmra.mxu0 %v13420_v25  ;;  %v19257_v26 = vmax.f32 %v15670_v45, %v15675_v1 }
 0x20d   :  { %v504_v22 = vld [vmem:[%s19188_s1 + $0xd78] sm:$0xff]  ;;  %v5199_v17 = vmax.f32 %v4429_v4, %v4439_v46  ;;  %5028 = vmatpush1.bf16.msra.mxu0 %v11905_v6 }
 0x20e   :  { %v5207_v47 = vmax.f32 %v19256_v63, %v5191_v27  ;;  %v436_v55 = vld [vmem:[%s19188_s1 + $0xb58] sm:$0xff]  ;;  %v15796_v16 = vmax.f32 %v19257_v26, %v5192_v12  ;;  %4971 = vmatpush2.bf16.msra.mxu1 %v11841_v28  ;;  %5029 = vmatprep.subr.bf16.mxu0 %v11898_v37  ;;  %v11890_v5 = vcombine.high %v500_v2, %v504_v22 }
 0x20f   :  { %v440_v48 = vld [vmem:[%s19188_s1 + $0xb78] sm:$0xff]  ;;  %v5215_v52 = vmax.f32 %v19258_v14, %v5199_v17  ;;  %4972 = vmatprep.subr.bf16.mxu1 %v11834_v35  ;;  %v11889_v11 = vcombine.low %v500_v2, %v504_v22 }
 0x210   :  { %v5265_v49 = vadd.f32 %v5234_v53, %v5207_v47  ;;  %v13421_v34 = vld [vmem:[%s19189_s0 + $0x54] ss:$36 sps:$4 sm:$0xff]   ;;  %v11826_v45 = vcombine.high %v436_v55, %v440_v48  ;;  %v11825_v20 = vcombine.low %v436_v55, %v440_v48 }
 0x211   :  { %4923 = vmatprep.mubr.bf16.mxu0 %v13421_v34  ;;  %v492_v1 = vld [vmem:[%s19188_s1 + $0xd18] sm:$0xff]  ;;  %v5273_v47 = vadd.f32 %v5234_v53, %v5215_v52  ;;  %5030 = vmatpush1.bf16.msra.mxu0 %v11897_v62  ;;  %v13422_v53 = vld [vmem:[%s19189_s0 + $0x50] ss:$36 sps:$4 sm:$0xff]  }
 0x212   :  { %v496_v0 = vld [vmem:[%s19188_s1 + $0xd38] sm:$0xff]  ;;  %4973 = vmatpush2.bf16.msra.mxu1 %v11833_v33  ;;  %5031 = vmatprep.subr.bf16.mxu0 %v11890_v5  ;;  %v5281_v38 = vmax.f32 %v5265_v49, 0.0  ;;  %v13425_v49 = vld [vmem:[%s19189_s0 + $0xe4] ss:$36 sps:$4 sm:$0xff]  }
 0x213   :  { %v428_v58 = vld [vmem:[%s19188_s1 + $0xb18] sm:$0xff]  ;;  %v11882_v60 = vcombine.high %v492_v1, %v496_v0  ;;  %v5289_v51 = vmax.f32 %v5273_v47, 0.0  ;;  %4974 = vmatprep.subr.bf16.mxu1 %v11826_v45  ;;  %v11881_v32 = vcombine.low %v492_v1, %v496_v0 }
 0x214   :  { %v432_v9 = vld [vmem:[%s19188_s1 + $0xb38] sm:$0xff]  ;;  %4924 = vmatmul.mubr.bf16.gmra.mxu0 %v13422_v53 }
 0x215   :  { %v11818_v29 = vcombine.high %v428_v58, %v432_v9  ;;  %v484_v12 = vld [vmem:[%s19188_s1 + $0xcd8] sm:$0xff]  ;;  %v15831_v27 = vpack.c.bf16 %v5289_v51, %v5281_v38  ;;  %5032 = vmatpush1.bf16.msra.mxu0 %v11889_v11  ;;  %4933 = vmatprep.mubr.bf16.mxu0 %v13423_v7  ;;  %v11817_v31 = vcombine.low %v428_v58, %v432_v9  ;;  %v13426_v51 = vld [vmem:[%s19189_s0 + $0xe0] ss:$36 sps:$4 sm:$0xff]  }
 0x216   :  { %v488_v42 = vld [vmem:[%s19188_s1 + $0xcf8] sm:$0xff]  ;;  %4975 = vmatpush2.bf16.msra.mxu1 %v11825_v20  ;;  %5033 = vmatprep.subr.bf16.mxu0 %v11882_v60 }
 0x217   :  { %v420_v6 = vld [vmem:[%s19188_s1 + $0xad8] sm:$0xff]  ;;  %19259 = vst [vmem:[#allocation25_spill] sm:$0xff] %v15831_v27  ;;  %v11874_v28 = vcombine.high %v484_v12, %v488_v42  ;;  %4976 = vmatprep.subr.bf16.mxu1 %v11818_v29  ;;  %v11873_v2 = vcombine.low %v484_v12, %v488_v42 }
 0x218   :  { %v424_v15 = vld [vmem:[%s19188_s1 + $0xaf8] sm:$0xff] }
 0x219   :  { %v11810_v35 = vcombine.high %v420_v6, %v424_v15  ;;  %v476_v37 = vld [vmem:[%s19188_s1 + $0xc98] sm:$0xff]  ;;  %5034 = vmatpush1.bf16.msra.mxu0 %v11881_v32  ;;  %v11809_v22 = vcombine.low %v420_v6, %v424_v15 }
 0x21a   :  { %v480_v4 = vld [vmem:[%s19188_s1 + $0xcb8] sm:$0xff]  ;;  %4977 = vmatpush2.bf16.msra.mxu1 %v11817_v31  ;;  %5035 = vmatprep.subr.bf16.mxu0 %v11874_v28 }
 0x21b   :  { %v412_v63 = vld [vmem:[%s19188_s1 + $0xa98] sm:$0xff]  ;;  %v11866_v25 = vcombine.high %v476_v37, %v480_v4  ;;  %4978 = vmatprep.subr.bf16.mxu1 %v11810_v35  ;;  %v11865_v5 = vcombine.low %v476_v37, %v480_v4  ;;  %v15908_v4 = vpop.f32.mrf.mxu0 }
 0x21c   :  { %v416_v46 = vld [vmem:[%s19188_s1 + $0xab8] sm:$0xff] }
 0x21d   :  { %v11802_v55 = vcombine.high %v412_v63, %v416_v46  ;;  %v468_v48 = vld [vmem:[%s19188_s1 + $0xc58] sm:$0xff]  ;;  %5036 = vmatpush1.bf16.msra.mxu0 %v11873_v2  ;;  %v11801_v14 = vcombine.low %v412_v63, %v416_v46  ;;  %v15910_v2 = vpop.f32.mrf.mxu1 }
 0x21e   :  { %v472_v26 = vld [vmem:[%s19188_s1 + $0xc78] sm:$0xff]  ;;  %4979 = vmatpush2.bf16.msra.mxu1 %v11809_v22  ;;  %5037 = vmatprep.subr.bf16.mxu0 %v11866_v25 }
 0x21f   :  { %v13424_v17 = vld [vmem:[%s19189_s0 + $0x98] ss:$36 sps:$4 sm:$0xff]   ;;  %v11858_v52 = vcombine.high %v468_v48, %v472_v26  ;;  %4980 = vmatprep.subr.bf16.mxu1 %v11802_v55  ;;  %v11857_v9 = vcombine.low %v468_v48, %v472_v26 }
 0x220   :  { %4934 = vmatmul.mubr.bf16.gmra.mxu0 %v13424_v17  ;;  %v404_v62 = vld [vmem:[%s19188_s1 + $0xa58] sm:$0xff] }
 0x221   :  { %v408_v33 = vld [vmem:[%s19188_s1 + $0xa78] sm:$0xff]  ;;  %4943 = vmatprep.mubr.bf16.mxu0 %v13425_v49  ;;  %5038 = vmatpush1.bf16.msra.mxu0 %v11865_v5 }
 0x222   :  { %v11794_v34 = vcombine.high %v404_v62, %v408_v33  ;;  %v460_v45 = vld [vmem:[%s19188_s1 + $0xc18] sm:$0xff]  ;;  %4981 = vmatpush2.bf16.msra.mxu1 %v11801_v14  ;;  %v11793_v47 = vcombine.low %v404_v62, %v408_v33  ;;  %5039 = vmatprep.subr.bf16.mxu0 %v11858_v52  ;;  %v13428_v33 = vld [vmem:[%s19189_s0 + $0x10] ss:$36 sps:$4 sm:$0xff]  }
 0x223   :  { %v464_v1 = vld [vmem:[%s19188_s1 + $0xc38] sm:$0xff] }
 0x224   :  { %v396_v0 = vld [vmem:[%s19188_s1 + $0xa18] sm:$0xff]  ;;  %v11850_v11 = vcombine.high %v460_v45, %v464_v1  ;;  %4982 = vmatprep.subr.bf16.mxu1 %v11794_v34  ;;  %v11849_v42 = vcombine.low %v460_v45, %v464_v1 }
 0x225   :  { %v400_v58 = vld [vmem:[%s19188_s1 + $0xa38] sm:$0xff]  ;;  %5040 = vmatpush1.bf16.msra.mxu0 %v11857_v9 }
 0x226   :  { %v11786_v20 = vcombine.high %v396_v0, %v400_v58  ;;  %v580_v60 = vld [vmem:[%s19188_s1 + $0xfd8] sm:$0xff]  ;;  %4983 = vmatpush2.bf16.msra.mxu1 %v11793_v47  ;;  %v11785_v6 = vcombine.low %v396_v0, %v400_v58  ;;  %5041 = vmatprep.subr.bf16.mxu0 %v11850_v11 }
 0x227   :  { %v584_v38 = vld [vmem:[%s19188_s1 + $0xff8] sm:$0xff] }
 0x228   :  { %4944 = vmatmul.mubr.bf16.gmra.mxu0 %v13426_v51  ;;  %v644_v29 = vld [vmem:[%s19188_s1 + $0x11d8] sm:$0xff]  ;;  %v11970_v15 = vcombine.high %v580_v60, %v584_v38  ;;  %4984 = vmatprep.subr.bf16.mxu1 %v11786_v20  ;;  %v11969_v37 = vcombine.low %v580_v60, %v584_v38 }
 0x229   :  { %v648_v12 = vld [vmem:[%s19188_s1 + $0x11f8] sm:$0xff]  ;;  %5042 = vmatpush1.bf16.msra.mxu0 %v11849_v42 }
 0x22a   :  { %v13427_v53 = vld [vmem:[%s19189_s0 + $0x1c] ss:$36 sps:$4 sm:$0xff]   ;;  %v12034_v32 = vcombine.high %v644_v29, %v648_v12  ;;  %4985 = vmatpush2.bf16.msra.mxu1 %v11785_v6  ;;  %5043 = vmatprep.subr.bf16.mxu0 %v11970_v15  ;;  %v12033_v63 = vcombine.low %v644_v29, %v648_v12 }
 0x22b   :  { %5059 = vmatprep.mubr.bf16.mxu0 %v13427_v53  ;;  %v572_v7 = vld [vmem:[%s19188_s1 + $0xf98] sm:$0xff] }
 0x22c   :  { %v576_v31 = vld [vmem:[%s19188_s1 + $0xfb8] sm:$0xff]  ;;  %5100 = vmatprep.subr.bf16.mxu1 %v12034_v32  ;;  %v4477_v48 = vpop.f32.mrf.mxu0 }
 0x22d   :  { %v636_v28 = vld [vmem:[%s19188_s1 + $0x1198] sm:$0xff]  ;;  %v11962_v46 = vcombine.high %v572_v7, %v576_v31  ;;  %v4550_v62 = vpop.f32.mrf.mxu1  ;;  %4987 = vmatmul.mubr.bf16.vlgmr.msra.gmra.mxu1 %v13428_v33  ;;  %5044 = vmatpush2.bf16.msra.mxu0 %v11969_v37  ;;  %v11961_v5 = vcombine.low %v572_v7, %v576_v31 }
 0x22e   :  { %v640_v35 = vld [vmem:[%s19188_s1 + $0x11b8] sm:$0xff]  ;;  %v15927_v49 = vadd.f32 %v4550_v62, %v4477_v48  ;;  %5101 = vmatpush1.bf16.msra.mxu1 %v12033_v63  ;;  %v15929_v14 = vpop.f32.mrf.mxu0  ;;  %v13431_v48 = vld [vmem:[%s19189_s0 + $0xa4] ss:$36 sps:$4 sm:$0xff]  }
 0x22f   :  { %v12026_v22 = vcombine.high %v636_v28, %v640_v35  ;;  %v564_v25 = vld [vmem:[%s19188_s1 + $0xf58] sm:$0xff]  ;;  %5045 = vmatprep.subr.bf16.mxu0 %v11962_v46  ;;  %v12025_v52 = vcombine.low %v636_v28, %v640_v35  ;;  %v15931_v45 = vpop.f32.mrf.mxu1 }
 0x230   :  { %v568_v55 = vld [vmem:[%s19188_s1 + $0xf78] sm:$0xff]  ;;  %v4481_v47 = vpop.f32.mrf.mxu0 }
 0x231   :  { %v628_v26 = vld [vmem:[%s19188_s1 + $0x1158] sm:$0xff]  ;;  %v11954_v34 = vcombine.high %v564_v25, %v568_v55  ;;  %5102 = vmatprep.subr.bf16.mxu1 %v12026_v22  ;;  %v4554_v60 = vpop.f32.mrf.mxu1  ;;  %5046 = vmatpush2.bf16.msra.mxu0 %v11961_v5  ;;  %v11953_v38 = vcombine.low %v564_v25, %v568_v55 }
 0x232   :  { %v632_v17 = vld [vmem:[%s19188_s1 + $0x1178] sm:$0xff]  ;;  %v15948_v51 = vadd.f32 %v4554_v60, %v4481_v47  ;;  %5103 = vmatpush1.bf16.msra.mxu1 %v12025_v52  ;;  %v15950_v29 = vpop.f32.mrf.mxu0 }
 0x233   :  { %v13429_v1 = vld [vmem:[%s19189_s0 + $0x5c] ss:$36 sps:$4 sm:$0xff]   ;;  %v12018_v0 = vcombine.high %v628_v26, %v632_v17  ;;  %5047 = vmatprep.subr.bf16.mxu0 %v11954_v34  ;;  %v12017_v12 = vcombine.low %v628_v26, %v632_v17  ;;  %v15952_v53 = vpop.f32.mrf.mxu1 }
 0x234   :  { %4996 = vmatprep.mubr.bf16.mxu1 %v13429_v1  ;;  %v556_v58 = vld [vmem:[%s19188_s1 + $0xf18] sm:$0xff]  ;;  %v4487_v28 = vpop.f32.mrf.mxu0 }
 0x235   :  { %v560_v9 = vld [vmem:[%s19188_s1 + $0xf38] sm:$0xff]  ;;  %5104 = vmatprep.subr.bf16.mxu1 %v12018_v0  ;;  %5048 = vmatpush2.bf16.msra.mxu0 %v11953_v38  ;;  %v4560_v63 = vpop.f32.mrf.mxu1 }
 0x236   :  { %v620_v11 = vld [vmem:[%s19188_s1 + $0x1118] sm:$0xff]  ;;  %v11946_v42 = vcombine.high %v556_v58, %v560_v9  ;;  %v11945_v37 = vcombine.low %v556_v58, %v560_v9  ;;  %5105 = vmatpush1.bf16.msra.mxu1 %v12017_v12  ;;  %v15969_v25 = vadd.f32 %v4560_v63, %v4487_v28  ;;  %v15971_v55 = vpop.f32.mrf.mxu0 }
 0x237   :  { %v624_v20 = vld [vmem:[%s19188_s1 + $0x1138] sm:$0xff]  ;;  %v15982_v33 = vpop.f32.mrf.mxu1 }
 0x238   :  { %v12010_v6 = vcombine.high %v620_v11, %v624_v20  ;;  %v548_v15 = vld [vmem:[%s19188_s1 + $0xed8] sm:$0xff]  ;;  %5049 = vmatprep.subr.bf16.mxu0 %v11946_v42  ;;  %v12009_v46 = vcombine.low %v620_v11, %v624_v20  ;;  %v4491_v1 = vpop.f32.mrf.mxu0  ;;  %v13432_v42 = vld [vmem:[%s19189_s0 + $0xa0] ss:$36 sps:$4 sm:$0xff]  }
 0x239   :  { %v552_v32 = vld [vmem:[%s19188_s1 + $0xef8] sm:$0xff]  ;;  %5050 = vmatpush2.bf16.msra.mxu0 %v11945_v37  ;;  %v4564_v0 = vpop.f32.mrf.mxu1 }
 0x23a   :  { %v612_v7 = vld [vmem:[%s19188_s1 + $0x10d8] sm:$0xff]  ;;  %v11938_v22 = vcombine.high %v548_v15, %v552_v32  ;;  %5106 = vmatprep.subr.bf16.mxu1 %v12010_v6  ;;  %v11937_v34 = vcombine.low %v548_v15, %v552_v32  ;;  %v15990_v47 = vadd.f32 %v4564_v0, %v4491_v1  ;;  %v3857_v1 = vadd.f32 %v14772_v59, %v14770_v21  ;;  %v13434_v0 = vld [vmem:[%s19189_s0 + $0xe8] ss:$36 sps:$4 sm:$0xff]   ;;  %v5351_v59 = vld [vmem:[%s19191_s3 + $0x180] sm:$0xff] }
 0x23b   :  { %v616_v31 = vld [vmem:[%s19188_s1 + $0x10f8] sm:$0xff]  ;;  %5107 = vmatpush1.bf16.msra.mxu1 %v12009_v46 }
 0x23c   :  { %v13430_v35 = vld [vmem:[%s19189_s0 + $0x58] ss:$36 sps:$4 sm:$0xff]   ;;  %v12002_v26 = vcombine.high %v612_v7, %v616_v31  ;;  %5051 = vmatprep.subr.bf16.mxu0 %v11938_v22  ;;  %v12001_v58 = vcombine.low %v612_v7, %v616_v31  ;;  %v13433_v7 = vld [vmem:[%s19189_s0 + $0xec] ss:$36 sps:$4 sm:$0xff]  }
 0x23d   :  { %4997 = vmatmul.mubr.bf16.gmra.mxu1 %v13430_v35  ;;  %v540_v17 = vld [vmem:[%s19188_s1 + $0xe98] sm:$0xff]  ;;  %5052 = vmatpush2.bf16.msra.mxu0 %v11937_v34  ;;  %v5491_v34 = vld [vmem:[%s19191_s3 + $0x5e0] sm:$0xff] }
 0x23e   :  { %5006 = vmatprep.mubr.bf16.mxu1 %v13431_v48  ;;  %v544_v62 = vld [vmem:[%s19188_s1 + $0xeb8] sm:$0xff]  ;;  %5108 = vmatprep.subr.bf16.mxu1 %v12002_v26 }
 0x23f   :  { %v604_v5 = vld [vmem:[%s19188_s1 + $0x1098] sm:$0xff]  ;;  %v11930_v9 = vcombine.high %v540_v17, %v544_v62  ;;  %v11929_v6 = vcombine.low %v540_v17, %v544_v62  ;;  %5109 = vmatpush1.bf16.msra.mxu1 %v12001_v58  ;;  %v5359_v17 = vld [vmem:[%s19191_s3 + $0x1c0] sm:$0xff] }
 0x240   :  { %v608_v52 = vld [vmem:[%s19188_s1 + $0x10b8] sm:$0xff]  ;;  %v5363_v62 = vld [vmem:[%s19191_s3 + $0x1e0] sm:$0xff] }
 0x241   :  { %v11994_v11 = vcombine.high %v604_v5, %v608_v52  ;;  %v532_v20 = vld [vmem:[%s19188_s1 + $0xe58] sm:$0xff]  ;;  %5053 = vmatprep.subr.bf16.mxu0 %v11930_v9  ;;  %v11993_v15 = vcombine.low %v604_v5, %v608_v52  ;;  %v3837_v5 = vadd.f32 %v14578_v23, %v14570_v18  ;;  %v5487_v52 = vld [vmem:[%s19191_s3 + $0x5c0] sm:$0xff]  ;;  %v12092_v9 = vcombine.high %v5359_v17, %v5363_v62 }
 0x242   :  { %v536_v60 = vld [vmem:[%s19188_s1 + $0xe78] sm:$0xff]  ;;  %5054 = vmatpush2.bf16.msra.mxu0 %v11929_v6  ;;  %v12220_v21 = vcombine.high %v5487_v52, %v5491_v34  ;;  %v12219_v6 = vcombine.low %v5487_v52, %v5491_v34  ;;  %v13436_v34 = vld [vmem:[%s19189_s0 + $0x20] ss:$36 sps:$4 sm:$0xff]  }
 0x243   :  { %v596_v38 = vld [vmem:[%s19188_s1 + $0x1058] sm:$0xff]  ;;  %v11922_v32 = vcombine.high %v532_v20, %v536_v60  ;;  %5110 = vmatprep.subr.bf16.mxu1 %v11994_v11  ;;  %v11921_v46 = vcombine.low %v532_v20, %v536_v60  ;;  %v3910_v18 = vadd.f32 %v14842_v13, %v3837_v5  ;;  %v3827_v11 = vadd.f32 %v14536_v54, %v14534_v50  ;;  %v5355_v20 = vld [vmem:[%s19191_s3 + $0x1a0] sm:$0xff] }
 0x244   :  { %v600_v12 = vld [vmem:[%s19188_s1 + $0x1078] sm:$0xff]  ;;  %5111 = vmatpush1.bf16.msra.mxu1 %v11993_v15  ;;  %v3930_v13 = vadd.f32 %v14916_v39, %v3857_v1  ;;  %v5479_v60 = vld [vmem:[%s19191_s3 + $0x580] sm:$0xff]  ;;  %v3847_v54 = vadd.f32 %v14614_v57, %v14606_v8  ;;  %v12084_v15 = vcombine.high %v5351_v59, %v5355_v20  ;;  %v4212_v8 = vadd.f32 %v15390_v43, %v15345_v44  ;;  %v19260_v57 = vld [vmem:[#allocation19_spill] sm:$0xff] }
 0x245   :  { %5007 = vmatmul.mubr.bf16.gmra.mxu1 %v13432_v42  ;;  %v11986_v31 = vcombine.high %v596_v38, %v600_v12  ;;  %v524_v28 = vld [vmem:[%s19188_s1 + $0xe18] sm:$0xff]  ;;  %5055 = vmatprep.subr.bf16.mxu0 %v11922_v32  ;;  %v11985_v22 = vcombine.low %v596_v38, %v600_v12  ;;  %v5483_v50 = vld [vmem:[%s19191_s3 + $0x5a0] sm:$0xff]  ;;  %v3900_v38 = vadd.f32 %v14805_v19, %v3827_v11  ;;  %v16064_v32 = vpop.f32.mrf.mxu0  ;;  %v19267_v1 = vld [vmem:[#allocation16_spill] sm:$0xff] }
 0x246   :  { %5016 = vmatprep.mubr.bf16.mxu1 %v13433_v7  ;;  %v528_v35 = vld [vmem:[%s19188_s1 + $0xe38] sm:$0xff]  ;;  %5056 = vmatpush2.bf16.msra.mxu0 %v11921_v46  ;;  %v4222_v12 = vadd.f32 %v15585_v10, %v15434_v3  ;;  %v12091_v42 = vcombine.low %v5359_v17, %v5363_v62  ;;  %v3983_v39 = vadd.f32 %v14846_v41, %v3910_v18  ;;  %v16074_v41 = vld [vmem:[%s19191_s3 + $0x140] sm:$0xff] }
 0x247   :  { %v588_v37 = vld [vmem:[%s19188_s1 + $0x1018] sm:$0xff]  ;;  %v11914_v48 = vcombine.high %v524_v28, %v528_v35  ;;  %5112 = vmatprep.subr.bf16.mxu1 %v11986_v31  ;;  %v11913_v58 = vcombine.low %v524_v28, %v528_v35  ;;  %v4202_v7 = vadd.f32 %v15343_v30, %v15252_v24  ;;  %v12212_v3 = vcombine.high %v5479_v60, %v5483_v50  ;;  %v16079_v10 = vld [vmem:[%s19191_s3 + $0x160] sm:$0xff]  ;;  %v16081_v31 = vpop.f32.mrf.mxu1  ;;  %v19261_v24 = vld [vmem:[#allocation3_spill] sm:$0xff] }
 0x248   :  { %v592_v63 = vld [vmem:[%s19188_s1 + $0x1038] sm:$0xff]  ;;  %5113 = vmatpush1.bf16.msra.mxu1 %v11985_v22  ;;  %v4295_v19 = vadd.f32 %v19260_v57, %v4222_v12  ;;  %v3920_v30 = vadd.f32 %v19261_v24, %v3847_v54  ;;  %v19262_v28 = vld [vmem:[#allocation11_spill] sm:$0xff]  ;;  %v12083_v46 = vcombine.low %v5351_v59, %v5355_v20  ;;  %v5471_v22 = vld [vmem:[%s19191_s3 + $0x540] sm:$0xff]  ;;  %v12076_v18 = vcombine.high %v16074_v41, %v16079_v10 }
 0x249   :  { %v11978_v26 = vcombine.high %v588_v37, %v592_v63  ;;  %5057 = vmatprep.subr.bf16.mxu0 %v11914_v48  ;;  %v11977_v23 = vcombine.low %v588_v37, %v592_v63  ;;  %v4003_v44 = vadd.f32 %v19262_v28, %v3930_v13  ;;  %v19263_v43 = vld [vmem:[#allocation13_spill] sm:$0xff]  ;;  %v19264_v35 = vld [vmem:[#allocation15_spill] sm:$0xff]  ;;  %v5475_v48 = vld [vmem:[%s19191_s3 + $0x560] sm:$0xff]  ;;  %v16112_v59 = vpop.f32.mrf.mxu1  ;;  %v12075_v57 = vcombine.low %v16074_v41, %v16079_v10 }
 0x24a   :  { %5058 = vmatpush2.bf16.msra.mxu0 %v11913_v58  ;;  %v4192_v37 = vadd.f32 %v19264_v35, %v19263_v43  ;;  %v13435_v63 = vld [vmem:[%s19189_s0 + $0x18] ss:$36 sps:$4 sm:$0xff]   ;;  %v19266_v62 = vld [vmem:[#allocation18_spill] sm:$0xff]  ;;  %v4368_v52 = vadd.f32 %v15908_v4, %v4295_v19  ;;  %v12211_v58 = vcombine.low %v5479_v60, %v5483_v50  ;;  %v19272_v19 = vld [vmem:[#allocation8_spill] sm:$0xff]  ;;  %v12203_v24 = vcombine.low %v5471_v22, %v5475_v48 }
 0x24b   :  { %5114 = vmatprep.subr.bf16.mxu1 %v11978_v26  ;;  %8417 = vmatprep.subr.bf16.mxu0 %v12092_v9  ;;  %v19265_v26 = vld [vmem:[#allocation17_spill] sm:$0xff]  ;;  %v4285_v5 = vadd.f32 %v19266_v62, %v4212_v8  ;;  %v13437_v11 = vld [vmem:[%s19189_s0 + $0x64] ss:$36 sps:$4 sm:$0xff]  }
 0x24c   :  { %5115 = vmatpush1.bf16.msra.mxu1 %v11977_v23  ;;  %v4275_v17 = vadd.f32 %v19265_v26, %v4202_v7  ;;  %v16105_v23 = vpop.f32.mrf.mxu0  ;;  %v5335_v20 = vld [vmem:[%s19191_s3 + $0x100] sm:$0xff]  ;;  %v19275_v10 = vld [vmem:[#allocation5_spill] sm:$0xff] }
 0x24d   :  { %5017 = vmatmul.mubr.bf16.gmra.mxu1 %v13434_v0  ;;  %8460 = vmatprep.subr.bf16.mxu1 %v12220_v21  ;;  %v4265_v0 = vadd.f32 %v19267_v1, %v4192_v37  ;;  %v4358_v4 = vadd.f32 %v15720_v61, %v4285_v5  ;;  %v12204_v21 = vcombine.high %v5471_v22, %v5475_v48  ;;  %v5339_v13 = vld [vmem:[%s19191_s3 + $0x120] sm:$0xff]  ;;  %v19269_v61 = vld [vmem:[#allocation4_spill] sm:$0xff]  ;;  %v16140_v37 = vpop.f32.mrf.mxu1 }
 0x24e   :  { %5132 = vmatprep.mubr.bf16.mxu1 %v19246_v56  ;;  %5060 = vmatmul.mubr.bf16.vlgmr.msra.gmra.mxu0 %v13435_v63  ;;  %v4348_v9 = vadd.f32 %v15677_v36, %v4275_v17  ;;  %v19268_v36 = vld [vmem:[#allocation2_spill] sm:$0xff]  ;;  %v3993_v50 = vadd.f32 %v19269_v61, %v3920_v30  ;;  %v12068_v30 = vcombine.high %v5335_v20, %v5339_v13  ;;  %v16136_v28 = vpop.f32.mrf.mxu0  ;;  %v19276_v17 = vld [vmem:[#allocation20_spill] sm:$0xff] }
 0x24f   :  { %8418 = vmatpush1.bf16.msra.mxu0 %v12091_v42  ;;  %5069 = vmatprep.mubr.bf16.mxu0 %v13437_v11  ;;  %v3973_v60 = vadd.f32 %v19268_v36, %v3900_v38  ;;  %v19270_v54 = vld [vmem:[#allocation14_spill] sm:$0xff]  ;;  %v4338_v8 = vadd.f32 %v15626_v40, %v4265_v0  ;;  %v4441_v38 = vadd.f32 %v15910_v2, %v4368_v52  ;;  %v13439_v52 = vld [vmem:[%s19189_s0 + $0x68] ss:$36 sps:$4 sm:$0xff]   ;;  %v16170_v36 = vpop.f32.mrf.mxu1 }
 0x250   :  { %8419 = vmatprep.subr.bf16.mxu0 %v12084_v15  ;;  %v4076_v12 = vadd.f32 %v19270_v54, %v4003_v44  ;;  %v5463_v42 = vld [vmem:[%s19191_s3 + $0x500] sm:$0xff]  ;;  %v19273_v44 = vld [vmem:[#allocation21_spill] sm:$0xff]  ;;  %v19277_v0 = vld [vmem:[#allocation7_spill] sm:$0xff] }
 0x251   :  { %v19271_v15 = vld [vmem:[#allocation6_spill] sm:$0xff]  ;;  %v4421_v43 = vadd.f32 %v19273_v44, %v4348_v9  ;;  %v4046_v63 = vadd.f32 %v19275_v10, %v3973_v60  ;;  %v4411_v62 = vadd.f32 %v19276_v17, %v4338_v8  ;;  %v16165_v9 = vpop.f32.mrf.mxu0 }
 0x252   :  { %v4056_v7 = vadd.f32 %v19271_v15, %v3983_v39  ;;  %v19274_v35 = vld [vmem:[#allocation22_spill] sm:$0xff]  ;;  %v19280_v15 = vld [vmem:[#allocation24_spill] sm:$0xff] }
 0x253   :  { %8420 = vmatpush1.bf16.msra.mxu0 %v12083_v46  ;;  %v4431_v39 = vadd.f32 %v19274_v35, %v4358_v4  ;;  %v5327_v2 = vld [vmem:[%s19191_s3 + $0xc0] sm:$0xff]  ;;  %v5184_v11 = vmax.f32 %v4411_v62, %v4421_v43  ;;  %v13441_v35 = vld [vmem:[%s19189_s0 + $0xa8] ss:$36 sps:$4 sm:$0xff]  }
 0x254   :  { %8421 = vmatprep.subr.bf16.mxu0 %v12076_v18  ;;  %v5331_v41 = vld [vmem:[%s19191_s3 + $0xe0] sm:$0xff]  ;;  %v5182_v1 = vmax.f32 %v4046_v63, %v4056_v7 }
 0x255   :  { %5133 = vmatmul.mubr.bf16.vlgmr.msra.gmra.mxu1 %v13436_v34  ;;  %v13438_v22 = vld [vmem:[%s19189_s0 + $0x60] ss:$36 sps:$4 sm:$0xff]   ;;  %v5200_v5 = vmax.f32 %v4431_v39, %v4441_v38  ;;  %v12067_v34 = vcombine.low %v5335_v20, %v5339_v13  ;;  %v12060_v4 = vcombine.high %v5327_v2, %v5331_v41  ;;  %v13440_v20 = vld [vmem:[%s19189_s0 + $0xac] ss:$36 sps:$4 sm:$0xff]   ;;  %v16190_v38 = vpop.f32.mrf.mxu0 }
 0x256   :  { %8461 = vmatpush1.bf16.msra.mxu1 %v12219_v6  ;;  %5142 = vmatprep.mubr.bf16.mxu1 %v19246_v56  ;;  %v5467_v6 = vld [vmem:[%s19191_s3 + $0x520] sm:$0xff] }
 0x257   :  { %8462 = vmatprep.subr.bf16.mxu1 %v12212_v3  ;;  %v4066_v3 = vadd.f32 %v19272_v19, %v3993_v50  ;;  %v12196_v40 = vcombine.high %v5463_v42, %v5467_v6  ;;  %5070 = vmatmul.mubr.bf16.gmra.mxu0 %v13438_v22  ;;  %v5455_v48 = vld [vmem:[%s19191_s3 + $0x4c0] sm:$0xff]  ;;  %v12195_v18 = vcombine.low %v5463_v42, %v5467_v6  ;;  %v16215_v22 = vpop.f32.mrf.mxu0 }
 0x258   :  { %v5459_v26 = vld [vmem:[%s19191_s3 + $0x4e0] sm:$0xff]  ;;  %8422 = vmatpush1.bf16.msra.mxu0 %v12075_v57  ;;  %5079 = vmatprep.mubr.bf16.mxu0 %v13440_v20  ;;  %v5216_v42 = vmax.f32 %v5184_v11, %v5200_v5  ;;  %v12059_v6 = vcombine.low %v5327_v2, %v5331_v41  ;;  %v13442_v41 = vld [vmem:[%s19189_s0 + $0xb0] ss:$36 sps:$4 sm:$0xff]  }
 0x259   :  { %v5198_v46 = vmax.f32 %v4066_v3, %v4076_v12  ;;  %8423 = vmatprep.subr.bf16.mxu0 %v12068_v30  ;;  %v12188_v13 = vcombine.high %v5455_v48, %v5459_v26  ;;  %v5319_v60 = vld [vmem:[%s19191_s3 + $0x80] sm:$0xff]  ;;  %v12187_v8 = vcombine.low %v5455_v48, %v5459_v26  ;;  %v16194_v3 = vpop.f32.mrf.mxu1  ;;  %v13443_v5 = vld [vmem:[%s19189_s0 + $0xf4] ss:$36 sps:$4 sm:$0xff]  }
 0x25a   :  { %8463 = vmatpush1.bf16.msra.mxu1 %v12211_v58  ;;  %v16163_v58 = vsub.s32 1, %v19277_v0  ;;  %v5323_v61 = vld [vmem:[%s19191_s3 + $0xa0] sm:$0xff] }
 0x25b   :  { %8464 = vmatprep.subr.bf16.mxu1 %v12204_v21  ;;  %v16168_v21 = vsub.s32 3, %v19277_v0  ;;  %v5214_v50 = vmax.f32 %v5182_v1, %v5198_v46  ;;  %v5447_v54 = vld [vmem:[%s19191_s3 + $0x480] sm:$0xff]  ;;  %v12052_v57 = vcombine.high %v5319_v60, %v5323_v61  ;;  %v12051_v10 = vcombine.low %v5319_v60, %v5323_v61  ;;  %v16218_v62 = vpop.f32.mrf.mxu1 }
 0x25c   :  { %19278 = vst [vmem:[#allocation19_spill] sm:$0xff] %v16163_v58  ;;  %v5451_v12 = vld [vmem:[%s19191_s3 + $0x4a0] sm:$0xff]  ;;  %8424 = vmatpush1.bf16.msra.mxu0 %v12067_v34  ;;  %v5230_v7 = vrot.slane %v19280_v15, %v16163_v58 }
 0x25d   :  { %5143 = vmatmul.mubr.bf16.gmra.mxu1 %v13439_v52  ;;  %19279 = vst [vmem:[#allocation3_spill] sm:$0xff] %v16168_v21  ;;  %8425 = vmatprep.subr.bf16.mxu0 %v12060_v4  ;;  %v5238_v19 = vrot.slane %v19280_v15, %v16168_v21  ;;  %v5311_v30 = vld [vmem:[%s19191_s3 + $0x40] sm:$0xff]  ;;  %v12179_v48 = vcombine.low %v5447_v54, %v5451_v12 }
 0x25e   :  { %8465 = vmatpush1.bf16.msra.mxu1 %v12203_v24  ;;  %5152 = vmatprep.mubr.bf16.mxu1 %v19246_v56  ;;  %v12180_v24 = vcombine.high %v5447_v54, %v5451_v12  ;;  %v5315_v44 = vld [vmem:[%s19191_s3 + $0x60] sm:$0xff]  ;;  %v5272_v43 = vadd.f32 %v5230_v7, %v5214_v50  ;;  %v16238_v50 = vpop.f32.mrf.mxu1 }
 0x25f   :  { %8466 = vmatprep.subr.bf16.mxu1 %v12196_v40  ;;  %5080 = vmatmul.mubr.bf16.gmra.mxu0 %v13441_v35  ;;  %v5439_v39 = vld [vmem:[%s19191_s3 + $0x440] sm:$0xff]  ;;  %v5274_v2 = vadd.f32 %v5238_v19, %v5216_v42  ;;  %v12044_v26 = vcombine.high %v5311_v30, %v5315_v44  ;;  %v5266_v17 = vadd.f32 %v5238_v19, %v15796_v16  ;;  %v13445_v19 = vld [vmem:[%s19189_s0 + $0xf8] ss:$36 sps:$4 sm:$0xff]  }
 0x260   :  { %v5443_v40 = vld [vmem:[%s19191_s3 + $0x460] sm:$0xff]  ;;  %8426 = vmatpush1.bf16.msra.mxu0 %v12059_v6  ;;  %5089 = vmatprep.mubr.bf16.mxu0 %v13443_v5  ;;  %v5288_v34 = vmax.f32 %v5272_v43, 0.0  ;;  %v12043_v4 = vcombine.low %v5311_v30, %v5315_v44  ;;  %v13444_v6 = vld [vmem:[%s19189_s0 + $0xf0] ss:$36 sps:$4 sm:$0xff]  }
 0x261   :  { %v19281_v63 = vld [vmem:[#allocation10_spill] sm:$0xff]  ;;  %8427 = vmatprep.subr.bf16.mxu0 %v12052_v57  ;;  %v12172_v52 = vcombine.high %v5439_v39, %v5443_v40  ;;  %v12171_v60 = vcombine.low %v5439_v39, %v5443_v40  ;;  %v5282_v61 = vmax.f32 %v5266_v17, 0.0  ;;  %v16265_v39 = vpop.f32.mrf.mxu1 }
 0x262   :  { %8467 = vmatpush1.bf16.msra.mxu1 %v12195_v18  ;;  %v5264_v46 = vadd.f32 %v5230_v7, %v19281_v63  ;;  %v5303_v1 = vld [vmem:[%s19191_s3] sm:$0xff]  ;;  %v5290_v18 = vmax.f32 %v5274_v2, 0.0 }
 0x263   :  { %8468 = vmatprep.subr.bf16.mxu1 %v12188_v13  ;;  %v5307_v16 = vld [vmem:[%s19191_s3 + $0x20] sm:$0xff]  ;;  %v16236_v13 = vpop.f32.mrf.mxu0  ;;  %v16282_v5 = vpop.f32.mrf.mxu1 }
 0x264   :  { %8428 = vmatpush1.bf16.msra.mxu0 %v12051_v10  ;;  %v5431_v11 = vld [vmem:[%s19191_s3 + $0x400] sm:$0xff]  ;;  %v12036_v54 = vcombine.high %v5303_v1, %v5307_v16  ;;  %v12035_v30 = vcombine.low %v5303_v1, %v5307_v16 }
 0x265   :  { %5153 = vmatmul.mubr.bf16.gmra.mxu1 %v13442_v41  ;;  %v5435_v20 = vld [vmem:[%s19191_s3 + $0x420] sm:$0xff]  ;;  %8429 = vmatprep.subr.bf16.mxu0 %v12044_v26  ;;  %v16262_v44 = vpop.f32.mrf.mxu0 }
 0x266   :  { %8469 = vmatpush1.bf16.msra.mxu1 %v12187_v8  ;;  %5162 = vmatprep.mubr.bf16.mxu1 %v19246_v56  ;;  %v5280_v56 = vmax.f32 %v5264_v46, 0.0  ;;  %v5423_v12 = vld [vmem:[%s19191_s3 + $0x3c0] sm:$0xff]  ;;  %v12164_v7 = vcombine.high %v5431_v11, %v5435_v20  ;;  %v12163_v43 = vcombine.low %v5431_v11, %v5435_v20 }
 0x267   :  { %8470 = vmatprep.subr.bf16.mxu1 %v12180_v24  ;;  %v5427_v42 = vld [vmem:[%s19191_s3 + $0x3e0] sm:$0xff]  ;;  %5090 = vmatmul.mubr.bf16.gmra.mxu0 %v13444_v6  ;;  %v16260_v24 = vpack.c.bf16 %v5290_v18, %v5282_v61 }
 0x268   :  { %v16249_v15 = vpack.c.bf16 %v5288_v34, %v5280_v56  ;;  %v5551_v8 = vld [vmem:[%s19191_s3 + $0x7c0] sm:$0xff]  ;;  %8430 = vmatpush1.bf16.msra.mxu0 %v12043_v4  ;;  %v12156_v35 = vcombine.high %v5423_v12, %v5427_v42  ;;  %v12155_v46 = vcombine.low %v5423_v12, %v5427_v42 }
 0x269   :  { %v5555_v57 = vld [vmem:[%s19191_s3 + $0x7e0] sm:$0xff]  ;;  %19283 = vst [vmem:[#allocation13_spill] sm:$0xff] %v16260_v24  ;;  %8431 = vmatprep.subr.bf16.mxu0 %v12036_v54 }
 0x26a   :  { %8471 = vmatpush1.bf16.msra.mxu1 %v12179_v48  ;;  %19282 = vst [vmem:[#allocation11_spill] sm:$0xff] %v16249_v15  ;;  %8449 = vmatprep.mubr.bf16.mxu0 %v16249_v15  ;;  %v12284_v40 = vcombine.high %v5551_v8, %v5555_v57  ;;  %v5415_v2 = vld [vmem:[%s19191_s3 + $0x380] sm:$0xff]  ;;  %v16280_v48 = vpop.f32.mrf.mxu0  ;;  %v12283_v26 = vcombine.low %v5551_v8, %v5555_v57 }
 0x26b   :  { %8472 = vmatprep.subr.bf16.mxu1 %v12172_v52  ;;  %v5419_v41 = vld [vmem:[%s19191_s3 + $0x3a0] sm:$0xff] }
 0x26c   :  { %v5543_v10 = vld [vmem:[%s19191_s3 + $0x780] sm:$0xff]  ;;  %8432 = vmatpush1.bf16.msra.mxu0 %v12035_v30  ;;  %v12148_v17 = vcombine.high %v5415_v2, %v5419_v41  ;;  %v4623_v16 = vpop.f32.mrf.mxu0  ;;  %v12147_v56 = vcombine.low %v5415_v2, %v5419_v41 }
 0x26d   :  { %5163 = vmatmul.mubr.bf16.gmra.mxu1 %v13445_v19  ;;  %v5547_v63 = vld [vmem:[%s19191_s3 + $0x7a0] sm:$0xff]  ;;  %8433 = vmatprep.subr.bf16.mxu0 %v12156_v35  ;;  %v16297_v11 = vadd.f32 %v4623_v16, %v15927_v49  ;;  %v16299_v20 = vpop.f32.mrf.mxu1 }
 0x26e   :  { %8473 = vmatpush1.bf16.msra.mxu1 %v12171_v60  ;;  %8492 = vmatprep.mubr.bf16.mxu1 %v16260_v24  ;;  %v12276_v52 = vcombine.high %v5543_v10, %v5547_v63  ;;  %v5407_v34 = vld [vmem:[%s19191_s3 + $0x340] sm:$0xff]  ;;  %v16301_v60 = vpop.f32.mrf.mxu0  ;;  %v12275_v61 = vcombine.low %v5543_v10, %v5547_v63 }
 0x26f   :  { %8474 = vmatprep.subr.bf16.mxu1 %v12164_v7  ;;  %v5411_v1 = vld [vmem:[%s19191_s3 + $0x360] sm:$0xff]  ;;  %v16303_v12 = vpop.f32.mrf.mxu1 }
 0x270   :  { %v5535_v18 = vld [vmem:[%s19191_s3 + $0x740] sm:$0xff]  ;;  %8434 = vmatpush2.bf16.msra.mxu0 %v12155_v46  ;;  %v12140_v54 = vcombine.high %v5407_v34, %v5411_v1  ;;  %v4627_v7 = vpop.f32.mrf.mxu0  ;;  %v12139_v30 = vcombine.low %v5407_v34, %v5411_v1 }
 0x271   :  { %v5539_v4 = vld [vmem:[%s19191_s3 + $0x760] sm:$0xff]  ;;  %8435 = vmatprep.subr.bf16.mxu0 %v12148_v17  ;;  %v16318_v19 = vadd.f32 %v4627_v7, %v15948_v51  ;;  %v16322_v2 = vpop.f32.mrf.mxu1 }
 0x272   :  { %8475 = vmatpush1.bf16.msra.mxu1 %v12163_v43  ;;  %v12268_v42 = vcombine.high %v5535_v18, %v5539_v4  ;;  %v5399_v6 = vld [vmem:[%s19191_s3 + $0x300] sm:$0xff]  ;;  %v16320_v43 = vpop.f32.mrf.mxu0  ;;  %v12267_v35 = vcombine.low %v5535_v18, %v5539_v4 }
 0x273   :  { %8476 = vmatprep.subr.bf16.mxu1 %v12284_v40  ;;  %v5403_v49 = vld [vmem:[%s19191_s3 + $0x320] sm:$0xff]  ;;  %19284 = vst [vmem:[#allocation15_spill] sm:$0xff] %v16320_v43  ;;  %v16341_v18 = vpop.f32.mrf.mxu1 }
 0x274   :  { %v5527_v8 = vld [vmem:[%s19191_s3 + $0x700] sm:$0xff]  ;;  %8436 = vmatpush2.bf16.msra.mxu0 %v12147_v56  ;;  %v12132_v40 = vcombine.high %v5399_v6, %v5403_v49  ;;  %v4633_v63 = vpop.f32.mrf.mxu0  ;;  %19285 = vst [vmem:[#allocation17_spill] sm:$0xff] %v16341_v18 }
 0x275   :  { %v5531_v57 = vld [vmem:[%s19191_s3 + $0x720] sm:$0xff]  ;;  %8437 = vmatprep.subr.bf16.mxu0 %v12140_v54  ;;  %v16337_v17 = vadd.f32 %v4633_v63, %v15969_v25 }
 0x276   :  { %8477 = vmatpush2.bf16.msra.mxu1 %v12283_v26  ;;  %v12260_v41 = vcombine.high %v5527_v8, %v5531_v57  ;;  %v5391_v10 = vld [vmem:[%s19191_s3 + $0x2c0] sm:$0xff]  ;;  %v16339_v34 = vpop.f32.mrf.mxu0  ;;  %v12259_v1 = vcombine.low %v5527_v8, %v5531_v57 }
 0x277   :  { %8478 = vmatprep.subr.bf16.mxu1 %v12276_v52  ;;  %v5395_v51 = vld [vmem:[%s19191_s3 + $0x2e0] sm:$0xff]  ;;  %v12131_v52 = vcombine.low %v5399_v6, %v5403_v49  ;;  %v16355_v6 = vpop.f32.mrf.mxu1 }
 0x278   :  { %v5519_v46 = vld [vmem:[%s19191_s3 + $0x6c0] sm:$0xff]  ;;  %8438 = vmatpush2.bf16.msra.mxu0 %v12139_v30  ;;  %v12124_v16 = vcombine.high %v5391_v10, %v5395_v51  ;;  %v12123_v7 = vcombine.low %v5391_v10, %v5395_v51 }
 0x279   :  { %v5523_v26 = vld [vmem:[%s19191_s3 + $0x6e0] sm:$0xff]  ;;  %8439 = vmatprep.subr.bf16.mxu0 %v12132_v40  ;;  %v16376_v63 = vpop.f32.mrf.mxu1 }
 0x27a   :  { %8479 = vmatpush2.bf16.msra.mxu1 %v12275_v61  ;;  %v12252_v4 = vcombine.high %v5519_v46, %v5523_v26  ;;  %v5383_v56 = vld [vmem:[%s19191_s3 + $0x280] sm:$0xff]  ;;  %v4637_v61 = vpop.f32.mrf.mxu0  ;;  %v12251_v57 = vcombine.low %v5519_v46, %v5523_v26 }
 0x27b   :  { %8480 = vmatprep.subr.bf16.mxu1 %v12268_v42  ;;  %v5387_v25 = vld [vmem:[%s19191_s3 + $0x2a0] sm:$0xff]  ;;  %v16358_v49 = vadd.f32 %v4637_v61, %v15990_v47 }
 0x27c   :  { %v5511_v54 = vld [vmem:[%s19191_s3 + $0x680] sm:$0xff]  ;;  %8440 = vmatpush2.bf16.msra.mxu0 %v12131_v52  ;;  %v16360_v8 = vpop.f32.mrf.mxu0  ;;  %v12116_v30 = vcombine.high %v5383_v56, %v5387_v25  ;;  %v12115_v46 = vcombine.low %v5383_v56, %v5387_v25 }
 0x27d   :  { %v5515_v42 = vld [vmem:[%s19191_s3 + $0x6a0] sm:$0xff]  ;;  %8441 = vmatprep.subr.bf16.mxu0 %v12124_v16 }
 0x27e   :  { %8481 = vmatpush2.bf16.msra.mxu1 %v12267_v35  ;;  %v12244_v35 = vcombine.high %v5511_v54, %v5515_v42  ;;  %v5375_v40 = vld [vmem:[%s19191_s3 + $0x240] sm:$0xff]  ;;  %v16368_v47 = vpop.f32.mrf.mxu0  ;;  %v12243_v52 = vcombine.low %v5511_v54, %v5515_v42  ;;  %v16394_v54 = vpop.f32.mrf.mxu1 }
 0x27f   :  { %8482 = vmatprep.subr.bf16.mxu1 %v12260_v41  ;;  %v5379_v41 = vld [vmem:[%s19191_s3 + $0x260] sm:$0xff] }
 0x280   :  { %v5503_v10 = vld [vmem:[%s19191_s3 + $0x640] sm:$0xff]  ;;  %8442 = vmatpush2.bf16.msra.mxu0 %v12123_v7  ;;  %v16378_v26 = vpop.f32.mrf.mxu0  ;;  %v12107_v42 = vcombine.low %v5375_v40, %v5379_v41 }
 0x281   :  { %v5507_v51 = vld [vmem:[%s19191_s3 + $0x660] sm:$0xff]  ;;  %8443 = vmatprep.subr.bf16.mxu0 %v12116_v30 }
 0x282   :  { %8483 = vmatpush2.bf16.msra.mxu1 %v12259_v1  ;;  %v12108_v1 = vcombine.high %v5375_v40, %v5379_v41  ;;  %v12236_v16 = vcombine.high %v5503_v10, %v5507_v51  ;;  %v5371_v61 = vld [vmem:[%s19191_s3 + $0x220] sm:$0xff]  ;;  %v16386_v21 = vpop.f32.mrf.mxu0 }
 0x283   :  { %8484 = vmatprep.subr.bf16.mxu1 %v12252_v4  ;;  %v5367_v4 = vld [vmem:[%s19191_s3 + $0x200] sm:$0xff]  ;;  %19286 = vst [vmem:[#allocation18_spill] sm:$0xff] %v16386_v21 }
 0x284   :  { %v5495_v56 = vld [vmem:[%s19191_s3 + $0x600] sm:$0xff]  ;;  %8444 = vmatpush2.bf16.msra.mxu0 %v12115_v46  ;;  %v16396_v7 = vpop.f32.mrf.mxu0  ;;  %v12100_v30 = vcombine.high %v5367_v4, %v5371_v61 }
 0x285   :  { %v5499_v25 = vld [vmem:[%s19191_s3 + $0x620] sm:$0xff]  ;;  %19287 = vst [vmem:[#allocation16_spill] sm:$0xff] %v16396_v7  ;;  %8445 = vmatprep.subr.bf16.mxu0 %v12108_v1 }
 0x286   :  { %8485 = vmatpush2.bf16.msra.mxu1 %v12251_v57  ;;  %v12235_v57 = vcombine.low %v5503_v10, %v5507_v51  ;;  %v5615_v58 = vld [vmem:[%s19191_s3 + $0x9c0] sm:$0xff]  ;;  %v16404_v15 = vpop.f32.mrf.mxu0  ;;  %v16412_v10 = vpop.f32.mrf.mxu1  ;;  %v12099_v51 = vcombine.low %v5367_v4, %v5371_v61 }
 0x287   :  { %8486 = vmatprep.subr.bf16.mxu1 %v12244_v35  ;;  %v12228_v35 = vcombine.high %v5495_v56, %v5499_v25  ;;  %v5619_v24 = vld [vmem:[%s19191_s3 + $0x9e0] sm:$0xff]  ;;  %19288 = vst [vmem:[#allocation2_spill] sm:$0xff] %v16412_v10 }
 0x288   :  { %v5743_v40 = vld [vmem:[%s19191_s3 + $0xdc0] sm:$0xff]  ;;  %8446 = vmatpush2.bf16.msra.mxu0 %v12107_v42  ;;  %v16414_v46 = vpop.f32.mrf.mxu0  ;;  %v12348_v1 = vcombine.high %v5615_v58, %v5619_v24 }
 0x289   :  { %v5747_v41 = vld [vmem:[%s19191_s3 + $0xde0] sm:$0xff]  ;;  %8447 = vmatprep.subr.bf16.mxu0 %v12100_v30 }
 0x28a   :  { %8487 = vmatpush2.bf16.msra.mxu1 %v12243_v52  ;;  %v12227_v52 = vcombine.low %v5495_v56, %v5499_v25  ;;  %v5611_v18 = vld [vmem:[%s19191_s3 + $0x9a0] sm:$0xff]  ;;  %v12476_v7 = vcombine.high %v5743_v40, %v5747_v41  ;;  %v16422_v43 = vpop.f32.mrf.mxu0  ;;  %v16430_v56 = vpop.f32.mrf.mxu1  ;;  %v12347_v25 = vcombine.low %v5615_v58, %v5619_v24  ;;  %v12475_v30 = vcombine.low %v5743_v40, %v5747_v41 }
 0x28b   :  { %8488 = vmatprep.subr.bf16.mxu1 %v12236_v16  ;;  %v5607_v16 = vld [vmem:[%s19191_s3 + $0x980] sm:$0xff]  ;;  %19289 = vst [vmem:[#allocation4_spill] sm:$0xff] %v16422_v43  ;;  %19290 = vst [vmem:[#allocation14_spill] sm:$0xff] %v16430_v56  ;;  %v19292_v56 = vld [vmem:[#allocation12_spill] sm:$0xff] }
 0x28c   :  { %v5735_v4 = vld [vmem:[%s19191_s3 + $0xd80] sm:$0xff]  ;;  %8448 = vmatpush2.bf16.msra.mxu0 %v12099_v51  ;;  %v16432_v42 = vpop.f32.mrf.mxu0  ;;  %v16447_v40 = vpop.f32.mrf.mxu1  ;;  %v12339_v41 = vcombine.low %v5607_v16, %v5611_v18 }
 0x28d   :  { %v5739_v61 = vld [vmem:[%s19191_s3 + $0xda0] sm:$0xff]  ;;  %19291 = vst [vmem:[#allocation6_spill] sm:$0xff] %v16432_v42  ;;  %8503 = vmatprep.subr.bf16.mxu0 %v12348_v1  ;;  %v4553_v1 = vadd.f32 %v15931_v45, %v15929_v14 }
 0x28e   :  { %8489 = vmatpush2.bf16.msra.mxu1 %v12235_v57  ;;  %v12340_v57 = vcombine.high %v5607_v16, %v5611_v18  ;;  %v5603_v10 = vld [vmem:[%s19191_s3 + $0x960] sm:$0xff]  ;;  %v12468_v43 = vcombine.high %v5735_v4, %v5739_v61  ;;  %v4769_v21 = vpop.f32.mrf.mxu0 }
 0x28f   :  { %8490 = vmatprep.subr.bf16.mxu1 %v12228_v35  ;;  %v5599_v35 = vld [vmem:[%s19191_s3 + $0x940] sm:$0xff]  ;;  %8450 = vmatmul.mubr.bf16.vlgmr.msra.gmra.mxu0 %v19292_v56  ;;  %v4563_v56 = vadd.f32 %v15982_v33, %v15971_v55  ;;  %v4626_v45 = vadd.f32 %v16301_v60, %v4553_v1  ;;  %v16470_v33 = vpop.f32.mrf.mxu1 }
 0x290   :  { %v5727_v58 = vld [vmem:[%s19191_s3 + $0xd40] sm:$0xff]  ;;  %8504 = vmatpush1.bf16.msra.mxu0 %v12347_v25  ;;  %v4771_v51 = vpop.f32.mrf.mxu0 }
 0x291   :  { %v5731_v24 = vld [vmem:[%s19191_s3 + $0xd60] sm:$0xff]  ;;  %8505 = vmatprep.subr.bf16.mxu0 %v12340_v57  ;;  %v4636_v55 = vadd.f32 %v16339_v34, %v4563_v56  ;;  %v4697_v56 = vadd.f32 %v16299_v20, %v16297_v11  ;;  %v4699_v20 = vadd.f32 %v16303_v12, %v4626_v45 }
 0x292   :  { %8491 = vmatpush2.bf16.msra.mxu1 %v12227_v52  ;;  %v12467_v52 = vcombine.low %v5735_v4, %v5739_v61  ;;  %v5591_v42 = vld [vmem:[%s19191_s3 + $0x900] sm:$0xff]  ;;  %v12460_v18 = vcombine.high %v5727_v58, %v5731_v24  ;;  %v4773_v16 = vpop.f32.mrf.mxu0  ;;  %v12331_v61 = vcombine.low %v5599_v35, %v5603_v10  ;;  %v12459_v34 = vcombine.low %v5727_v58, %v5731_v24 }
 0x293   :  { %8546 = vmatprep.subr.bf16.mxu1 %v12476_v7  ;;  %v12332_v7 = vcombine.high %v5599_v35, %v5603_v10  ;;  %v5595_v25 = vld [vmem:[%s19191_s3 + $0x920] sm:$0xff]  ;;  %v4707_v10 = vadd.f32 %v16355_v6, %v16337_v17  ;;  %v4709_v17 = vadd.f32 %v16376_v63, %v4636_v55  ;;  %v16503_v6 = vpop.f32.mrf.mxu1  ;;  %v4701_v24 = vadd.f32 %v16322_v2, %v16318_v19 }
 0x294   :  { %v16463_v4 = vld [vmem:[%s19191_s3 + $0xd00] sm:$0xff]  ;;  %8506 = vmatpush1.bf16.msra.mxu0 %v12339_v41  ;;  %v12324_v60 = vcombine.high %v5591_v42, %v5595_v25  ;;  %v12323_v1 = vcombine.low %v5591_v42, %v5595_v25  ;;  %v16505_v42 = vadd.f32 %v4769_v21, %v4697_v56  ;;  %v16519_v63 = vadd.f32 %v4771_v51, %v4699_v20 }
 0x295   :  { %8493 = vmatmul.mubr.bf16.vlgmr.msra.gmra.mxu1 %v15831_v27  ;;  %v5723_v14 = vld [vmem:[%s19191_s3 + $0xd20] sm:$0xff]  ;;  %8507 = vmatprep.subr.bf16.mxu0 %v12332_v7 }
 0x296   :  { %8547 = vmatpush1.bf16.msra.mxu1 %v12475_v30  ;;  %v16480_v57 = vld [vmem:[%s19191_s3 + $0x8e0] sm:$0xff]  ;;  %v16482_v30 = vpop.f32.mrf.mxu0  ;;  %v12452_v35 = vcombine.high %v16463_v4, %v5723_v14  ;;  %v12451_v21 = vcombine.low %v16463_v4, %v5723_v14  ;;  %v19220_v14 = vsub.s32 4, %v19277_v0 }
 0x297   :  { %8548 = vmatprep.subr.bf16.mxu1 %v12468_v43  ;;  %v16475_v43 = vld [vmem:[%s19191_s3 + $0x8c0] sm:$0xff] }
 0x298   :  { %v4779_v41 = vpop.f32.mrf.mxu0  ;;  %v12316_v27 = vcombine.high %v16475_v43, %v16480_v57  ;;  %v16494_v7 = vld [vmem:[%s19191_s3 + $0xcc0] sm:$0xff]  ;;  %8508 = vmatpush1.bf16.msra.mxu0 %v12331_v61  ;;  %v12315_v4 = vcombine.low %v16475_v43, %v16480_v57  ;;  %v16562_v43 = vadd.f32 %v4773_v16, %v4701_v24 }
 0x299   :  { %v16499_v11 = vld [vmem:[%s19191_s3 + $0xce0] sm:$0xff]  ;;  %v16507_v58 = vadd.f32 %v4779_v41, %v4707_v10  ;;  %8509 = vmatprep.subr.bf16.mxu0 %v12324_v60  ;;  %v19223_v10 = vsub.s32 5, %v19277_v0 }
 0x29a   :  { %8549 = vmatpush1.bf16.msra.mxu1 %v12467_v52  ;;  %v4711_v52 = vadd.f32 %v16394_v54, %v16358_v49  ;;  %v4781_v25 = vpop.f32.mrf.mxu0  ;;  %v16516_v12 = vld [vmem:[%s19191_s3 + $0x880] sm:$0xff]  ;;  %v12444_v54 = vcombine.high %v16494_v7, %v16499_v11  ;;  %19293 = vst [vmem:[#allocation8_spill] sm:$0xff] %v16562_v43  ;;  %v12443_v24 = vcombine.low %v16494_v7, %v16499_v11 }
 0x29b   :  { %8550 = vmatprep.subr.bf16.mxu1 %v12460_v18  ;;  %v16523_v45 = vadd.f32 %v4781_v25, %v4709_v17  ;;  %v16528_v19 = vld [vmem:[%s19191_s3 + $0x8a0] sm:$0xff]  ;;  %v4581_v11 = vadd.f32 %v16218_v62, %v16215_v22  ;;  %v4573_v43 = vadd.f32 %v16140_v37, %v16136_v28  ;;  %v4583_v22 = vadd.f32 %v16238_v50, %v16236_v13 }
 0x29c   :  { %v16533_v2 = vld [vmem:[%s19191_s3 + $0x840] sm:$0xff]  ;;  %v4783_v51 = vpop.f32.mrf.mxu0  ;;  %8510 = vmatpush1.bf16.msra.mxu0 %v12323_v1  ;;  %v12307_v1 = vcombine.low %v16516_v12, %v16528_v19  ;;  %v12308_v17 = vcombine.high %v16516_v12, %v16528_v19  ;;  %v4557_v28 = vadd.f32 %v15952_v53, %v15950_v29  ;;  %v4575_v37 = vadd.f32 %v16170_v36, %v16165_v9 }
 0x29d   :  { %v16538_v49 = vld [vmem:[%s19191_s3 + $0x860] sm:$0xff]  ;;  %v16566_v56 = vadd.f32 %v4783_v51, %v4711_v52  ;;  %8511 = vmatprep.subr.bf16.mxu0 %v12316_v27  ;;  %v4585_v13 = vadd.f32 %v16265_v39, %v16262_v44  ;;  %v4577_v53 = vadd.f32 %v16194_v3, %v16190_v38  ;;  %v4587_v9 = vadd.f32 %v16282_v5, %v16280_v48  ;;  %v19299_v5 = vld [vmem:[#allocation15_spill] sm:$0xff] }
 0x29e   :  { %8551 = vmatpush1.bf16.msra.mxu1 %v12459_v34  ;;  %v16548_v55 = vld [vmem:[%s19191_s3 + $0x800] sm:$0xff]  ;;  %v16560_v34 = vpop.f32.mrf.mxu1  ;;  %v16584_v20 = vpop.f32.mrf.mxu0  ;;  %v12300_v51 = vcombine.high %v16533_v2, %v16538_v49  ;;  %v4646_v36 = vadd.f32 %v16378_v26, %v4573_v43  ;;  %v4656_v44 = vadd.f32 %v16414_v46, %v4583_v22  ;;  %v4630_v26 = vadd.f32 %v19299_v5, %v4557_v28 }
 0x29f   :  { %8552 = vmatprep.subr.bf16.mxu1 %v12452_v35  ;;  %v16553_v61 = vld [vmem:[%s19191_s3 + $0xc80] sm:$0xff]  ;;  %19294 = vst [vmem:[#allocation21_spill] sm:$0xff] %v16566_v56  ;;  %v4567_v56 = vadd.f32 %v16081_v31, %v16064_v32  ;;  %v19303_v28 = vcombine.low %v16533_v2, %v16538_v49  ;;  %v19304_v49 = vld [vmem:[#allocation17_spill] sm:$0xff] }
 0x2a0   :  { %v16558_v60 = vld [vmem:[%s19191_s3 + $0xca0] sm:$0xff]  ;;  %v4789_v57 = vpop.f32.mrf.mxu0  ;;  %v4728_v18 = vpop.f32.mrf.mxu1  ;;  %8512 = vmatpush1.bf16.msra.mxu0 %v12315_v4  ;;  %v4654_v4 = vadd.f32 %v16404_v15, %v4581_v11 }
 0x2a1   :  { %v16572_v35 = vld [vmem:[%s19191_s3 + $0x820] sm:$0xff]  ;;  %v12436_v27 = vcombine.high %v16553_v61, %v16558_v60  ;;  %8513 = vmatprep.subr.bf16.mxu0 %v12308_v17  ;;  %v4640_v50 = vadd.f32 %v16360_v8, %v4567_v56 }
 0x2a2   :  { %v16577_v41 = vld [vmem:[%s19191_s3 + $0xbc0] sm:$0xff]  ;;  %8553 = vmatpush1.bf16.msra.mxu1 %v12451_v21  ;;  %v12292_v21 = vcombine.high %v16548_v55, %v16572_v35  ;;  %v4730_v39 = vpop.f32.mrf.mxu1  ;;  %v4727_v38 = vadd.f32 %v16560_v34, %v4654_v4 }
 0x2a3   :  { %v16582_v16 = vld [vmem:[%s19191_s3 + $0xbe0] sm:$0xff]  ;;  %8554 = vmatprep.subr.bf16.mxu1 %v12444_v54 }
 0x2a4   :  { %v16603_v12 = vld [vmem:[%s19190_s2] sm:$0xff]  ;;  %v12411_v25 = vcombine.low %v16577_v41, %v16582_v16  ;;  %8514 = vmatpush1.bf16.msra.mxu0 %v12307_v1  ;;  %v19301_v1 = vld [vmem:[#allocation16_spill] sm:$0xff] }
 0x2a5   :  { %19295 = vst [vmem:[#allocation22_spill] sm:$0xff] %v16603_v12  ;;  %v16608_v7 = vrot.slane %v16603_v12, %v19220_v14  ;;  %v5695_v54 = vld [vmem:[%s19191_s3 + $0xc40] sm:$0xff]  ;;  %v4571_v14 = vadd.f32 %v16112_v59, %v16105_v23  ;;  %v16629_v19 = vrot.slane %v16603_v12, %v19223_v10  ;;  %v4791_v23 = vpop.f32.mrf.mxu0  ;;  %v12435_v59 = vcombine.low %v16553_v61, %v16558_v60  ;;  %v19297_v60 = vld [vmem:[#allocation4_spill] sm:$0xff] }
 0x2a6   :  { %v5699_v52 = vld [vmem:[%s19191_s3 + $0xc60] sm:$0xff]  ;;  %8555 = vmatpush1.bf16.msra.mxu1 %v12443_v24  ;;  %v4658_v56 = vadd.f32 %v19297_v60, %v4585_v13  ;;  %8515 = vmatprep.subr.bf16.mxu0 %v12300_v51  ;;  %v4650_v22 = vadd.f32 %v19301_v1, %v4577_v53  ;;  %v19310_v1 = vld [vmem:[#allocation21_spill] sm:$0xff] }
 0x2a7   :  { %v4644_v62 = vadd.f32 %v16368_v47, %v4571_v14  ;;  %v16646_v32 = vld [vmem:[%s19191_s3 + $0xb80] sm:$0xff]  ;;  %8556 = vmatprep.subr.bf16.mxu1 %v12436_v27  ;;  %v12428_v31 = vcombine.high %v5695_v54, %v5699_v52  ;;  %v4793_v47 = vpop.f32.mrf.mxu0  ;;  %v12427_v24 = vcombine.low %v5695_v54, %v5699_v52  ;;  %v4719_v54 = vadd.f32 %v16447_v40, %v4646_v36 }
 0x2a8   :  { %v16658_v15 = vld [vmem:[%s19191_s3 + $0xba0] sm:$0xff]  ;;  %8516 = vmatpush1.bf16.msra.mxu0 %v19303_v28  ;;  %v4731_v53 = vadd.f32 %v4730_v39, %v4658_v56  ;;  %v19305_v36 = vmax.f32 %v16505_v42, %v16507_v58  ;;  %v19306_v56 = vcombine.low %v16548_v55, %v16572_v35  ;;  %v19308_v42 = vmax.f32 %v16519_v63, %v16523_v45 }
 0x2a9   :  { %v5687_v14 = vld [vmem:[%s19191_s3 + $0xc00] sm:$0xff]  ;;  %v4795_v17 = vpop.f32.mrf.mxu0  ;;  %v12404_v3 = vcombine.high %v16646_v32, %v16658_v15  ;;  %8517 = vmatprep.subr.bf16.mxu0 %v12292_v21  ;;  %v4792_v60 = vadd.f32 %v4791_v23, %v4719_v54  ;;  %v12403_v35 = vcombine.low %v16646_v32, %v16658_v15 }
 0x2aa   :  { %v5691_v29 = vld [vmem:[%s19191_s3 + $0xc20] sm:$0xff]  ;;  %8557 = vmatpush1.bf16.msra.mxu1 %v12435_v59  ;;  %v4729_v59 = vadd.f32 %v4728_v18, %v4656_v44 }
 0x2ab   :  { %v19296_v8 = vld [vmem:[#allocation18_spill] sm:$0xff]  ;;  %8558 = vmatprep.subr.bf16.mxu1 %v12428_v31  ;;  %v12420_v48 = vcombine.high %v5687_v14, %v5691_v29  ;;  %v4799_v51 = vpop.f32.mrf.mxu0 }
 0x2ac   :  { %v4648_v61 = vadd.f32 %v19296_v8, %v4575_v37  ;;  %v19298_v27 = vld [vmem:[#allocation14_spill] sm:$0xff]  ;;  %v4800_v31 = vadd.f32 %v4799_v51, %v4727_v38  ;;  %v12419_v8 = vcombine.low %v5687_v14, %v5691_v29  ;;  %8518 = vmatpush1.bf16.msra.mxu0 %v19306_v56 }
 0x2ad   :  { %v4717_v11 = vadd.f32 %v19298_v27, %v4644_v62  ;;  %v19300_v46 = vld [vmem:[#allocation2_spill] sm:$0xff]  ;;  %v4732_v62 = vpop.f32.mrf.mxu1 }
 0x2ae   :  { %v4713_v43 = vadd.f32 %v19300_v46, %v4640_v50  ;;  %v19302_v37 = vld [vmem:[#allocation6_spill] sm:$0xff]  ;;  %v4721_v50 = vadd.f32 %v16470_v33, %v4648_v61  ;;  %8559 = vmatpush1.bf16.msra.mxu1 %v12427_v24  ;;  %v4703_v33 = vadd.f32 %v19304_v49, %v4630_v26 }
 0x2af   :  { %v4660_v13 = vadd.f32 %v19302_v37, %v4587_v9  ;;  %v5807_v52 = vld [vmem:[%s19191_s3 + $0xfc0] sm:$0xff]  ;;  %v4790_v4 = vadd.f32 %v4789_v57, %v4717_v11  ;;  %v4801_v9 = vpop.f32.mrf.mxu0  ;;  %8560 = vmatprep.subr.bf16.mxu1 %v12420_v48  ;;  %v4723_v57 = vadd.f32 %v16503_v6, %v4650_v22  ;;  %v19307_v6 = vcombine.high %v16577_v41, %v16582_v16 }
 0x2b0   :  { %v5811_v34 = vld [vmem:[%s19191_s3 + $0xfe0] sm:$0xff]  ;;  %v4802_v5 = vadd.f32 %v4801_v9, %v4729_v59  ;;  %v4786_v14 = vadd.f32 %v16584_v20, %v4713_v43  ;;  %v4794_v29 = vadd.f32 %v4793_v47, %v4721_v50  ;;  %v4776_v24 = vadd.f32 %v16482_v30, %v4703_v33  ;;  %v19309_v43 = vld [vmem:[#allocation8_spill] sm:$0xff] }
 0x2b1   :  { %v5193_v27 = vmax.f32 %v4790_v4, %v4800_v31  ;;  %v12540_v40 = vcombine.high %v5807_v52, %v5811_v34  ;;  %v5799_v18 = vld [vmem:[%s19191_s3 + $0xf80] sm:$0xff]  ;;  %v4733_v21 = vadd.f32 %v4732_v62, %v4660_v13  ;;  %v4803_v23 = vpop.f32.mrf.mxu0  ;;  %8519 = vmatprep.subr.bf16.mxu0 %v19307_v6  ;;  %v12539_v20 = vcombine.low %v5807_v52, %v5811_v34  ;;  %v16751_v4 = vpop.f32.mrf.mxu1 }
 0x2b2   :  { %v5803_v2 = vld [vmem:[%s19191_s3 + $0xfa0] sm:$0xff]  ;;  %v5194_v39 = vmax.f32 %v4792_v60, %v4802_v5  ;;  %v4804_v61 = vadd.f32 %v4803_v23, %v4731_v53  ;;  %8561 = vmatpush1.bf16.msra.mxu1 %v12419_v8  ;;  %v4796_v38 = vadd.f32 %v4795_v17, %v4723_v57  ;;  %v5186_v45 = vmax.f32 %v4776_v24, %v4786_v14 }
 0x2b3   :  { %v5209_v44 = vmax.f32 %v19305_v36, %v5193_v27  ;;  %v4805_v11 = vpop.f32.mrf.mxu0  ;;  %v12532_v47 = vcombine.high %v5799_v18, %v5803_v2  ;;  %v5663_v55 = vld [vmem:[%s19191_s3 + $0xb40] sm:$0xff]  ;;  %8562 = vmatprep.subr.bf16.mxu1 %v12540_v40  ;;  %v19311_v22 = vmax.f32 %v19309_v43, %v19310_v1  ;;  %8520 = vmatpush2.bf16.msra.mxu0 %v12411_v25 }
 0x2b4   :  { %v5210_v58 = vmax.f32 %v19308_v42, %v5194_v39  ;;  %v5201_v48 = vmax.f32 %v4794_v29, %v4804_v61  ;;  %v4806_v26 = vadd.f32 %v4805_v11, %v4733_v21  ;;  %v5667_v30 = vld [vmem:[%s19191_s3 + $0xb60] sm:$0xff]  ;;  %8521 = vmatprep.subr.bf16.mxu0 %v12404_v3  ;;  %v12531_v15 = vcombine.low %v5799_v18, %v5803_v2  ;;  %v16767_v18 = vpop.f32.mrf.mxu1  ;;  %v16792_v39 = vld [vmem:[%s19191_s3 + $0x5e8] sm:$0xff] }
 0x2b5   :  { %v5791_v17 = vld [vmem:[%s19191_s3 + $0xf40] sm:$0xff]  ;;  %v5267_v46 = vadd.f32 %v16608_v7, %v5209_v44  ;;  %v12396_v32 = vcombine.high %v5663_v55, %v5667_v30  ;;  %v12395_v31 = vcombine.low %v5663_v55, %v5667_v30  ;;  %v16787_v44 = vld [vmem:[%s19191_s3 + $0x5c8] sm:$0xff]  ;;  %19315 = vst [vmem:[#allocation24_spill] sm:$0xff] %v16792_v39 }
 0x2b6   :  { %v5795_v63 = vld [vmem:[%s19191_s3 + $0xf60] sm:$0xff]  ;;  %v5217_v37 = vmax.f32 %v19311_v22, %v5201_v48  ;;  %v5202_v13 = vmax.f32 %v4796_v38, %v4806_v26  ;;  %8563 = vmatpush2.bf16.msra.mxu1 %v12539_v20  ;;  %v5268_v51 = vadd.f32 %v16629_v19, %v5210_v58  ;;  %19314 = vst [vmem:[#allocation7_spill] sm:$0xff] %v16787_v44  ;;  %v16794_v61 = vpop.f32.mrf.mxu1 }
 0x2b7   :  { %v5655_v54 = vld [vmem:[%s19191_s3 + $0xb00] sm:$0xff]  ;;  %8564 = vmatprep.subr.bf16.mxu1 %v12532_v47  ;;  %v12524_v41 = vcombine.high %v5791_v17, %v5795_v63  ;;  %8522 = vmatpush2.bf16.msra.mxu0 %v12403_v35  ;;  %v12523_v50 = vcombine.low %v5791_v17, %v5795_v63 }
 0x2b8   :  { %v5275_v52 = vadd.f32 %v16608_v7, %v5217_v37  ;;  %v5218_v34 = vmax.f32 %v5186_v45, %v5202_v13  ;;  %v5659_v59 = vld [vmem:[%s19191_s3 + $0xb20] sm:$0xff]  ;;  %v5283_v7 = vmax.f32 %v5267_v46, 0.0  ;;  %8523 = vmatprep.subr.bf16.mxu0 %v12396_v32  ;;  %v5284_v53 = vmax.f32 %v5268_v51, 0.0  ;;  %v16810_v48 = vpop.f32.mrf.mxu1  ;;  %v5360_v13 = vld [vmem:[%s19191_s3 + $0x1c8] sm:$0xff] }
 0x2b9   :  { %v5783_v16 = vld [vmem:[%s19191_s3 + $0xf00] sm:$0xff]  ;;  %v12388_v28 = vcombine.high %v5655_v54, %v5659_v59  ;;  %v12387_v49 = vcombine.low %v5655_v54, %v5659_v59  ;;  %v5364_v32 = vld [vmem:[%s19191_s3 + $0x1e8] sm:$0xff] }
 0x2ba   :  { %v5787_v25 = vld [vmem:[%s19191_s3 + $0xf20] sm:$0xff]  ;;  %v5291_v3 = vmax.f32 %v5275_v52, 0.0  ;;  %v5276_v62 = vadd.f32 %v16629_v19, %v5218_v34  ;;  %8565 = vmatpush2.bf16.msra.mxu1 %v12531_v15  ;;  %v16818_v63 = vpop.f32.mrf.mxu1  ;;  %v12094_v34 = vcombine.high %v5360_v13, %v5364_v32  ;;  %v5352_v59 = vld [vmem:[%s19191_s3 + $0x188] sm:$0xff] }
 0x2bb   :  { %v5647_v60 = vld [vmem:[%s19191_s3 + $0xac0] sm:$0xff]  ;;  %8566 = vmatprep.subr.bf16.mxu1 %v12524_v41  ;;  %v12516_v27 = vcombine.high %v5783_v16, %v5787_v25  ;;  %8524 = vmatpush2.bf16.msra.mxu0 %v12395_v31  ;;  %v12515_v57 = vcombine.low %v5783_v16, %v5787_v25  ;;  %v5356_v41 = vld [vmem:[%s19191_s3 + $0x1a8] sm:$0xff]  ;;  %v12222_v25 = vcombine.high %v16787_v44, %v16792_v39  ;;  %v19322_v39 = vld [vmem:[#allocation12_spill] sm:$0xff] }
 0x2bc   :  { %v16753_v9 = vpack.c.bf16 %v5291_v3, %v5283_v7  ;;  %v5292_v8 = vmax.f32 %v5276_v62, 0.0  ;;  %v5651_v19 = vld [vmem:[%s19191_s3 + $0xae0] sm:$0xff]  ;;  %8525 = vmatprep.subr.bf16.mxu0 %v12388_v28  ;;  %v16832_v15 = vpop.f32.mrf.mxu1  ;;  %v12093_v7 = vcombine.low %v5360_v13, %v5364_v32  ;;  %v12086_v3 = vcombine.high %v5352_v59, %v5356_v41  ;;  %v5344_v62 = vld [vmem:[%s19191_s3 + $0x148] sm:$0xff] }
 0x2bd   :  { %v5775_v5 = vld [vmem:[%s19191_s3 + $0xec0] sm:$0xff]  ;;  %v12380_v33 = vcombine.high %v5647_v60, %v5651_v19  ;;  %v12379_v56 = vcombine.low %v5647_v60, %v5651_v19  ;;  %v5348_v31 = vld [vmem:[%s19191_s3 + $0x168] sm:$0xff] }
 0x2be   :  { %19312 = vst [vmem:[#allocation5_spill] sm:$0xff] %v16753_v9  ;;  %v5779_v40 = vld [vmem:[%s19191_s3 + $0xee0] sm:$0xff]  ;;  %v16769_v2 = vpack.c.bf16 %v5292_v8, %v5284_v53  ;;  %8567 = vmatpush2.bf16.msra.mxu1 %v12523_v50  ;;  %v16840_v16 = vpop.f32.mrf.mxu1  ;;  %v19316_v50 = vld [vmem:[#allocation11_spill] sm:$0xff]  ;;  %v12085_v53 = vcombine.low %v5352_v59, %v5356_v41  ;;  %v12078_v60 = vcombine.high %v5344_v62, %v5348_v31 }
 0x2bf   :  { %v5639_v21 = vld [vmem:[%s19191_s3 + $0xa80] sm:$0xff]  ;;  %8568 = vmatprep.subr.bf16.mxu1 %v12516_v27  ;;  %v12508_v23 = vcombine.high %v5775_v5, %v5779_v40  ;;  %8526 = vmatpush2.bf16.msra.mxu0 %v12387_v49  ;;  %v12507_v6 = vcombine.low %v5775_v5, %v5779_v40  ;;  %v5336_v27 = vld [vmem:[%s19191_s3 + $0x108] sm:$0xff]  ;;  %v12077_v40 = vcombine.low %v5344_v62, %v5348_v31 }
 0x2c0   :  { %19313 = vst [vmem:[#allocation20_spill] sm:$0xff] %v16769_v2  ;;  %8535 = vmatprep.mubr.bf16.mxu0 %v16769_v2  ;;  %v5643_v14 = vld [vmem:[%s19191_s3 + $0xaa0] sm:$0xff]  ;;  %8527 = vmatprep.subr.bf16.mxu0 %v12380_v33  ;;  %v16850_v28 = vpop.f32.mrf.mxu1  ;;  %v5340_v5 = vld [vmem:[%s19191_s3 + $0x128] sm:$0xff] }
 0x2c1   :  { %v5767_v29 = vld [vmem:[%s19191_s3 + $0xe80] sm:$0xff]  ;;  %v12372_v11 = vcombine.high %v5639_v21, %v5643_v14  ;;  %v12371_v26 = vcombine.low %v5639_v21, %v5643_v14  ;;  %v12070_v33 = vcombine.high %v5336_v27, %v5340_v5  ;;  %v5328_v21 = vld [vmem:[%s19191_s3 + $0xc8] sm:$0xff] }
 0x2c2   :  { %v5771_v36 = vld [vmem:[%s19191_s3 + $0xea0] sm:$0xff]  ;;  %8569 = vmatpush2.bf16.msra.mxu1 %v12515_v57  ;;  %v16856_v19 = vpop.f32.mrf.mxu1  ;;  %v5332_v14 = vld [vmem:[%s19191_s3 + $0xe8] sm:$0xff] }
 0x2c3   :  { %v5631_v20 = vld [vmem:[%s19191_s3 + $0xa40] sm:$0xff]  ;;  %8570 = vmatprep.subr.bf16.mxu1 %v12508_v23  ;;  %v12500_v38 = vcombine.high %v5767_v29, %v5771_v36  ;;  %8528 = vmatpush2.bf16.msra.mxu0 %v12379_v56  ;;  %v12499_v30 = vcombine.low %v5767_v29, %v5771_v36  ;;  %v12069_v23 = vcombine.low %v5336_v27, %v5340_v5  ;;  %v5424_v13 = vld [vmem:[%s19191_s3 + $0x3c8] sm:$0xff] }
 0x2c4   :  { %v5635_v47 = vld [vmem:[%s19191_s3 + $0xa60] sm:$0xff]  ;;  %8529 = vmatprep.subr.bf16.mxu0 %v12372_v11  ;;  %v16866_v57 = vpop.f32.mrf.mxu1  ;;  %v12062_v36 = vcombine.high %v5328_v21, %v5332_v14  ;;  %v5320_v11 = vld [vmem:[%s19191_s3 + $0x88] sm:$0xff] }
 0x2c5   :  { %v5759_v42 = vld [vmem:[%s19191_s3 + $0xe40] sm:$0xff]  ;;  %v12364_v55 = vcombine.high %v5631_v20, %v5635_v47  ;;  %v12363_v1 = vcombine.low %v5631_v20, %v5635_v47  ;;  %v12061_v20 = vcombine.low %v5328_v21, %v5332_v14  ;;  %v5428_v32 = vld [vmem:[%s19191_s3 + $0x3e8] sm:$0xff] }
 0x2c6   :  { %v5763_v58 = vld [vmem:[%s19191_s3 + $0xe60] sm:$0xff]  ;;  %8571 = vmatpush2.bf16.msra.mxu1 %v12507_v6  ;;  %v16876_v56 = vpop.f32.mrf.mxu1  ;;  %v5324_v6 = vld [vmem:[%s19191_s3 + $0xa8] sm:$0xff] }
 0x2c7   :  { %v5623_v35 = vld [vmem:[%s19191_s3 + $0xa00] sm:$0xff]  ;;  %8572 = vmatprep.subr.bf16.mxu1 %v12500_v38  ;;  %v12492_v45 = vcombine.high %v5759_v42, %v5763_v58  ;;  %8530 = vmatpush2.bf16.msra.mxu0 %v12371_v26  ;;  %v12491_v37 = vcombine.low %v5759_v42, %v5763_v58  ;;  %v12054_v38 = vcombine.high %v5320_v11, %v5324_v6  ;;  %v5312_v58 = vld [vmem:[%s19191_s3 + $0x48] sm:$0xff] }
 0x2c8   :  { %v5627_v17 = vld [vmem:[%s19191_s3 + $0xa20] sm:$0xff]  ;;  %8531 = vmatprep.subr.bf16.mxu0 %v12364_v55  ;;  %v16886_v42 = vpop.f32.mrf.mxu1  ;;  %v5316_v26 = vld [vmem:[%s19191_s3 + $0x68] sm:$0xff]  ;;  %v12053_v55 = vcombine.low %v5320_v11, %v5324_v6 }
 0x2c9   :  { %v5751_v46 = vld [vmem:[%s19191_s3 + $0xe00] sm:$0xff]  ;;  %v12356_v22 = vcombine.high %v5623_v35, %v5627_v17  ;;  %v12355_v52 = vcombine.low %v5623_v35, %v5627_v17  ;;  %v12046_v35 = vcombine.high %v5312_v58, %v5316_v26  ;;  %v5416_v59 = vld [vmem:[%s19191_s3 + $0x388] sm:$0xff] }
 0x2ca   :  { %v5755_v43 = vld [vmem:[%s19191_s3 + $0xe20] sm:$0xff]  ;;  %8573 = vmatpush2.bf16.msra.mxu1 %v12499_v30  ;;  %v16896_v17 = vpop.f32.mrf.mxu1  ;;  %v5420_v41 = vld [vmem:[%s19191_s3 + $0x3a8] sm:$0xff] }
 0x2cb   :  { %8574 = vmatprep.subr.bf16.mxu1 %v12492_v45  ;;  %v12484_v51 = vcombine.high %v5751_v46, %v5755_v43  ;;  %8532 = vmatpush2.bf16.msra.mxu0 %v12363_v1  ;;  %v12483_v54 = vcombine.low %v5751_v46, %v5755_v43  ;;  %v5304_v45 = vld [vmem:[%s19191_s3 + $0x8] sm:$0xff]  ;;  %v12045_v43 = vcombine.low %v5312_v58, %v5316_v26 }
 0x2cc   :  { %8533 = vmatprep.subr.bf16.mxu0 %v12356_v22  ;;  %v16854_v8 = vpop.f32.mrf.mxu0  ;;  %v5308_v46 = vld [vmem:[%s19191_s3 + $0x28] sm:$0xff]  ;;  %v12149_v27 = vcombine.low %v5416_v59, %v5420_v41 }
 0x2cd   :  { %v12038_v22 = vcombine.high %v5304_v45, %v5308_v46  ;;  %v5408_v31 = vld [vmem:[%s19191_s3 + $0x348] sm:$0xff] }
 0x2ce   :  { %8575 = vmatpush2.bf16.msra.mxu1 %v12491_v37  ;;  %v16864_v49 = vpop.f32.mrf.mxu0  ;;  %v16906_v37 = vpop.f32.mrf.mxu1  ;;  %v5400_v21 = vld [vmem:[%s19191_s3 + $0x308] sm:$0xff] }
 0x2cf   :  { %8576 = vmatprep.subr.bf16.mxu1 %v12484_v51  ;;  %8534 = vmatpush2.bf16.msra.mxu0 %v12355_v52  ;;  %v12037_v51 = vcombine.low %v5304_v45, %v5308_v46  ;;  %v5404_v14 = vld [vmem:[%s19191_s3 + $0x328] sm:$0xff] }
 0x2d0   :  { %8589 = vmatprep.subr.bf16.mxu0 %v12094_v34  ;;  %v16874_v29 = vpop.f32.mrf.mxu0  ;;  %v12158_v34 = vcombine.high %v5424_v13, %v5428_v32  ;;  %v12134_v6 = vcombine.high %v5400_v21, %v5404_v14  ;;  %v5396_v58 = vld [vmem:[%s19191_s3 + $0x2e8] sm:$0xff] }
 0x2d2   :  { %8577 = vmatpush2.bf16.msra.mxu1 %v12483_v54  ;;  %8536 = vmatmul.mubr.bf16.vlgmr.msra.gmra.mxu0 %v16753_v9  ;;  %v16884_v47 = vpop.f32.mrf.mxu0  ;;  %v16916_v54 = vpop.f32.mrf.mxu1 }
 0x2d3   :  { %8632 = vmatprep.subr.bf16.mxu1 %v12222_v25  ;;  %8590 = vmatpush1.bf16.msra.mxu0 %v12093_v7  ;;  %v12157_v25 = vcombine.low %v5424_v13, %v5428_v32 }
 0x2d4   :  { %8621 = vmatprep.mubr.bf16.mxu0 %v19316_v50  ;;  %8591 = vmatprep.subr.bf16.mxu0 %v12086_v3  ;;  %v16894_v30 = vpop.f32.mrf.mxu0  ;;  %v12150_v3 = vcombine.high %v5416_v59, %v5420_v41  ;;  %v16926_v62 = vpop.f32.mrf.mxu1  ;;  %v5376_v41 = vld [vmem:[%s19191_s3 + $0x248] sm:$0xff] }
 0x2d5   :  { %19317 = vst [vmem:[#allocation10_spill] sm:$0xff] %v16926_v62  ;;  %v5604_v50 = vld [vmem:[%s19191_s3 + $0x968] sm:$0xff] }
 0x2d6   :  { %v16904_v1 = vpop.f32.mrf.mxu0 }
 0x2d7   :  { %8592 = vmatpush1.bf16.msra.mxu0 %v12085_v53  ;;  %v5412_v53 = vld [vmem:[%s19191_s3 + $0x368] sm:$0xff] }
 0x2d8   :  { %8593 = vmatprep.subr.bf16.mxu0 %v12078_v60  ;;  %v16914_v52 = vpop.f32.mrf.mxu0 }
 0x2da   :  { %v16924_v7 = vpop.f32.mrf.mxu0 }
 0x2db   :  { %8594 = vmatpush1.bf16.msra.mxu0 %v12077_v40  ;;  %v12142_v40 = vcombine.high %v5408_v31, %v5412_v53 }
 0x2dc   :  { %8595 = vmatprep.subr.bf16.mxu0 %v12070_v33 }
 0x2df   :  { %8596 = vmatpush1.bf16.msra.mxu0 %v12069_v23 }
 0x2e0   :  { %8597 = vmatprep.subr.bf16.mxu0 %v12062_v36  ;;  %v16936_v5 = vpop.f32.mrf.mxu0  ;;  %v12141_v36 = vcombine.low %v5408_v31, %v5412_v53 }
 0x2e2   :  { %v16948_v11 = vpop.f32.mrf.mxu0 }
 0x2e3   :  { %8598 = vmatpush1.bf16.msra.mxu0 %v12061_v20 }
 0x2e4   :  { %8599 = vmatprep.subr.bf16.mxu0 %v12054_v38  ;;  %v5392_v38 = vld [vmem:[%s19191_s3 + $0x2c8] sm:$0xff] }
 0x2e5   :  { %v12126_v45 = vcombine.high %v5392_v38, %v5396_v58  ;;  %v12125_v32 = vcombine.low %v5392_v38, %v5396_v58 }
 0x2e7   :  { %8600 = vmatpush1.bf16.msra.mxu0 %v12053_v55  ;;  %v12133_v55 = vcombine.low %v5400_v21, %v5404_v14  ;;  %v5368_v21 = vld [vmem:[%s19191_s3 + $0x208] sm:$0xff] }
 0x2e8   :  { %8601 = vmatprep.subr.bf16.mxu0 %v12046_v35  ;;  %v16960_v35 = vpop.f32.mrf.mxu0  ;;  %v5372_v14 = vld [vmem:[%s19191_s3 + $0x228] sm:$0xff] }
 0x2e9   :  { %v12102_v58 = vcombine.high %v5368_v21, %v5372_v14 }
 0x2eb   :  { %8602 = vmatpush1.bf16.msra.mxu0 %v12045_v43  ;;  %v5384_v43 = vld [vmem:[%s19191_s3 + $0x288] sm:$0xff] }
 0x2ec   :  { %8603 = vmatprep.subr.bf16.mxu0 %v12038_v22  ;;  %v5388_v22 = vld [vmem:[%s19191_s3 + $0x2a8] sm:$0xff] }
 0x2ed   :  { %v16934_v60 = vpop.f32.mrf.mxu1  ;;  %v12117_v31 = vcombine.low %v5384_v43, %v5388_v22 }
 0x2ef   :  { %8604 = vmatpush1.bf16.msra.mxu0 %v12037_v51  ;;  %v16938_v33 = vpop.f32.mrf.mxu1  ;;  %v16972_v51 = vpop.f32.mrf.mxu0 }
 0x2f0   :  { %8605 = vmatprep.subr.bf16.mxu0 %v12158_v34  ;;  %v12118_v34 = vcombine.high %v5384_v43, %v5388_v22  ;;  %v5620_v43 = vld [vmem:[%s19191_s3 + $0x9e8] sm:$0xff] }
 0x2f1   :  { %v16946_v23 = vpop.f32.mrf.mxu1  ;;  %v16984_v53 = vpop.f32.mrf.mxu0 }
 0x2f3   :  { %8606 = vmatpush2.bf16.msra.mxu0 %v12157_v25  ;;  %v16950_v20 = vpop.f32.mrf.mxu1  ;;  %v5380_v25 = vld [vmem:[%s19191_s3 + $0x268] sm:$0xff]  ;;  %v16996_v38 = vpop.f32.mrf.mxu0 }
 0x2f4   :  { %8607 = vmatprep.subr.bf16.mxu0 %v12150_v3 }
 0x2f7   :  { %8608 = vmatpush2.bf16.msra.mxu0 %v12149_v27  ;;  %v12110_v27 = vcombine.high %v5376_v41, %v5380_v25 }
 0x2f8   :  { %8609 = vmatprep.subr.bf16.mxu0 %v12142_v40 }
 0x2fb   :  { %8610 = vmatpush2.bf16.msra.mxu0 %v12141_v36 }
 0x2fc   :  { %8611 = vmatprep.subr.bf16.mxu0 %v12134_v6  ;;  %v12109_v6 = vcombine.low %v5376_v41, %v5380_v25 }
 0x2fd   :  { %v16958_v26 = vpop.f32.mrf.mxu1 }
 0x2ff   :  { %v16962_v46 = vpop.f32.mrf.mxu1  ;;  %8612 = vmatpush2.bf16.msra.mxu0 %v12133_v55 }
 0x300   :  { %8613 = vmatprep.subr.bf16.mxu0 %v12126_v45  ;;  %v5616_v45 = vld [vmem:[%s19191_s3 + $0x9c8] sm:$0xff] }
 0x301   :  { %v16970_v13 = vpop.f32.mrf.mxu1  ;;  %v12350_v41 = vcombine.high %v5616_v45, %v5620_v43  ;;  %v12349_v24 = vcombine.low %v5616_v45, %v5620_v43 }
 0x303   :  { %v16974_v59 = vpop.f32.mrf.mxu1  ;;  %8614 = vmatpush2.bf16.msra.mxu0 %v12125_v32  ;;  %v12101_v32 = vcombine.low %v5368_v21, %v5372_v14 }
 0x304   :  { %8615 = vmatprep.subr.bf16.mxu0 %v12118_v34  ;;  %v17008_v34 = vpop.f32.mrf.mxu0 }
 0x305   :  { %v16982_v3 = vpop.f32.mrf.mxu1 }
 0x307   :  { %v16986_v40 = vpop.f32.mrf.mxu1  ;;  %8616 = vmatpush2.bf16.msra.mxu0 %v12117_v31  ;;  %v5608_v31 = vld [vmem:[%s19191_s3 + $0x988] sm:$0xff] }
 0x308   :  { %8617 = vmatprep.subr.bf16.mxu0 %v12110_v27  ;;  %v5612_v27 = vld [vmem:[%s19191_s3 + $0x9a8] sm:$0xff] }
 0x309   :  { %v16994_v36 = vpop.f32.mrf.mxu1  ;;  %v12342_v21 = vcombine.high %v5608_v31, %v5612_v27  ;;  %v12341_v45 = vcombine.low %v5608_v31, %v5612_v27  ;;  %v4926_v31 = vadd.f32 %v16894_v30, %v16818_v63  ;;  %v5584_v30 = vld [vmem:[%s19191_s3 + $0x8c8] sm:$0xff] }
 0x30b   :  { %v16998_v55 = vpop.f32.mrf.mxu1  ;;  %8618 = vmatpush2.bf16.msra.mxu0 %v12109_v6  ;;  %v17020_v6 = vpop.f32.mrf.mxu0 }
 0x30c   :  { %19318 = vst [vmem:[#allocation18_spill] sm:$0xff] %v16998_v55  ;;  %8619 = vmatprep.subr.bf16.mxu0 %v12102_v58  ;;  %19320 = vst [vmem:[#allocation14_spill] sm:$0xff] %v17020_v6  ;;  %v5600_v58 = vld [vmem:[%s19191_s3 + $0x948] sm:$0xff]  ;;  %v4920_v6 = vadd.f32 %v16874_v29, %v16794_v61  ;;  %v4930_v61 = vadd.f32 %v16914_v52, %v16840_v16 }
 0x30d   :  { %v17006_v22 = vpop.f32.mrf.mxu1 }
 0x30e   :  { %v5061_v9 = vpop.f32.mrf.mxu0 }
 0x30f   :  { %v17010_v25 = vpop.f32.mrf.mxu1  ;;  %8620 = vmatpush2.bf16.msra.mxu0 %v12101_v32  ;;  %v12334_v32 = vcombine.high %v5600_v58, %v5604_v50 }
 0x310   :  { %8675 = vmatprep.subr.bf16.mxu0 %v12350_v41  ;;  %v5063_v43 = vpop.f32.mrf.mxu0  ;;  %v4916_v41 = vadd.f32 %v16854_v8, %v16751_v4  ;;  %v12333_v4 = vcombine.low %v5600_v58, %v5604_v50  ;;  %v5588_v50 = vld [vmem:[%s19191_s3 + $0x8e8] sm:$0xff] }
 0x311   :  { %v17018_v10 = vpop.f32.mrf.mxu1  ;;  %v12318_v16 = vcombine.high %v5584_v30, %v5588_v50 }
 0x312   :  { %19319 = vst [vmem:[#allocation4_spill] sm:$0xff] %v17018_v10  ;;  %8622 = vmatmul.mubr.bf16.vlgmr.msra.gmra.mxu0 %v19322_v39  ;;  %v5596_v39 = vld [vmem:[%s19191_s3 + $0x928] sm:$0xff]  ;;  %v4989_v27 = vadd.f32 %v16934_v60, %v4916_v41  ;;  %v4922_v60 = vadd.f32 %v16884_v47, %v16810_v48  ;;  %v5003_v48 = vadd.f32 %v16970_v13, %v4930_v61 }
 0x313   :  { %v17022_v14 = vpop.f32.mrf.mxu1  ;;  %8676 = vmatpush1.bf16.msra.mxu0 %v12349_v24  ;;  %8707 = vmatprep.mubr.bf16.mxu0 %v16769_v2  ;;  %v4918_v24 = vadd.f32 %v16864_v49, %v16767_v18  ;;  %v5065_v2 = vpop.f32.mrf.mxu0  ;;  %v4928_v18 = vadd.f32 %v16904_v1, %v16832_v15  ;;  %v4999_v49 = vadd.f32 %v16958_v26, %v4926_v31 }
 0x314   :  { %19321 = vst [vmem:[#allocation15_spill] sm:$0xff] %v17022_v14  ;;  %8677 = vmatprep.subr.bf16.mxu0 %v12342_v21  ;;  %v5592_v14 = vld [vmem:[%s19191_s3 + $0x908] sm:$0xff]  ;;  %v5062_v62 = vadd.f32 %v5061_v9, %v4989_v27  ;;  %v4993_v1 = vadd.f32 %v16946_v23, %v4920_v6 }
 0x315   :  { %v5134_v44 = vpop.f32.mrf.mxu1  ;;  %v4991_v8 = vadd.f32 %v16938_v33, %v4918_v24  ;;  %v5067_v10 = vpop.f32.mrf.mxu0  ;;  %v12326_v55 = vcombine.high %v5592_v14, %v5596_v39  ;;  %v5001_v9 = vadd.f32 %v16962_v46, %v4928_v18  ;;  %v12325_v58 = vcombine.low %v5592_v14, %v5596_v39  ;;  %v5576_v39 = vld [vmem:[%s19191_s3 + $0x888] sm:$0xff] }
 0x316   :  { %v17067_v52 = vadd.f32 %v5134_v44, %v5062_v62  ;;  %v12317_v44 = vcombine.low %v5584_v30, %v5588_v50  ;;  %v5572_v18 = vld [vmem:[%s19191_s3 + $0x868] sm:$0xff] }
 0x317   :  { %v5136_v12 = vpop.f32.mrf.mxu1  ;;  %8678 = vmatpush1.bf16.msra.mxu0 %v12341_v45  ;;  %v5064_v29 = vadd.f32 %v5063_v43, %v4991_v8  ;;  %v5071_v15 = vpop.f32.mrf.mxu0  ;;  %v4932_v45 = vadd.f32 %v16924_v7, %v16850_v28  ;;  %v5066_v43 = vadd.f32 %v5065_v2, %v4993_v1  ;;  %v5580_v28 = vld [vmem:[%s19191_s3 + $0x8a8] sm:$0xff]  ;;  %v4936_v1 = vadd.f32 %v16936_v5, %v16856_v19 }
 0x318   :  { %8679 = vmatprep.subr.bf16.mxu0 %v12334_v32  ;;  %v5072_v33 = vadd.f32 %v5071_v15, %v4999_v49  ;;  %v4995_v32 = vadd.f32 %v16950_v20, %v4922_v60  ;;  %v12310_v31 = vcombine.high %v5576_v39, %v5580_v28  ;;  %v5568_v8 = vld [vmem:[%s19191_s3 + $0x848] sm:$0xff]  ;;  %v12309_v61 = vcombine.low %v5576_v39, %v5580_v28 }
 0x319   :  { %v5138_v21 = vpop.f32.mrf.mxu1  ;;  %v5073_v47 = vpop.f32.mrf.mxu0  ;;  %v5005_v7 = vadd.f32 %v16974_v59, %v4932_v45  ;;  %v17078_v20 = vadd.f32 %v5136_v12, %v5064_v29  ;;  %v12302_v15 = vcombine.high %v5568_v8, %v5572_v18  ;;  %v5009_v19 = vadd.f32 %v16982_v3, %v4936_v1  ;;  %v5680_v3 = vld [vmem:[%s19191_s3 + $0xbc8] sm:$0xff] }
 0x31a   :  { %v5074_v46 = vadd.f32 %v5073_v47, %v5001_v9  ;;  %v5068_v62 = vadd.f32 %v5067_v10, %v4995_v32  ;;  %v17084_v27 = vadd.f32 %v5138_v21, %v5066_v43  ;;  %v4946_v32 = vadd.f32 %v16984_v53, %v16896_v17 }
 0x31b   :  { %v5140_v63 = vpop.f32.mrf.mxu1  ;;  %8680 = vmatpush1.bf16.msra.mxu0 %v12333_v4  ;;  %v5075_v13 = vpop.f32.mrf.mxu0  ;;  %v4940_v47 = vadd.f32 %v16960_v35, %v16876_v56  ;;  %v5684_v56 = vld [vmem:[%s19191_s3 + $0xbe8] sm:$0xff]  ;;  %v4942_v35 = vadd.f32 %v16972_v51, %v16886_v42 }
 0x31c   :  { %8681 = vmatprep.subr.bf16.mxu0 %v12326_v55  ;;  %v5076_v14 = vadd.f32 %v5075_v13, %v5003_v48  ;;  %v17096_v30 = vadd.f32 %v5140_v63, %v5068_v62  ;;  %v5560_v63 = vld [vmem:[%s19191_s3 + $0x808] sm:$0xff]  ;;  %v12301_v48 = vcombine.low %v5568_v8, %v5572_v18  ;;  %v5249_v13 = vsub.s32 6, %v19277_v0  ;;  %v19324_v62 = vld [vmem:[#allocation14_spill] sm:$0xff] }
 0x31d   :  { %v5144_v26 = vpop.f32.mrf.mxu1  ;;  %v5077_v24 = vpop.f32.mrf.mxu0  ;;  %v5013_v53 = vadd.f32 %v16994_v36, %v4940_v47  ;;  %v5672_v8 = vld [vmem:[%s19191_s3 + $0xb88] sm:$0xff] }
 0x31e   :  { %v17069_v23 = vadd.f32 %v5144_v26, %v5072_v33  ;;  %v5078_v4 = vadd.f32 %v5077_v24, %v5005_v7  ;;  %v5564_v26 = vld [vmem:[%s19191_s3 + $0x828] sm:$0xff]  ;;  %v12414_v24 = vcombine.high %v5680_v3, %v5684_v56 }
 0x31f   :  { %v5146_v6 = vpop.f32.mrf.mxu1  ;;  %8682 = vmatpush1.bf16.msra.mxu0 %v12325_v58  ;;  %v5081_v49 = vpop.f32.mrf.mxu0  ;;  %v4938_v58 = vadd.f32 %v16948_v11, %v16866_v57  ;;  %v4948_v57 = vadd.f32 %v16996_v38, %v16906_v37  ;;  %v5019_v11 = vadd.f32 %v17006_v22, %v4946_v32  ;;  %v12293_v37 = vcombine.low %v5560_v63, %v5564_v26  ;;  %v5676_v18 = vld [vmem:[%s19191_s3 + $0xba8] sm:$0xff] }
 0x320   :  { %v5179_v2 = vmax.f32 %v17067_v52, %v17069_v23  ;;  %v17082_v55 = vadd.f32 %v5146_v6, %v5074_v46  ;;  %8683 = vmatprep.subr.bf16.mxu0 %v12318_v16  ;;  %v12294_v46 = vcombine.high %v5560_v63, %v5564_v26  ;;  %v5082_v6 = vadd.f32 %v5081_v49, %v5009_v19  ;;  %v19327_v49 = vld [vmem:[#allocation15_spill] sm:$0xff] }
 0x321   :  { %v5148_v41 = vpop.f32.mrf.mxu1  ;;  %v5083_v29 = vpop.f32.mrf.mxu0  ;;  %v5011_v16 = vadd.f32 %v16986_v40, %v4938_v58  ;;  %v4950_v38 = vadd.f32 %v17008_v34, %v16916_v54  ;;  %v5021_v22 = vadd.f32 %v17010_v25, %v4948_v57  ;;  %v12413_v63 = vcombine.low %v5680_v3, %v5684_v56 }
 0x322   :  { %v5180_v12 = vmax.f32 %v17078_v20, %v17082_v55  ;;  %v17088_v59 = vadd.f32 %v5148_v41, %v5076_v14  ;;  %v19325_v41 = vld [vmem:[#allocation18_spill] sm:$0xff]  ;;  %v5660_v20 = vld [vmem:[%s19191_s3 + $0xb28] sm:$0xff] }
 0x323   :  { %v5150_v10 = vpop.f32.mrf.mxu1  ;;  %8684 = vmatpush1.bf16.msra.mxu0 %v12317_v44  ;;  %v5085_v45 = vpop.f32.mrf.mxu0  ;;  %v5084_v40 = vadd.f32 %v5083_v29, %v5011_v16  ;;  %v19323_v44 = vld [vmem:[#allocation10_spill] sm:$0xff]  ;;  %v5015_v42 = vadd.f32 %v19325_v41, %v4942_v35  ;;  %v12405_v35 = vcombine.low %v5672_v8, %v5676_v18 }
 0x324   :  { %v5187_v21 = vmax.f32 %v17084_v27, %v17088_v59  ;;  %v17100_v50 = vadd.f32 %v5150_v10, %v5078_v4  ;;  %8685 = vmatprep.subr.bf16.mxu0 %v12310_v31  ;;  %v4952_v14 = vadd.f32 %v19324_v62, %v19323_v44  ;;  %v5086_v51 = vadd.f32 %v5085_v45, %v5013_v53  ;;  %v19326_v31 = vld [vmem:[#allocation4_spill] sm:$0xff]  ;;  %v5648_v44 = vld [vmem:[%s19191_s3 + $0xac8] sm:$0xff] }
 0x325   :  { %v5154_v60 = vpop.f32.mrf.mxu1  ;;  %v5087_v43 = vpop.f32.mrf.mxu0  ;;  %v5023_v4 = vadd.f32 %v19326_v31, %v4950_v38  ;;  %v5652_v62 = vld [vmem:[%s19191_s3 + $0xae8] sm:$0xff] }
 0x326   :  { %v5188_v9 = vmax.f32 %v17096_v30, %v17100_v50  ;;  %v5155_v10 = vadd.f32 %v5154_v60, %v5082_v6  ;;  %v5088_v26 = vadd.f32 %v5087_v43, %v5015_v42  ;;  %v5664_v6 = vld [vmem:[%s19191_s3 + $0xb48] sm:$0xff] }
 0x327   :  { %v5156_v33 = vpop.f32.mrf.mxu1  ;;  %8686 = vmatpush1.bf16.msra.mxu0 %v12309_v61  ;;  %v5091_v39 = vpop.f32.mrf.mxu0  ;;  %v5025_v61 = vadd.f32 %v19327_v49, %v4952_v14  ;;  %v5484_v42 = vld [vmem:[%s19191_s3 + $0x5a8] sm:$0xff] }
 0x328   :  { %8687 = vmatprep.subr.bf16.mxu0 %v12302_v15  ;;  %v5092_v28 = vadd.f32 %v5091_v39, %v5019_v11  ;;  %v5157_v29 = vadd.f32 %v5156_v33, %v5084_v40  ;;  %v5253_v15 = vsub.s32 7, %v19277_v0  ;;  %v5644_v31 = vld [vmem:[%s19191_s3 + $0xaa8] sm:$0xff] }
 0x329   :  { %v5158_v5 = vpop.f32.mrf.mxu1  ;;  %v5093_v36 = vpop.f32.mrf.mxu0 }
 0x32a   :  { %v5094_v34 = vadd.f32 %v5093_v36, %v5021_v22  ;;  %v5159_v19 = vadd.f32 %v5158_v5, %v5086_v51  ;;  %v5668_v5 = vld [vmem:[%s19191_s3 + $0xb68] sm:$0xff]  ;;  %v12382_v51 = vcombine.high %v5648_v44, %v5652_v62 }
 0x32b   :  { %v5160_v17 = vpop.f32.mrf.mxu1  ;;  %8688 = vmatpush1.bf16.msra.mxu0 %v12301_v48  ;;  %v5095_v1 = vpop.f32.mrf.mxu0  ;;  %v19328_v48 = vld [vmem:[#allocation22_spill] sm:$0xff]  ;;  %v12398_v40 = vcombine.high %v5664_v6, %v5668_v5  ;;  %v5656_v22 = vld [vmem:[%s19191_s3 + $0xb08] sm:$0xff] }
 0x32c   :  { %8689 = vmatprep.subr.bf16.mxu0 %v12294_v46  ;;  %v5096_v45 = vadd.f32 %v5095_v1, %v5023_v4  ;;  %v5250_v47 = vrot.slane %v19328_v48, %v5249_v13  ;;  %v12406_v46 = vcombine.high %v5672_v8, %v5676_v18  ;;  %v5254_v3 = vrot.slane %v19328_v48, %v5253_v15  ;;  %v19329_v8 = vld [vmem:[#allocation7_spill] sm:$0xff]  ;;  %v19330_v18 = vld [vmem:[#allocation24_spill] sm:$0xff] }
 0x32d   :  { %v5164_v7 = vpop.f32.mrf.mxu1  ;;  %v5097_v16 = vpop.f32.mrf.mxu0  ;;  %v5161_v53 = vadd.f32 %v5160_v17, %v5088_v26  ;;  %v12390_v27 = vcombine.high %v5656_v22, %v5660_v20  ;;  %v12389_v50 = vcombine.low %v5656_v22, %v5660_v20  ;;  %v19331_v49 = vcombine.low %v19329_v8, %v19330_v18  ;;  %v5632_v1 = vld [vmem:[%s19191_s3 + $0xa48] sm:$0xff] }
 0x32e   :  { %v5165_v54 = vadd.f32 %v5164_v7, %v5092_v28  ;;  %v5098_v43 = vadd.f32 %v5097_v16, %v5025_v61  ;;  %v12397_v28 = vcombine.low %v5664_v6, %v5668_v5  ;;  %v19332_v61 = vld [vmem:[#allocation13_spill] sm:$0xff]  ;;  %v5624_v48 = vld [vmem:[%s19191_s3 + $0xa08] sm:$0xff]  ;;  %v5361_v6 = vld [vmem:[%s19191_s3 + $0x1d0] sm:$0xff] }
 0x32f   :  { %v5166_v25 = vpop.f32.mrf.mxu1  ;;  %8690 = vmatpush1.bf16.msra.mxu0 %v12293_v37  ;;  %v5365_v5 = vld [vmem:[%s19191_s3 + $0x1f0] sm:$0xff] }
 0x330   :  { %v5195_v60 = vmax.f32 %v5155_v10, %v5165_v54  ;;  %v5167_v58 = vadd.f32 %v5166_v25, %v5094_v34  ;;  %8691 = vmatprep.subr.bf16.mxu0 %v12414_v24  ;;  %v5640_v24 = vld [vmem:[%s19191_s3 + $0xa88] sm:$0xff]  ;;  %v12381_v10 = vcombine.low %v5648_v44, %v5652_v62  ;;  %v12095_v20 = vcombine.low %v5361_v6, %v5365_v5 }
 0x331   :  { %v5168_v32 = vpop.f32.mrf.mxu1  ;;  %v5472_v54 = vld [vmem:[%s19191_s3 + $0x548] sm:$0xff]  ;;  %v12374_v25 = vcombine.high %v5640_v24, %v5644_v31 }
 0x332   :  { %v5211_v33 = vmax.f32 %v5179_v2, %v5195_v60  ;;  %v5196_v57 = vmax.f32 %v5157_v29, %v5167_v58  ;;  %v5169_v11 = vadd.f32 %v5168_v32, %v5096_v45  ;;  %v5476_v34 = vld [vmem:[%s19191_s3 + $0x568] sm:$0xff]  ;;  %v12373_v60 = vcombine.low %v5640_v24, %v5644_v31 }
 0x333   :  { %v5170_v56 = vpop.f32.mrf.mxu1  ;;  %8692 = vmatpush2.bf16.msra.mxu0 %v12413_v63  ;;  %v5636_v63 = vld [vmem:[%s19191_s3 + $0xa68] sm:$0xff]  ;;  %v12206_v26 = vcombine.high %v5472_v54, %v5476_v34 }
 0x334   :  { %v5212_v52 = vmax.f32 %v5180_v12, %v5196_v57  ;;  %v5203_v23 = vmax.f32 %v5159_v19, %v5169_v11  ;;  %v5171_v2 = vadd.f32 %v5170_v56, %v5098_v43  ;;  %8693 = vmatprep.subr.bf16.mxu0 %v12406_v46  ;;  %v5269_v39 = vadd.f32 %v5250_v47, %v5211_v33  ;;  %v5464_v58 = vld [vmem:[%s19191_s3 + $0x508] sm:$0xff] }
 0x335   :  { %v5468_v45 = vld [vmem:[%s19191_s3 + $0x528] sm:$0xff]  ;;  %v12366_v32 = vcombine.high %v5632_v1, %v5636_v63  ;;  %v12205_v19 = vcombine.low %v5472_v54, %v5476_v34  ;;  %v12365_v46 = vcombine.low %v5632_v1, %v5636_v63  ;;  %v5337_v54 = vld [vmem:[%s19191_s3 + $0x110] sm:$0xff] }
 0x336   :  { %v5219_v37 = vmax.f32 %v5187_v21, %v5203_v23  ;;  %v5204_v38 = vmax.f32 %v5161_v53, %v5171_v2  ;;  %v5270_v55 = vadd.f32 %v5254_v3, %v5212_v52  ;;  %v5285_v59 = vmax.f32 %v5269_v39, 0.0  ;;  %v5456_v33 = vld [vmem:[%s19191_s3 + $0x4c8] sm:$0xff]  ;;  %v5815_v52 = vld [vmem:[%s19192_s4] sm:$0xff]  ;;  %v5357_v39 = vld [vmem:[%s19191_s3 + $0x1b0] sm:$0xff] }
 0x337   :  { %8694 = vmatpush2.bf16.msra.mxu0 %v12405_v35  ;;  %v12198_v16 = vcombine.high %v5464_v58, %v5468_v45  ;;  %v5460_v57 = vld [vmem:[%s19191_s3 + $0x4e8] sm:$0xff]  ;;  %v12197_v43 = vcombine.low %v5464_v58, %v5468_v45  ;;  %v12096_v23 = vcombine.high %v5361_v6, %v5365_v5  ;;  %v5341_v34 = vld [vmem:[%s19191_s3 + $0x130] sm:$0xff] }
 0x338   :  { %v5277_v12 = vadd.f32 %v5250_v47, %v5219_v37  ;;  %v5220_v17 = vmax.f32 %v5188_v9, %v5204_v38  ;;  %8695 = vmatprep.subr.bf16.mxu0 %v12398_v40  ;;  %v5286_v14 = vmax.f32 %v5270_v55, 0.0  ;;  %v5480_v9 = vld [vmem:[%s19191_s3 + $0x588] sm:$0xff]  ;;  %v12189_v2 = vcombine.low %v5456_v33, %v5460_v57  ;;  %v5353_v40 = vld [vmem:[%s19191_s3 + $0x190] sm:$0xff]  ;;  %v19333_v38 = vld [vmem:[#allocation9_spill] sm:$0xff] }
 0x339   :  { %v12214_v4 = vcombine.high %v5480_v9, %v5484_v42  ;;  %v12213_v29 = vcombine.low %v5480_v9, %v5484_v42  ;;  %v5628_v47 = vld [vmem:[%s19191_s3 + $0xa28] sm:$0xff]  ;;  %v5820_v22 = vrot.slane %v5815_v52, %v19333_v38  ;;  %v5329_v45 = vld [vmem:[%s19191_s3 + $0xd0] sm:$0xff] }
 0x33a   :  { %v5293_v21 = vmax.f32 %v5277_v12, 0.0  ;;  %v5278_v7 = vadd.f32 %v5254_v3, %v5220_v17  ;;  %v12358_v11 = vcombine.high %v5624_v48, %v5628_v47  ;;  %v12190_v3 = vcombine.high %v5456_v33, %v5460_v57  ;;  %v5448_v35 = vld [vmem:[%s19191_s3 + $0x488] sm:$0xff]  ;;  %v5321_v57 = vld [vmem:[%s19191_s3 + $0x90] sm:$0xff] }
 0x33b   :  { %8696 = vmatpush2.bf16.msra.mxu0 %v12397_v28  ;;  %v12357_v56 = vcombine.low %v5624_v48, %v5628_v47  ;;  %v5452_v53 = vld [vmem:[%s19191_s3 + $0x4a8] sm:$0xff]  ;;  %v12088_v17 = vcombine.high %v5353_v40, %v5357_v39  ;;  %v12071_v48 = vcombine.low %v5337_v54, %v5341_v34  ;;  %v5317_v52 = vld [vmem:[%s19191_s3 + $0x70] sm:$0xff] }
 0x33c   :  { %v17184_v41 = vpack.c.bf16 %v5293_v21, %v5285_v59  ;;  %v5294_v30 = vmax.f32 %v5278_v7, 0.0  ;;  %8697 = vmatprep.subr.bf16.mxu0 %v12390_v27  ;;  %v12182_v37 = vcombine.high %v5448_v35, %v5452_v53  ;;  %v5440_v55 = vld [vmem:[%s19191_s3 + $0x448] sm:$0xff]  ;;  %v12181_v28 = vcombine.low %v5448_v35, %v5452_v53  ;;  %v5345_v27 = vld [vmem:[%s19191_s3 + $0x150] sm:$0xff]  ;;  %v19334_v7 = vld [vmem:[#allocation5_spill] sm:$0xff] }
 0x33d   :  { %v5444_v12 = vld [vmem:[%s19191_s3 + $0x468] sm:$0xff]  ;;  %v5349_v59 = vld [vmem:[%s19191_s3 + $0x170] sm:$0xff] }
 0x33e   :  { %v17192_v36 = vpack.c.bf16 %v5294_v30, %v5286_v14  ;;  %v12174_v44 = vcombine.high %v5440_v55, %v5444_v12  ;;  %v19335_v30 = vld [vmem:[#allocation11_spill] sm:$0xff]  ;;  %v12080_v24 = vcombine.high %v5345_v27, %v5349_v59  ;;  %v5313_v53 = vld [vmem:[%s19191_s3 + $0x50] sm:$0xff] }
 0x33f   :  { %8698 = vmatpush2.bf16.msra.mxu0 %v12389_v50  ;;  %v12087_v50 = vcombine.low %v5353_v40, %v5357_v39  ;;  %v5432_v9 = vld [vmem:[%s19191_s3 + $0x408] sm:$0xff] }
 0x340   :  { %8578 = vmatprep.mubr.bf16.mxu1 %v17192_v36  ;;  %8699 = vmatprep.subr.bf16.mxu0 %v12382_v51  ;;  %v5436_v42 = vld [vmem:[%s19191_s3 + $0x428] sm:$0xff] }
 0x341   :  { %8579 = vmatmul.mubr.bf16.vlgmr.msra.gmra.mxu1 %v17184_v41  ;;  %v12166_v8 = vcombine.high %v5432_v9, %v5436_v42  ;;  %v5556_v1 = vld [vmem:[%s19191_s3 + $0x7e8] sm:$0xff]  ;;  %v12165_v58 = vcombine.low %v5432_v9, %v5436_v42 }
 0x342   :  { %8633 = vmatpush1.bf16.msra.mxu1 %v19331_v49  ;;  %8664 = vmatprep.mubr.bf16.mxu1 %v19332_v61  ;;  %v12079_v49 = vcombine.low %v5345_v27, %v5349_v59  ;;  %v5544_v47 = vld [vmem:[%s19191_s3 + $0x788] sm:$0xff] }
 0x343   :  { %8634 = vmatprep.subr.bf16.mxu1 %v12214_v4  ;;  %8700 = vmatpush2.bf16.msra.mxu0 %v12381_v10  ;;  %v12173_v10 = vcombine.low %v5440_v55, %v5444_v12  ;;  %v5536_v5 = vld [vmem:[%s19191_s3 + $0x748] sm:$0xff]  ;;  %v5309_v55 = vld [vmem:[%s19191_s3 + $0x30] sm:$0xff] }
 0x344   :  { %8701 = vmatprep.subr.bf16.mxu0 %v12374_v25  ;;  %v5528_v40 = vld [vmem:[%s19191_s3 + $0x708] sm:$0xff] }
 0x345   :  { %v5532_v39 = vld [vmem:[%s19191_s3 + $0x728] sm:$0xff] }
 0x346   :  { %8635 = vmatpush1.bf16.msra.mxu1 %v12213_v29  ;;  %v5552_v29 = vld [vmem:[%s19191_s3 + $0x7c8] sm:$0xff]  ;;  %v12262_v12 = vcombine.high %v5528_v40, %v5532_v39 }
 0x347   :  { %8636 = vmatprep.subr.bf16.mxu1 %v12206_v26  ;;  %8702 = vmatpush2.bf16.msra.mxu0 %v12373_v60  ;;  %v12072_v26 = vcombine.high %v5337_v54, %v5341_v34  ;;  %v12285_v33 = vcombine.low %v5552_v29, %v5556_v1  ;;  %v5524_v27 = vld [vmem:[%s19191_s3 + $0x6e8] sm:$0xff]  ;;  %v5417_v54 = vld [vmem:[%s19191_s3 + $0x390] sm:$0xff] }
 0x348   :  { %8703 = vmatprep.subr.bf16.mxu0 %v12366_v32  ;;  %v5333_v32 = vld [vmem:[%s19191_s3 + $0xf0] sm:$0xff]  ;;  %v5512_v9 = vld [vmem:[%s19191_s3 + $0x688] sm:$0xff] }
 0x349   :  { %v12063_v6 = vcombine.low %v5329_v45, %v5333_v32  ;;  %v5516_v42 = vld [vmem:[%s19191_s3 + $0x6a8] sm:$0xff]  ;;  %v5421_v34 = vld [vmem:[%s19191_s3 + $0x3b0] sm:$0xff] }
 0x34a   :  { %8637 = vmatpush1.bf16.msra.mxu1 %v12205_v19  ;;  %v12286_v19 = vcombine.high %v5552_v29, %v5556_v1  ;;  %v12152_v29 = vcombine.high %v5417_v54, %v5421_v34  ;;  %v12245_v1 = vcombine.low %v5512_v9, %v5516_v42 }
 0x34b   :  { %8638 = vmatprep.subr.bf16.mxu1 %v12198_v16  ;;  %8704 = vmatpush2.bf16.msra.mxu0 %v12365_v46  ;;  %v5548_v16 = vld [vmem:[%s19191_s3 + $0x7a8] sm:$0xff]  ;;  %v12064_v46 = vcombine.high %v5329_v45, %v5333_v32  ;;  %v12151_v45 = vcombine.low %v5417_v54, %v5421_v34 }
 0x34c   :  { %8705 = vmatprep.subr.bf16.mxu0 %v12358_v11  ;;  %v5325_v11 = vld [vmem:[%s19191_s3 + $0xb0] sm:$0xff]  ;;  %v12277_v35 = vcombine.low %v5544_v47, %v5548_v16  ;;  %v5496_v32 = vld [vmem:[%s19191_s3 + $0x608] sm:$0xff] }
 0x34e   :  { %8639 = vmatpush1.bf16.msra.mxu1 %v12197_v43  ;;  %v12278_v43 = vcombine.high %v5544_v47, %v5548_v16  ;;  %v5401_v16 = vld [vmem:[%s19191_s3 + $0x310] sm:$0xff] }
 0x34f   :  { %8640 = vmatprep.subr.bf16.mxu1 %v12190_v3  ;;  %8706 = vmatpush2.bf16.msra.mxu0 %v12357_v56  ;;  %v8451_v21 = vpop.f32.mrf.mxu0  ;;  %v5540_v3 = vld [vmem:[%s19191_s3 + $0x768] sm:$0xff]  ;;  %v12056_v56 = vcombine.high %v5321_v57, %v5325_v11 }
 0x350   :  { %8761 = vmatprep.subr.bf16.mxu0 %v12096_v23  ;;  %v8452_v62 = vadd.f32 %v8451_v21, %v5820_v22  ;;  %v12270_v23 = vcombine.high %v5536_v5, %v5540_v3  ;;  %v12261_v21 = vcombine.low %v5528_v40, %v5532_v39  ;;  %v5385_v39 = vld [vmem:[%s19191_s3 + $0x290] sm:$0xff] }
 0x351   :  { %v17278_v51 = vpop.f32.mrf.mxu0 }
 0x352   :  { %8641 = vmatpush1.bf16.msra.mxu1 %v12189_v2  ;;  %8708 = vmatmul.mubr.bf16.vlgmr.msra.gmra.mxu0 %v19334_v7  ;;  %v12055_v2 = vcombine.low %v5321_v57, %v5325_v11  ;;  %v5744_v11 = vld [vmem:[%s19191_s3 + $0xdc8] sm:$0xff] }
 0x353   :  { %8642 = vmatprep.subr.bf16.mxu1 %v12182_v37  ;;  %8762 = vmatpush1.bf16.msra.mxu0 %v12095_v20  ;;  %v8455_v25 = vpop.f32.mrf.mxu0  ;;  %v12048_v37 = vcombine.high %v5313_v53, %v5317_v52  ;;  %v5305_v20 = vld [vmem:[%s19191_s3 + $0x10] sm:$0xff] }
 0x354   :  { %8793 = vmatprep.mubr.bf16.mxu0 %v19335_v30  ;;  %8763 = vmatprep.subr.bf16.mxu0 %v12088_v17  ;;  %v8456_v18 = vadd.f32 %v8455_v25, %v5820_v22  ;;  %v12269_v22 = vcombine.low %v5536_v5, %v5540_v3  ;;  %v12047_v17 = vcombine.low %v5313_v53, %v5317_v52  ;;  %v5393_v3 = vld [vmem:[%s19191_s3 + $0x2d0] sm:$0xff]  ;;  %v5736_v52 = vld [vmem:[%s19191_s3 + $0xd88] sm:$0xff] }
 0x355   :  { %v8494_v14 = vpop.f32.mrf.mxu1  ;;  %v12040_v59 = vcombine.high %v5305_v20, %v5309_v55  ;;  %v12246_v25 = vcombine.high %v5512_v9, %v5516_v42 }
 0x356   :  { %v17280_v31 = vadd.f32 %v8494_v14, %v8452_v62  ;;  %8643 = vmatpush1.bf16.msra.mxu1 %v12181_v28  ;;  %v5520_v28 = vld [vmem:[%s19191_s3 + $0x6c8] sm:$0xff]  ;;  %v5429_v62 = vld [vmem:[%s19191_s3 + $0x3f0] sm:$0xff] }
 0x357   :  { %v17282_v4 = vpop.f32.mrf.mxu1  ;;  %8644 = vmatprep.subr.bf16.mxu1 %v12174_v44  ;;  %8764 = vmatpush1.bf16.msra.mxu0 %v12087_v50  ;;  %v5425_v44 = vld [vmem:[%s19191_s3 + $0x3d0] sm:$0xff]  ;;  %v12254_v14 = vcombine.high %v5520_v28, %v5524_v27  ;;  %v12039_v50 = vcombine.low %v5305_v20, %v5309_v55  ;;  %v5728_v55 = vld [vmem:[%s19191_s3 + $0xd48] sm:$0xff] }
 0x358   :  { %8765 = vmatprep.subr.bf16.mxu0 %v12080_v24  ;;  %v12160_v24 = vcombine.high %v5425_v44, %v5429_v62 }
 0x359   :  { %v8498_v63 = vpop.f32.mrf.mxu1 }
 0x35a   :  { %v17296_v60 = vadd.f32 %v8498_v63, %v8456_v18  ;;  %8645 = vmatpush1.bf16.msra.mxu1 %v12173_v10  ;;  %v12253_v10 = vcombine.low %v5520_v28, %v5524_v27  ;;  %v5504_v18 = vld [vmem:[%s19191_s3 + $0x648] sm:$0xff]  ;;  %v5409_v63 = vld [vmem:[%s19191_s3 + $0x350] sm:$0xff] }
 0x35b   :  { %8646 = vmatprep.subr.bf16.mxu1 %v12166_v8  ;;  %8766 = vmatpush1.bf16.msra.mxu0 %v12079_v49  ;;  %v12159_v8 = vcombine.low %v5425_v44, %v5429_v62  ;;  %v5508_v49 = vld [vmem:[%s19191_s3 + $0x668] sm:$0xff] }
 0x35c   :  { %8767 = vmatprep.subr.bf16.mxu0 %v12072_v26  ;;  %v5413_v26 = vld [vmem:[%s19191_s3 + $0x370] sm:$0xff]  ;;  %v12237_v47 = vcombine.low %v5504_v18, %v5508_v49 }
 0x35d   :  { %v12143_v57 = vcombine.low %v5409_v63, %v5413_v26 }
 0x35e   :  { %8647 = vmatpush1.bf16.msra.mxu1 %v12165_v58  ;;  %v12238_v58 = vcombine.high %v5504_v18, %v5508_v49 }
 0x35f   :  { %8648 = vmatprep.subr.bf16.mxu1 %v12286_v19  ;;  %8768 = vmatpush1.bf16.msra.mxu0 %v12071_v48  ;;  %v5500_v19 = vld [vmem:[%s19191_s3 + $0x628] sm:$0xff]  ;;  %v12144_v48 = vcombine.high %v5409_v63, %v5413_v26 }
 0x360   :  { %8769 = vmatprep.subr.bf16.mxu0 %v12064_v46  ;;  %v5405_v46 = vld [vmem:[%s19191_s3 + $0x330] sm:$0xff]  ;;  %v12229_v5 = vcombine.low %v5496_v32, %v5500_v19 }
 0x361   :  { %v12135_v53 = vcombine.low %v5401_v16, %v5405_v46 }
 0x362   :  { %8649 = vmatpush2.bf16.msra.mxu1 %v12285_v33  ;;  %v12230_v33 = vcombine.high %v5496_v32, %v5500_v19 }
 0x363   :  { %8650 = vmatprep.subr.bf16.mxu1 %v12278_v43  ;;  %8770 = vmatpush1.bf16.msra.mxu0 %v12063_v6  ;;  %v5748_v43 = vld [vmem:[%s19191_s3 + $0xde8] sm:$0xff]  ;;  %v12136_v6 = vcombine.high %v5401_v16, %v5405_v46 }
 0x364   :  { %8771 = vmatprep.subr.bf16.mxu0 %v12056_v56  ;;  %v5397_v56 = vld [vmem:[%s19191_s3 + $0x2f0] sm:$0xff]  ;;  %v12477_v40 = vcombine.low %v5744_v11, %v5748_v43 }
 0x365   :  { %v12127_v20 = vcombine.low %v5393_v3, %v5397_v56 }
 0x366   :  { %8651 = vmatpush2.bf16.msra.mxu1 %v12277_v35  ;;  %v12478_v35 = vcombine.high %v5744_v11, %v5748_v43  ;;  %v17468_v11 = vpop.f32.mrf.mxu0 }
 0x367   :  { %8652 = vmatprep.subr.bf16.mxu1 %v12270_v23  ;;  %8772 = vmatpush1.bf16.msra.mxu0 %v12055_v2  ;;  %v5740_v23 = vld [vmem:[%s19191_s3 + $0xda8] sm:$0xff]  ;;  %v12128_v2 = vcombine.high %v5393_v3, %v5397_v56  ;;  %v5605_v3 = vld [vmem:[%s19191_s3 + $0x970] sm:$0xff] }
 0x368   :  { %8773 = vmatprep.subr.bf16.mxu0 %v12048_v37  ;;  %v5389_v37 = vld [vmem:[%s19191_s3 + $0x2b0] sm:$0xff]  ;;  %v12469_v27 = vcombine.low %v5736_v52, %v5740_v23 }
 0x369   :  { %v12120_v28 = vcombine.high %v5385_v39, %v5389_v37  ;;  %v12119_v62 = vcombine.low %v5385_v39, %v5389_v37  ;;  %v5692_v39 = vld [vmem:[%s19191_s3 + $0xc28] sm:$0xff] }
 0x36a   :  { %8653 = vmatpush2.bf16.msra.mxu1 %v12269_v22  ;;  %v12470_v22 = vcombine.high %v5736_v52, %v5740_v23  ;;  %v19338_v23 = vld [vmem:[#allocation20_spill] sm:$0xff] }
 0x36b   :  { %8654 = vmatprep.subr.bf16.mxu1 %v12262_v12  ;;  %8774 = vmatpush1.bf16.msra.mxu0 %v12047_v17  ;;  %v5732_v12 = vld [vmem:[%s19191_s3 + $0xd68] sm:$0xff]  ;;  %v19336_v17 = vld [vmem:[#allocation25_spill] sm:$0xff] }
 0x36c   :  { %8775 = vmatprep.subr.bf16.mxu0 %v12040_v59  ;;  %v5377_v59 = vld [vmem:[%s19191_s3 + $0x250] sm:$0xff]  ;;  %v12462_v44 = vcombine.high %v5728_v55, %v5732_v12  ;;  %v12461_v42 = vcombine.low %v5728_v55, %v5732_v12 }
 0x36d   :  { %v5597_v55 = vld [vmem:[%s19191_s3 + $0x930] sm:$0xff] }
 0x36e   :  { %8655 = vmatpush2.bf16.msra.mxu1 %v12261_v21  ;;  %v5381_v21 = vld [vmem:[%s19191_s3 + $0x270] sm:$0xff] }
 0x36f   :  { %8656 = vmatprep.subr.bf16.mxu1 %v12254_v14  ;;  %8776 = vmatpush1.bf16.msra.mxu0 %v12039_v50  ;;  %v5720_v14 = vld [vmem:[%s19191_s3 + $0xd08] sm:$0xff]  ;;  %v12112_v9 = vcombine.high %v5377_v59, %v5381_v21  ;;  %v12111_v34 = vcombine.low %v5377_v59, %v5381_v21 }
 0x370   :  { %8777 = vmatprep.subr.bf16.mxu0 %v12160_v24  ;;  %v5724_v50 = vld [vmem:[%s19191_s3 + $0xd28] sm:$0xff]  ;;  %v5369_v24 = vld [vmem:[%s19191_s3 + $0x210] sm:$0xff] }
 0x371   :  { %v12454_v54 = vcombine.high %v5720_v14, %v5724_v50  ;;  %v12453_v49 = vcombine.low %v5720_v14, %v5724_v50  ;;  %v5808_v21 = vld [vmem:[%s19191_s3 + $0xfc8] sm:$0xff]  ;;  %v5585_v50 = vld [vmem:[%s19191_s3 + $0x8d0] sm:$0xff] }
 0x372   :  { %8657 = vmatpush2.bf16.msra.mxu1 %v12253_v10  ;;  %v5373_v10 = vld [vmem:[%s19191_s3 + $0x230] sm:$0xff] }
 0x373   :  { %8658 = vmatprep.subr.bf16.mxu1 %v12246_v25  ;;  %8778 = vmatpush2.bf16.msra.mxu0 %v12159_v8  ;;  %v5712_v25 = vld [vmem:[%s19191_s3 + $0xcc8] sm:$0xff]  ;;  %v12104_v18 = vcombine.high %v5369_v24, %v5373_v10  ;;  %v12103_v26 = vcombine.low %v5369_v24, %v5373_v10 }
 0x374   :  { %8779 = vmatprep.subr.bf16.mxu0 %v12152_v29  ;;  %v5716_v8 = vld [vmem:[%s19191_s3 + $0xce8] sm:$0xff]  ;;  %v5617_v29 = vld [vmem:[%s19191_s3 + $0x9d0] sm:$0xff] }
 0x375   :  { %v12446_v63 = vcombine.high %v5712_v25, %v5716_v8  ;;  %v12445_v19 = vcombine.low %v5712_v25, %v5716_v8  ;;  %v5800_v24 = vld [vmem:[%s19191_s3 + $0xf88] sm:$0xff]  ;;  %v5577_v25 = vld [vmem:[%s19191_s3 + $0x890] sm:$0xff] }
 0x376   :  { %8659 = vmatpush2.bf16.msra.mxu1 %v12245_v1  ;;  %v5621_v1 = vld [vmem:[%s19191_s3 + $0x9f0] sm:$0xff]  ;;  %v5804_v10 = vld [vmem:[%s19191_s3 + $0xfa8] sm:$0xff] }
 0x377   :  { %8660 = vmatprep.subr.bf16.mxu1 %v12238_v58  ;;  %8780 = vmatpush2.bf16.msra.mxu0 %v12151_v45  ;;  %v5704_v58 = vld [vmem:[%s19191_s3 + $0xc88] sm:$0xff]  ;;  %v12352_v32 = vcombine.high %v5617_v29, %v5621_v1  ;;  %v12351_v46 = vcombine.low %v5617_v29, %v5621_v1  ;;  %v5581_v8 = vld [vmem:[%s19191_s3 + $0x8b0] sm:$0xff] }
 0x378   :  { %8781 = vmatprep.subr.bf16.mxu0 %v12144_v48  ;;  %v5708_v45 = vld [vmem:[%s19191_s3 + $0xca8] sm:$0xff]  ;;  %v5609_v48 = vld [vmem:[%s19191_s3 + $0x990] sm:$0xff] }
 0x379   :  { %v12438_v16 = vcombine.high %v5704_v58, %v5708_v45  ;;  %v5792_v29 = vld [vmem:[%s19191_s3 + $0xf48] sm:$0xff] }
 0x37a   :  { %8661 = vmatpush2.bf16.msra.mxu1 %v12237_v47  ;;  %v5613_v47 = vld [vmem:[%s19191_s3 + $0x9b0] sm:$0xff]  ;;  %v5796_v1 = vld [vmem:[%s19191_s3 + $0xf68] sm:$0xff] }
 0x37b   :  { %8662 = vmatprep.subr.bf16.mxu1 %v12230_v33  ;;  %8782 = vmatpush2.bf16.msra.mxu0 %v12143_v57  ;;  %v5696_v33 = vld [vmem:[%s19191_s3 + $0xc48] sm:$0xff]  ;;  %v12344_v43 = vcombine.high %v5609_v48, %v5613_v47 }
 0x37c   :  { %8783 = vmatprep.subr.bf16.mxu0 %v12136_v6  ;;  %v5700_v57 = vld [vmem:[%s19191_s3 + $0xc68] sm:$0xff]  ;;  %v12437_v6 = vcombine.low %v5704_v58, %v5708_v45  ;;  %v5569_v58 = vld [vmem:[%s19191_s3 + $0x850] sm:$0xff] }
 0x37d   :  { %v5573_v45 = vld [vmem:[%s19191_s3 + $0x870] sm:$0xff] }
 0x37e   :  { %8663 = vmatpush2.bf16.msra.mxu1 %v12229_v5  ;;  %v5601_v5 = vld [vmem:[%s19191_s3 + $0x950] sm:$0xff] }
 0x37f   :  { %8718 = vmatprep.subr.bf16.mxu1 %v12478_v35  ;;  %8784 = vmatpush2.bf16.msra.mxu0 %v12135_v53  ;;  %v19337_v35 = vld [vmem:[#allocation12_spill] sm:$0xff]  ;;  %v12430_v53 = vcombine.high %v5696_v33, %v5700_v57  ;;  %v12335_v59 = vcombine.low %v5601_v5, %v5605_v3 }
 0x380   :  { %8785 = vmatprep.subr.bf16.mxu0 %v12128_v2  ;;  %v12343_v2 = vcombine.low %v5609_v48, %v5613_v47  ;;  %v5784_v48 = vld [vmem:[%s19191_s3 + $0xf08] sm:$0xff] }
 0x381   :  { %8665 = vmatmul.mubr.bf16.vlgmr.msra.gmra.mxu1 %v19336_v17  ;;  %v5788_v47 = vld [vmem:[%s19191_s3 + $0xf28] sm:$0xff] }
 0x382   :  { %8719 = vmatpush1.bf16.msra.mxu1 %v12477_v40  ;;  %8750 = vmatprep.mubr.bf16.mxu1 %v17192_v36  ;;  %v5688_v40 = vld [vmem:[%s19191_s3 + $0xc08] sm:$0xff] }
 0x383   :  { %8720 = vmatprep.subr.bf16.mxu1 %v12470_v22  ;;  %8786 = vmatpush2.bf16.msra.mxu0 %v12127_v20  ;;  %v12336_v22 = vcombine.high %v5601_v5, %v5605_v3  ;;  %v12429_v20 = vcombine.low %v5696_v33, %v5700_v57  ;;  %v12421_v14 = vcombine.low %v5688_v40, %v5692_v39  ;;  %v5561_v33 = vld [vmem:[%s19191_s3 + $0x810] sm:$0xff]  ;;  %v5776_v5 = vld [vmem:[%s19191_s3 + $0xec8] sm:$0xff] }
 0x384   :  { %8787 = vmatprep.subr.bf16.mxu0 %v12120_v28  ;;  %v12422_v28 = vcombine.high %v5688_v40, %v5692_v39  ;;  %v5565_v57 = vld [vmem:[%s19191_s3 + $0x830] sm:$0xff]  ;;  %v5780_v3 = vld [vmem:[%s19191_s3 + $0xee8] sm:$0xff] }
 0x385   :  { %v5685_v40 = vld [vmem:[%s19191_s3 + $0xbf0] sm:$0xff]  ;;  %v12510_v39 = vcombine.high %v5776_v5, %v5780_v3 }
 0x386   :  { %8721 = vmatpush1.bf16.msra.mxu1 %v12469_v27 }
 0x387   :  { %8722 = vmatprep.subr.bf16.mxu1 %v12462_v44  ;;  %8788 = vmatpush2.bf16.msra.mxu0 %v12119_v62  ;;  %v5812_v44 = vld [vmem:[%s19191_s3 + $0xfe8] sm:$0xff] }
 0x388   :  { %8789 = vmatprep.subr.bf16.mxu0 %v12112_v9  ;;  %v12542_v9 = vcombine.high %v5808_v21, %v5812_v44 }
 0x38a   :  { %8723 = vmatpush1.bf16.msra.mxu1 %v12461_v42 }
 0x38b   :  { %8724 = vmatprep.subr.bf16.mxu1 %v12454_v54  ;;  %8790 = vmatpush2.bf16.msra.mxu0 %v12111_v34  ;;  %v12541_v34 = vcombine.low %v5808_v21, %v5812_v44 }
 0x38c   :  { %8791 = vmatprep.subr.bf16.mxu0 %v12104_v18  ;;  %v12534_v18 = vcombine.high %v5800_v24, %v5804_v10 }
 0x38e   :  { %8725 = vmatpush1.bf16.msra.mxu1 %v12453_v49 }
 0x38f   :  { %8726 = vmatprep.subr.bf16.mxu1 %v12446_v63  ;;  %8792 = vmatpush2.bf16.msra.mxu0 %v12103_v26  ;;  %v12312_v63 = vcombine.high %v5577_v25, %v5581_v8  ;;  %v12533_v26 = vcombine.low %v5800_v24, %v5804_v10 }
 0x390   :  { %8847 = vmatprep.subr.bf16.mxu0 %v12352_v32  ;;  %v12526_v32 = vcombine.high %v5792_v29, %v5796_v1 }
 0x392   :  { %8727 = vmatpush1.bf16.msra.mxu1 %v12445_v19  ;;  %v8537_v56 = vpop.f32.mrf.mxu0  ;;  %8794 = vmatmul.mubr.bf16.vlgmr.msra.gmra.mxu0 %v19337_v35  ;;  %v12311_v19 = vcombine.low %v5577_v25, %v5581_v8 }
 0x393   :  { %8728 = vmatprep.subr.bf16.mxu1 %v12438_v16  ;;  %v17478_v52 = vadd.f32 %v8537_v56, %v17280_v31  ;;  %8848 = vmatpush1.bf16.msra.mxu0 %v12351_v46  ;;  %v5593_v31 = vld [vmem:[%s19191_s3 + $0x910] sm:$0xff]  ;;  %v12304_v16 = vcombine.high %v5569_v58, %v5573_v45  ;;  %v12525_v46 = vcombine.low %v5792_v29, %v5796_v1 }
 0x394   :  { %8879 = vmatprep.mubr.bf16.mxu0 %v19338_v23  ;;  %v17487_v37 = vpop.f32.mrf.mxu0  ;;  %8849 = vmatprep.subr.bf16.mxu0 %v12344_v43  ;;  %v12328_v62 = vcombine.high %v5593_v31, %v5597_v55  ;;  %v12327_v42 = vcombine.low %v5593_v31, %v5597_v55  ;;  %v12518_v43 = vcombine.high %v5784_v48, %v5788_v47  ;;  %v5772_v31 = vld [vmem:[%s19191_s3 + $0xea8] sm:$0xff] }
 0x395   :  { %v12296_v56 = vcombine.high %v5561_v33, %v5565_v57 }
 0x396   :  { %8729 = vmatpush1.bf16.msra.mxu1 %v12437_v6  ;;  %v8541_v12 = vpop.f32.mrf.mxu0  ;;  %v12303_v6 = vcombine.low %v5569_v58, %v5573_v45 }
 0x397   :  { %8730 = vmatprep.subr.bf16.mxu1 %v12430_v53  ;;  %v17496_v27 = vadd.f32 %v8541_v12, %v17296_v60  ;;  %8850 = vmatpush1.bf16.msra.mxu0 %v12343_v2  ;;  %v5589_v60 = vld [vmem:[%s19191_s3 + $0x8f0] sm:$0xff]  ;;  %v12517_v53 = vcombine.low %v5784_v48, %v5788_v47  ;;  %v12509_v12 = vcombine.low %v5776_v5, %v5780_v3 }
 0x398   :  { %8851 = vmatprep.subr.bf16.mxu0 %v12336_v22  ;;  %v12320_v54 = vcombine.high %v5585_v50, %v5589_v60  ;;  %v12319_v49 = vcombine.low %v5585_v50, %v5589_v60  ;;  %v5681_v2 = vld [vmem:[%s19191_s3 + $0xbd0] sm:$0xff]  ;;  %v12295_v22 = vcombine.low %v5561_v33, %v5565_v57 }
 0x399   :  { %v12416_v55 = vcombine.high %v5681_v2, %v5685_v40  ;;  %v12415_v44 = vcombine.low %v5681_v2, %v5685_v40 }
 0x39a   :  { %8731 = vmatpush1.bf16.msra.mxu1 %v12429_v20  ;;  %v5768_v20 = vld [vmem:[%s19191_s3 + $0xe88] sm:$0xff] }
 0x39b   :  { %8732 = vmatprep.subr.bf16.mxu1 %v12422_v28  ;;  %8852 = vmatpush1.bf16.msra.mxu0 %v12335_v59  ;;  %v5673_v28 = vld [vmem:[%s19191_s3 + $0xb90] sm:$0xff]  ;;  %v12502_v21 = vcombine.high %v5768_v20, %v5772_v31  ;;  %v12501_v60 = vcombine.low %v5768_v20, %v5772_v31 }
 0x39c   :  { %8853 = vmatprep.subr.bf16.mxu0 %v12328_v62  ;;  %v5677_v59 = vld [vmem:[%s19191_s3 + $0xbb0] sm:$0xff]  ;;  %v5760_v62 = vld [vmem:[%s19191_s3 + $0xe48] sm:$0xff] }
 0x39d   :  { %v12408_v50 = vcombine.high %v5673_v28, %v5677_v59  ;;  %v12407_v10 = vcombine.low %v5673_v28, %v5677_v59 }
 0x39e   :  { %8733 = vmatpush1.bf16.msra.mxu1 %v12421_v14  ;;  %v5764_v14 = vld [vmem:[%s19191_s3 + $0xe68] sm:$0xff] }
 0x39f   :  { %8734 = vmatprep.subr.bf16.mxu1 %v12542_v9  ;;  %8854 = vmatpush1.bf16.msra.mxu0 %v12327_v42  ;;  %v5665_v9 = vld [vmem:[%s19191_s3 + $0xb50] sm:$0xff]  ;;  %v12494_v24 = vcombine.high %v5760_v62, %v5764_v14  ;;  %v12493_v8 = vcombine.low %v5760_v62, %v5764_v14 }
 0x3a0   :  { %8855 = vmatprep.subr.bf16.mxu0 %v12320_v54  ;;  %v5669_v42 = vld [vmem:[%s19191_s3 + $0xb70] sm:$0xff]  ;;  %v5752_v54 = vld [vmem:[%s19191_s3 + $0xe08] sm:$0xff] }
 0x3a1   :  { %v12400_v25 = vcombine.high %v5665_v9, %v5669_v42  ;;  %v12399_v1 = vcombine.low %v5665_v9, %v5669_v42 }
 0x3a2   :  { %8735 = vmatpush2.bf16.msra.mxu1 %v12541_v34  ;;  %v5756_v34 = vld [vmem:[%s19191_s3 + $0xe28] sm:$0xff] }
 0x3a3   :  { %8736 = vmatprep.subr.bf16.mxu1 %v12534_v18  ;;  %8856 = vmatpush1.bf16.msra.mxu0 %v12319_v49  ;;  %v5657_v18 = vld [vmem:[%s19191_s3 + $0xb10] sm:$0xff]  ;;  %v12486_v29 = vcombine.high %v5752_v54, %v5756_v34  ;;  %v12485_v45 = vcombine.low %v5752_v54, %v5756_v34 }
 0x3a4   :  { %8857 = vmatprep.subr.bf16.mxu0 %v12312_v63  ;;  %v5661_v49 = vld [vmem:[%s19191_s3 + $0xb30] sm:$0xff] }
 0x3a5   :  { %v5489_v63 = vld [vmem:[%s19191_s3 + $0x5d0] sm:$0xff]  ;;  %v12392_v58 = vcombine.high %v5657_v18, %v5661_v49  ;;  %v12391_v47 = vcombine.low %v5657_v18, %v5661_v49 }
 0x3a6   :  { %8737 = vmatpush2.bf16.msra.mxu1 %v12533_v26  ;;  %v5493_v26 = vld [vmem:[%s19191_s3 + $0x5f0] sm:$0xff] }
 0x3a7   :  { %8738 = vmatprep.subr.bf16.mxu1 %v12526_v32  ;;  %8858 = vmatpush1.bf16.msra.mxu0 %v12311_v19  ;;  %v5649_v32 = vld [vmem:[%s19191_s3 + $0xad0] sm:$0xff]  ;;  %v12224_v48 = vcombine.high %v5489_v63, %v5493_v26  ;;  %v12223_v57 = vcombine.low %v5489_v63, %v5493_v26 }
 0x3a8   :  { %8859 = vmatprep.subr.bf16.mxu0 %v12304_v16  ;;  %v5653_v19 = vld [vmem:[%s19191_s3 + $0xaf0] sm:$0xff] }
 0x3a9   :  { %v5481_v16 = vld [vmem:[%s19191_s3 + $0x590] sm:$0xff]  ;;  %v12384_v33 = vcombine.high %v5649_v32, %v5653_v19  ;;  %v12383_v3 = vcombine.low %v5649_v32, %v5653_v19 }
 0x3aa   :  { %8739 = vmatpush2.bf16.msra.mxu1 %v12525_v46  ;;  %v5485_v46 = vld [vmem:[%s19191_s3 + $0x5b0] sm:$0xff] }
 0x3ab   :  { %8740 = vmatprep.subr.bf16.mxu1 %v12518_v43  ;;  %8860 = vmatpush1.bf16.msra.mxu0 %v12303_v6  ;;  %v5641_v43 = vld [vmem:[%s19191_s3 + $0xa90] sm:$0xff]  ;;  %v12216_v5 = vcombine.high %v5481_v16, %v5485_v46  ;;  %v12215_v40 = vcombine.low %v5481_v16, %v5485_v46 }
 0x3ac   :  { %8861 = vmatprep.subr.bf16.mxu0 %v12296_v56  ;;  %v5645_v6 = vld [vmem:[%s19191_s3 + $0xab0] sm:$0xff] }
 0x3ad   :  { %v5473_v56 = vld [vmem:[%s19191_s3 + $0x550] sm:$0xff]  ;;  %v12376_v2 = vcombine.high %v5641_v43, %v5645_v6  ;;  %v12375_v31 = vcombine.low %v5641_v43, %v5645_v6  ;;  %v5338_v43 = vld [vmem:[%s19191_s3 + $0x118] sm:$0xff] }
 0x3ae   :  { %8741 = vmatpush2.bf16.msra.mxu1 %v12517_v53  ;;  %v5477_v53 = vld [vmem:[%s19191_s3 + $0x570] sm:$0xff]  ;;  %v5342_v6 = vld [vmem:[%s19191_s3 + $0x138] sm:$0xff] }
 0x3af   :  { %8742 = vmatprep.subr.bf16.mxu1 %v12510_v39  ;;  %8862 = vmatpush1.bf16.msra.mxu0 %v12295_v22  ;;  %v5633_v39 = vld [vmem:[%s19191_s3 + $0xa50] sm:$0xff]  ;;  %v12208_v20 = vcombine.high %v5473_v56, %v5477_v53  ;;  %v12207_v59 = vcombine.low %v5473_v56, %v5477_v53 }
 0x3b0   :  { %8863 = vmatprep.subr.bf16.mxu0 %v12416_v55  ;;  %v5637_v22 = vld [vmem:[%s19191_s3 + $0xa70] sm:$0xff] }
 0x3b1   :  { %v5465_v55 = vld [vmem:[%s19191_s3 + $0x510] sm:$0xff]  ;;  %v12368_v28 = vcombine.high %v5633_v39, %v5637_v22  ;;  %v12367_v14 = vcombine.low %v5633_v39, %v5637_v22  ;;  %v5330_v22 = vld [vmem:[%s19191_s3 + $0xd8] sm:$0xff] }
 0x3b2   :  { %8743 = vmatpush2.bf16.msra.mxu1 %v12509_v12  ;;  %v5469_v12 = vld [vmem:[%s19191_s3 + $0x530] sm:$0xff] }
 0x3b3   :  { %8744 = vmatprep.subr.bf16.mxu1 %v12502_v21  ;;  %8864 = vmatpush2.bf16.msra.mxu0 %v12415_v44  ;;  %v5625_v21 = vld [vmem:[%s19191_s3 + $0xa10] sm:$0xff]  ;;  %v12200_v62 = vcombine.high %v5465_v55, %v5469_v12  ;;  %v12199_v42 = vcombine.low %v5465_v55, %v5469_v12 }
 0x3b4   :  { %8865 = vmatprep.subr.bf16.mxu0 %v12408_v50  ;;  %v5629_v44 = vld [vmem:[%s19191_s3 + $0xa30] sm:$0xff] }
 0x3b5   :  { %v5457_v50 = vld [vmem:[%s19191_s3 + $0x4d0] sm:$0xff]  ;;  %v12360_v9 = vcombine.high %v5625_v21, %v5629_v44  ;;  %v12359_v34 = vcombine.low %v5625_v21, %v5629_v44  ;;  %v5322_v44 = vld [vmem:[%s19191_s3 + $0x98] sm:$0xff] }
 0x3b6   :  { %8745 = vmatpush2.bf16.msra.mxu1 %v12501_v60  ;;  %v5461_v60 = vld [vmem:[%s19191_s3 + $0x4f0] sm:$0xff] }
 0x3b7   :  { %8746 = vmatprep.subr.bf16.mxu1 %v12494_v24  ;;  %8866 = vmatpush2.bf16.msra.mxu0 %v12407_v10  ;;  %v5362_v24 = vld [vmem:[%s19191_s3 + $0x1d8] sm:$0xff]  ;;  %v12192_v54 = vcombine.high %v5457_v50, %v5461_v60  ;;  %v12191_v49 = vcombine.low %v5457_v50, %v5461_v60  ;;  %v5433_v46 = vld [vmem:[%s19191_s3 + $0x410] sm:$0xff] }
 0x3b8   :  { %8867 = vmatprep.subr.bf16.mxu0 %v12400_v25  ;;  %v5366_v10 = vld [vmem:[%s19191_s3 + $0x1f8] sm:$0xff]  ;;  %v5449_v25 = vld [vmem:[%s19191_s3 + $0x490] sm:$0xff] }
 0x3b9   :  { %v12098_v18 = vcombine.high %v5362_v24, %v5366_v10  ;;  %v12097_v26 = vcombine.low %v5362_v24, %v5366_v10  ;;  %v5549_v12 = vld [vmem:[%s19191_s3 + $0x7b0] sm:$0xff]  ;;  %v5314_v10 = vld [vmem:[%s19191_s3 + $0x58] sm:$0xff] }
 0x3ba   :  { %8747 = vmatpush2.bf16.msra.mxu1 %v12493_v8  ;;  %v5453_v8 = vld [vmem:[%s19191_s3 + $0x4b0] sm:$0xff] }
 0x3bb   :  { %8748 = vmatprep.subr.bf16.mxu1 %v12486_v29  ;;  %8868 = vmatpush2.bf16.msra.mxu0 %v12399_v1  ;;  %v5354_v29 = vld [vmem:[%s19191_s3 + $0x198] sm:$0xff]  ;;  %v12184_v63 = vcombine.high %v5449_v25, %v5453_v8  ;;  %v12183_v19 = vcombine.low %v5449_v25, %v5453_v8  ;;  %v5541_v60 = vld [vmem:[%s19191_s3 + $0x770] sm:$0xff] }
 0x3bc   :  { %8869 = vmatprep.subr.bf16.mxu0 %v12392_v58  ;;  %v5358_v1 = vld [vmem:[%s19191_s3 + $0x1b8] sm:$0xff]  ;;  %v5441_v58 = vld [vmem:[%s19191_s3 + $0x450] sm:$0xff] }
 0x3bd   :  { %v12090_v32 = vcombine.high %v5354_v29, %v5358_v1  ;;  %v5533_v8 = vld [vmem:[%s19191_s3 + $0x730] sm:$0xff] }
 0x3be   :  { %8749 = vmatpush2.bf16.msra.mxu1 %v12485_v45  ;;  %v5445_v45 = vld [vmem:[%s19191_s3 + $0x470] sm:$0xff] }
 0x3bf   :  { %8804 = vmatprep.subr.bf16.mxu1 %v12224_v48  ;;  %8870 = vmatpush2.bf16.msra.mxu0 %v12391_v47  ;;  %v5346_v48 = vld [vmem:[%s19191_s3 + $0x158] sm:$0xff]  ;;  %v12176_v16 = vcombine.high %v5441_v58, %v5445_v45 }
 0x3c0   :  { %8871 = vmatprep.subr.bf16.mxu0 %v12384_v33  ;;  %v5350_v47 = vld [vmem:[%s19191_s3 + $0x178] sm:$0xff]  ;;  %v12089_v33 = vcombine.low %v5354_v29, %v5358_v1 }
 0x3c1   :  { %8751 = vmatmul.mubr.bf16.vlgmr.msra.gmra.mxu1 %v17184_v41  ;;  %v12081_v53 = vcombine.low %v5346_v48, %v5350_v47  ;;  %v5306_v1 = vld [vmem:[%s19191_s3 + $0x18] sm:$0xff] }
 0x3c2   :  { %8805 = vmatpush1.bf16.msra.mxu1 %v12223_v57  ;;  %8836 = vmatprep.mubr.bf16.mxu1 %v19332_v61  ;;  %v5437_v57 = vld [vmem:[%s19191_s3 + $0x430] sm:$0xff] }
 0x3c3   :  { %8806 = vmatprep.subr.bf16.mxu1 %v12216_v5  ;;  %8872 = vmatpush2.bf16.msra.mxu0 %v12383_v3  ;;  %v12082_v5 = vcombine.high %v5346_v48, %v5350_v47  ;;  %v12175_v3 = vcombine.low %v5441_v58, %v5445_v45  ;;  %v12168_v56 = vcombine.high %v5433_v46, %v5437_v57  ;;  %v5525_v45 = vld [vmem:[%s19191_s3 + $0x6f0] sm:$0xff]  ;;  %v5426_v47 = vld [vmem:[%s19191_s3 + $0x3d8] sm:$0xff] }
 0x3c4   :  { %8873 = vmatprep.subr.bf16.mxu0 %v12376_v2  ;;  %v5557_v2 = vld [vmem:[%s19191_s3 + $0x7f0] sm:$0xff]  ;;  %v12167_v39 = vcombine.low %v5433_v46, %v5437_v57 }
 0x3c5   :  { %v5513_v46 = vld [vmem:[%s19191_s3 + $0x690] sm:$0xff] }
 0x3c6   :  { %8807 = vmatpush1.bf16.msra.mxu1 %v12215_v40  ;;  %v12074_v40 = vcombine.high %v5338_v43, %v5342_v6  ;;  %v5517_v57 = vld [vmem:[%s19191_s3 + $0x6b0] sm:$0xff] }
 0x3c7   :  { %8808 = vmatprep.subr.bf16.mxu1 %v12208_v20  ;;  %8874 = vmatpush2.bf16.msra.mxu0 %v12375_v31  ;;  %v5334_v20 = vld [vmem:[%s19191_s3 + $0xf8] sm:$0xff]  ;;  %v5545_v31 = vld [vmem:[%s19191_s3 + $0x790] sm:$0xff] }
 0x3c8   :  { %8875 = vmatprep.subr.bf16.mxu0 %v12368_v28  ;;  %v12073_v28 = vcombine.low %v5338_v43, %v5342_v6  ;;  %v12280_v50 = vcombine.high %v5545_v31, %v5549_v12  ;;  %v12279_v24 = vcombine.low %v5545_v31, %v5549_v12  ;;  %v5414_v31 = vld [vmem:[%s19191_s3 + $0x378] sm:$0xff] }
 0x3ca   :  { %8809 = vmatpush1.bf16.msra.mxu1 %v12207_v59  ;;  %v12066_v59 = vcombine.high %v5330_v22, %v5334_v20 }
 0x3cb   :  { %8810 = vmatprep.subr.bf16.mxu1 %v12200_v62  ;;  %8876 = vmatpush2.bf16.msra.mxu0 %v12367_v14  ;;  %v5326_v62 = vld [vmem:[%s19191_s3 + $0xb8] sm:$0xff]  ;;  %v5537_v14 = vld [vmem:[%s19191_s3 + $0x750] sm:$0xff] }
 0x3cc   :  { %8877 = vmatprep.subr.bf16.mxu0 %v12360_v9  ;;  %v12065_v9 = vcombine.low %v5330_v22, %v5334_v20  ;;  %v12272_v25 = vcombine.high %v5537_v14, %v5541_v60  ;;  %v12271_v29 = vcombine.low %v5537_v14, %v5541_v60  ;;  %v12247_v22 = vcombine.low %v5513_v46, %v5517_v57  ;;  %v5410_v20 = vld [vmem:[%s19191_s3 + $0x358] sm:$0xff] }
 0x3cd   :  { %v5406_v14 = vld [vmem:[%s19191_s3 + $0x338] sm:$0xff] }
 0x3ce   :  { %8811 = vmatpush1.bf16.msra.mxu1 %v12199_v42  ;;  %v12058_v42 = vcombine.high %v5322_v44, %v5326_v62 }
 0x3cf   :  { %8812 = vmatprep.subr.bf16.mxu1 %v12192_v54  ;;  %8878 = vmatpush2.bf16.msra.mxu0 %v12359_v34  ;;  %v5318_v54 = vld [vmem:[%s19191_s3 + $0x78] sm:$0xff]  ;;  %v5529_v34 = vld [vmem:[%s19191_s3 + $0x710] sm:$0xff] }
 0x3d0   :  { %8933 = vmatprep.subr.bf16.mxu0 %v12098_v18  ;;  %v12057_v18 = vcombine.low %v5322_v44, %v5326_v62  ;;  %v12264_v58 = vcombine.high %v5529_v34, %v5533_v8  ;;  %v12263_v48 = vcombine.low %v5529_v34, %v5533_v8  ;;  %v5402_v62 = vld [vmem:[%s19191_s3 + $0x318] sm:$0xff] }
 0x3d1   :  { %v5398_v34 = vld [vmem:[%s19191_s3 + $0x2f8] sm:$0xff] }
 0x3d2   :  { %8813 = vmatpush1.bf16.msra.mxu1 %v12191_v49  ;;  %8880 = vmatmul.mubr.bf16.vlgmr.msra.gmra.mxu0 %v19334_v7  ;;  %v12050_v49 = vcombine.high %v5314_v10, %v5318_v54 }
 0x3d3   :  { %8814 = vmatprep.subr.bf16.mxu1 %v12184_v63  ;;  %8934 = vmatpush1.bf16.msra.mxu0 %v12097_v26  ;;  %v5310_v63 = vld [vmem:[%s19191_s3 + $0x38] sm:$0xff]  ;;  %v5521_v26 = vld [vmem:[%s19191_s3 + $0x6d0] sm:$0xff] }
 0x3d4   :  { %8965 = vmatprep.mubr.bf16.mxu0 %v19335_v30  ;;  %8935 = vmatprep.subr.bf16.mxu0 %v12090_v32  ;;  %v5553_v30 = vld [vmem:[%s19191_s3 + $0x7d0] sm:$0xff]  ;;  %v12049_v32 = vcombine.low %v5314_v10, %v5318_v54  ;;  %v12041_v43 = vcombine.low %v5306_v1, %v5310_v63  ;;  %v5394_v54 = vld [vmem:[%s19191_s3 + $0x2d8] sm:$0xff] }
 0x3d5   :  { %v12288_v55 = vcombine.high %v5553_v30, %v5557_v2  ;;  %v12287_v21 = vcombine.low %v5553_v30, %v5557_v2  ;;  %v5505_v30 = vld [vmem:[%s19191_s3 + $0x650] sm:$0xff] }
 0x3d6   :  { %8815 = vmatpush1.bf16.msra.mxu1 %v12183_v19  ;;  %v12042_v19 = vcombine.high %v5306_v1, %v5310_v63  ;;  %v5509_v2 = vld [vmem:[%s19191_s3 + $0x670] sm:$0xff]  ;;  %v5386_v63 = vld [vmem:[%s19191_s3 + $0x298] sm:$0xff] }
 0x3d7   :  { %8816 = vmatprep.subr.bf16.mxu1 %v12176_v16  ;;  %8936 = vmatpush1.bf16.msra.mxu0 %v12089_v33  ;;  %v5430_v16 = vld [vmem:[%s19191_s3 + $0x3f8] sm:$0xff]  ;;  %v12256_v33 = vcombine.high %v5521_v26, %v5525_v45  ;;  %v12240_v12 = vcombine.high %v5505_v30, %v5509_v2  ;;  %v12239_v44 = vcombine.low %v5505_v30, %v5509_v2 }
 0x3d8   :  { %8937 = vmatprep.subr.bf16.mxu0 %v12082_v5  ;;  %v12162_v6 = vcombine.high %v5426_v47, %v5430_v16  ;;  %v12255_v5 = vcombine.low %v5521_v26, %v5525_v45  ;;  %v5390_v26 = vld [vmem:[%s19191_s3 + $0x2b8] sm:$0xff] }
 0x3d9   :  { %v12121_v30 = vcombine.low %v5386_v63, %v5390_v26 }
 0x3da   :  { %8817 = vmatpush1.bf16.msra.mxu1 %v12175_v3  ;;  %v5418_v3 = vld [vmem:[%s19191_s3 + $0x398] sm:$0xff] }
 0x3db   :  { %8818 = vmatprep.subr.bf16.mxu1 %v12168_v56  ;;  %8938 = vmatpush1.bf16.msra.mxu0 %v12081_v53  ;;  %v5422_v56 = vld [vmem:[%s19191_s3 + $0x3b8] sm:$0xff]  ;;  %v12248_v53 = vcombine.high %v5513_v46, %v5517_v57 }
 0x3dc   :  { %8939 = vmatprep.subr.bf16.mxu0 %v12074_v40  ;;  %v12161_v40 = vcombine.low %v5426_v47, %v5430_v16  ;;  %v5378_v47 = vld [vmem:[%s19191_s3 + $0x258] sm:$0xff] }
 0x3dd   :  { %v5382_v16 = vld [vmem:[%s19191_s3 + $0x278] sm:$0xff] }
 0x3de   :  { %8819 = vmatpush1.bf16.msra.mxu1 %v12167_v39  ;;  %v12154_v39 = vcombine.high %v5418_v3, %v5422_v56 }
 0x3df   :  { %8820 = vmatprep.subr.bf16.mxu1 %v12288_v55  ;;  %8940 = vmatpush1.bf16.msra.mxu0 %v12073_v28  ;;  %v5497_v55 = vld [vmem:[%s19191_s3 + $0x610] sm:$0xff] }
 0x3e0   :  { %8941 = vmatprep.subr.bf16.mxu0 %v12066_v59  ;;  %v5501_v28 = vld [vmem:[%s19191_s3 + $0x630] sm:$0xff]  ;;  %v12153_v59 = vcombine.low %v5418_v3, %v5422_v56 }
 0x3e1   :  { %v12232_v60 = vcombine.high %v5497_v55, %v5501_v28  ;;  %v12231_v10 = vcombine.low %v5497_v55, %v5501_v28  ;;  %v5721_v3 = vld [vmem:[%s19191_s3 + $0xd10] sm:$0xff] }
 0x3e2   :  { %8821 = vmatpush2.bf16.msra.mxu1 %v12287_v21  ;;  %v12146_v21 = vcombine.high %v5410_v20, %v5414_v31  ;;  %v5725_v56 = vld [vmem:[%s19191_s3 + $0xd30] sm:$0xff] }
 0x3e3   :  { %8822 = vmatprep.subr.bf16.mxu1 %v12280_v50  ;;  %8942 = vmatpush1.bf16.msra.mxu0 %v12065_v9  ;;  %v5745_v50 = vld [vmem:[%s19191_s3 + $0xdd0] sm:$0xff] }
 0x3e4   :  { %8943 = vmatprep.subr.bf16.mxu0 %v12058_v42  ;;  %v5749_v9 = vld [vmem:[%s19191_s3 + $0xdf0] sm:$0xff]  ;;  %v12145_v42 = vcombine.low %v5410_v20, %v5414_v31  ;;  %v12456_v20 = vcombine.high %v5721_v3, %v5725_v56 }
 0x3e5   :  { %v12480_v8 = vcombine.high %v5745_v50, %v5749_v9  ;;  %v12479_v1 = vcombine.low %v5745_v50, %v5749_v9  ;;  %v5713_v31 = vld [vmem:[%s19191_s3 + $0xcd0] sm:$0xff] }
 0x3e6   :  { %8823 = vmatpush2.bf16.msra.mxu1 %v12279_v24  ;;  %v12138_v24 = vcombine.high %v5402_v62, %v5406_v14  ;;  %v5717_v55 = vld [vmem:[%s19191_s3 + $0xcf0] sm:$0xff] }
 0x3e7   :  { %8824 = vmatprep.subr.bf16.mxu1 %v12272_v25  ;;  %8944 = vmatpush1.bf16.msra.mxu0 %v12057_v18  ;;  %v5737_v25 = vld [vmem:[%s19191_s3 + $0xd90] sm:$0xff]  ;;  %v12448_v50 = vcombine.high %v5713_v31, %v5717_v55 }
 0x3e8   :  { %8945 = vmatprep.subr.bf16.mxu0 %v12050_v49  ;;  %v5741_v18 = vld [vmem:[%s19191_s3 + $0xdb0] sm:$0xff]  ;;  %v12137_v49 = vcombine.low %v5402_v62, %v5406_v14  ;;  %v12455_v14 = vcombine.low %v5721_v3, %v5725_v56  ;;  %v5590_v3 = vld [vmem:[%s19191_s3 + $0x8f8] sm:$0xff] }
 0x3e9   :  { %v12472_v45 = vcombine.high %v5737_v25, %v5741_v18 }
 0x3ea   :  { %8825 = vmatpush2.bf16.msra.mxu1 %v12271_v29  ;;  %v12130_v29 = vcombine.high %v5394_v54, %v5398_v34 }
 0x3eb   :  { %8826 = vmatprep.subr.bf16.mxu1 %v12264_v58  ;;  %8946 = vmatpush1.bf16.msra.mxu0 %v12049_v32  ;;  %v17814_v58 = vpop.f32.mrf.mxu1  ;;  %v5729_v32 = vld [vmem:[%s19191_s3 + $0xd50] sm:$0xff] }
 0x3ec   :  { %8947 = vmatprep.subr.bf16.mxu0 %v12042_v19  ;;  %v5733_v19 = vld [vmem:[%s19191_s3 + $0xd70] sm:$0xff] }
 0x3ee   :  { %8827 = vmatpush2.bf16.msra.mxu1 %v12263_v48  ;;  %v12129_v48 = vcombine.low %v5394_v54, %v5398_v34  ;;  %v5610_v54 = vld [vmem:[%s19191_s3 + $0x998] sm:$0xff] }
 0x3ef   :  { %8828 = vmatprep.subr.bf16.mxu1 %v12256_v33  ;;  %8948 = vmatpush1.bf16.msra.mxu0 %v12041_v43  ;;  %v12122_v33 = vcombine.high %v5386_v63, %v5390_v26  ;;  %v12471_v43 = vcombine.low %v5737_v25, %v5741_v18  ;;  %v5614_v34 = vld [vmem:[%s19191_s3 + $0x9b8] sm:$0xff]  ;;  %v5697_v25 = vld [vmem:[%s19191_s3 + $0xc50] sm:$0xff] }
 0x3f0   :  { %8949 = vmatprep.subr.bf16.mxu0 %v12162_v6  ;;  %v5701_v18 = vld [vmem:[%s19191_s3 + $0xc70] sm:$0xff]  ;;  %v12346_v63 = vcombine.high %v5610_v54, %v5614_v34 }
 0x3f2   :  { %8829 = vmatpush2.bf16.msra.mxu1 %v12255_v5  ;;  %v12464_v5 = vcombine.high %v5729_v32, %v5733_v19 }
 0x3f3   :  { %8830 = vmatprep.subr.bf16.mxu1 %v12248_v53  ;;  %8950 = vmatpush2.bf16.msra.mxu0 %v12161_v40  ;;  %v5374_v53 = vld [vmem:[%s19191_s3 + $0x238] sm:$0xff]  ;;  %v12114_v40 = vcombine.high %v5378_v47, %v5382_v16 }
 0x3f4   :  { %8951 = vmatprep.subr.bf16.mxu0 %v12154_v39 }
 0x3f6   :  { %8831 = vmatpush2.bf16.msra.mxu1 %v12247_v22  ;;  %v12463_v22 = vcombine.low %v5729_v32, %v5733_v19  ;;  %v5689_v32 = vld [vmem:[%s19191_s3 + $0xc10] sm:$0xff] }
 0x3f7   :  { %8832 = vmatprep.subr.bf16.mxu1 %v12240_v12  ;;  %8952 = vmatpush2.bf16.msra.mxu0 %v12153_v59  ;;  %v12113_v59 = vcombine.low %v5378_v47, %v5382_v16  ;;  %v5693_v19 = vld [vmem:[%s19191_s3 + $0xc30] sm:$0xff]  ;;  %v5594_v47 = vld [vmem:[%s19191_s3 + $0x918] sm:$0xff] }
 0x3f8   :  { %8953 = vmatprep.subr.bf16.mxu0 %v12146_v21  ;;  %v5622_v21 = vld [vmem:[%s19191_s3 + $0x9f8] sm:$0xff] }
 0x3fa   :  { %8833 = vmatpush2.bf16.msra.mxu1 %v12239_v44 }
 0x3fb   :  { %8834 = vmatprep.subr.bf16.mxu1 %v12232_v60  ;;  %8954 = vmatpush2.bf16.msra.mxu0 %v12145_v42  ;;  %v5705_v60 = vld [vmem:[%s19191_s3 + $0xc90] sm:$0xff] }
 0x3fc   :  { %8955 = vmatprep.subr.bf16.mxu0 %v12138_v24  ;;  %v5709_v42 = vld [vmem:[%s19191_s3 + $0xcb0] sm:$0xff] }
 0x3fd   :  { %v12439_v26 = vcombine.low %v5705_v60, %v5709_v42 }
 0x3fe   :  { %8835 = vmatpush2.bf16.msra.mxu1 %v12231_v10  ;;  %v12447_v10 = vcombine.low %v5713_v31, %v5717_v55  ;;  %v5793_v55 = vld [vmem:[%s19191_s3 + $0xf50] sm:$0xff] }
 0x3ff   :  { %8890 = vmatprep.subr.bf16.mxu1 %v12480_v8  ;;  %8956 = vmatpush2.bf16.msra.mxu0 %v12137_v49  ;;  %v12440_v8 = vcombine.high %v5705_v60, %v5709_v42  ;;  %v5789_v60 = vld [vmem:[%s19191_s3 + $0xf30] sm:$0xff] }
 0x400   :  { %8957 = vmatprep.subr.bf16.mxu0 %v12130_v29  ;;  %v5602_v29 = vld [vmem:[%s19191_s3 + $0x958] sm:$0xff] }
 0x401   :  { %8837 = vmatmul.mubr.bf16.vlgmr.msra.gmra.mxu1 %v19336_v17  ;;  %v8580_v46 = vpop.f32.mrf.mxu1 }
 0x402   :  { %v8581_v57 = vadd.f32 %v8580_v46, %v17478_v52  ;;  %8891 = vmatpush1.bf16.msra.mxu1 %v12479_v1  ;;  %8922 = vmatprep.mubr.bf16.mxu1 %v17192_v36  ;;  %v5370_v52 = vld [vmem:[%s19191_s3 + $0x218] sm:$0xff]  ;;  %v12431_v46 = vcombine.low %v5697_v25, %v5701_v18 }
 0x403   :  { %v17831_v6 = vpop.f32.mrf.mxu1  ;;  %8892 = vmatprep.subr.bf16.mxu1 %v12472_v45  ;;  %8958 = vmatpush2.bf16.msra.mxu0 %v12129_v48  ;;  %v12106_v44 = vcombine.high %v5370_v52, %v5374_v53  ;;  %v12105_v9 = vcombine.low %v5370_v52, %v5374_v53  ;;  %v5606_v1 = vld [vmem:[%s19191_s3 + $0x978] sm:$0xff]  ;;  %v12432_v45 = vcombine.high %v5697_v25, %v5701_v18  ;;  %v5801_v52 = vld [vmem:[%s19191_s3 + $0xf90] sm:$0xff] }
 0x404   :  { %8959 = vmatprep.subr.bf16.mxu0 %v12122_v33  ;;  %v9105_v12 = vmax.f32 %v8581_v57, 0.0  ;;  %v12345_v48 = vcombine.low %v5610_v54, %v5614_v34  ;;  %v12338_v16 = vcombine.high %v5602_v29, %v5606_v1  ;;  %v12424_v33 = vcombine.high %v5689_v32, %v5693_v19  ;;  %v5809_v57 = vld [vmem:[%s19191_s3 + $0xfd0] sm:$0xff] }
 0x405   :  { %v8584_v2 = vpop.f32.mrf.mxu1  ;;  %v5805_v53 = vld [vmem:[%s19191_s3 + $0xfb0] sm:$0xff] }
 0x406   :  { %v8585_v39 = vadd.f32 %v8584_v2, %v17496_v27  ;;  %8893 = vmatpush1.bf16.msra.mxu1 %v12471_v43  ;;  %v5618_v27 = vld [vmem:[%s19191_s3 + $0x9d8] sm:$0xff]  ;;  %v12337_v43 = vcombine.low %v5602_v29, %v5606_v1  ;;  %v5777_v25 = vld [vmem:[%s19191_s3 + $0xed0] sm:$0xff] }
 0x407   :  { %8894 = vmatprep.subr.bf16.mxu1 %v12464_v5  ;;  %8960 = vmatpush2.bf16.msra.mxu0 %v12121_v30  ;;  %v12354_v24 = vcombine.high %v5618_v27, %v5622_v21  ;;  %v12353_v49 = vcombine.low %v5618_v27, %v5622_v21  ;;  %v5586_v5 = vld [vmem:[%s19191_s3 + $0x8d8] sm:$0xff]  ;;  %v12423_v30 = vcombine.low %v5689_v32, %v5693_v19  ;;  %v5773_v32 = vld [vmem:[%s19191_s3 + $0xeb0] sm:$0xff] }
 0x408   :  { %v9113_v28 = vmax.f32 %v8585_v39, 0.0  ;;  %8961 = vmatprep.subr.bf16.mxu0 %v12114_v40  ;;  %v5578_v39 = vld [vmem:[%s19191_s3 + $0x898] sm:$0xff] }
 0x409   :  { %v5570_v27 = vld [vmem:[%s19191_s3 + $0x858] sm:$0xff] }
 0x40a   :  { %v17858_v62 = vpack.c.bf16 %v9113_v28, %v9105_v12  ;;  %8895 = vmatpush1.bf16.msra.mxu1 %v12463_v22  ;;  %v5582_v22 = vld [vmem:[%s19191_s3 + $0x8b8] sm:$0xff]  ;;  %v5797_v12 = vld [vmem:[%s19191_s3 + $0xf70] sm:$0xff]  ;;  %v12536_v28 = vcombine.high %v5801_v52, %v5805_v53 }
 0x40b   :  { %8896 = vmatprep.subr.bf16.mxu1 %v12456_v20  ;;  %8962 = vmatpush2.bf16.msra.mxu0 %v12113_v59  ;;  %v12322_v20 = vcombine.high %v5586_v5, %v5590_v3  ;;  %v12321_v59 = vcombine.low %v5586_v5, %v5590_v3  ;;  %v5574_v21 = vld [vmem:[%s19191_s3 + $0x878] sm:$0xff]  ;;  %v12313_v42 = vcombine.low %v5578_v39, %v5582_v22 }
 0x40c   :  { %8963 = vmatprep.subr.bf16.mxu0 %v12106_v44  ;;  %v12314_v44 = vcombine.high %v5578_v39, %v5582_v22  ;;  %v12306_v54 = vcombine.high %v5570_v27, %v5574_v21  ;;  %v12527_v34 = vcombine.low %v5793_v55, %v5797_v12  ;;  %v5682_v29 = vld [vmem:[%s19191_s3 + $0xbd8] sm:$0xff] }
 0x40d   :  { %v5686_v1 = vld [vmem:[%s19191_s3 + $0xbf8] sm:$0xff] }
 0x40e   :  { %8897 = vmatpush1.bf16.msra.mxu1 %v12455_v14  ;;  %v12535_v14 = vcombine.low %v5801_v52, %v5805_v53  ;;  %v12417_v5 = vcombine.low %v5682_v29, %v5686_v1  ;;  %v5666_v3 = vld [vmem:[%s19191_s3 + $0xb58] sm:$0xff] }
 0x40f   :  { %8898 = vmatprep.subr.bf16.mxu1 %v12448_v50  ;;  %8964 = vmatpush2.bf16.msra.mxu0 %v12105_v9  ;;  %v5785_v50 = vld [vmem:[%s19191_s3 + $0xf10] sm:$0xff]  ;;  %v12528_v9 = vcombine.high %v5793_v55, %v5797_v12 }
 0x410   :  { %9019 = vmatprep.subr.bf16.mxu0 %v12354_v24  ;;  %v5562_v24 = vld [vmem:[%s19191_s3 + $0x818] sm:$0xff]  ;;  %v12520_v18 = vcombine.high %v5785_v50, %v5789_v60 }
 0x412   :  { %8899 = vmatpush1.bf16.msra.mxu1 %v12447_v10  ;;  %8966 = vmatmul.mubr.bf16.vlgmr.msra.gmra.mxu0 %v19337_v35  ;;  %v5598_v35 = vld [vmem:[%s19191_s3 + $0x938] sm:$0xff] }
 0x413   :  { %8900 = vmatprep.subr.bf16.mxu1 %v12440_v8  ;;  %9020 = vmatpush1.bf16.msra.mxu0 %v12353_v49  ;;  %v12330_v56 = vcombine.high %v5594_v47, %v5598_v35  ;;  %v12329_v40 = vcombine.low %v5594_v47, %v5598_v35  ;;  %v5566_v10 = vld [vmem:[%s19191_s3 + $0x838] sm:$0xff]  ;;  %v5781_v8 = vld [vmem:[%s19191_s3 + $0xef0] sm:$0xff]  ;;  %v12305_v49 = vcombine.low %v5570_v27, %v5574_v21 }
 0x414   :  { %9051 = vmatprep.mubr.bf16.mxu0 %v19338_v23  ;;  %9021 = vmatprep.subr.bf16.mxu0 %v12346_v63  ;;  %v5813_v23 = vld [vmem:[%s19191_s3 + $0xff0] sm:$0xff]  ;;  %v12298_v63 = vcombine.high %v5562_v24, %v5566_v10  ;;  %v12512_v19 = vcombine.high %v5777_v25, %v5781_v8  ;;  %v5674_v47 = vld [vmem:[%s19191_s3 + $0xb98] sm:$0xff] }
 0x415   :  { %v12544_v2 = vcombine.high %v5809_v57, %v5813_v23  ;;  %v12543_v31 = vcombine.low %v5809_v57, %v5813_v23  ;;  %v5678_v35 = vld [vmem:[%s19191_s3 + $0xbb8] sm:$0xff]  ;;  %v5765_v57 = vld [vmem:[%s19191_s3 + $0xe70] sm:$0xff]  ;;  %v17976_v23 = vpop.f32.mrf.mxu0 }
 0x416   :  { %8901 = vmatpush1.bf16.msra.mxu1 %v12439_v26  ;;  %v12519_v26 = vcombine.low %v5785_v50, %v5789_v60  ;;  %v12410_v52 = vcombine.high %v5674_v47, %v5678_v35  ;;  %v12409_v22 = vcombine.low %v5674_v47, %v5678_v35  ;;  %v5494_v27 = vld [vmem:[%s19191_s3 + $0x5f8] sm:$0xff]  ;;  %v19340_v35 = vld [vmem:[#allocation19_spill] sm:$0xff] }
 0x417   :  { %8902 = vmatprep.subr.bf16.mxu1 %v12432_v45  ;;  %9022 = vmatpush1.bf16.msra.mxu0 %v12345_v48  ;;  %v5769_v45 = vld [vmem:[%s19191_s3 + $0xe90] sm:$0xff]  ;;  %v12297_v48 = vcombine.low %v5562_v24, %v5566_v10  ;;  %v5654_v50 = vld [vmem:[%s19191_s3 + $0xaf8] sm:$0xff] }
 0x418   :  { %9023 = vmatprep.subr.bf16.mxu0 %v12338_v16  ;;  %v12418_v16 = vcombine.high %v5682_v29, %v5686_v1  ;;  %v12503_v53 = vcombine.low %v5769_v45, %v5773_v32  ;;  %v5482_v24 = vld [vmem:[%s19191_s3 + $0x598] sm:$0xff] }
 0x419   :  { %v5486_v10 = vld [vmem:[%s19191_s3 + $0x5b8] sm:$0xff] }
 0x41a   :  { %8903 = vmatpush1.bf16.msra.mxu1 %v12431_v46  ;;  %v12511_v46 = vcombine.low %v5777_v25, %v5781_v8  ;;  %v19339_v25 = vld [vmem:[#allocation23_spill] sm:$0xff]  ;;  %v5646_v29 = vld [vmem:[%s19191_s3 + $0xab8] sm:$0xff]  ;;  %v12218_v47 = vcombine.high %v5482_v24, %v5486_v10 }
 0x41b   :  { %8904 = vmatprep.subr.bf16.mxu1 %v12424_v33  ;;  %9024 = vmatpush1.bf16.msra.mxu0 %v12337_v43  ;;  %v5761_v33 = vld [vmem:[%s19191_s3 + $0xe50] sm:$0xff]  ;;  %v12504_v43 = vcombine.high %v5769_v45, %v5773_v32  ;;  %v5474_v45 = vld [vmem:[%s19191_s3 + $0x558] sm:$0xff] }
 0x41c   :  { %9025 = vmatprep.subr.bf16.mxu0 %v12330_v56  ;;  %v5670_v56 = vld [vmem:[%s19191_s3 + $0xb78] sm:$0xff]  ;;  %v12496_v39 = vcombine.high %v5761_v33, %v5765_v57 }
 0x41d   :  { %v12402_v12 = vcombine.high %v5666_v3, %v5670_v56  ;;  %v5478_v32 = vld [vmem:[%s19191_s3 + $0x578] sm:$0xff] }
 0x41e   :  { %8905 = vmatpush1.bf16.msra.mxu1 %v12423_v30  ;;  %v8623_v30 = vpop.f32.mrf.mxu0 }
 0x41f   :  { %8906 = vmatprep.subr.bf16.mxu1 %v12544_v2  ;;  %9026 = vmatpush1.bf16.msra.mxu0 %v12329_v40  ;;  %v5753_v2 = vld [vmem:[%s19191_s3 + $0xe10] sm:$0xff] }
 0x420   :  { %9027 = vmatprep.subr.bf16.mxu0 %v12322_v20  ;;  %v5757_v40 = vld [vmem:[%s19191_s3 + $0xe30] sm:$0xff]  ;;  %v5658_v20 = vld [vmem:[%s19191_s3 + $0xb18] sm:$0xff]  ;;  %v17996_v55 = vpop.f32.mrf.mxu0 }
 0x421   :  { %v12488_v21 = vcombine.high %v5753_v2, %v5757_v40 }
 0x422   :  { %8907 = vmatpush2.bf16.msra.mxu1 %v12543_v31  ;;  %v5662_v31 = vld [vmem:[%s19191_s3 + $0xb38] sm:$0xff]  ;;  %v8627_v60 = vpop.f32.mrf.mxu0 }
 0x423   :  { %8908 = vmatprep.subr.bf16.mxu1 %v12536_v28  ;;  %9028 = vmatpush1.bf16.msra.mxu0 %v12321_v59  ;;  %v12495_v28 = vcombine.low %v5761_v33, %v5765_v57  ;;  %v5490_v59 = vld [vmem:[%s19191_s3 + $0x5d8] sm:$0xff] }
 0x424   :  { %9029 = vmatprep.subr.bf16.mxu0 %v12314_v44  ;;  %v12401_v44 = vcombine.low %v5666_v3, %v5670_v56  ;;  %v18029_v1 = vpop.f32.mrf.mxu0  ;;  %v5634_v57 = vld [vmem:[%s19191_s3 + $0xa58] sm:$0xff] }
 0x425   :  { %v5638_v3 = vld [vmem:[%s19191_s3 + $0xa78] sm:$0xff] }
 0x426   :  { %8909 = vmatpush2.bf16.msra.mxu1 %v12535_v14  ;;  %v5650_v14 = vld [vmem:[%s19191_s3 + $0xad8] sm:$0xff] }
 0x427   :  { %8910 = vmatprep.subr.bf16.mxu1 %v12528_v9  ;;  %9030 = vmatpush1.bf16.msra.mxu0 %v12313_v42  ;;  %v12394_v9 = vcombine.high %v5658_v20, %v5662_v31  ;;  %v12487_v42 = vcombine.low %v5753_v2, %v5757_v40  ;;  %v12385_v33 = vcombine.low %v5650_v14, %v5654_v50 }
 0x428   :  { %9031 = vmatprep.subr.bf16.mxu0 %v12306_v54  ;;  %v12226_v54 = vcombine.high %v5490_v59, %v5494_v27 }
 0x42a   :  { %8911 = vmatpush2.bf16.msra.mxu1 %v12527_v34  ;;  %v18019_v34 = vld [vmem:[%s19192_s4] sm:$0xff] }
 0x42b   :  { %8912 = vmatprep.subr.bf16.mxu1 %v12520_v18  ;;  %9032 = vmatpush1.bf16.msra.mxu0 %v12305_v49  ;;  %v5828_v8 = vrot.slane %v18019_v34, %v19339_v25  ;;  %v12393_v18 = vcombine.low %v5658_v20, %v5662_v31  ;;  %v5642_v49 = vld [vmem:[%s19191_s3 + $0xa98] sm:$0xff] }
 0x42c   :  { %9033 = vmatprep.subr.bf16.mxu0 %v12298_v63  ;;  %v12386_v63 = vcombine.high %v5650_v14, %v5654_v50 }
 0x42d   :  { %v8628_v20 = vadd.f32 %v8627_v60, %v5828_v8 }
 0x42e   :  { %8913 = vmatpush2.bf16.msra.mxu1 %v12519_v26  ;;  %v12225_v26 = vcombine.low %v5490_v59, %v5494_v27 }
 0x42f   :  { %8914 = vmatprep.subr.bf16.mxu1 %v12512_v19  ;;  %9034 = vmatpush1.bf16.msra.mxu0 %v12297_v48  ;;  %v8586_v19 = vpop.f32.mrf.mxu1  ;;  %v8709_v48 = vpop.f32.mrf.mxu0 }
 0x430   :  { %9035 = vmatprep.subr.bf16.mxu0 %v12418_v16  ;;  %v5824_v16 = vrot.slane %v18019_v34, %v19340_v35 }
 0x431   :  { %v18051_v2 = vpop.f32.mrf.mxu0 }
 0x432   :  { %8915 = vmatpush2.bf16.msra.mxu1 %v12511_v46  ;;  %v8624_v46 = vadd.f32 %v8623_v30, %v5828_v8  ;;  %v8458_v56 = vadd.f32 %v17468_v11, %v5824_v16  ;;  %v12217_v30 = vcombine.low %v5482_v24, %v5486_v10  ;;  %v12377_v11 = vcombine.low %v5642_v49, %v5646_v29  ;;  %v5462_v24 = vld [vmem:[%s19191_s3 + $0x4f8] sm:$0xff] }
 0x433   :  { %8916 = vmatprep.subr.bf16.mxu1 %v12504_v43  ;;  %9036 = vmatpush2.bf16.msra.mxu0 %v12417_v5  ;;  %v12378_v5 = vcombine.high %v5642_v49, %v5646_v29  ;;  %v8713_v14 = vpop.f32.mrf.mxu0 }
 0x434   :  { %9037 = vmatprep.subr.bf16.mxu0 %v12410_v52  ;;  %v8501_v59 = vadd.f32 %v17814_v58, %v8458_v56  ;;  %v12369_v58 = vcombine.low %v5634_v57, %v5638_v3  ;;  %v5438_v56 = vld [vmem:[%s19191_s3 + $0x438] sm:$0xff] }
 0x436   :  { %8917 = vmatpush2.bf16.msra.mxu1 %v12503_v53  ;;  %v5466_v53 = vld [vmem:[%s19191_s3 + $0x518] sm:$0xff] }
 0x437   :  { %8918 = vmatprep.subr.bf16.mxu1 %v12496_v39  ;;  %9038 = vmatpush2.bf16.msra.mxu0 %v12409_v22  ;;  %v12210_v39 = vcombine.high %v5474_v45, %v5478_v32  ;;  %v8454_v22 = vadd.f32 %v17278_v51, %v5824_v16  ;;  %v5626_v51 = vld [vmem:[%s19191_s3 + $0xa18] sm:$0xff] }
 0x438   :  { %9039 = vmatprep.subr.bf16.mxu0 %v12402_v12  ;;  %v5446_v16 = vld [vmem:[%s19191_s3 + $0x478] sm:$0xff] }
 0x439   :  { %v8497_v60 = vadd.f32 %v17282_v4, %v8454_v22  ;;  %v5558_v22 = vld [vmem:[%s19191_s3 + $0x7f8] sm:$0xff] }
 0x43a   :  { %8919 = vmatpush2.bf16.msra.mxu1 %v12495_v28  ;;  %v12370_v28 = vcombine.high %v5634_v57, %v5638_v3  ;;  %v5434_v3 = vld [vmem:[%s19191_s3 + $0x418] sm:$0xff] }
 0x43b   :  { %8920 = vmatprep.subr.bf16.mxu1 %v12488_v21  ;;  %9040 = vmatpush2.bf16.msra.mxu0 %v12401_v44  ;;  %v12209_v21 = vcombine.low %v5474_v45, %v5478_v32  ;;  %v5630_v44 = vld [vmem:[%s19191_s3 + $0xa38] sm:$0xff]  ;;  %v8540_v8 = vadd.f32 %v17487_v37, %v8497_v60  ;;  %v12935_v37 = vld [vmem:[%s19193_s5 + $0xe4] ss:$16 sps:$4 sm:$0xff]  }
 0x43c   :  { %9041 = vmatprep.subr.bf16.mxu0 %v12394_v9  ;;  %v8544_v9 = vadd.f32 %v17976_v23, %v8501_v59  ;;  %v12361_v29 = vcombine.low %v5626_v51, %v5630_v44  ;;  %v5550_v59 = vld [vmem:[%s19191_s3 + $0x7b8] sm:$0xff]  ;;  %v12950_v60 = vld [vmem:[%s19193_s5 + $0x44] ss:$16 sps:$4 sm:$0xff]  }
 0x43d   :  { %v8583_v49 = vadd.f32 %v17831_v6, %v8540_v8  ;;  %v12953_v8 = vld [vmem:[%s19193_s5 + $0x24] ss:$16 sps:$4 sm:$0xff]  }
 0x43e   :  { %8921 = vmatpush2.bf16.msra.mxu1 %v12487_v42  ;;  %v5458_v42 = vld [vmem:[%s19191_s3 + $0x4d8] sm:$0xff] }
 0x43f   :  { %8976 = vmatprep.subr.bf16.mxu1 %v12226_v54  ;;  %9042 = vmatpush2.bf16.msra.mxu0 %v12393_v18  ;;  %v12362_v54 = vcombine.high %v5626_v51, %v5630_v44  ;;  %v8587_v18 = vadd.f32 %v8586_v19, %v8544_v9  ;;  %v12194_v23 = vcombine.high %v5458_v42, %v5462_v24  ;;  %v9106_v19 = vmax.f32 %v8583_v49, 0.0  ;;  %v12945_v44 = vld [vmem:[%s19193_s5 + $0x60] ss:$16 sps:$4 sm:$0xff]   ;;  %v5522_v49 = vld [vmem:[%s19191_s3 + $0x6d8] sm:$0xff] }
 0x440   :  { %9043 = vmatprep.subr.bf16.mxu0 %v12386_v63  ;;  %v5450_v63 = vld [vmem:[%s19191_s3 + $0x498] sm:$0xff]  ;;  %v12193_v32 = vcombine.low %v5458_v42, %v5462_v24  ;;  %v12948_v42 = vld [vmem:[%s19193_s5 + $0x40] ss:$16 sps:$4 sm:$0xff]  }
 0x441   :  { %v8666_v43 = vpop.f32.mrf.mxu1  ;;  %8923 = vmatmul.mubr.bf16.vlgmr.msra.gmra.mxu1 %v17184_v41  ;;  %v9114_v45 = vmax.f32 %v8587_v18, 0.0  ;;  %v5530_v24 = vld [vmem:[%s19191_s3 + $0x718] sm:$0xff] }
 0x442   :  { %v8667_v52 = vadd.f32 %v8666_v43, %v8624_v46  ;;  %8977 = vmatpush1.bf16.msra.mxu1 %v12225_v26  ;;  %9008 = vmatprep.mubr.bf16.mxu1 %v19332_v61  ;;  %v5470_v61 = vld [vmem:[%s19191_s3 + $0x538] sm:$0xff]  ;;  %v12938_v46 = vld [vmem:[%s19193_s5 + $0xc4] ss:$16 sps:$4 sm:$0xff]  }
 0x443   :  { %v18053_v40 = vpop.f32.mrf.mxu1  ;;  %8978 = vmatprep.subr.bf16.mxu1 %v12218_v47  ;;  %9044 = vmatpush2.bf16.msra.mxu0 %v12385_v33  ;;  %v12202_v50 = vcombine.high %v5466_v53, %v5470_v61  ;;  %v12201_v4 = vcombine.low %v5466_v53, %v5470_v61  ;;  %v5454_v26 = vld [vmem:[%s19191_s3 + $0x4b8] sm:$0xff]  ;;  %v18101_v33 = vpack.c.bf16 %v9114_v45, %v9106_v19  ;;  %v12939_v53 = vld [vmem:[%s19193_s5 + $0xa0] ss:$16 sps:$4 sm:$0xff]   ;;  %v12959_v19 = vld [vmem:[%s19193_s5 + $0x1e4] ss:$16 sps:$4 sm:$0xff]  }
 0x444   :  { %v18059_v31 = vadd.f32 %v8709_v48, %v8667_v52  ;;  %9045 = vmatprep.subr.bf16.mxu0 %v12378_v5  ;;  %v12186_v6 = vcombine.high %v5450_v63, %v5454_v26  ;;  %v12933_v48 = vld [vmem:[%s19193_s5 + $0xe0] ss:$16 sps:$4 sm:$0xff]   ;;  %v5442_v47 = vld [vmem:[%s19191_s3 + $0x458] sm:$0xff]  ;;  %v12185_v57 = vcombine.low %v5450_v63, %v5454_v26  ;;  %v12956_v63 = vld [vmem:[%s19193_s5 + $0x4] ss:$16 sps:$4 sm:$0xff]  }
 0x445   :  { %v8670_v12 = vpop.f32.mrf.mxu1  ;;  %v12178_v43 = vcombine.high %v5442_v47, %v5446_v16  ;;  %v12936_v5 = vld [vmem:[%s19193_s5 + $0xc0] ss:$16 sps:$4 sm:$0xff]   ;;  %v12177_v52 = vcombine.low %v5442_v47, %v5446_v16 }
 0x446   :  { %v8671_v27 = vadd.f32 %v8670_v12, %v8628_v20  ;;  %8979 = vmatpush1.bf16.msra.mxu1 %v12217_v30  ;;  %v12170_v30 = vcombine.high %v5434_v3, %v5438_v56  ;;  %v12944_v20 = vld [vmem:[%s19193_s5 + $0x84] ss:$16 sps:$4 sm:$0xff]   ;;  %v12942_v12 = vld [vmem:[%s19193_s5 + $0x80] ss:$16 sps:$4 sm:$0xff]  }
 0x447   :  { %8980 = vmatprep.subr.bf16.mxu1 %v12210_v39  ;;  %9046 = vmatpush2.bf16.msra.mxu0 %v12377_v11  ;;  %v5554_v39 = vld [vmem:[%s19191_s3 + $0x7d8] sm:$0xff]  ;;  %v12169_v11 = vcombine.low %v5434_v3, %v5438_v56  ;;  %v12954_v45 = vld [vmem:[%s19193_s5] ss:$16 sps:$4 sm:$0xff]  }
 0x448   :  { %v18076_v10 = vadd.f32 %v8713_v14, %v8671_v27  ;;  %9047 = vmatprep.subr.bf16.mxu0 %v12370_v28  ;;  %v12290_v61 = vcombine.high %v5554_v39, %v5558_v22  ;;  %v5546_v28 = vld [vmem:[%s19191_s3 + $0x798] sm:$0xff]  ;;  %v12947_v27 = vld [vmem:[%s19193_s5 + $0x64] ss:$16 sps:$4 sm:$0xff]   ;;  %v12957_v16 = vld [vmem:[%s19193_s5 + $0x1e0] ss:$16 sps:$4 sm:$0xff]  }
 0x449   :  { %v12282_v51 = vcombine.high %v5546_v28, %v5550_v59  ;;  %v5538_v14 = vld [vmem:[%s19191_s3 + $0x758] sm:$0xff]  ;;  %v12281_v9 = vcombine.low %v5546_v28, %v5550_v59  ;;  %v12960_v56 = vld [vmem:[%s19193_s5 + $0x1c0] ss:$16 sps:$4 sm:$0xff]  }
 0x44a   :  { %8981 = vmatpush1.bf16.msra.mxu1 %v12209_v21  ;;  %v12289_v21 = vcombine.low %v5554_v39, %v5558_v22  ;;  %v12963_v22 = vld [vmem:[%s19193_s5 + $0x1a0] ss:$16 sps:$4 sm:$0xff]  }
 0x44b   :  { %8982 = vmatprep.subr.bf16.mxu1 %v12202_v50  ;;  %9048 = vmatpush2.bf16.msra.mxu0 %v12369_v58  ;;  %v5542_v50 = vld [vmem:[%s19191_s3 + $0x778] sm:$0xff]  ;;  %v12966_v59 = vld [vmem:[%s19193_s5 + $0x180] ss:$16 sps:$4 sm:$0xff]  }
 0x44c   :  { %9049 = vmatprep.subr.bf16.mxu0 %v12362_v54  ;;  %v12274_v58 = vcombine.high %v5538_v14, %v5542_v50  ;;  %v5534_v54 = vld [vmem:[%s19191_s3 + $0x738] sm:$0xff]  ;;  %v12273_v18 = vcombine.low %v5538_v14, %v5542_v50  ;;  %v18237_v14 = vpop.f32.mrf.mxu1 }
 0x44d   :  { %v12265_v26 = vcombine.low %v5530_v24, %v5534_v54 }
 0x44e   :  { %8983 = vmatpush1.bf16.msra.mxu1 %v12201_v4  ;;  %v12266_v4 = vcombine.high %v5530_v24, %v5534_v54  ;;  %v12974_v24 = vld [vmem:[%s19193_s5 + $0x144] ss:$16 sps:$4 sm:$0xff]  }
 0x44f   :  { %8984 = vmatprep.subr.bf16.mxu1 %v12194_v23  ;;  %9050 = vmatpush2.bf16.msra.mxu0 %v12361_v29  ;;  %v12951_v23 = vld [vmem:[%s19193_s5 + $0x20] ss:$16 sps:$4 sm:$0xff]   ;;  %v5526_v29 = vld [vmem:[%s19191_s3 + $0x6f8] sm:$0xff] }
 0x450   :  { %10687 = vmatprep.subr.bf16.mxu0 %v12935_v37  ;;  %v12258_v37 = vcombine.high %v5522_v49, %v5526_v29 }
 0x452   :  { %8985 = vmatpush1.bf16.msra.mxu1 %v12193_v32  ;;  %9052 = vmatmul.mubr.bf16.vlgmr.msra.gmra.mxu0 %v19334_v7  ;;  %v12941_v7 = vld [vmem:[%s19193_s5 + $0xa4] ss:$16 sps:$4 sm:$0xff]   ;;  %v5514_v32 = vld [vmem:[%s19191_s3 + $0x698] sm:$0xff] }
 0x453   :  { %8986 = vmatprep.subr.bf16.mxu1 %v12186_v6  ;;  %10688 = vmatpush1.bf16.msra.mxu0 %v12933_v48  ;;  %v5518_v6 = vld [vmem:[%s19191_s3 + $0x6b8] sm:$0xff]  ;;  %v12257_v48 = vcombine.low %v5522_v49, %v5526_v29 }
 0x454   :  { %10719 = vmatprep.mubr.bf16.mxu0 %v18101_v33  ;;  %10689 = vmatprep.subr.bf16.mxu0 %v12938_v46  ;;  %v12250_v47 = vcombine.high %v5514_v32, %v5518_v6  ;;  %v5506_v46 = vld [vmem:[%s19191_s3 + $0x658] sm:$0xff] }
 0x456   :  { %8987 = vmatpush1.bf16.msra.mxu1 %v12185_v57  ;;  %v5510_v57 = vld [vmem:[%s19191_s3 + $0x678] sm:$0xff] }
 0x457   :  { %8988 = vmatprep.subr.bf16.mxu1 %v12178_v43  ;;  %10690 = vmatpush1.bf16.msra.mxu0 %v12936_v5  ;;  %v12962_v43 = vld [vmem:[%s19193_s5 + $0x1c4] ss:$16 sps:$4 sm:$0xff]   ;;  %v12249_v5 = vcombine.low %v5514_v32, %v5518_v6  ;;  %v12242_v3 = vcombine.high %v5506_v46, %v5510_v57  ;;  %v12975_v32 = vld [vmem:[%s19193_s5 + $0x120] ss:$16 sps:$4 sm:$0xff]   ;;  %v5714_v6 = vld [vmem:[%s19191_s3 + $0xcd8] sm:$0xff] }
 0x458   :  { %10691 = vmatprep.subr.bf16.mxu0 %v12941_v7  ;;  %v5498_v7 = vld [vmem:[%s19191_s3 + $0x618] sm:$0xff] }
 0x45a   :  { %8989 = vmatpush1.bf16.msra.mxu1 %v12177_v52  ;;  %v5502_v52 = vld [vmem:[%s19191_s3 + $0x638] sm:$0xff] }
 0x45b   :  { %8990 = vmatprep.subr.bf16.mxu1 %v12170_v30  ;;  %10692 = vmatpush1.bf16.msra.mxu0 %v12939_v53  ;;  %v12965_v30 = vld [vmem:[%s19193_s5 + $0x1a4] ss:$16 sps:$4 sm:$0xff]   ;;  %v12241_v53 = vcombine.low %v5506_v46, %v5510_v57  ;;  %v12234_v39 = vcombine.high %v5498_v7, %v5502_v52  ;;  %v12978_v46 = vld [vmem:[%s19193_s5 + $0x100] ss:$16 sps:$4 sm:$0xff]   ;;  %v5706_v57 = vld [vmem:[%s19191_s3 + $0xc98] sm:$0xff] }
 0x45c   :  { %10693 = vmatprep.subr.bf16.mxu0 %v12944_v20  ;;  %v5746_v20 = vld [vmem:[%s19191_s3 + $0xdd8] sm:$0xff] }
 0x45e   :  { %8991 = vmatpush1.bf16.msra.mxu1 %v12169_v11  ;;  %v5750_v11 = vld [vmem:[%s19191_s3 + $0xdf8] sm:$0xff] }
 0x45f   :  { %8992 = vmatprep.subr.bf16.mxu1 %v12290_v61  ;;  %10694 = vmatpush1.bf16.msra.mxu0 %v12942_v12  ;;  %v12968_v61 = vld [vmem:[%s19193_s5 + $0x184] ss:$16 sps:$4 sm:$0xff]   ;;  %v12233_v12 = vcombine.low %v5498_v7, %v5502_v52  ;;  %v12482_v28 = vcombine.high %v5746_v20, %v5750_v11  ;;  %v5698_v7 = vld [vmem:[%s19191_s3 + $0xc58] sm:$0xff] }
 0x460   :  { %10695 = vmatprep.subr.bf16.mxu0 %v12947_v27  ;;  %v5738_v27 = vld [vmem:[%s19191_s3 + $0xd98] sm:$0xff] }
 0x461   :  { %v5702_v52 = vld [vmem:[%s19191_s3 + $0xc78] sm:$0xff] }
 0x462   :  { %8993 = vmatpush2.bf16.msra.mxu1 %v12289_v21  ;;  %v5742_v21 = vld [vmem:[%s19191_s3 + $0xdb8] sm:$0xff] }
 0x463   :  { %8994 = vmatprep.subr.bf16.mxu1 %v12282_v51  ;;  %10696 = vmatpush1.bf16.msra.mxu0 %v12945_v44  ;;  %v12971_v51 = vld [vmem:[%s19193_s5 + $0x164] ss:$16 sps:$4 sm:$0xff]   ;;  %v12481_v44 = vcombine.low %v5746_v20, %v5750_v11  ;;  %v12474_v50 = vcombine.high %v5738_v27, %v5742_v21  ;;  %v5690_v20 = vld [vmem:[%s19191_s3 + $0xc18] sm:$0xff] }
 0x464   :  { %10697 = vmatprep.subr.bf16.mxu0 %v12950_v60  ;;  %v12969_v60 = vld [vmem:[%s19193_s5 + $0x160] ss:$16 sps:$4 sm:$0xff]   ;;  %v5694_v11 = vld [vmem:[%s19191_s3 + $0xc38] sm:$0xff] }
 0x466   :  { %8995 = vmatpush2.bf16.msra.mxu1 %v12281_v9  ;;  %v5730_v9 = vld [vmem:[%s19191_s3 + $0xd58] sm:$0xff] }
 0x467   :  { %8996 = vmatprep.subr.bf16.mxu1 %v12274_v58  ;;  %10698 = vmatpush1.bf16.msra.mxu0 %v12948_v42  ;;  %v5734_v58 = vld [vmem:[%s19191_s3 + $0xd78] sm:$0xff] }
 0x468   :  { %10699 = vmatprep.subr.bf16.mxu0 %v12953_v8  ;;  %v12473_v8 = vcombine.low %v5738_v27, %v5742_v21  ;;  %v5810_v27 = vld [vmem:[%s19191_s3 + $0xfd8] sm:$0xff] }
 0x469   :  { %v5814_v21 = vld [vmem:[%s19191_s3 + $0xff8] sm:$0xff] }
 0x46a   :  { %8997 = vmatpush2.bf16.msra.mxu1 %v12273_v18 }
 0x46b   :  { %8998 = vmatprep.subr.bf16.mxu1 %v12266_v4  ;;  %10700 = vmatpush1.bf16.msra.mxu0 %v12951_v23  ;;  %v12466_v4 = vcombine.high %v5730_v9, %v5734_v58  ;;  %v5722_v23 = vld [vmem:[%s19191_s3 + $0xd18] sm:$0xff] }
 0x46c   :  { %10701 = vmatprep.subr.bf16.mxu0 %v12956_v63  ;;  %v12465_v63 = vcombine.low %v5730_v9, %v5734_v58  ;;  %v5802_v9 = vld [vmem:[%s19191_s3 + $0xf98] sm:$0xff] }
 0x46d   :  { %v5806_v58 = vld [vmem:[%s19191_s3 + $0xfb8] sm:$0xff] }
 0x46e   :  { %8999 = vmatpush2.bf16.msra.mxu1 %v12265_v26 }
 0x46f   :  { %9000 = vmatprep.subr.bf16.mxu1 %v12258_v37  ;;  %10702 = vmatpush1.bf16.msra.mxu0 %v12954_v45 }
 0x470   :  { %10703 = vmatprep.subr.bf16.mxu0 %v12959_v19  ;;  %v5718_v19 = vld [vmem:[%s19191_s3 + $0xcf8] sm:$0xff] }
 0x472   :  { %9001 = vmatpush2.bf16.msra.mxu1 %v12257_v48 }
 0x473   :  { %9002 = vmatprep.subr.bf16.mxu1 %v12250_v47  ;;  %10704 = vmatpush2.bf16.msra.mxu0 %v12957_v16  ;;  %v12450_v16 = vcombine.high %v5714_v6, %v5718_v19 }
 0x474   :  { %10705 = vmatprep.subr.bf16.mxu0 %v12962_v43  ;;  %v5710_v43 = vld [vmem:[%s19191_s3 + $0xcb8] sm:$0xff] }
 0x476   :  { %9003 = vmatpush2.bf16.msra.mxu1 %v12249_v5  ;;  %v12995_v5 = vld [vmem:[%s19193_s5 + $0x4e4] ss:$16 sps:$4 sm:$0xff]  }
 0x477   :  { %9004 = vmatprep.subr.bf16.mxu1 %v12242_v3  ;;  %10706 = vmatpush2.bf16.msra.mxu0 %v12960_v56  ;;  %v12449_v3 = vcombine.low %v5714_v6, %v5718_v19  ;;  %v12442_v56 = vcombine.high %v5706_v57, %v5710_v43  ;;  %v5778_v6 = vld [vmem:[%s19191_s3 + $0xed8] sm:$0xff] }
 0x478   :  { %10707 = vmatprep.subr.bf16.mxu0 %v12965_v30  ;;  %v12993_v30 = vld [vmem:[%s19193_s5 + $0x4e0] ss:$16 sps:$4 sm:$0xff]   ;;  %v5782_v19 = vld [vmem:[%s19191_s3 + $0xef8] sm:$0xff] }
 0x47a   :  { %9005 = vmatpush2.bf16.msra.mxu1 %v12241_v53  ;;  %v13001_v53 = vld [vmem:[%s19193_s5 + $0x4c4] ss:$16 sps:$4 sm:$0xff]  }
 0x47b   :  { %9006 = vmatprep.subr.bf16.mxu1 %v12234_v39  ;;  %10708 = vmatpush2.bf16.msra.mxu0 %v12963_v22  ;;  %v12441_v39 = vcombine.low %v5706_v57, %v5710_v43  ;;  %v12434_v22 = vcombine.high %v5698_v7, %v5702_v52  ;;  %v5770_v57 = vld [vmem:[%s19191_s3 + $0xe98] sm:$0xff] }
 0x47c   :  { %10709 = vmatprep.subr.bf16.mxu0 %v12968_v61  ;;  %v12999_v61 = vld [vmem:[%s19193_s5 + $0x4c0] ss:$16 sps:$4 sm:$0xff]   ;;  %v5774_v43 = vld [vmem:[%s19191_s3 + $0xeb8] sm:$0xff] }
 0x47e   :  { %9007 = vmatpush2.bf16.msra.mxu1 %v12233_v12  ;;  %v13007_v12 = vld [vmem:[%s19193_s5 + $0x4a4] ss:$16 sps:$4 sm:$0xff]  }
 0x47f   :  { %9062 = vmatprep.subr.bf16.mxu1 %v12482_v28  ;;  %10710 = vmatpush2.bf16.msra.mxu0 %v12966_v59  ;;  %v12433_v28 = vcombine.low %v5698_v7, %v5702_v52  ;;  %v12426_v59 = vcombine.high %v5690_v20, %v5694_v11  ;;  %v12513_v52 = vcombine.low %v5778_v6, %v5782_v19 }
 0x480   :  { %10711 = vmatprep.subr.bf16.mxu0 %v12971_v51  ;;  %v13005_v51 = vld [vmem:[%s19193_s5 + $0x4a0] ss:$16 sps:$4 sm:$0xff]  }
 0x481   :  { %v8752_v42 = vpop.f32.mrf.mxu1  ;;  %9009 = vmatmul.mubr.bf16.vlgmr.msra.gmra.mxu1 %v19336_v17  ;;  %v12972_v17 = vld [vmem:[%s19193_s5 + $0x140] ss:$16 sps:$4 sm:$0xff]  }
 0x482   :  { %v8753_v54 = vadd.f32 %v8752_v42, %v18059_v31  ;;  %9063 = vmatpush1.bf16.msra.mxu1 %v12481_v44  ;;  %9094 = vmatprep.mubr.bf16.mxu1 %v17192_v36  ;;  %v5726_v31 = vld [vmem:[%s19191_s3 + $0xd38] sm:$0xff]  ;;  %v12977_v36 = vld [vmem:[%s19193_s5 + $0x124] ss:$16 sps:$4 sm:$0xff]   ;;  %v13011_v42 = vld [vmem:[%s19193_s5 + $0x480] ss:$16 sps:$4 sm:$0xff]  }
 0x483   :  { %v18254_v18 = vpop.f32.mrf.mxu1  ;;  %9064 = vmatprep.subr.bf16.mxu1 %v12474_v50  ;;  %10712 = vmatpush2.bf16.msra.mxu0 %v12969_v60  ;;  %v12458_v26 = vcombine.high %v5722_v23, %v5726_v31  ;;  %v12457_v47 = vcombine.low %v5722_v23, %v5726_v31  ;;  %v13013_v44 = vld [vmem:[%s19193_s5 + $0x484] ss:$16 sps:$4 sm:$0xff]   ;;  %v12425_v50 = vcombine.low %v5690_v20, %v5694_v11  ;;  %v13017_v23 = vld [vmem:[%s19193_s5 + $0x460] ss:$16 sps:$4 sm:$0xff]  }
 0x484   :  { %10713 = vmatprep.subr.bf16.mxu0 %v12974_v24  ;;  %v9107_v37 = vmax.f32 %v8753_v54, 0.0  ;;  %v12546_v60 = vcombine.high %v5810_v27, %v5814_v21  ;;  %v13019_v24 = vld [vmem:[%s19193_s5 + $0x464] ss:$16 sps:$4 sm:$0xff]   ;;  %v12545_v54 = vcombine.low %v5810_v27, %v5814_v21  ;;  %v13041_v20 = vld [vmem:[%s19193_s5 + $0x5e0] ss:$16 sps:$4 sm:$0xff]   ;;  %v5754_v27 = vld [vmem:[%s19191_s3 + $0xe18] sm:$0xff] }
 0x485   :  { %v8756_v49 = vpop.f32.mrf.mxu1  ;;  %v13025_v31 = vld [vmem:[%s19193_s5 + $0x444] ss:$16 sps:$4 sm:$0xff]   ;;  %v5758_v21 = vld [vmem:[%s19191_s3 + $0xe38] sm:$0xff] }
 0x486   :  { %v8757_v29 = vadd.f32 %v8756_v49, %v18076_v10  ;;  %9065 = vmatpush1.bf16.msra.mxu1 %v12473_v8  ;;  %v12980_v10 = vld [vmem:[%s19193_s5 + $0x104] ss:$16 sps:$4 sm:$0xff]   ;;  %v12538_v8 = vcombine.high %v5802_v9, %v5806_v58  ;;  %v12537_v49 = vcombine.low %v5802_v9, %v5806_v58 }
 0x487   :  { %9066 = vmatprep.subr.bf16.mxu1 %v12466_v4  ;;  %10714 = vmatpush2.bf16.msra.mxu0 %v12972_v17  ;;  %v5794_v4 = vld [vmem:[%s19191_s3 + $0xf58] sm:$0xff]  ;;  %v13049_v11 = vld [vmem:[%s19193_s5 + $0x5c4] ss:$16 sps:$4 sm:$0xff]  }
 0x488   :  { %v9115_v45 = vmax.f32 %v8757_v29, 0.0  ;;  %10715 = vmatprep.subr.bf16.mxu0 %v12977_v36  ;;  %v5798_v17 = vld [vmem:[%s19191_s3 + $0xf78] sm:$0xff] }
 0x489   :  { %v12530_v36 = vcombine.high %v5794_v4, %v5798_v17  ;;  %v5786_v29 = vld [vmem:[%s19191_s3 + $0xf18] sm:$0xff] }
 0x48a   :  { %v18281_v48 = vpack.c.bf16 %v9115_v45, %v9107_v37  ;;  %9067 = vmatpush1.bf16.msra.mxu1 %v12465_v63  ;;  %v5790_v63 = vld [vmem:[%s19191_s3 + $0xf38] sm:$0xff]  ;;  %v13031_v37 = vld [vmem:[%s19193_s5 + $0x424] ss:$16 sps:$4 sm:$0xff]   ;;  %v12529_v45 = vcombine.low %v5794_v4, %v5798_v17  ;;  %v13059_v17 = vld [vmem:[%s19193_s5 + $0x580] ss:$16 sps:$4 sm:$0xff]  }
 0x48b   :  { %9068 = vmatprep.subr.bf16.mxu1 %v12458_v26  ;;  %10716 = vmatpush2.bf16.msra.mxu0 %v12975_v32  ;;  %v13023_v26 = vld [vmem:[%s19193_s5 + $0x440] ss:$16 sps:$4 sm:$0xff]   ;;  %v12522_v32 = vcombine.high %v5786_v29, %v5790_v63 }
 0x48c   :  { %10717 = vmatprep.subr.bf16.mxu0 %v12980_v10  ;;  %v13029_v10 = vld [vmem:[%s19193_s5 + $0x420] ss:$16 sps:$4 sm:$0xff]  }
 0x48e   :  { %9069 = vmatpush1.bf16.msra.mxu1 %v12457_v47  ;;  %v13037_v47 = vld [vmem:[%s19193_s5 + $0x404] ss:$16 sps:$4 sm:$0xff]  }
 0x48f   :  { %9070 = vmatprep.subr.bf16.mxu1 %v12450_v16  ;;  %10718 = vmatpush2.bf16.msra.mxu0 %v12978_v46  ;;  %v12521_v16 = vcombine.low %v5786_v29, %v5790_v63  ;;  %v12514_v46 = vcombine.high %v5778_v6, %v5782_v19  ;;  %v13065_v29 = vld [vmem:[%s19193_s5 + $0x560] ss:$16 sps:$4 sm:$0xff]   ;;  %v13070_v63 = vld [vmem:[%s19193_s5 + $0x544] ss:$16 sps:$4 sm:$0xff]  }
 0x490   :  { %10773 = vmatprep.subr.bf16.mxu0 %v12995_v5  ;;  %v13035_v5 = vld [vmem:[%s19193_s5 + $0x400] ss:$16 sps:$4 sm:$0xff]   ;;  %v12992_v6 = vld [vmem:[%s19193_s5 + $0x284] ss:$16 sps:$4 sm:$0xff]  }
 0x491   :  { %v13071_v19 = vld [vmem:[%s19193_s5 + $0x520] ss:$16 sps:$4 sm:$0xff]  }
 0x492   :  { %9071 = vmatpush1.bf16.msra.mxu1 %v12449_v3  ;;  %10720 = vmatmul.mubr.bf16.vlgmr.msra.gmra.mxu0 %v17858_v62  ;;  %v13043_v3 = vld [vmem:[%s19193_s5 + $0x5e4] ss:$16 sps:$4 sm:$0xff]  }
 0x493   :  { %9072 = vmatprep.subr.bf16.mxu1 %v12442_v56  ;;  %10774 = vmatpush1.bf16.msra.mxu0 %v12993_v30  ;;  %v19341_v56 = vld [vmem:[#allocation3_spill] sm:$0xff]  ;;  %v12506_v30 = vcombine.high %v5770_v57, %v5774_v43 }
 0x494   :  { %10775 = vmatprep.subr.bf16.mxu0 %v13001_v53  ;;  %v5832_v7 = vrot.slane %v18019_v34, %v19341_v56 }
 0x496   :  { %9073 = vmatpush1.bf16.msra.mxu1 %v12441_v39  ;;  %v8630_v53 = vadd.f32 %v18029_v1, %v5832_v7  ;;  %v5762_v39 = vld [vmem:[%s19191_s3 + $0xe58] sm:$0xff]  ;;  %v8626_v1 = vadd.f32 %v17996_v55, %v5832_v7  ;;  %v13047_v55 = vld [vmem:[%s19193_s5 + $0x5c0] ss:$16 sps:$4 sm:$0xff]   ;;  %v13010_v7 = vld [vmem:[%s19193_s5 + $0x224] ss:$16 sps:$4 sm:$0xff]  }
 0x497   :  { %9074 = vmatprep.subr.bf16.mxu1 %v12434_v22  ;;  %10776 = vmatpush1.bf16.msra.mxu0 %v12999_v61  ;;  %v5766_v22 = vld [vmem:[%s19191_s3 + $0xe78] sm:$0xff] }
 0x498   :  { %10777 = vmatprep.subr.bf16.mxu0 %v13007_v12  ;;  %v8673_v61 = vadd.f32 %v18237_v14, %v8630_v53  ;;  %v12505_v12 = vcombine.low %v5770_v57, %v5774_v43  ;;  %v8715_v14 = vpop.f32.mrf.mxu0  ;;  %v13079_v57 = vld [vmem:[%s19193_s5 + $0xec] ss:$16 sps:$4 sm:$0xff]   ;;  %v12996_v43 = vld [vmem:[%s19193_s5 + $0x260] ss:$16 sps:$4 sm:$0xff]  }
 0x499   :  { %v13014_v53 = vld [vmem:[%s19193_s5 + $0x200] ss:$16 sps:$4 sm:$0xff]  }
 0x49a   :  { %9075 = vmatpush1.bf16.msra.mxu1 %v12433_v28  ;;  %v12498_v28 = vcombine.high %v5762_v39, %v5766_v22 }
 0x49b   :  { %9076 = vmatprep.subr.bf16.mxu1 %v12426_v59  ;;  %10778 = vmatpush1.bf16.msra.mxu0 %v13005_v51  ;;  %v8669_v59 = vadd.f32 %v18053_v40, %v8626_v1  ;;  %v8758_v51 = vpop.f32.mrf.mxu1  ;;  %v13055_v40 = vld [vmem:[%s19193_s5 + $0x5a4] ss:$16 sps:$4 sm:$0xff]  }
 0x49c   :  { %10779 = vmatprep.subr.bf16.mxu0 %v13013_v44  ;;  %v8716_v44 = vadd.f32 %v8715_v14, %v8673_v61  ;;  %v13034_v1 = vld [vmem:[%s19193_s5 + $0x3a4] ss:$16 sps:$4 sm:$0xff]   ;;  %v13032_v61 = vld [vmem:[%s19193_s5 + $0x3a0] ss:$16 sps:$4 sm:$0xff]  }
 0x49d   :  { %v8712_v9 = vadd.f32 %v18051_v2, %v8669_v59  ;;  %v12983_v2 = vld [vmem:[%s19193_s5 + $0x2e4] ss:$16 sps:$4 sm:$0xff]   ;;  %v8795_v59 = vpop.f32.mrf.mxu0 }
 0x49e   :  { %9077 = vmatpush1.bf16.msra.mxu1 %v12425_v50  ;;  %v12497_v50 = vcombine.low %v5762_v39, %v5766_v22  ;;  %v8759_v58 = vadd.f32 %v8758_v51, %v8716_v44  ;;  %v13022_v39 = vld [vmem:[%s19193_s5 + $0x3e4] ss:$16 sps:$4 sm:$0xff]   ;;  %v13020_v22 = vld [vmem:[%s19193_s5 + $0x3e0] ss:$16 sps:$4 sm:$0xff]  }
 0x49f   :  { %9078 = vmatprep.subr.bf16.mxu1 %v12546_v60  ;;  %10780 = vmatpush1.bf16.msra.mxu0 %v13011_v42  ;;  %v12490_v60 = vcombine.high %v5754_v27, %v5758_v21  ;;  %v13053_v42 = vld [vmem:[%s19193_s5 + $0x5a0] ss:$16 sps:$4 sm:$0xff]   ;;  %v13052_v14 = vld [vmem:[%s19193_s5 + $0x344] ss:$16 sps:$4 sm:$0xff]  }
 0x4a0   :  { %10781 = vmatprep.subr.bf16.mxu0 %v13019_v24  ;;  %v13061_v24 = vld [vmem:[%s19193_s5 + $0x584] ss:$16 sps:$4 sm:$0xff]   ;;  %v9116_v4 = vmax.f32 %v8759_v58, 0.0  ;;  %v13050_v51 = vld [vmem:[%s19193_s5 + $0x340] ss:$16 sps:$4 sm:$0xff]  }
 0x4a2   :  { %9079 = vmatpush2.bf16.msra.mxu1 %v12545_v54  ;;  %v8755_v54 = vadd.f32 %v18254_v18, %v8712_v9  ;;  %v12981_v18 = vld [vmem:[%s19193_s5 + $0x2e0] ss:$16 sps:$4 sm:$0xff]  }
 0x4a3   :  { %9080 = vmatprep.subr.bf16.mxu1 %v12538_v8  ;;  %10782 = vmatpush1.bf16.msra.mxu0 %v13017_v23  ;;  %v12489_v8 = vcombine.low %v5754_v27, %v5758_v21  ;;  %v13067_v23 = vld [vmem:[%s19193_s5 + $0x564] ss:$16 sps:$4 sm:$0xff]   ;;  %v13044_v21 = vld [vmem:[%s19193_s5 + $0x360] ss:$16 sps:$4 sm:$0xff]  }
 0x4a4   :  { %10783 = vmatprep.subr.bf16.mxu0 %v13025_v31  ;;  %v9108_v31 = vmax.f32 %v8755_v54, 0.0  ;;  %v13046_v27 = vld [vmem:[%s19193_s5 + $0x364] ss:$16 sps:$4 sm:$0xff]   ;;  %v19342_v54 = vsub.s32 5, %v19277_v0 }
 0x4a6   :  { %9081 = vmatpush2.bf16.msra.mxu1 %v12537_v49  ;;  %v12986_v49 = vld [vmem:[%s19193_s5 + $0x2c4] ss:$16 sps:$4 sm:$0xff]  }
 0x4a7   :  { %9082 = vmatprep.subr.bf16.mxu1 %v12530_v36  ;;  %10784 = vmatpush1.bf16.msra.mxu0 %v13023_v26  ;;  %v18445_v36 = vpack.c.bf16 %v9116_v4, %v9108_v31  ;;  %v12984_v26 = vld [vmem:[%s19193_s5 + $0x2c0] ss:$16 sps:$4 sm:$0xff]   ;;  %v19343_v4 = vsub.s32 4, %v19277_v0  ;;  %v13127_v31 = vld [vmem:[%s19193_s5 + $0x6e4] ss:$16 sps:$4 sm:$0xff]  }
 0x4a8   :  { %10785 = vmatprep.subr.bf16.mxu0 %v13031_v37  ;;  %v12989_v37 = vld [vmem:[%s19193_s5 + $0x2a4] ss:$16 sps:$4 sm:$0xff]  }
 0x4aa   :  { %9083 = vmatpush2.bf16.msra.mxu1 %v12529_v45  ;;  %v13073_v45 = vld [vmem:[%s19193_s5 + $0x524] ss:$16 sps:$4 sm:$0xff]  }
 0x4ab   :  { %9084 = vmatprep.subr.bf16.mxu1 %v12522_v32  ;;  %10786 = vmatpush1.bf16.msra.mxu0 %v13029_v10  ;;  %v12987_v32 = vld [vmem:[%s19193_s5 + $0x2a0] ss:$16 sps:$4 sm:$0xff]   ;;  %v13076_v10 = vld [vmem:[%s19193_s5 + $0x504] ss:$16 sps:$4 sm:$0xff]  }
 0x4ac   :  { %10787 = vmatprep.subr.bf16.mxu0 %v13037_v47  ;;  %v12990_v47 = vld [vmem:[%s19193_s5 + $0x280] ss:$16 sps:$4 sm:$0xff]  }
 0x4ae   :  { %9085 = vmatpush2.bf16.msra.mxu1 %v12521_v16  ;;  %v12998_v16 = vld [vmem:[%s19193_s5 + $0x264] ss:$16 sps:$4 sm:$0xff]  }
 0x4af   :  { %9086 = vmatprep.subr.bf16.mxu1 %v12514_v46  ;;  %10788 = vmatpush1.bf16.msra.mxu0 %v13035_v5  ;;  %v13074_v46 = vld [vmem:[%s19193_s5 + $0x500] ss:$16 sps:$4 sm:$0xff]   ;;  %v13004_v5 = vld [vmem:[%s19193_s5 + $0x244] ss:$16 sps:$4 sm:$0xff]  }
 0x4b0   :  { %10789 = vmatprep.subr.bf16.mxu0 %v13043_v3  ;;  %v13002_v3 = vld [vmem:[%s19193_s5 + $0x240] ss:$16 sps:$4 sm:$0xff]  }
 0x4b2   :  { %9087 = vmatpush2.bf16.msra.mxu1 %v12513_v52  ;;  %v13008_v52 = vld [vmem:[%s19193_s5 + $0x220] ss:$16 sps:$4 sm:$0xff]  }
 0x4b3   :  { %9088 = vmatprep.subr.bf16.mxu1 %v12506_v30  ;;  %10790 = vmatpush2.bf16.msra.mxu0 %v13041_v20  ;;  %v13016_v30 = vld [vmem:[%s19193_s5 + $0x204] ss:$16 sps:$4 sm:$0xff]  }
 0x4b4   :  { %10791 = vmatprep.subr.bf16.mxu0 %v13049_v11  ;;  %v13028_v20 = vld [vmem:[%s19193_s5 + $0x3c4] ss:$16 sps:$4 sm:$0xff]   ;;  %v13026_v11 = vld [vmem:[%s19193_s5 + $0x3c0] ss:$16 sps:$4 sm:$0xff]  }
 0x4b6   :  { %9089 = vmatpush2.bf16.msra.mxu1 %v12505_v12  ;;  %v13040_v12 = vld [vmem:[%s19193_s5 + $0x384] ss:$16 sps:$4 sm:$0xff]  }
 0x4b7   :  { %9090 = vmatprep.subr.bf16.mxu1 %v12498_v28  ;;  %10792 = vmatpush2.bf16.msra.mxu0 %v13047_v55  ;;  %v13038_v28 = vld [vmem:[%s19193_s5 + $0x380] ss:$16 sps:$4 sm:$0xff]   ;;  %v8797_v55 = vpop.f32.mrf.mxu0 }
 0x4b8   :  { %10793 = vmatprep.subr.bf16.mxu0 %v13055_v40 }
 0x4b9   :  { %v8799_v40 = vpop.f32.mrf.mxu0 }
 0x4ba   :  { %9091 = vmatpush2.bf16.msra.mxu1 %v12497_v50  ;;  %v13058_v50 = vld [vmem:[%s19193_s5 + $0x324] ss:$16 sps:$4 sm:$0xff]  }
 0x4bb   :  { %9092 = vmatprep.subr.bf16.mxu1 %v12490_v60  ;;  %10794 = vmatpush2.bf16.msra.mxu0 %v13053_v42  ;;  %v13056_v60 = vld [vmem:[%s19193_s5 + $0x320] ss:$16 sps:$4 sm:$0xff]   ;;  %v8801_v9 = vpop.f32.mrf.mxu0  ;;  %v13064_v42 = vld [vmem:[%s19193_s5 + $0x304] ss:$16 sps:$4 sm:$0xff]  }
 0x4bc   :  { %10795 = vmatprep.subr.bf16.mxu0 %v13061_v24 }
 0x4bd   :  { %v8881_v24 = vpop.f32.mrf.mxu0 }
 0x4be   :  { %9093 = vmatpush2.bf16.msra.mxu1 %v12489_v8  ;;  %v5840_v8 = vrot.slane %v18019_v34, %v19342_v54  ;;  %v13088_v54 = vld [vmem:[%s19193_s5 + $0x8c] ss:$16 sps:$4 sm:$0xff]  }
 0x4bf   :  { %10730 = vmatprep.subr.bf16.mxu1 %v12983_v2  ;;  %10796 = vmatpush2.bf16.msra.mxu0 %v13059_v17  ;;  %v13062_v2 = vld [vmem:[%s19193_s5 + $0x300] ss:$16 sps:$4 sm:$0xff]   ;;  %v5836_v17 = vrot.slane %v18019_v34, %v19343_v4  ;;  %v13133_v34 = vld [vmem:[%s19193_s5 + $0x6c4] ss:$16 sps:$4 sm:$0xff]   ;;  %v13086_v4 = vld [vmem:[%s19193_s5 + $0x88] ss:$16 sps:$4 sm:$0xff]  }
 0x4c0   :  { %10797 = vmatprep.subr.bf16.mxu0 %v13067_v23 }
 0x4c1   :  { %9095 = vmatmul.mubr.bf16.vlgmr.msra.gmra.mxu1 %v17184_v41  ;;  %v13068_v41 = vld [vmem:[%s19193_s5 + $0x540] ss:$16 sps:$4 sm:$0xff]   ;;  %v8838_v44 = vpop.f32.mrf.mxu1 }
 0x4c2   :  { %10731 = vmatpush1.bf16.msra.mxu1 %v12981_v18  ;;  %10762 = vmatprep.mubr.bf16.mxu1 %v18445_v36  ;;  %v8883_v18 = vpop.f32.mrf.mxu0 }
 0x4c3   :  { %10732 = vmatprep.subr.bf16.mxu1 %v12986_v49  ;;  %10798 = vmatpush2.bf16.msra.mxu0 %v13065_v29  ;;  %v8840_v58 = vpop.f32.mrf.mxu1  ;;  %v8798_v49 = vadd.f32 %v8797_v55, %v5840_v8  ;;  %v8800_v29 = vadd.f32 %v8799_v40, %v5836_v17  ;;  %v13151_v55 = vld [vmem:[%s19193_s5 + $0x664] ss:$16 sps:$4 sm:$0xff]  }
 0x4c4   :  { %10799 = vmatprep.subr.bf16.mxu0 %v13070_v63  ;;  %v13125_v63 = vld [vmem:[%s19193_s5 + $0x6e0] ss:$16 sps:$4 sm:$0xff]  }
 0x4c5   :  { %v8842_v23 = vpop.f32.mrf.mxu1 }
 0x4c6   :  { %10733 = vmatpush1.bf16.msra.mxu1 %v12984_v26  ;;  %v8796_v26 = vadd.f32 %v8795_v59, %v5836_v17  ;;  %v13091_v17 = vld [vmem:[%s19193_s5 + $0x6c] ss:$16 sps:$4 sm:$0xff]  }
 0x4c7   :  { %10734 = vmatprep.subr.bf16.mxu1 %v12989_v37  ;;  %10800 = vmatpush2.bf16.msra.mxu0 %v13068_v41  ;;  %v8844_v37 = vpop.f32.mrf.mxu1  ;;  %v8802_v41 = vadd.f32 %v8801_v9, %v5840_v8  ;;  %v13080_v9 = vld [vmem:[%s19193_s5 + $0xc8] ss:$16 sps:$4 sm:$0xff]   ;;  %v13161_v8 = vld [vmem:[%s19193_s5 + $0x620] ss:$16 sps:$4 sm:$0xff]  }
 0x4c8   :  { %10801 = vmatprep.subr.bf16.mxu0 %v13073_v45  ;;  %v8841_v45 = vadd.f32 %v8840_v58, %v8798_v49  ;;  %v13085_v58 = vld [vmem:[%s19193_s5 + $0xac] ss:$16 sps:$4 sm:$0xff]  }
 0x4c9   :  { %v13094_v49 = vld [vmem:[%s19193_s5 + $0x4c] ss:$16 sps:$4 sm:$0xff]  }
 0x4ca   :  { %10735 = vmatpush1.bf16.msra.mxu1 %v12987_v32  ;;  %v8843_v32 = vadd.f32 %v8842_v23, %v8800_v29  ;;  %v13167_v23 = vld [vmem:[%s19193_s5 + $0x600] ss:$16 sps:$4 sm:$0xff]  }
 0x4cb   :  { %10736 = vmatprep.subr.bf16.mxu1 %v12992_v6  ;;  %10802 = vmatpush2.bf16.msra.mxu0 %v13071_v19  ;;  %v8885_v6 = vpop.f32.mrf.mxu0  ;;  %v8839_v19 = vadd.f32 %v8838_v44, %v8796_v26  ;;  %v13082_v44 = vld [vmem:[%s19193_s5 + $0xcc] ss:$16 sps:$4 sm:$0xff]   ;;  %v13173_v29 = vld [vmem:[%s19193_s5 + $0x7e0] ss:$16 sps:$4 sm:$0xff]   ;;  %v13092_v26 = vld [vmem:[%s19193_s5 + $0x48] ss:$16 sps:$4 sm:$0xff]  }
 0x4cc   :  { %10803 = vmatprep.subr.bf16.mxu0 %v13076_v10 }
 0x4ce   :  { %10737 = vmatpush1.bf16.msra.mxu1 %v12990_v47  ;;  %v8845_v47 = vadd.f32 %v8844_v37, %v8802_v41  ;;  %v13097_v37 = vld [vmem:[%s19193_s5 + $0x2c] ss:$16 sps:$4 sm:$0xff]   ;;  %v13187_v41 = vld [vmem:[%s19193_s5 + $0x7a4] ss:$16 sps:$4 sm:$0xff]  }
 0x4cf   :  { %10738 = vmatprep.subr.bf16.mxu1 %v12998_v16  ;;  %10804 = vmatpush2.bf16.msra.mxu0 %v13074_v46  ;;  %v13131_v16 = vld [vmem:[%s19193_s5 + $0x6c0] ss:$16 sps:$4 sm:$0xff]  }
 0x4d0   :  { %10859 = vmatprep.subr.bf16.mxu0 %v13079_v57  ;;  %v13139_v57 = vld [vmem:[%s19193_s5 + $0x6a4] ss:$16 sps:$4 sm:$0xff]  }
 0x4d2   :  { %10739 = vmatpush1.bf16.msra.mxu1 %v12996_v43  ;;  %v8884_v43 = vadd.f32 %v8883_v18, %v8841_v45  ;;  %v13089_v18 = vld [vmem:[%s19193_s5 + $0x68] ss:$16 sps:$4 sm:$0xff]  }
 0x4d3   :  { %10740 = vmatprep.subr.bf16.mxu1 %v13004_v5  ;;  %v8886_v5 = vadd.f32 %v8885_v6, %v8843_v32  ;;  %v13095_v45 = vld [vmem:[%s19193_s5 + $0x28] ss:$16 sps:$4 sm:$0xff]   ;;  %v13100_v32 = vld [vmem:[%s19193_s5 + $0xc] ss:$16 sps:$4 sm:$0xff]   ;;  %v13185_v6 = vld [vmem:[%s19193_s5 + $0x7a0] ss:$16 sps:$4 sm:$0xff]  }
 0x4d6   :  { %10741 = vmatpush1.bf16.msra.mxu1 %v13002_v3  ;;  %v8887_v3 = vpop.f32.mrf.mxu0 }
 0x4d7   :  { %10742 = vmatprep.subr.bf16.mxu1 %v13010_v7  ;;  %v8882_v7 = vadd.f32 %v8881_v24, %v8839_v19  ;;  %v13163_v24 = vld [vmem:[%s19193_s5 + $0x624] ss:$16 sps:$4 sm:$0xff]  }
 0x4d8   :  { %v13193_v19 = vld [vmem:[%s19193_s5 + $0x784] ss:$16 sps:$4 sm:$0xff]  }
 0x4da   :  { %10743 = vmatpush1.bf16.msra.mxu1 %v13008_v52 }
 0x4db   :  { %10744 = vmatprep.subr.bf16.mxu1 %v13016_v30 }
 0x4de   :  { %10745 = vmatpush1.bf16.msra.mxu1 %v13014_v53 }
 0x4df   :  { %10746 = vmatprep.subr.bf16.mxu1 %v13022_v39  ;;  %v8888_v39 = vadd.f32 %v8887_v3, %v8845_v47  ;;  %v13103_v47 = vld [vmem:[%s19193_s5 + $0x1ec] ss:$16 sps:$4 sm:$0xff]   ;;  %v13205_v3 = vld [vmem:[%s19193_s5 + $0x744] ss:$16 sps:$4 sm:$0xff]  }
 0x4e2   :  { %10747 = vmatpush2.bf16.msra.mxu1 %v13020_v22  ;;  %v13137_v22 = vld [vmem:[%s19193_s5 + $0x6a0] ss:$16 sps:$4 sm:$0xff]  }
 0x4e3   :  { %10748 = vmatprep.subr.bf16.mxu1 %v13028_v20 }
 0x4e6   :  { %10749 = vmatpush2.bf16.msra.mxu1 %v13026_v11 }
 0x4e7   :  { %10750 = vmatprep.subr.bf16.mxu1 %v13034_v1  ;;  %v13145_v1 = vld [vmem:[%s19193_s5 + $0x684] ss:$16 sps:$4 sm:$0xff]  }
 0x4ea   :  { %10751 = vmatpush2.bf16.msra.mxu1 %v13032_v61 }
 0x4eb   :  { %10752 = vmatprep.subr.bf16.mxu1 %v13040_v12 }
 0x4ee   :  { %10753 = vmatpush2.bf16.msra.mxu1 %v13038_v28 }
 0x4ef   :  { %10754 = vmatprep.subr.bf16.mxu1 %v13046_v27  ;;  %v13143_v27 = vld [vmem:[%s19193_s5 + $0x680] ss:$16 sps:$4 sm:$0xff]  }
 0x4f2   :  { %10755 = vmatpush2.bf16.msra.mxu1 %v13044_v21 }
 0x4f3   :  { %10756 = vmatprep.subr.bf16.mxu1 %v13052_v14 }
 0x4f6   :  { %10757 = vmatpush2.bf16.msra.mxu1 %v13050_v51  ;;  %v13077_v51 = vld [vmem:[%s19193_s5 + $0xe8] ss:$16 sps:$4 sm:$0xff]  }
 0x4f7   :  { %10758 = vmatprep.subr.bf16.mxu1 %v13058_v50  ;;  %v13149_v50 = vld [vmem:[%s19193_s5 + $0x660] ss:$16 sps:$4 sm:$0xff]  }
 0x4fa   :  { %10759 = vmatpush2.bf16.msra.mxu1 %v13056_v60  ;;  %v13157_v60 = vld [vmem:[%s19193_s5 + $0x644] ss:$16 sps:$4 sm:$0xff]  }
 0x4fb   :  { %10760 = vmatprep.subr.bf16.mxu1 %v13064_v42  ;;  %v13155_v42 = vld [vmem:[%s19193_s5 + $0x640] ss:$16 sps:$4 sm:$0xff]  }
 0x4fe   :  { %10761 = vmatpush2.bf16.msra.mxu1 %v13062_v2  ;;  %v13169_v2 = vld [vmem:[%s19193_s5 + $0x604] ss:$16 sps:$4 sm:$0xff]  }
 0x4ff   :  { %10816 = vmatprep.subr.bf16.mxu1 %v13127_v31  ;;  %v13175_v31 = vld [vmem:[%s19193_s5 + $0x7e4] ss:$16 sps:$4 sm:$0xff]  }
 0x501   :  { %v8924_v10 = vpop.f32.mrf.mxu1  ;;  %10763 = vmatmul.mubr.bf16.vlgmr.msra.gmra.mxu1 %v18281_v48 }
 0x502   :  { %10817 = vmatpush1.bf16.msra.mxu1 %v13125_v63  ;;  %v8925_v20 = vadd.f32 %v8924_v10, %v8882_v7  ;;  %v13181_v63 = vld [vmem:[%s19193_s5 + $0x7c4] ss:$16 sps:$4 sm:$0xff]   ;;  %v13098_v10 = vld [vmem:[%s19193_s5 + $0x8] ss:$16 sps:$4 sm:$0xff]  }
 0x503   :  { %v8926_v46 = vpop.f32.mrf.mxu1  ;;  %10818 = vmatprep.subr.bf16.mxu1 %v13133_v34  ;;  %v13179_v34 = vld [vmem:[%s19193_s5 + $0x7c0] ss:$16 sps:$4 sm:$0xff]   ;;  %v13104_v7 = vld [vmem:[%s19193_s5 + $0x1c8] ss:$16 sps:$4 sm:$0xff]  }
 0x504   :  { %v8927_v30 = vadd.f32 %v8926_v46, %v8884_v43  ;;  %v9109_v21 = vmax.f32 %v8925_v20, 0.0  ;;  %v13199_v46 = vld [vmem:[%s19193_s5 + $0x764] ss:$16 sps:$4 sm:$0xff]   ;;  %v13106_v43 = vld [vmem:[%s19193_s5 + $0x1cc] ss:$16 sps:$4 sm:$0xff]  }
 0x505   :  { %v8928_v52 = vpop.f32.mrf.mxu1  ;;  %v13209_v20 = vld [vmem:[%s19193_s5 + $0x720] ss:$16 sps:$4 sm:$0xff]  }
 0x506   :  { %v8929_v53 = vadd.f32 %v8928_v52, %v8886_v5  ;;  %10819 = vmatpush1.bf16.msra.mxu1 %v13131_v16  ;;  %v9110_v28 = vmax.f32 %v8927_v30, 0.0  ;;  %v13191_v16 = vld [vmem:[%s19193_s5 + $0x780] ss:$16 sps:$4 sm:$0xff]   ;;  %v13109_v52 = vld [vmem:[%s19193_s5 + $0x1ac] ss:$16 sps:$4 sm:$0xff]  }
 0x507   :  { %v8930_v11 = vpop.f32.mrf.mxu1  ;;  %10820 = vmatprep.subr.bf16.mxu1 %v13139_v57  ;;  %v13101_v57 = vld [vmem:[%s19193_s5 + $0x1e8] ss:$16 sps:$4 sm:$0xff]   ;;  %v13197_v5 = vld [vmem:[%s19193_s5 + $0x760] ss:$16 sps:$4 sm:$0xff]  }
 0x508   :  { %v8931_v61 = vadd.f32 %v8930_v11, %v8888_v39  ;;  %v9117_v12 = vmax.f32 %v8929_v53, 0.0  ;;  %v13203_v30 = vld [vmem:[%s19193_s5 + $0x740] ss:$16 sps:$4 sm:$0xff]   ;;  %v13211_v53 = vld [vmem:[%s19193_s5 + $0x724] ss:$16 sps:$4 sm:$0xff]  }
 0x509   :  { %v13107_v39 = vld [vmem:[%s19193_s5 + $0x1a8] ss:$16 sps:$4 sm:$0xff]   ;;  %v13217_v11 = vld [vmem:[%s19193_s5 + $0x704] ss:$16 sps:$4 sm:$0xff]  }
 0x50a   :  { %v9118_v59 = vmax.f32 %v8931_v61, 0.0  ;;  %10821 = vmatpush1.bf16.msra.mxu1 %v13137_v22  ;;  %v18599_v40 = vpack.c.bf16 %v9117_v12, %v9109_v21  ;;  %v13112_v22 = vld [vmem:[%s19193_s5 + $0x18c] ss:$16 sps:$4 sm:$0xff]   ;;  %v13215_v12 = vld [vmem:[%s19193_s5 + $0x700] ss:$16 sps:$4 sm:$0xff]  }
 0x50b   :  { %10822 = vmatprep.subr.bf16.mxu1 %v13145_v1  ;;  %v13110_v1 = vld [vmem:[%s19193_s5 + $0x188] ss:$16 sps:$4 sm:$0xff]   ;;  %v13115_v61 = vld [vmem:[%s19193_s5 + $0x16c] ss:$16 sps:$4 sm:$0xff]  }
 0x50c   :  { %v18594_v14 = vpack.c.bf16 %v9118_v59, %v9110_v28  ;;  %v13223_v28 = vld [vmem:[%s19193_s5 + $0x2ec] ss:$16 sps:$4 sm:$0xff]   ;;  %v13113_v59 = vld [vmem:[%s19193_s5 + $0x168] ss:$16 sps:$4 sm:$0xff]  }
 0x50d   :  { %v13116_v21 = vld [vmem:[%s19193_s5 + $0x148] ss:$16 sps:$4 sm:$0xff]  }
 0x50e   :  { %10805 = vmatprep.mubr.bf16.mxu0 %v18594_v14  ;;  %10823 = vmatpush1.bf16.msra.mxu1 %v13143_v27  ;;  %v13118_v27 = vld [vmem:[%s19193_s5 + $0x14c] ss:$16 sps:$4 sm:$0xff]  }
 0x50f   :  { %10806 = vmatmul.mubr.bf16.vlgmr.msra.gmra.mxu0 %v18599_v40  ;;  %10824 = vmatprep.subr.bf16.mxu1 %v13151_v55  ;;  %v13121_v55 = vld [vmem:[%s19193_s5 + $0x12c] ss:$16 sps:$4 sm:$0xff]  }
 0x510   :  { %10860 = vmatpush1.bf16.msra.mxu0 %v13077_v51  ;;  %10891 = vmatprep.mubr.bf16.mxu0 %v18101_v33  ;;  %v13083_v33 = vld [vmem:[%s19193_s5 + $0xa8] ss:$16 sps:$4 sm:$0xff]  }
 0x511   :  { %10861 = vmatprep.subr.bf16.mxu0 %v13082_v44  ;;  %v13119_v51 = vld [vmem:[%s19193_s5 + $0x128] ss:$16 sps:$4 sm:$0xff]   ;;  %v13124_v44 = vld [vmem:[%s19193_s5 + $0x10c] ss:$16 sps:$4 sm:$0xff]  }
 0x512   :  { %10825 = vmatpush1.bf16.msra.mxu1 %v13149_v50  ;;  %v13122_v50 = vld [vmem:[%s19193_s5 + $0x108] ss:$16 sps:$4 sm:$0xff]  }
 0x513   :  { %10826 = vmatprep.subr.bf16.mxu1 %v13157_v60  ;;  %v13130_v60 = vld [vmem:[%s19193_s5 + $0x4ec] ss:$16 sps:$4 sm:$0xff]  }
 0x514   :  { %10862 = vmatpush1.bf16.msra.mxu0 %v13080_v9  ;;  %v13128_v9 = vld [vmem:[%s19193_s5 + $0x4e8] ss:$16 sps:$4 sm:$0xff]  }
 0x515   :  { %10863 = vmatprep.subr.bf16.mxu0 %v13085_v58  ;;  %v13136_v58 = vld [vmem:[%s19193_s5 + $0x4cc] ss:$16 sps:$4 sm:$0xff]  }
 0x516   :  { %10827 = vmatpush1.bf16.msra.mxu1 %v13155_v42  ;;  %v13134_v42 = vld [vmem:[%s19193_s5 + $0x4c8] ss:$16 sps:$4 sm:$0xff]  }
 0x517   :  { %10828 = vmatprep.subr.bf16.mxu1 %v13163_v24  ;;  %v13142_v24 = vld [vmem:[%s19193_s5 + $0x4ac] ss:$16 sps:$4 sm:$0xff]  }
 0x518   :  { %10864 = vmatpush1.bf16.msra.mxu0 %v13083_v33  ;;  %v13140_v33 = vld [vmem:[%s19193_s5 + $0x4a8] ss:$16 sps:$4 sm:$0xff]  }
 0x519   :  { %10865 = vmatprep.subr.bf16.mxu0 %v13088_v54  ;;  %v13154_v54 = vld [vmem:[%s19193_s5 + $0x46c] ss:$16 sps:$4 sm:$0xff]  }
 0x51a   :  { %10829 = vmatpush1.bf16.msra.mxu1 %v13161_v8  ;;  %v13152_v8 = vld [vmem:[%s19193_s5 + $0x468] ss:$16 sps:$4 sm:$0xff]  }
 0x51b   :  { %10830 = vmatprep.subr.bf16.mxu1 %v13169_v2  ;;  %v13160_v2 = vld [vmem:[%s19193_s5 + $0x44c] ss:$16 sps:$4 sm:$0xff]  }
 0x51c   :  { %10866 = vmatpush1.bf16.msra.mxu0 %v13086_v4  ;;  %v13158_v4 = vld [vmem:[%s19193_s5 + $0x448] ss:$16 sps:$4 sm:$0xff]  }
 0x51d   :  { %10867 = vmatprep.subr.bf16.mxu0 %v13091_v17  ;;  %v13166_v17 = vld [vmem:[%s19193_s5 + $0x42c] ss:$16 sps:$4 sm:$0xff]  }
 0x51e   :  { %10831 = vmatpush1.bf16.msra.mxu1 %v13167_v23  ;;  %v13164_v23 = vld [vmem:[%s19193_s5 + $0x428] ss:$16 sps:$4 sm:$0xff]  }
 0x51f   :  { %10832 = vmatprep.subr.bf16.mxu1 %v13175_v31  ;;  %v13172_v31 = vld [vmem:[%s19193_s5 + $0x40c] ss:$16 sps:$4 sm:$0xff]  }
 0x520   :  { %10868 = vmatpush1.bf16.msra.mxu0 %v13089_v18  ;;  %v13170_v18 = vld [vmem:[%s19193_s5 + $0x408] ss:$16 sps:$4 sm:$0xff]  }
 0x521   :  { %10869 = vmatprep.subr.bf16.mxu0 %v13094_v49  ;;  %v13178_v49 = vld [vmem:[%s19193_s5 + $0x5ec] ss:$16 sps:$4 sm:$0xff]  }
 0x522   :  { %10833 = vmatpush2.bf16.msra.mxu1 %v13173_v29  ;;  %v8967_v29 = vpop.f32.mrf.mxu0 }
 0x523   :  { %10834 = vmatprep.subr.bf16.mxu1 %v13181_v63  ;;  %v13176_v63 = vld [vmem:[%s19193_s5 + $0x5e8] ss:$16 sps:$4 sm:$0xff]  }
 0x524   :  { %10870 = vmatpush1.bf16.msra.mxu0 %v13092_v26  ;;  %v13184_v26 = vld [vmem:[%s19193_s5 + $0x5cc] ss:$16 sps:$4 sm:$0xff]  }
 0x525   :  { %10871 = vmatprep.subr.bf16.mxu0 %v13097_v37  ;;  %v8969_v37 = vpop.f32.mrf.mxu0 }
 0x526   :  { %10835 = vmatpush2.bf16.msra.mxu1 %v13179_v34  ;;  %v13182_v34 = vld [vmem:[%s19193_s5 + $0x5c8] ss:$16 sps:$4 sm:$0xff]  }
 0x527   :  { %10836 = vmatprep.subr.bf16.mxu1 %v13187_v41  ;;  %v13190_v41 = vld [vmem:[%s19193_s5 + $0x5ac] ss:$16 sps:$4 sm:$0xff]  }
 0x528   :  { %10872 = vmatpush1.bf16.msra.mxu0 %v13095_v45  ;;  %v8971_v45 = vpop.f32.mrf.mxu0 }
 0x529   :  { %10873 = vmatprep.subr.bf16.mxu0 %v13100_v32 }
 0x52a   :  { %10837 = vmatpush2.bf16.msra.mxu1 %v13185_v6  ;;  %v13188_v6 = vld [vmem:[%s19193_s5 + $0x5a8] ss:$16 sps:$4 sm:$0xff]  }
 0x52b   :  { %10838 = vmatprep.subr.bf16.mxu1 %v13193_v19  ;;  %v13196_v19 = vld [vmem:[%s19193_s5 + $0x58c] ss:$16 sps:$4 sm:$0xff]  }
 0x52c   :  { %10874 = vmatpush1.bf16.msra.mxu0 %v13098_v10  ;;  %v8973_v10 = vpop.f32.mrf.mxu0 }
 0x52d   :  { %10875 = vmatprep.subr.bf16.mxu0 %v13103_v47 }
 0x52e   :  { %10839 = vmatpush2.bf16.msra.mxu1 %v13191_v16  ;;  %v13194_v16 = vld [vmem:[%s19193_s5 + $0x588] ss:$16 sps:$4 sm:$0xff]  }
 0x52f   :  { %10840 = vmatprep.subr.bf16.mxu1 %v13199_v46  ;;  %v9053_v46 = vpop.f32.mrf.mxu0 }
 0x530   :  { %10876 = vmatpush2.bf16.msra.mxu0 %v13101_v57  ;;  %v13202_v57 = vld [vmem:[%s19193_s5 + $0x56c] ss:$16 sps:$4 sm:$0xff]  }
 0x531   :  { %10877 = vmatprep.subr.bf16.mxu0 %v13106_v43  ;;  %v13448_v43 = vld [vmem:[%s19192_s4] sm:$0xff] }
 0x532   :  { %10841 = vmatpush2.bf16.msra.mxu1 %v13197_v5  ;;  %v5848_v5 = vrot.slane %v13448_v43, %v5253_v15 }
 0x533   :  { %10842 = vmatprep.subr.bf16.mxu1 %v13205_v3  ;;  %v5844_v3 = vrot.slane %v13448_v43, %v5249_v13  ;;  %v13206_v13 = vld [vmem:[%s19193_s5 + $0x548] ss:$16 sps:$4 sm:$0xff]   ;;  %v13323_v43 = vld [vmem:[%s19194_s7 + $0x60] sm:$0xff]  }
 0x534   :  { %10878 = vmatpush2.bf16.msra.mxu0 %v13104_v7  ;;  %v8974_v15 = vadd.f32 %v8973_v10, %v5848_v5  ;;  %v13233_v10 = vld [vmem:[%s19193_s5 + $0x268] ss:$16 sps:$4 sm:$0xff]  }
 0x535   :  { %10879 = vmatprep.subr.bf16.mxu0 %v13109_v52  ;;  %v13200_v52 = vld [vmem:[%s19193_s5 + $0x568] ss:$16 sps:$4 sm:$0xff]  }
 0x536   :  { %10843 = vmatpush2.bf16.msra.mxu1 %v13203_v30  ;;  %v9055_v30 = vpop.f32.mrf.mxu0 }
 0x537   :  { %10844 = vmatprep.subr.bf16.mxu1 %v13211_v53  ;;  %v13208_v53 = vld [vmem:[%s19193_s5 + $0x54c] ss:$16 sps:$4 sm:$0xff]  }
 0x538   :  { %10880 = vmatpush2.bf16.msra.mxu0 %v13107_v39  ;;  %v8970_v39 = vadd.f32 %v8969_v37, %v5848_v5  ;;  %v13227_v37 = vld [vmem:[%s19193_s5 + $0x2a8] ss:$16 sps:$4 sm:$0xff]   ;;  %v13324_v5 = vld [vmem:[%s19194_s7 + $0x20] sm:$0xff]  }
 0x539   :  { %10881 = vmatprep.subr.bf16.mxu0 %v13112_v22  ;;  %v8972_v22 = vadd.f32 %v8971_v45, %v5844_v3  ;;  %v13318_v45 = vld [vmem:[%s19194_s7 + $0x38] sm:$0xff]  }
 0x53a   :  { %10845 = vmatpush2.bf16.msra.mxu1 %v13209_v20  ;;  %v8968_v20 = vadd.f32 %v8967_v29, %v5844_v3  ;;  %v13226_v29 = vld [vmem:[%s19193_s5 + $0x2cc] ss:$16 sps:$4 sm:$0xff]  }
 0x53b   :  { %10846 = vmatprep.subr.bf16.mxu1 %v13217_v11  ;;  %v13325_v3 = vld [vmem:[%s19194_s7 + $0x58] sm:$0xff]  }
 0x53c   :  { %10882 = vmatpush2.bf16.msra.mxu0 %v13110_v1 }
 0x53d   :  { %10883 = vmatprep.subr.bf16.mxu0 %v13115_v61  ;;  %v9057_v61 = vpop.f32.mrf.mxu0 }
 0x53e   :  { %10847 = vmatpush2.bf16.msra.mxu1 %v13215_v12 }
 0x53f   :  { %10902 = vmatprep.subr.bf16.mxu1 %v13223_v28 }
 0x540   :  { %10884 = vmatpush2.bf16.msra.mxu0 %v13113_v59  ;;  %v13214_v59 = vld [vmem:[%s19193_s5 + $0x52c] ss:$16 sps:$4 sm:$0xff]  }
 0x541   :  { %10885 = vmatprep.subr.bf16.mxu0 %v13118_v27  ;;  %v9010_v32 = vpop.f32.mrf.mxu1 }
 0x542   :  { %v9011_v12 = vadd.f32 %v9010_v32, %v8968_v20  ;;  %v13319_v32 = vld [vmem:[%s19194_s7 + $0x70] sm:$0xff]   ;;  %v13248_v20 = vld [vmem:[%s19193_s5 + $0x3c8] ss:$16 sps:$4 sm:$0xff]  }
 0x543   :  { %v9012_v47 = vpop.f32.mrf.mxu1 }
 0x544   :  { %10886 = vmatpush2.bf16.msra.mxu0 %v13116_v21  ;;  %v9013_v1 = vadd.f32 %v9012_v47, %v8970_v39  ;;  %v13238_v47 = vld [vmem:[%s19193_s5 + $0x24c] ss:$16 sps:$4 sm:$0xff]   ;;  %v13245_v39 = vld [vmem:[%s19193_s5 + $0x3e8] ss:$16 sps:$4 sm:$0xff]  }
 0x545   :  { %10887 = vmatprep.subr.bf16.mxu0 %v13121_v55  ;;  %v9014_v7 = vpop.f32.mrf.mxu1 }
 0x546   :  { %v9015_v0 = vadd.f32 %v9014_v7, %v8972_v22  ;;  %v9056_v55 = vadd.f32 %v9055_v30, %v9013_v1  ;;  %v13239_v7 = vld [vmem:[%s19193_s5 + $0x228] ss:$16 sps:$4 sm:$0xff]   ;;  %v13250_v22 = vld [vmem:[%s19193_s5 + $0x3cc] ss:$16 sps:$4 sm:$0xff]  }
 0x547   :  { %v9016_v11 = vpop.f32.mrf.mxu1  ;;  %v13242_v30 = vld [vmem:[%s19193_s5 + $0x208] ss:$16 sps:$4 sm:$0xff]   ;;  %v13256_v1 = vld [vmem:[%s19193_s5 + $0x38c] ss:$16 sps:$4 sm:$0xff]  }
 0x548   :  { %10888 = vmatpush2.bf16.msra.mxu0 %v13119_v51  ;;  %v9017_v27 = vadd.f32 %v9016_v11, %v8974_v15  ;;  %v9058_v51 = vadd.f32 %v9057_v61, %v9015_v0  ;;  %v13253_v11 = vld [vmem:[%s19193_s5 + $0x3ac] ss:$16 sps:$4 sm:$0xff]   ;;  %v13251_v15 = vld [vmem:[%s19193_s5 + $0x3a8] ss:$16 sps:$4 sm:$0xff]  }
 0x549   :  { %10889 = vmatprep.subr.bf16.mxu0 %v13124_v44  ;;  %v13212_v44 = vld [vmem:[%s19193_s5 + $0x528] ss:$16 sps:$4 sm:$0xff]  }
 0x54a   :  { %v13254_v0 = vld [vmem:[%s19193_s5 + $0x388] ss:$16 sps:$4 sm:$0xff]  }
 0x54b   :  { %v13257_v61 = vld [vmem:[%s19193_s5 + $0x368] ss:$16 sps:$4 sm:$0xff]  }
 0x54c   :  { %10890 = vmatpush2.bf16.msra.mxu0 %v13122_v50  ;;  %v9059_v50 = vpop.f32.mrf.mxu0 }
 0x54d   :  { %10945 = vmatprep.subr.bf16.mxu0 %v13130_v60  ;;  %v9054_v60 = vadd.f32 %v9053_v46, %v9011_v12  ;;  %v13322_v46 = vld [vmem:[%s19194_s7 + $0x28] sm:$0xff]  }
 0x54e   :  { %v13262_v12 = vld [vmem:[%s19193_s5 + $0x34c] ss:$16 sps:$4 sm:$0xff]  }
 0x54f   :  { %10892 = vmatmul.mubr.bf16.vlgmr.msra.gmra.mxu0 %v17858_v62  ;;  %v13148_v62 = vld [vmem:[%s19193_s5 + $0x48c] ss:$16 sps:$4 sm:$0xff]  }
 0x550   :  { %10946 = vmatpush1.bf16.msra.mxu0 %v13128_v9  ;;  %10977 = vmatprep.mubr.bf16.mxu0 %v18594_v14  ;;  %v13146_v14 = vld [vmem:[%s19193_s5 + $0x488] ss:$16 sps:$4 sm:$0xff]  }
 0x551   :  { %10947 = vmatprep.subr.bf16.mxu0 %v13136_v58  ;;  %v13220_v58 = vld [vmem:[%s19193_s5 + $0x50c] ss:$16 sps:$4 sm:$0xff]  }
 0x554   :  { %10948 = vmatpush1.bf16.msra.mxu0 %v13134_v42 }
 0x555   :  { %10949 = vmatprep.subr.bf16.mxu0 %v13142_v24 }
 0x558   :  { %10950 = vmatpush1.bf16.msra.mxu0 %v13140_v33  ;;  %v9060_v33 = vadd.f32 %v9059_v50, %v9017_v27  ;;  %v13263_v27 = vld [vmem:[%s19193_s5 + $0x328] ss:$16 sps:$4 sm:$0xff]   ;;  %v13274_v50 = vld [vmem:[%s19193_s5 + $0x6cc] ss:$16 sps:$4 sm:$0xff]  }
 0x559   :  { %10951 = vmatprep.subr.bf16.mxu0 %v13148_v62 }
 0x55c   :  { %10952 = vmatpush1.bf16.msra.mxu0 %v13146_v14 }
 0x55d   :  { %10953 = vmatprep.subr.bf16.mxu0 %v13154_v54 }
 0x560   :  { %10954 = vmatpush1.bf16.msra.mxu0 %v13152_v8  ;;  %v13218_v8 = vld [vmem:[%s19193_s5 + $0x508] ss:$16 sps:$4 sm:$0xff]  }
 0x561   :  { %10955 = vmatprep.subr.bf16.mxu0 %v13160_v2 }
 0x564   :  { %10956 = vmatpush1.bf16.msra.mxu0 %v13158_v4 }
 0x565   :  { %10957 = vmatprep.subr.bf16.mxu0 %v13166_v17 }
 0x568   :  { %10958 = vmatpush1.bf16.msra.mxu0 %v13164_v23 }
 0x569   :  { %10959 = vmatprep.subr.bf16.mxu0 %v13172_v31 }
 0x56c   :  { %10960 = vmatpush1.bf16.msra.mxu0 %v13170_v18  ;;  %v13221_v18 = vld [vmem:[%s19193_s5 + $0x2e8] ss:$16 sps:$4 sm:$0xff]  }
 0x56d   :  { %10961 = vmatprep.subr.bf16.mxu0 %v13178_v49 }
 0x570   :  { %10962 = vmatpush2.bf16.msra.mxu0 %v13176_v63  ;;  %v13224_v63 = vld [vmem:[%s19193_s5 + $0x2c8] ss:$16 sps:$4 sm:$0xff]  }
 0x571   :  { %10963 = vmatprep.subr.bf16.mxu0 %v13184_v26  ;;  %v13229_v26 = vld [vmem:[%s19193_s5 + $0x2ac] ss:$16 sps:$4 sm:$0xff]  }
 0x574   :  { %10964 = vmatpush2.bf16.msra.mxu0 %v13182_v34  ;;  %v13235_v34 = vld [vmem:[%s19193_s5 + $0x26c] ss:$16 sps:$4 sm:$0xff]  }
 0x575   :  { %10965 = vmatprep.subr.bf16.mxu0 %v13190_v41  ;;  %v13317_v41 = vld [vmem:[%s19194_s7 + $0x78] sm:$0xff]  }
 0x578   :  { %10966 = vmatpush2.bf16.msra.mxu0 %v13188_v6  ;;  %v13320_v6 = vld [vmem:[%s19194_s7 + $0x30] sm:$0xff]  }
 0x579   :  { %10967 = vmatprep.subr.bf16.mxu0 %v13196_v19  ;;  %v13321_v19 = vld [vmem:[%s19194_s7 + $0x68] sm:$0xff]  }
 0x57c   :  { %10968 = vmatpush2.bf16.msra.mxu0 %v13194_v16  ;;  %v13236_v16 = vld [vmem:[%s19193_s5 + $0x248] ss:$16 sps:$4 sm:$0xff]  }
 0x57d   :  { %10969 = vmatprep.subr.bf16.mxu0 %v13202_v57  ;;  %v13241_v57 = vld [vmem:[%s19193_s5 + $0x22c] ss:$16 sps:$4 sm:$0xff]  }
 0x580   :  { %10970 = vmatpush2.bf16.msra.mxu0 %v13200_v52  ;;  %v13244_v52 = vld [vmem:[%s19193_s5 + $0x20c] ss:$16 sps:$4 sm:$0xff]  }
 0x581   :  { %v9096_v28 = vpop.f32.mrf.mxu1  ;;  %10971 = vmatprep.subr.bf16.mxu0 %v13208_v53  ;;  %v13247_v53 = vld [vmem:[%s19193_s5 + $0x3ec] ss:$16 sps:$4 sm:$0xff]  }
 0x582   :  { %v9097_v62 = vadd.f32 %v9096_v28, %v9054_v60  ;;  %v13260_v28 = vld [vmem:[%s19193_s5 + $0x348] ss:$16 sps:$4 sm:$0xff]  }
 0x583   :  { %v9098_v21 = vpop.f32.mrf.mxu1  ;;  %v13326_v60 = vld [vmem:[%s19194_s7 + $0x18] sm:$0xff]  }
 0x584   :  { %10972 = vmatpush2.bf16.msra.mxu0 %v13206_v13  ;;  %v9099_v42 = vadd.f32 %v9098_v21, %v9056_v55  ;;  %v9111_v23 = vmax.f32 %v9097_v62, 0.0  ;;  %v13259_v13 = vld [vmem:[%s19193_s5 + $0x36c] ss:$16 sps:$4 sm:$0xff]   ;;  %v13266_v55 = vld [vmem:[%s19193_s5 + $0x308] ss:$16 sps:$4 sm:$0xff]  }
 0x585   :  { %v9100_v9 = vpop.f32.mrf.mxu1  ;;  %10973 = vmatprep.subr.bf16.mxu0 %v13214_v59  ;;  %v13265_v59 = vld [vmem:[%s19193_s5 + $0x32c] ss:$16 sps:$4 sm:$0xff]  }
 0x586   :  { %v9101_v24 = vadd.f32 %v9100_v9, %v9058_v51  ;;  %v9112_v4 = vmax.f32 %v9099_v42, 0.0  ;;  %v13268_v21 = vld [vmem:[%s19193_s5 + $0x30c] ss:$16 sps:$4 sm:$0xff]   ;;  %v13272_v9 = vld [vmem:[%s19193_s5 + $0x6c8] ss:$16 sps:$4 sm:$0xff]  }
 0x587   :  { %v9102_v14 = vpop.f32.mrf.mxu1  ;;  %v13271_v51 = vld [vmem:[%s19193_s5 + $0x6ec] ss:$16 sps:$4 sm:$0xff]  }
 0x588   :  { %v9103_v54 = vadd.f32 %v9102_v14, %v9060_v33  ;;  %10974 = vmatpush2.bf16.msra.mxu0 %v13212_v44  ;;  %v9119_v2 = vmax.f32 %v9101_v24, 0.0  ;;  %v13269_v44 = vld [vmem:[%s19193_s5 + $0x6e8] ss:$16 sps:$4 sm:$0xff]   ;;  %v13277_v42 = vld [vmem:[%s19193_s5 + $0x6ac] ss:$16 sps:$4 sm:$0xff]  }
 0x589   :  { %10975 = vmatprep.subr.bf16.mxu0 %v13220_v58  ;;  %v13327_v58 = vld [vmem:[%s19194_s7 + $0x50] sm:$0xff]   ;;  %v13275_v24 = vld [vmem:[%s19193_s5 + $0x6a8] ss:$16 sps:$4 sm:$0xff]   ;;  %v13280_v62 = vld [vmem:[%s19193_s5 + $0x68c] ss:$16 sps:$4 sm:$0xff]  }
 0x58a   :  { %v9120_v17 = vmax.f32 %v9103_v54, 0.0  ;;  %v18876_v49 = vpack.c.bf16 %v9119_v2, %v9111_v23  ;;  %v13329_v33 = vld [vmem:[%s19194_s7 + $0x48] sm:$0xff]  }
 0x58b   :  { %v13330_v14 = vld [vmem:[%s19194_s7 + $0x8] sm:$0xff]  }
 0x58c   :  { %v18871_v31 = vpack.c.bf16 %v9120_v17, %v9112_v4  ;;  %10976 = vmatpush2.bf16.msra.mxu0 %v13218_v8  ;;  %v13278_v54 = vld [vmem:[%s19193_s5 + $0x688] ss:$16 sps:$4 sm:$0xff]   ;;  %v13331_v8 = vld [vmem:[%s19194_s7 + $0x40] sm:$0xff]   ;;  %v13283_v2 = vld [vmem:[%s19193_s5 + $0x66c] ss:$16 sps:$4 sm:$0xff]  }
 0x58d   :  { %12836 = vmatprep.subr.bf16.mxu0 %v13317_v41  ;;  %v13332_v4 = vld [vmem:[%s19194_s7] sm:$0xff]   ;;  %v13281_v17 = vld [vmem:[%s19193_s5 + $0x668] ss:$16 sps:$4 sm:$0xff]   ;;  %v13286_v23 = vld [vmem:[%s19193_s5 + $0x64c] ss:$16 sps:$4 sm:$0xff]  }
 0x58e   :  { %10848 = vmatprep.mubr.bf16.mxu1 %v18871_v31  ;;  %v13301_v41 = vld [vmem:[%s19193_s5 + $0x7ac] ss:$16 sps:$4 sm:$0xff]  }
 0x58f   :  { %10978 = vmatmul.mubr.bf16.vlgmr.msra.gmra.mxu0 %v18599_v40  ;;  %10849 = vmatmul.mubr.bf16.vlgmr.msra.gmra.mxu1 %v18876_v49  ;;  %v13232_v40 = vld [vmem:[%s19193_s5 + $0x28c] ss:$16 sps:$4 sm:$0xff]  }
 0x590   :  { %10903 = vmatpush1.bf16.msra.mxu1 %v13221_v18  ;;  %10934 = vmatprep.mubr.bf16.mxu1 %v18445_v36  ;;  %v13230_v36 = vld [vmem:[%s19193_s5 + $0x288] ss:$16 sps:$4 sm:$0xff]   ;;  %v13289_v18 = vld [vmem:[%s19193_s5 + $0x62c] ss:$16 sps:$4 sm:$0xff]  }
 0x591   :  { %10904 = vmatprep.subr.bf16.mxu1 %v13226_v29  ;;  %12837 = vmatpush3.bf16.msra.mxu0 %v13318_v45  ;;  %v13287_v29 = vld [vmem:[%s19193_s5 + $0x628] ss:$16 sps:$4 sm:$0xff]  }
 0x592   :  { %12838 = vmatprep.subr.bf16.mxu0 %v13319_v32  ;;  %v13299_v45 = vld [vmem:[%s19193_s5 + $0x7a8] ss:$16 sps:$4 sm:$0xff]   ;;  %v13304_v32 = vld [vmem:[%s19193_s5 + $0x78c] ss:$16 sps:$4 sm:$0xff]  }
 0x594   :  { %10905 = vmatpush1.bf16.msra.mxu1 %v13224_v63  ;;  %v13292_v63 = vld [vmem:[%s19193_s5 + $0x60c] ss:$16 sps:$4 sm:$0xff]  }
 0x595   :  { %10906 = vmatprep.subr.bf16.mxu1 %v13229_v26  ;;  %12839 = vmatpush3.bf16.msra.mxu0 %v13320_v6  ;;  %v13290_v26 = vld [vmem:[%s19193_s5 + $0x608] ss:$16 sps:$4 sm:$0xff]  }
 0x596   :  { %12840 = vmatprep.subr.bf16.mxu0 %v13321_v19  ;;  %v13302_v6 = vld [vmem:[%s19193_s5 + $0x788] ss:$16 sps:$4 sm:$0xff]   ;;  %v13307_v19 = vld [vmem:[%s19193_s5 + $0x76c] ss:$16 sps:$4 sm:$0xff]  }
 0x598   :  { %10907 = vmatpush1.bf16.msra.mxu1 %v13227_v37  ;;  %v13295_v37 = vld [vmem:[%s19193_s5 + $0x7ec] ss:$16 sps:$4 sm:$0xff]  }
 0x599   :  { %10908 = vmatprep.subr.bf16.mxu1 %v13232_v40  ;;  %12841 = vmatpush3.bf16.msra.mxu0 %v13322_v46  ;;  %v13293_v40 = vld [vmem:[%s19193_s5 + $0x7e8] ss:$16 sps:$4 sm:$0xff]   ;;  %v13313_v46 = vld [vmem:[%s19193_s5 + $0x72c] ss:$16 sps:$4 sm:$0xff]  }
 0x59a   :  { %12842 = vmatprep.subr.bf16.mxu0 %v13323_v43  ;;  %v13316_v43 = vld [vmem:[%s19193_s5 + $0x70c] ss:$16 sps:$4 sm:$0xff]  }
 0x59c   :  { %10909 = vmatpush1.bf16.msra.mxu1 %v13230_v36  ;;  %v13298_v36 = vld [vmem:[%s19193_s5 + $0x7cc] ss:$16 sps:$4 sm:$0xff]  }
 0x59d   :  { %10910 = vmatprep.subr.bf16.mxu1 %v13235_v34  ;;  %12843 = vmatpush3.bf16.msra.mxu0 %v13324_v5  ;;  %v13296_v34 = vld [vmem:[%s19193_s5 + $0x7c8] ss:$16 sps:$4 sm:$0xff]  }
 0x59e   :  { %12844 = vmatprep.subr.bf16.mxu0 %v13325_v3  ;;  %v13314_v5 = vld [vmem:[%s19193_s5 + $0x708] ss:$16 sps:$4 sm:$0xff]  }
 0x59f   :  { %v13333_v3 = vld [vmem:[%s19194_s7 + $0xf8] sm:$0xff]  }
 0x5a0   :  { %10911 = vmatpush1.bf16.msra.mxu1 %v13233_v10  ;;  %v13305_v10 = vld [vmem:[%s19193_s5 + $0x768] ss:$16 sps:$4 sm:$0xff]  }
 0x5a1   :  { %10912 = vmatprep.subr.bf16.mxu1 %v13238_v47  ;;  %12845 = vmatpush3.bf16.msra.mxu0 %v13326_v60  ;;  %v13310_v47 = vld [vmem:[%s19193_s5 + $0x74c] ss:$16 sps:$4 sm:$0xff]  }
 0x5a2   :  { %12846 = vmatprep.subr.bf16.mxu0 %v13327_v58 }
 0x5a4   :  { %10913 = vmatpush1.bf16.msra.mxu1 %v13236_v16  ;;  %v13308_v16 = vld [vmem:[%s19193_s5 + $0x748] ss:$16 sps:$4 sm:$0xff]  }
 0x5a5   :  { %10914 = vmatprep.subr.bf16.mxu1 %v13241_v57  ;;  %v13311_v57 = vld [vmem:[%s19193_s5 + $0x728] ss:$16 sps:$4 sm:$0xff]  }
 0x5a8   :  { %10915 = vmatpush1.bf16.msra.mxu1 %v13239_v7  ;;  %v13334_v7 = vld [vmem:[%s19194_s7 + $0xb8] sm:$0xff]  }
 0x5a9   :  { %10916 = vmatprep.subr.bf16.mxu1 %v13244_v52  ;;  %v13335_v52 = vld [vmem:[%s19194_s7 + $0xf0] sm:$0xff]  }
 0x5ac   :  { %10917 = vmatpush1.bf16.msra.mxu1 %v13242_v30  ;;  %v13336_v30 = vld [vmem:[%s19194_s7 + $0xb0] sm:$0xff]  }
 0x5ad   :  { %10918 = vmatprep.subr.bf16.mxu1 %v13247_v53  ;;  %v13338_v53 = vld [vmem:[%s19194_s7 + $0xa8] sm:$0xff]  }
 0x5b0   :  { %10919 = vmatpush2.bf16.msra.mxu1 %v13245_v39  ;;  %v13339_v39 = vld [vmem:[%s19194_s7 + $0xe0] sm:$0xff]  }
 0x5b1   :  { %10920 = vmatprep.subr.bf16.mxu1 %v13250_v22  ;;  %v13340_v22 = vld [vmem:[%s19194_s7 + $0xa0] sm:$0xff]  }
 0x5b4   :  { %10921 = vmatpush2.bf16.msra.mxu1 %v13248_v20  ;;  %v13341_v20 = vld [vmem:[%s19194_s7 + $0xd8] sm:$0xff]  }
 0x5b5   :  { %10922 = vmatprep.subr.bf16.mxu1 %v13253_v11  ;;  %v13342_v11 = vld [vmem:[%s19194_s7 + $0x98] sm:$0xff]  }
 0x5b8   :  { %10923 = vmatpush2.bf16.msra.mxu1 %v13251_v15  ;;  %v10721_v15 = vpop.f32.mrf.mxu0 }
 0x5b9   :  { %10924 = vmatprep.subr.bf16.mxu1 %v13256_v1 }
 0x5ba   :  { %v10723_v1 = vpop.f32.mrf.mxu0 }
 0x5bc   :  { %10925 = vmatpush2.bf16.msra.mxu1 %v13254_v0  ;;  %v10725_v0 = vpop.f32.mrf.mxu0 }
 0x5bd   :  { %10926 = vmatprep.subr.bf16.mxu1 %v13259_v13 }
 0x5c0   :  { %10927 = vmatpush2.bf16.msra.mxu1 %v13257_v61  ;;  %v10727_v61 = vpop.f32.mrf.mxu0 }
 0x5c1   :  { %10928 = vmatprep.subr.bf16.mxu1 %v13262_v12  ;;  %v10764_v13 = vpop.f32.mrf.mxu1 }
 0x5c3   :  { %v10766_v12 = vpop.f32.mrf.mxu1 }
 0x5c4   :  { %10929 = vmatpush2.bf16.msra.mxu1 %v13260_v28 }
 0x5c5   :  { %10930 = vmatprep.subr.bf16.mxu1 %v13265_v59  ;;  %v9385_v59 = vld [vmem:[%s19195_s6] sm:$0xf] }
 0x5c8   :  { %10931 = vmatpush2.bf16.msra.mxu1 %v13263_v27  ;;  %v10768_v27 = vpop.f32.mrf.mxu1 }
 0x5c9   :  { %10932 = vmatprep.subr.bf16.mxu1 %v13268_v21 }
 0x5cc   :  { %10933 = vmatpush2.bf16.msra.mxu1 %v13266_v55  ;;  %v9394_v55 = vrot.slane %v9385_v59, %v19340_v35 }
 0x5cd   :  { %10988 = vmatprep.subr.bf16.mxu1 %v13271_v51  ;;  %v9390_v51 = vrot.slane %v9385_v59, %v19333_v38 }
 0x5ce   :  { %v10724_v60 = vadd.f32 %v10723_v1, %v9394_v55 }
 0x5cf   :  { %10935 = vmatmul.mubr.bf16.vlgmr.msra.gmra.mxu1 %v18281_v48  ;;  %v13328_v48 = vld [vmem:[%s19194_s7 + $0x10] sm:$0xff]   ;;  %v10807_v28 = vpop.f32.mrf.mxu0  ;;  %v10722_v58 = vadd.f32 %v10721_v15, %v9390_v51 }
 0x5d0   :  { %10989 = vmatpush1.bf16.msra.mxu1 %v13269_v44  ;;  %11020 = vmatprep.mubr.bf16.mxu1 %v18871_v31  ;;  %v13284_v31 = vld [vmem:[%s19193_s5 + $0x648] ss:$16 sps:$4 sm:$0xff]   ;;  %v10770_v44 = vpop.f32.mrf.mxu1 }
 0x5d1   :  { %10990 = vmatprep.subr.bf16.mxu1 %v13274_v50  ;;  %12847 = vmatpush3.bf16.msra.mxu0 %v13328_v48  ;;  %v10809_v21 = vpop.f32.mrf.mxu0  ;;  %v13343_v48 = vld [vmem:[%s19194_s7 + $0xd0] sm:$0xff]   ;;  %v10765_v35 = vadd.f32 %v10764_v13, %v10722_v58 }
 0x5d2   :  { %12848 = vmatprep.subr.bf16.mxu0 %v13329_v33  ;;  %v10767_v33 = vadd.f32 %v10766_v12, %v10724_v60 }
 0x5d3   :  { %v10811_v50 = vpop.f32.mrf.mxu0 }
 0x5d4   :  { %10991 = vmatpush1.bf16.msra.mxu1 %v13272_v9  ;;  %v10726_v9 = vadd.f32 %v10725_v0, %v9390_v51 }
 0x5d5   :  { %10992 = vmatprep.subr.bf16.mxu1 %v13277_v42  ;;  %12849 = vmatpush3.bf16.msra.mxu0 %v13330_v14  ;;  %v13344_v14 = vld [vmem:[%s19194_s7 + $0x90] sm:$0xff]  }
 0x5d6   :  { %12850 = vmatprep.subr.bf16.mxu0 %v13331_v8 }
 0x5d8   :  { %10993 = vmatpush1.bf16.msra.mxu1 %v13275_v24  ;;  %v10728_v24 = vadd.f32 %v10727_v61, %v9394_v55 }
 0x5d9   :  { %10994 = vmatprep.subr.bf16.mxu1 %v13280_v62  ;;  %12851 = vmatpush3.bf16.msra.mxu0 %v13332_v4  ;;  %v10769_v62 = vadd.f32 %v10768_v27, %v10726_v9 }
 0x5da   :  { %v10771_v8 = vadd.f32 %v10770_v44, %v10728_v24 }
 0x5db   :  { %v10812_v4 = vadd.f32 %v10811_v50, %v10769_v62 }
 0x5dc   :  { %10995 = vmatpush1.bf16.msra.mxu1 %v13278_v54  ;;  %v10813_v54 = vpop.f32.mrf.mxu0 }
 0x5dd   :  { %10996 = vmatprep.subr.bf16.mxu1 %v13283_v2  ;;  %v10810_v2 = vadd.f32 %v10809_v21, %v10767_v33 }
 0x5e0   :  { %10997 = vmatpush1.bf16.msra.mxu1 %v13281_v17  ;;  %v10808_v17 = vadd.f32 %v10807_v28, %v10765_v35 }
 0x5e1   :  { %10998 = vmatprep.subr.bf16.mxu1 %v13286_v23 }
 0x5e4   :  { %10999 = vmatpush1.bf16.msra.mxu1 %v13284_v31  ;;  %v13345_v31 = vld [vmem:[%s19194_s7 + $0xc8] sm:$0xff]  }
 0x5e5   :  { %11000 = vmatprep.subr.bf16.mxu1 %v13289_v18  ;;  %v10814_v18 = vadd.f32 %v10813_v54, %v10771_v8 }
 0x5e8   :  { %11001 = vmatpush1.bf16.msra.mxu1 %v13287_v29 }
 0x5e9   :  { %11002 = vmatprep.subr.bf16.mxu1 %v13292_v63 }
 0x5ec   :  { %11003 = vmatpush1.bf16.msra.mxu1 %v13290_v26  ;;  %v13346_v26 = vld [vmem:[%s19194_s7 + $0x88] sm:$0xff]  }
 0x5ed   :  { %11004 = vmatprep.subr.bf16.mxu1 %v13295_v37 }
 0x5f0   :  { %11005 = vmatpush2.bf16.msra.mxu1 %v13293_v40 }
 0x5f1   :  { %11006 = vmatprep.subr.bf16.mxu1 %v13298_v36 }
 0x5f4   :  { %11007 = vmatpush2.bf16.msra.mxu1 %v13296_v34 }
 0x5f5   :  { %11008 = vmatprep.subr.bf16.mxu1 %v13301_v41  ;;  %v13347_v41 = vld [vmem:[%s19194_s7 + $0xc0] sm:$0xff]  }
 0x5f8   :  { %11009 = vmatpush2.bf16.msra.mxu1 %v13299_v45 }
 0x5f9   :  { %11010 = vmatprep.subr.bf16.mxu1 %v13304_v32 }
 0x5fc   :  { %11011 = vmatpush2.bf16.msra.mxu1 %v13302_v6  ;;  %v13348_v6 = vld [vmem:[%s19194_s7 + $0x80] sm:$0xff]  }
 0x5fd   :  { %11012 = vmatprep.subr.bf16.mxu1 %v13307_v19 }
 0x600   :  { %11013 = vmatpush2.bf16.msra.mxu1 %v13305_v10 }
 0x601   :  { %11014 = vmatprep.subr.bf16.mxu1 %v13310_v47 }
 0x604   :  { %11015 = vmatpush2.bf16.msra.mxu1 %v13308_v16 }
 0x605   :  { %11016 = vmatprep.subr.bf16.mxu1 %v13313_v46 }
 0x608   :  { %11017 = vmatpush2.bf16.msra.mxu1 %v13311_v57 }
 0x609   :  { %11018 = vmatprep.subr.bf16.mxu1 %v13316_v43 }
 0x60c   :  { %11019 = vmatpush2.bf16.msra.mxu1 %v13314_v5 }
 0x60d   :  { %12858 = vmatprep.subr.bf16.mxu1 %v13333_v3 }
 0x60f   :  { %11021 = vmatmul.mubr.bf16.vlgmr.msra.gmra.mxu1 %v18876_v49  ;;  %v13337_v49 = vld [vmem:[%s19194_s7 + $0xe8] sm:$0xff]   ;;  %v10893_v16 = vpop.f32.mrf.mxu0 }
 0x610   :  { %12859 = vmatpush3.bf16.msra.mxu1 %v13334_v7 }
 0x611   :  { %12860 = vmatprep.subr.bf16.mxu1 %v13335_v52  ;;  %v10895_v46 = vpop.f32.mrf.mxu0  ;;  %v9402_v52 = vrot.slane %v9385_v59, %v19341_v56 }
 0x613   :  { %v10897_v57 = vpop.f32.mrf.mxu0 }
 0x614   :  { %12861 = vmatpush3.bf16.msra.mxu1 %v13336_v30  ;;  %v9398_v30 = vrot.slane %v9385_v59, %v19339_v25 }
 0x615   :  { %12862 = vmatprep.subr.bf16.mxu1 %v13337_v49  ;;  %v10899_v5 = vpop.f32.mrf.mxu0 }
 0x616   :  { %v10900_v15 = vadd.f32 %v10899_v5, %v9402_v52 }
 0x618   :  { %12863 = vmatpush3.bf16.msra.mxu1 %v13338_v53 }
 0x619   :  { %12864 = vmatprep.subr.bf16.mxu1 %v13339_v39  ;;  %v10896_v39 = vadd.f32 %v10895_v46, %v9402_v52 }
 0x61c   :  { %12865 = vmatpush3.bf16.msra.mxu1 %v13340_v22  ;;  %v10898_v22 = vadd.f32 %v10897_v57, %v9398_v30 }
 0x61d   :  { %12866 = vmatprep.subr.bf16.mxu1 %v13341_v20  ;;  %v10894_v20 = vadd.f32 %v10893_v16, %v9398_v30 }
 0x620   :  { %12867 = vmatpush3.bf16.msra.mxu1 %v13342_v11 }
 0x621   :  { %12868 = vmatprep.subr.bf16.mxu1 %v13343_v48 }
 0x624   :  { %12869 = vmatpush3.bf16.msra.mxu1 %v13344_v14 }
 0x625   :  { %12870 = vmatprep.subr.bf16.mxu1 %v13345_v31  ;;  %v19344_v31 = vlaneseq }
 0x628   :  { %12871 = vmatpush3.bf16.msra.mxu1 %v13346_v26 }
 0x629   :  { %12872 = vmatprep.subr.bf16.mxu1 %v13347_v41 }
 0x62c   :  { %12873 = vmatpush3.bf16.msra.mxu1 %v13348_v6 }
 0x64f   :  { %v10850_v42 = vpop.f32.mrf.mxu1  ;;  %v10979_v7 = vpop.f32.mrf.mxu0 }
 0x650   :  { %v10851_v37 = vadd.f32 %v10850_v42, %v10808_v17 }
 0x651   :  { %v10852_v38 = vpop.f32.mrf.mxu1  ;;  %v10981_v53 = vpop.f32.mrf.mxu0 }
 0x652   :  { %v10853_v29 = vadd.f32 %v10852_v38, %v10810_v2  ;;  %v11031_v19 = vmax.f32 %v10851_v37, 0.0  ;;  %v12803_v2 = vld [vmem:[%s19196_s8] ss:$0 sm:$0xff] }
 0x653   :  { %v10854_v23 = vpop.f32.mrf.mxu1  ;;  %v10983_v13 = vpop.f32.mrf.mxu0 }
 0x654   :  { %v10855_v63 = vadd.f32 %v10854_v23, %v10812_v4  ;;  %v11032_v45 = vmax.f32 %v10853_v29, 0.0 }
 0x655   :  { %v10856_v40 = vpop.f32.mrf.mxu1  ;;  %v10985_v51 = vpop.f32.mrf.mxu0 }
 0x656   :  { %v10857_v36 = vadd.f32 %v10856_v40, %v10814_v18  ;;  %v11035_v34 = vmax.f32 %v10855_v63, 0.0  ;;  %v11391_v18 = vand.u32 127, %v19344_v31 }
 0x658   :  { %v11036_v32 = vmax.f32 %v10857_v36, 0.0  ;;  %v11039_v47 = vpack.c.bf16 %v11035_v34, %v11031_v19  ;;  %vm11392_vm0 = vcmp.lt.s32.totalorder %v11391_v18, 10 }
 0x65a   :  { %v11040_v10 = vpack.c.bf16 %v11036_v32, %v11032_v45 }
 0x65c   :  { %11338 = vmatprep.mubr.bf16.mxu0 %v11040_v10 }
 0x65d   :  { %11339 = vmatmul.mubr.bf16.vlgmr.msra.gmra.mxu0 %v11039_v47 }
 0x68f   :  { %v10936_v43 = vpop.f32.mrf.mxu1 }
 0x690   :  { %v10937_v61 = vadd.f32 %v10936_v43, %v10894_v20 }
 0x691   :  { %v10938_v3 = vpop.f32.mrf.mxu1 }
 0x692   :  { %v10939_v1 = vadd.f32 %v10938_v3, %v10896_v39  ;;  %v10980_v56 = vadd.f32 %v10979_v7, %v10937_v61 }
 0x693   :  { %v10940_v49 = vpop.f32.mrf.mxu1 }
 0x694   :  { %v10941_v0 = vadd.f32 %v10940_v49, %v10898_v22  ;;  %v10982_v21 = vadd.f32 %v10981_v53, %v10939_v1 }
 0x695   :  { %v10942_v11 = vpop.f32.mrf.mxu1 }
 0x696   :  { %v10943_v28 = vadd.f32 %v10942_v11, %v10900_v15  ;;  %v10984_v55 = vadd.f32 %v10983_v13, %v10941_v0 }
 0x698   :  { %v10986_v50 = vadd.f32 %v10985_v51, %v10943_v28 }
 0x6cf   :  { %v11022_v12 = vpop.f32.mrf.mxu1 }
 0x6d0   :  { %v11023_v60 = vadd.f32 %v11022_v12, %v10980_v56 }
 0x6d1   :  { %v11024_v27 = vpop.f32.mrf.mxu1 }
 0x6d2   :  { %v11025_v25 = vadd.f32 %v11024_v27, %v10982_v21  ;;  %v11033_v33 = vmax.f32 %v11023_v60, 0.0 }
 0x6d3   :  { %v11026_v44 = vpop.f32.mrf.mxu1 }
 0x6d4   :  { %v11027_v59 = vadd.f32 %v11026_v44, %v10984_v55  ;;  %v11034_v48 = vmax.f32 %v11025_v25, 0.0 }
 0x6d5   :  { %v11028_v9 = vpop.f32.mrf.mxu1 }
 0x6d6   :  { %v11029_v58 = vadd.f32 %v11028_v9, %v10986_v50  ;;  %v11037_v42 = vmax.f32 %v11027_v59, 0.0 }
 0x6d8   :  { %v11038_v24 = vmax.f32 %v11029_v58, 0.0  ;;  %v11041_v14 = vpack.c.bf16 %v11037_v42, %v11033_v33 }
 0x6da   :  { %v11042_v62 = vpack.c.bf16 %v11038_v24, %v11034_v48 }
 0x6dc   :  { %11379 = vmatprep.mubr.bf16.mxu1 %v11042_v62 }
 0x6dd   :  { %11380 = vmatmul.mubr.bf16.vlgmr.msra.gmra.mxu1 %v11041_v14 }
 0x71d   :  { %v12852_v35 = vpop.f32.mrf.mxu0 }
 0x71f   :  { %v12853_v54 = vpop.f32.mrf.mxu0 }
 0x720   :  { %v12854_v8 = vadd.f32 %v12853_v54, %v12852_v35 }
 0x721   :  { %v12855_v38 = vpop.f32.mrf.mxu0 }
 0x722   :  { %v11341_v29 = vadd.f32 %v12854_v8, %v12803_v2 }
 0x723   :  { %v12856_v4 = vpop.f32.mrf.mxu0 }
 0x724   :  { %v12857_v63 = vadd.f32 %v12856_v4, %v12855_v38 }
 0x726   :  { %v11344_v34 = vadd.f32 %v12857_v63, %v12803_v2 }
 0x79d   :  { %v12874_v17 = vpop.f32.mrf.mxu1 }
 0x79f   :  { %v12875_v23 = vpop.f32.mrf.mxu1 }
 0x7a0   :  { %v12876_v26 = vadd.f32 %v12875_v23, %v12874_v17 }
 0x7a1   :  { %v12877_v37 = vpop.f32.mrf.mxu1 }
 0x7a2   :  { %v11382_v40 = vadd.f32 %v12876_v26, %v11341_v29 }
 0x7a3   :  { %v12878_v36 = vpop.f32.mrf.mxu1 }
 0x7a4   :  { %v12879_v41 = vadd.f32 %v12878_v36, %v12877_v37  ;;  %v11388_v45 = vmax.f32 %v11382_v40, 0.0 }
 0x7a6   :  { %v11385_v32 = vadd.f32 %v12879_v41, %v11344_v34  ;;  %v11393_v6 = vsel %vm11392_vm0, %v11388_v45, -1e+30 }
 0x7a7   :  { %11395 = vmax.xlane.f32.xlu0 %v11393_v6 }
 0x7a8   :  { %v11389_v19 = vmax.f32 %v11385_v32, 0.0 }
 0x7aa   :  { %v11394_v10 = vsel %vm11392_vm0, %v11389_v19, -1e+30 }
 0x7ab   :  { %11397 = vmax.xlane.f32.xlu0 %v11394_v10 }
 0x830   :  { %v11396_v47 = vpop.xlane.xlu0 %11395 }
 0x831   :  { %v11399_v16 = vsub.f32 %v11393_v6, %v11396_v47 }
 0x833   :  { %v11401_v46 = vmul.f32 1.442695, %v11399_v16 }
 0x834   :  { %v11398_v57 = vpop.xlane.xlu0 %11397 }
 0x835   :  { %13349 = vpow2.f32 %v11401_v46  ;;  %v11400_v43 = vsub.f32 %v11394_v10, %v11398_v57 }
 0x837   :  { %v11403_v5 = vmul.f32 1.442695, %v11400_v43 }
 0x839   :  { %13351 = vpow2.f32 %v11403_v5 }
 0x842   :  { %v13350_v3 = vpop.eup %13349 }
 0x843   :  { %v11405_v7 = vsel %vm11392_vm0, %v13350_v3, 0.0 }
 0x844   :  { %11407 = vadd.xlane.f32.xlu1 %v11405_v7 }
 0x846   :  { %v13352_v52 = vpop.eup %13351 }
 0x847   :  { %v11406_v30 = vsel %vm11392_vm0, %v13352_v52, 0.0 }
 0x848   :  { %11409 = vadd.xlane.f32.xlu1 %v11406_v30 }
 0x8cd   :  { %v11408_v49 = vpop.xlane.xlu1 %11407 }
 0x8ce   :  { %13353 = vlog2.f32 %v11408_v49 }
 0x8d1   :  { %v11410_v53 = vpop.xlane.xlu1 %11409 }
 0x8d2   :  { %13355 = vlog2.f32 %v11410_v53 }
 0x8db   :  { %v13354_v39 = vpop.eup %13353 }
 0x8dc   :  { %v11412_v22 = vmul.f32 0.6931472, %v13354_v39 }
 0x8de   :  { %v11415_v20 = vsub.f32 %v11399_v16, %v11412_v22 }
 0x8df   :  { %v13356_v11 = vpop.eup %13355 }
 0x8e0   :  { %11417 = vst [vmem:[%s19197_s9] sm:$0xff] %v11415_v20  ;;  %v11414_v15 = vmul.f32 0.6931472, %v13356_v11 }
 0x8e2   :  { %v11416_v1 = vsub.f32 %v11400_v43, %v11414_v15 }
 0x8e4   :  { %11418 = vst [vmem:[%s19197_s9 + $0x8] sm:$0xff] %v11416_v1 }

</bundles_post_ra>
